<compile_context>
chip_gen: v7x
topology: tpu7x:2x2x1
jax: 0.10.0
libtpu: 0.0.40
codegen_flags: <defaults>
</compile_context>

<pallas_src>
import jax
import jax.numpy as jnp
from jax.experimental import pallas as pl
from jax.experimental.pallas import tpu as pltpu


# ----------------------------- Pallas kernels ------------------------------

def convT_relu_kernel(pT_ref, w_ref, b_ref, o_ref):
    # pT_ref: (1, K, P)    patches^T for one batch element (bf16, K=(Cin,KH,KW))
    # w_ref : (Cout, K)    pre-packed conv weight (bf16)
    # b_ref : (Cout, 1)    bias (f32)
    # o_ref : (1, Cout, P) NCHW-flat output (bf16, lane-dense along P)
    acc = jnp.dot(w_ref[...], pT_ref[0], preferred_element_type=jnp.float32)
    o_ref[0] = jnp.maximum(acc + b_ref[...], 0.0).astype(o_ref.dtype)


def conv3_fc_kernel(pT_ref, w3_ref, b3_ref, wfc_ref, bfc_ref, out_ref):
    # pT_ref : (1, K3, P3)    conv3 patches^T (bf16), K3 = 64*4*4, P3 = 8*8
    # w3_ref : (128, K3)      conv3 weight (bf16)
    # b3_ref : (128, 1)       conv3 bias (f32)
    # wfc_ref: (2L, 128, P3)  fused [fc_mu; fc_logvar] weight, torch (C,H,W)
    #                         flatten order along the last two dims (bf16)
    # bfc_ref: (2L, 1)        fused FC bias (f32)
    # out_ref: (1, 2L, 1)     [mu; logvar] for this batch element (f32)
    # conv3 (MXU, bf16 x bf16 -> f32 acc) + bias + ReLU
    h = jnp.dot(w3_ref[...], pT_ref[0], preferred_element_type=jnp.float32)
    h = jnp.maximum(h + b3_ref[...], 0.0)                    # (128, P3) == (C, H*W)
    # FC heads: out[l] = sum_{c,p} h[c,p] * Wfc[l,c,p]  (VPU mul + lane reduces;
    # avoids an in-kernel (C,P)->(C*P) flatten/relayout).
    prod = h[None, :, :] * wfc_ref[...].astype(jnp.float32)  # (2L, 128, P3)
    red = jnp.sum(prod, axis=2)                              # (2L, 128)
    red = jnp.sum(red, axis=1, keepdims=True)                # (2L, 1)
    out_ref[0] = red + bfc_ref[...]


# ----------------------------- XLA glue ------------------------------------

def _im2colT_nchw(x, k=4, stride=2, pad=1):
    """(B, C, H, W) -> patches^T (B, C*k*k, Ho*Wo) bf16, K ordered (Cin, kh, kw)."""
    B, C, H, W = x.shape
    Ho = (H + 2 * pad - k) // stride + 1
    Wo = (W + 2 * pad - k) // stride + 1
    xp = jnp.pad(x, ((0, 0), (0, 0), (pad, pad), (pad, pad)))
    cols = [xp[:, :, kh:kh + stride * Ho:stride, kw:kw + stride * Wo:stride]
            for kh in range(k) for kw in range(k)]
    pT = jnp.stack(cols, axis=2)                      # (B, C, k*k, Ho, Wo)
    pT = pT.reshape(B, C * k * k, Ho * Wo).astype(jnp.bfloat16)
    return pT, Ho, Wo


def conv2d_relu_T(x_nchw, w_mat, b_col):
    """Conv2d(k=4, s=2, p=1) + ReLU in NCHW via one full-P matmul per batch."""
    B = x_nchw.shape[0]
    cout, K = w_mat.shape
    pT, Ho, Wo = _im2colT_nchw(x_nchw)
    P = Ho * Wo
    assert pT.shape == (B, K, P)

    out = pl.pallas_call(
        convT_relu_kernel,
        out_shape=jax.ShapeDtypeStruct((B, cout, P), jnp.bfloat16),
        grid=(B,),
        in_specs=[
            pl.BlockSpec((1, K, P), lambda b: (b, 0, 0)),
            pl.BlockSpec((cout, K), lambda b: (0, 0)),      # weight resident
            pl.BlockSpec((cout, 1), lambda b: (0, 0)),
        ],
        out_specs=pl.BlockSpec((1, cout, P), lambda b: (b, 0, 0)),
        compiler_params=pltpu.CompilerParams(
            dimension_semantics=("parallel",)),
    )(pT, w_mat, b_col)
    return out.reshape(B, cout, Ho, Wo)


def conv3_fc_fused(x_nchw, w3_mat, b3_col, wfc3d, bfc_col):
    """Fused conv3 + ReLU + [fc_mu; fc_logvar]; returns (B, 2L) f32."""
    B = x_nchw.shape[0]
    cout, K = w3_mat.shape
    pT, Ho, Wo = _im2colT_nchw(x_nchw)
    P = Ho * Wo
    twoL = wfc3d.shape[0]
    assert pT.shape == (B, K, P)
    assert wfc3d.shape == (twoL, cout, P)

    out = pl.pallas_call(
        conv3_fc_kernel,
        out_shape=jax.ShapeDtypeStruct((B, twoL, 1), jnp.float32),
        grid=(B,),
        in_specs=[
            pl.BlockSpec((1, K, P), lambda b: (b, 0, 0)),
            pl.BlockSpec((cout, K), lambda b: (0, 0)),
            pl.BlockSpec((cout, 1), lambda b: (0, 0)),
            pl.BlockSpec((twoL, cout, P), lambda b: (0, 0, 0)),
            pl.BlockSpec((twoL, 1), lambda b: (0, 0)),
        ],
        out_specs=pl.BlockSpec((1, twoL, 1), lambda b: (b, 0, 0)),
        compiler_params=pltpu.CompilerParams(
            dimension_semantics=("parallel",)),
    )(pT, w3_mat, b3_col, wfc3d, bfc_col)
    return out[:, :, 0]                                     # (B, 2L)


# ----------------------- one-time parameter packing -------------------------

def prepare_params(params, weight_dtype=jnp.bfloat16):
    """Pre-pack PyTorch-layout weights OUTSIDE the jitted forward (runs once)."""
    def pack_conv(w, b):
        cout = w.shape[0]
        w_mat = w.reshape(cout, -1).astype(weight_dtype)     # (Cout, Cin*KH*KW)
        b_col = b.reshape(cout, 1).astype(jnp.float32)
        return w_mat, b_col

    w1, b1 = pack_conv(params["w1"], params["b1"])
    w2, b2 = pack_conv(params["w2"], params["b2"])
    w3, b3 = pack_conv(params["w3"], params["b3"])

    # Fused FC heads reshaped to (2L, C, H*W): torch flatten order (C, H, W)
    # matches our NCHW conv3 output (C, H*W) tile, so no flatten is needed
    # inside the fused kernel.
    L = params["w_mu"].shape[0]
    C3 = params["w3"].shape[0]
    P3 = params["w_mu"].shape[1] // C3
    wfc = jnp.concatenate([params["w_mu"], params["w_lv"]], axis=0)   # (2L, C*P)
    wfc3d = wfc.reshape(2 * L, C3, P3).astype(weight_dtype)           # (2L, C, P)
    bfc = jnp.concatenate([params["b_mu"], params["b_lv"]])
    bfc = bfc.reshape(2 * L, 1).astype(jnp.float32)

    return {"w1": w1, "b1": b1, "w2": w2, "b2": b2, "w3": w3, "b3": b3,
            "wfc": wfc3d, "bfc": bfc}


# ----------------------------- forward --------------------------------------

def encoder2d_forward(x, packed):
    """x: (B, 1, 64, 64) NCHW f32 -> (mu, logvar), each (B, latent_dim) f32."""
    h = conv2d_relu_T(x, packed["w1"], packed["b1"])     # (B, 32, 32, 32) bf16
    h = conv2d_relu_T(h, packed["w2"], packed["b2"])     # (B, 64, 16, 16) bf16
    out = conv3_fc_fused(h, packed["w3"], packed["b3"],
                         packed["wfc"], packed["bfc"])   # (B, 2L) f32
    L = out.shape[1] // 2
    return out[:, :L], out[:, L:]                        # free XLA slices


# ----------------------------- pure-JAX reference ---------------------------

def encoder2d_reference(x, params):
    h = x
    for w, b in ((params["w1"], params["b1"]),
                 (params["w2"], params["b2"]),
                 (params["w3"], params["b3"])):
        h = jax.lax.conv_general_dilated(
            h, w, window_strides=(2, 2), padding=((1, 1), (1, 1)),
            dimension_numbers=("NCHW", "OIHW", "NCHW"))
        h = jax.nn.relu(h + b.reshape(1, -1, 1, 1))
    h_flat = h.reshape(h.shape[0], -1)
    mu = h_flat @ params["w_mu"].T + params["b_mu"]
    lv = h_flat @ params["w_lv"].T + params["b_lv"]
    return mu, lv


# ----------------------------- main ------------------------------------------

if __name__ == "__main__":
    LATENT_DIM = 16
    B = 2
    key = jax.random.PRNGKey(0)
    ks = jax.random.split(key, 11)

    params = {
        # PyTorch Conv2d weight layout: (Cout, Cin, KH, KW)
        "w1": jax.random.normal(ks[0], (32, 1, 4, 4), jnp.float32) * 0.1,
        "b1": jax.random.normal(ks[1], (32,), jnp.float32) * 0.1,
        "w2": jax.random.normal(ks[2], (64, 32, 4, 4), jnp.float32) * 0.05,
        "b2": jax.random.normal(ks[3], (64,), jnp.float32) * 0.05,
        "w3": jax.random.normal(ks[4], (128, 64, 4, 4), jnp.float32) * 0.05,
        "b3": jax.random.normal(ks[5], (128,), jnp.float32) * 0.05,
        # PyTorch Linear weight layout: (out_features, in_features)
        "w_mu": jax.random.normal(ks[6], (LATENT_DIM, 128 * 8 * 8), jnp.float32) * 0.01,
        "b_mu": jax.random.normal(ks[7], (LATENT_DIM,), jnp.float32) * 0.01,
        "w_lv": jax.random.normal(ks[8], (LATENT_DIM, 128 * 8 * 8), jnp.float32) * 0.01,
        "b_lv": jax.random.normal(ks[9], (LATENT_DIM,), jnp.float32) * 0.01,
    }

    x = jax.random.normal(ks[10], (B, 1, 64, 64), jnp.float32)

    packed = prepare_params(params)          # one-time pack, off the hot path

    mu, logvar = jax.block_until_ready(jax.jit(encoder2d_forward)(x, packed))
    mu_ref, lv_ref = jax.block_until_ready(jax.jit(encoder2d_reference)(x, params))

    def rel_err(a, b):
        return float(jnp.max(jnp.abs(a - b)) / (jnp.max(jnp.abs(b)) + 1e-6))

    assert mu.shape == (B, LATENT_DIM) and logvar.shape == (B, LATENT_DIM)
    assert rel_err(mu, mu_ref) < 2e-2, "mu mismatch vs reference"
    assert rel_err(logvar, lv_ref) < 2e-2, "logvar mismatch vs reference"

    print("KERNEL_OK")
</pallas_src>

<mosaic_0001>
module attributes {stable_mosaic.version = 11 : i64} {
  func.func @convT_relu_kernel(%arg0: i32, %arg1: memref<1x16x1024xbf16, #tpu.memory_space<vmem>>, %arg2: memref<32x16xbf16, #tpu.memory_space<vmem>>, %arg3: memref<32x1xf32, #tpu.memory_space<vmem>>, %arg4: memref<1x32x1024xbf16, #tpu.memory_space<vmem>>) attributes {dimension_semantics = [#tpu.dimension_semantics<parallel>], iteration_bounds = array<i64: 2>, scalar_prefetch = 0 : i64, scratch_operands = 0 : i64, tpu.core_type = #tpu.core_type<tc>, window_params = [{transform_indices = @transform_0, window_bounds = array<i64: 1, 16, 1024>}, {pipeline_mode = #tpu.pipeline_mode<synchronous>, transform_indices = @transform_1, window_bounds = array<i64: 32, 16>}, {pipeline_mode = #tpu.pipeline_mode<synchronous>, transform_indices = @transform_2, window_bounds = array<i64: 32, 1>}, {transform_indices = @transform_3, window_bounds = array<i64: 1, 32, 1024>}]} {
    %c0 = arith.constant 0 : index
    %c0_0 = arith.constant 0 : index
    %0 = vector.load %arg2[%c0, %c0_0] : memref<32x16xbf16, #tpu.memory_space<vmem>>, vector<32x16xbf16>
    %c0_1 = arith.constant 0 : index
    %c0_2 = arith.constant 0 : index
    %c0_3 = arith.constant 0 : index
    %1 = vector.load %arg1[%c0_1, %c0_2, %c0_3] : memref<1x16x1024xbf16, #tpu.memory_space<vmem>>, vector<1x16x1024xbf16>
    %2 = vector.shape_cast %1 : vector<1x16x1024xbf16> to vector<16x1024xbf16>
    %cst = arith.constant dense<0.000000e+00> : vector<32x1024xf32>
    %3 = tpu.matmul %0, %2, %cst {dimension_numbers = #tpu.dot_dimension_numbers<[1], [0], [0], [1], [0, 0, 1, 1], [], []>} : vector<32x16xbf16>, vector<16x1024xbf16>, vector<32x1024xf32> -> vector<32x1024xf32>
    %c0_4 = arith.constant 0 : index
    %c0_5 = arith.constant 0 : index
    %4 = vector.load %arg3[%c0_4, %c0_5] : memref<32x1xf32, #tpu.memory_space<vmem>>, vector<32x1xf32>
    %5 = vector.broadcast %4 : vector<32x1xf32> to vector<32x1024xf32>
    %6 = arith.addf %3, %5 : vector<32x1024xf32>
    %cst_6 = arith.constant 0.000000e+00 : f32
    %7 = vector.broadcast %cst_6 : f32 to vector<32x1024xf32>
    %8 = arith.maximumf %6, %7 : vector<32x1024xf32>
    %9 = arith.truncf %8 : vector<32x1024xf32> to vector<32x1024xbf16>
    %c0_7 = arith.constant 0 : index
    %c0_8 = arith.constant 0 : index
    %c0_9 = arith.constant 0 : index
    %10 = vector.load %arg4[%c0_7, %c0_8, %c0_9] : memref<1x32x1024xbf16, #tpu.memory_space<vmem>>, vector<1x32x1024xbf16>
    %11 = vector.shape_cast %10 : vector<1x32x1024xbf16> to vector<32x1024xbf16>
    %12 = vector.shape_cast %9 : vector<32x1024xbf16> to vector<1x32x1024xbf16>
    tpu.vector_store %arg4[%c0_7, %c0_8, %c0_9], %12 {strides = array<i32>} : memref<1x32x1024xbf16, #tpu.memory_space<vmem>>, vector<1x32x1024xbf16>,
    return
  }
  func.func @transform_0(%arg0: i32) -> (i32, i32, i32) {
    %c0_i32 = arith.constant 0 : i32
    %c0_i32_0 = arith.constant 0 : i32
    %c0_i32_1 = arith.constant 0 : i32
    return %arg0, %c0_i32, %c0_i32_0 : i32, i32, i32
  }
  func.func @transform_1(%arg0: i32) -> (i32, i32) {
    %c0_i32 = arith.constant 0 : i32
    %c0_i32_0 = arith.constant 0 : i32
    %c0_i32_1 = arith.constant 0 : i32
    return %c0_i32, %c0_i32_0 : i32, i32
  }
  func.func @transform_2(%arg0: i32) -> (i32, i32) {
    %c0_i32 = arith.constant 0 : i32
    %c0_i32_0 = arith.constant 0 : i32
    %c0_i32_1 = arith.constant 0 : i32
    return %c0_i32, %c0_i32_0 : i32, i32
  }
  func.func @transform_3(%arg0: i32) -> (i32, i32, i32) {
    %c0_i32 = arith.constant 0 : i32
    %c0_i32_0 = arith.constant 0 : i32
    %c0_i32_1 = arith.constant 0 : i32
    return %arg0, %c0_i32, %c0_i32_0 : i32, i32, i32
  }
}

module attributes {stable_mosaic.version = 11 : i64} {
  func.func @convT_relu_kernel(%arg0: i32, %arg1: memref<1x512x256xbf16, #tpu.memory_space<vmem>>, %arg2: memref<64x512xbf16, #tpu.memory_space<vmem>>, %arg3: memref<64x1xf32, #tpu.memory_space<vmem>>, %arg4: memref<1x64x256xbf16, #tpu.memory_space<vmem>>) attributes {dimension_semantics = [#tpu.dimension_semantics<parallel>], iteration_bounds = array<i64: 2>, scalar_prefetch = 0 : i64, scratch_operands = 0 : i64, tpu.core_type = #tpu.core_type<tc>, window_params = [{transform_indices = @transform_0, window_bounds = array<i64: 1, 512, 256>}, {pipeline_mode = #tpu.pipeline_mode<synchronous>, transform_indices = @transform_1, window_bounds = array<i64: 64, 512>}, {pipeline_mode = #tpu.pipeline_mode<synchronous>, transform_indices = @transform_2, window_bounds = array<i64: 64, 1>}, {transform_indices = @transform_3, window_bounds = array<i64: 1, 64, 256>}]} {
    %c0 = arith.constant 0 : index
    %c0_0 = arith.constant 0 : index
    %0 = vector.load %arg2[%c0, %c0_0] : memref<64x512xbf16, #tpu.memory_space<vmem>>, vector<64x512xbf16>
    %c0_1 = arith.constant 0 : index
    %c0_2 = arith.constant 0 : index
    %c0_3 = arith.constant 0 : index
    %1 = vector.load %arg1[%c0_1, %c0_2, %c0_3] : memref<1x512x256xbf16, #tpu.memory_space<vmem>>, vector<1x512x256xbf16>
    %2 = vector.shape_cast %1 : vector<1x512x256xbf16> to vector<512x256xbf16>
    %cst = arith.constant dense<0.000000e+00> : vector<64x256xf32>
    %3 = tpu.matmul %0, %2, %cst {dimension_numbers = #tpu.dot_dimension_numbers<[1], [0], [0], [1], [0, 0, 1, 1], [], []>} : vector<64x512xbf16>, vector<512x256xbf16>, vector<64x256xf32> -> vector<64x256xf32>
    %c0_4 = arith.constant 0 : index
    %c0_5 = arith.constant 0 : index
    %4 = vector.load %arg3[%c0_4, %c0_5] : memref<64x1xf32, #tpu.memory_space<vmem>>, vector<64x1xf32>
    %5 = vector.broadcast %4 : vector<64x1xf32> to vector<64x256xf32>
    %6 = arith.addf %3, %5 : vector<64x256xf32>
    %cst_6 = arith.constant 0.000000e+00 : f32
    %7 = vector.broadcast %cst_6 : f32 to vector<64x256xf32>
    %8 = arith.maximumf %6, %7 : vector<64x256xf32>
    %9 = arith.truncf %8 : vector<64x256xf32> to vector<64x256xbf16>
    %c0_7 = arith.constant 0 : index
    %c0_8 = arith.constant 0 : index
    %c0_9 = arith.constant 0 : index
    %10 = vector.load %arg4[%c0_7, %c0_8, %c0_9] : memref<1x64x256xbf16, #tpu.memory_space<vmem>>, vector<1x64x256xbf16>
    %11 = vector.shape_cast %10 : vector<1x64x256xbf16> to vector<64x256xbf16>
    %12 = vector.shape_cast %9 : vector<64x256xbf16> to vector<1x64x256xbf16>
    tpu.vector_store %arg4[%c0_7, %c0_8, %c0_9], %12 {strides = array<i32>} : memref<1x64x256xbf16, #tpu.memory_space<vmem>>, vector<1x64x256xbf16>,
    return
  }
  func.func @transform_0(%arg0: i32) -> (i32, i32, i32) {
    %c0_i32 = arith.constant 0 : i32
    %c0_i32_0 = arith.constant 0 : i32
    %c0_i32_1 = arith.constant 0 : i32
    return %arg0, %c0_i32, %c0_i32_0 : i32, i32, i32
  }
  func.func @transform_1(%arg0: i32) -> (i32, i32) {
    %c0_i32 = arith.constant 0 : i32
    %c0_i32_0 = arith.constant 0 : i32
    %c0_i32_1 = arith.constant 0 : i32
    return %c0_i32, %c0_i32_0 : i32, i32
  }
  func.func @transform_2(%arg0: i32) -> (i32, i32) {
    %c0_i32 = arith.constant 0 : i32
    %c0_i32_0 = arith.constant 0 : i32
    %c0_i32_1 = arith.constant 0 : i32
    return %c0_i32, %c0_i32_0 : i32, i32
  }
  func.func @transform_3(%arg0: i32) -> (i32, i32, i32) {
    %c0_i32 = arith.constant 0 : i32
    %c0_i32_0 = arith.constant 0 : i32
    %c0_i32_1 = arith.constant 0 : i32
    return %arg0, %c0_i32, %c0_i32_0 : i32, i32, i32
  }
}

module attributes {stable_mosaic.version = 11 : i64} {
  func.func @conv3_fc_kernel(%arg0: i32, %arg1: memref<1x1024x64xbf16, #tpu.memory_space<vmem>>, %arg2: memref<128x1024xbf16, #tpu.memory_space<vmem>>, %arg3: memref<128x1xf32, #tpu.memory_space<vmem>>, %arg4: memref<32x128x64xbf16, #tpu.memory_space<vmem>>, %arg5: memref<32x1xf32, #tpu.memory_space<vmem>>, %arg6: memref<1x32x1xf32, #tpu.memory_space<vmem>>) attributes {dimension_semantics = [#tpu.dimension_semantics<parallel>], iteration_bounds = array<i64: 2>, scalar_prefetch = 0 : i64, scratch_operands = 0 : i64, tpu.core_type = #tpu.core_type<tc>, window_params = [{transform_indices = @transform_0, window_bounds = array<i64: 1, 1024, 64>}, {pipeline_mode = #tpu.pipeline_mode<synchronous>, transform_indices = @transform_1, window_bounds = array<i64: 128, 1024>}, {pipeline_mode = #tpu.pipeline_mode<synchronous>, transform_indices = @transform_2, window_bounds = array<i64: 128, 1>}, {pipeline_mode = #tpu.pipeline_mode<synchronous>, transform_indices = @transform_3, window_bounds = array<i64: 32, 128, 64>}, {pipeline_mode = #tpu.pipeline_mode<synchronous>, transform_indices = @transform_4, window_bounds = array<i64: 32, 1>}, {transform_indices = @transform_5, window_bounds = array<i64: 1, 32, 1>}]} {
    %c0 = arith.constant 0 : index
    %c0_0 = arith.constant 0 : index
    %0 = vector.load %arg2[%c0, %c0_0] : memref<128x1024xbf16, #tpu.memory_space<vmem>>, vector<128x1024xbf16>
    %c0_1 = arith.constant 0 : index
    %c0_2 = arith.constant 0 : index
    %c0_3 = arith.constant 0 : index
    %1 = vector.load %arg1[%c0_1, %c0_2, %c0_3] : memref<1x1024x64xbf16, #tpu.memory_space<vmem>>, vector<1x1024x64xbf16>
    %2 = vector.shape_cast %1 : vector<1x1024x64xbf16> to vector<1024x64xbf16>
    %cst = arith.constant dense<0.000000e+00> : vector<128x64xf32>
    %3 = tpu.matmul %0, %2, %cst {dimension_numbers = #tpu.dot_dimension_numbers<[1], [0], [0], [1], [0, 0, 1, 1], [], []>} : vector<128x1024xbf16>, vector<1024x64xbf16>, vector<128x64xf32> -> vector<128x64xf32>
    %c0_4 = arith.constant 0 : index
    %c0_5 = arith.constant 0 : index
    %4 = vector.load %arg3[%c0_4, %c0_5] : memref<128x1xf32, #tpu.memory_space<vmem>>, vector<128x1xf32>
    %5 = vector.broadcast %4 : vector<128x1xf32> to vector<128x64xf32>
    %6 = arith.addf %3, %5 : vector<128x64xf32>
    %cst_6 = arith.constant 0.000000e+00 : f32
    %7 = vector.broadcast %cst_6 : f32 to vector<128x64xf32>
    %8 = arith.maximumf %6, %7 : vector<128x64xf32>
    %9 = vector.shape_cast %8 : vector<128x64xf32> to vector<1x128x64xf32>
    %c0_7 = arith.constant 0 : index
    %c0_8 = arith.constant 0 : index
    %c0_9 = arith.constant 0 : index
    %10 = vector.load %arg4[%c0_7, %c0_8, %c0_9] : memref<32x128x64xbf16, #tpu.memory_space<vmem>>, vector<32x128x64xbf16>
    %11 = arith.extf %10 : vector<32x128x64xbf16> to vector<32x128x64xf32>
    %12 = vector.broadcast %9 : vector<1x128x64xf32> to vector<32x128x64xf32>
    %13 = arith.mulf %12, %11 : vector<32x128x64xf32>
    %cst_10 = arith.constant dense<0.000000e+00> : vector<32x128xf32>
    %14 = vector.multi_reduction <add>, %13, %cst_10 [2] : vector<32x128x64xf32> to vector<32x128xf32>
    %cst_11 = arith.constant dense<0.000000e+00> : vector<32xf32>
    %15 = vector.multi_reduction <add>, %14, %cst_11 [1] : vector<32x128xf32> to vector<32xf32>
    %16 = vector.shape_cast %15 : vector<32xf32> to vector<32x1xf32>
    %c0_12 = arith.constant 0 : index
    %c0_13 = arith.constant 0 : index
    %17 = vector.load %arg5[%c0_12, %c0_13] : memref<32x1xf32, #tpu.memory_space<vmem>>, vector<32x1xf32>
    %18 = arith.addf %16, %17 : vector<32x1xf32>
    %c0_14 = arith.constant 0 : index
    %c0_15 = arith.constant 0 : index
    %c0_16 = arith.constant 0 : index
    %19 = vector.load %arg6[%c0_14, %c0_15, %c0_16] : memref<1x32x1xf32, #tpu.memory_space<vmem>>, vector<1x32x1xf32>
    %20 = vector.shape_cast %19 : vector<1x32x1xf32> to vector<32x1xf32>
    %21 = vector.shape_cast %18 : vector<32x1xf32> to vector<1x32x1xf32>
    tpu.vector_store %arg6[%c0_14, %c0_15, %c0_16], %21 {strides = array<i32>} : memref<1x32x1xf32, #tpu.memory_space<vmem>>, vector<1x32x1xf32>,
    return
  }
  func.func @transform_0(%arg0: i32) -> (i32, i32, i32) {
    %c0_i32 = arith.constant 0 : i32
    %c0_i32_0 = arith.constant 0 : i32
    %c0_i32_1 = arith.constant 0 : i32
    return %arg0, %c0_i32, %c0_i32_0 : i32, i32, i32
  }
  func.func @transform_1(%arg0: i32) -> (i32, i32) {
    %c0_i32 = arith.constant 0 : i32
    %c0_i32_0 = arith.constant 0 : i32
    %c0_i32_1 = arith.constant 0 : i32
    return %c0_i32, %c0_i32_0 : i32, i32
  }
  func.func @transform_2(%arg0: i32) -> (i32, i32) {
    %c0_i32 = arith.constant 0 : i32
    %c0_i32_0 = arith.constant 0 : i32
    %c0_i32_1 = arith.constant 0 : i32
    return %c0_i32, %c0_i32_0 : i32, i32
  }
  func.func @transform_3(%arg0: i32) -> (i32, i32, i32) {
    %c0_i32 = arith.constant 0 : i32
    %c0_i32_0 = arith.constant 0 : i32
    %c0_i32_1 = arith.constant 0 : i32
    %c0_i32_2 = arith.constant 0 : i32
    return %c0_i32, %c0_i32_0, %c0_i32_1 : i32, i32, i32
  }
  func.func @transform_4(%arg0: i32) -> (i32, i32) {
    %c0_i32 = arith.constant 0 : i32
    %c0_i32_0 = arith.constant 0 : i32
    %c0_i32_1 = arith.constant 0 : i32
    return %c0_i32, %c0_i32_0 : i32, i32
  }
  func.func @transform_5(%arg0: i32) -> (i32, i32, i32) {
    %c0_i32 = arith.constant 0 : i32
    %c0_i32_0 = arith.constant 0 : i32
    %c0_i32_1 = arith.constant 0 : i32
    return %arg0, %c0_i32, %c0_i32_0 : i32, i32, i32
  }
}

</mosaic_0001>

<bundles_post_ra>
// kernel: encoder2d_forward.3
= control target key start
LH: loop header
LB: loop body
LE: loop exit
PB: predicated region body
PF: predicated region fallthrough
CT: control target
= control target key end

     0   :  { %s781_s12 = smov 0   ;;  %s886_s0 = inlined_call_operand.vmem [shape: bf16[2,16,1024], index: 0, kind: input, shape index: {}]   ;;  %s887_s1 = inlined_call_operand.vmem [shape: bf16[32,16], index: 1, kind: input, shape index: {}]   ;;  %s888_s2 = inlined_call_operand.vmem [shape: f32[32,1], index: 2, kind: input, shape index: {}]   ;;  %s889_s3 = inlined_call_operand.vmem [shape: bf16[2,32,1024], index: 3, kind: output, shape index: {}]  }
   0x1 LB: > { %s676_s13 = sadd.s32 4294967295, %s758_s12   ;;  %p680_p0 = scmp.ge.s32.totalorder %s758_s12, 1  ;;  %s758_s12 = sphi %s781_s12, %s13_s12  }
   0x2   : > { %p137_p1 = scmp.lt.s32.totalorder %s758_s12, 3 }
   0x4   : > { %p138_p2 = pnand %p680_p0, %p137_p1 }
   0x5   : > { %p161_p3 = scmp.lt.s32.totalorder (!%p138_p2), %s676_s13, 1  ;;  %v760_v0 = vmov (!%p138_p2), 0   ;;  %v184_v1 = vld [vmem:[%s888_s2] sm:$0xff] (!%p138_p2)  ;;  %v186_v2 = vld [vmem:[%s888_s2 + $0x10] sm:$0xff] (!%p138_p2)  ;;  %v185_v3 = vld [vmem:[%s888_s2 + $0x8] sm:$0xff] (!%p138_p2)  ;;  %vm258_vm0 = vcmask (!%p138_p2), 130048  }
   0x6   : > { %141 = sbr.rel (%p138_p2) target bundleno = 270 (0x10e), region = 32  ;;  %297 = vmatprep.mubr.bf16.mxu0 (!%p138_p2), %v760_v0  ;;  %350 = vmatprep.mubr.bf16.mxu1 (!%p138_p2), %v760_v0  ;;  %v187_v4 = vld [vmem:[%s888_s2 + $0x18] sm:$0xff] (!%p138_p2)  ;;  %v750_v18 = vld [vmem:[%s887_s1] sm:$0xff] (!%p138_p2)   ;;  %v751_v22 = vld [vmem:[%s887_s1 + $0x8] sm:$0xff] (!%p138_p2)  }
   0x7   : > { %748 = vset.pattern.permute.xlu0 (!%p138_p2), %v760_v0  ;;  %749 = vset.pattern.permute.xlu1 (!%p138_p2), %v760_v0 }
   0x8   : > { %190 = vperm.xlu0 (!%p138_p2), %748, %v184_v1   ;;  %200 = vperm.xlu1 (!%p138_p2), %749, %v186_v2  }
   0xc   : > { %195 = vperm.xlu0 (!%p138_p2), %748, %v185_v3   ;;  %205 = vperm.xlu1 (!%p138_p2), %749, %v187_v4  }
   0xd   : > { %s891_s13 = smov (!%p161_p3, %s676_s13), 1 }
   0xe   : > { %s721_s18 = sshll.u32 %s891_s13, 6  ;;  %s722_s30 = sshll.u32 %s891_s13, 7 }
   0xf   : > { %s165_s23 = scalar_lea.vmem %s886_s0, %s721_s18  ;;  %s838_s6 = scalar_lea.vmem %s889_s3, %s722_s30 }
  0x10   : > { %v176_v5 = vld [vmem:[%s165_s23] sm:$0xff]  ;;  %v177_v7 = vld [vmem:[%s165_s23 + $0x8] sm:$0xff]  ;;  %v178_v11 = vld [vmem:[%s165_s23 + $0x10] sm:$0xff] }
  0x11   : > { %v180_v6 = vld [vmem:[%s165_s23 + $0x20] sm:$0xff]  ;;  %v181_v9 = vld [vmem:[%s165_s23 + $0x28] sm:$0xff]  ;;  %v182_v12 = vld [vmem:[%s165_s23 + $0x30] sm:$0xff] }
  0x12   : > { %v688_v8 = vcombine.high %v176_v5, %v180_v6  ;;  %v687_v10 = vcombine.low %v176_v5, %v180_v6  ;;  %v690_v13 = vcombine.high %v177_v7, %v181_v9  ;;  %v689_v14 = vcombine.low %v177_v7, %v181_v9  ;;  %v179_v16 = vld [vmem:[%s165_s23 + $0x18] sm:$0xff] }
  0x13   : > { %v692_v15 = vcombine.high %v178_v11, %v182_v12  ;;  %v183_v17 = vld [vmem:[%s165_s23 + $0x38] sm:$0xff]  ;;  %v691_v20 = vcombine.low %v178_v11, %v182_v12 }
  0x14   : > { %265 = vmatprep.subr.bf16.mxu0 %v688_v8  ;;  %v694_v19 = vcombine.high %v179_v16, %v183_v17  ;;  %318 = vmatprep.subr.bf16.mxu1 %v690_v13  ;;  %v693_v21 = vcombine.low %v179_v16, %v183_v17 }
  0x15   : > { %266 = vmatpush1.bf16.msra.mxu0 %v687_v10  ;;  %319 = vmatpush1.bf16.msra.mxu1 %v689_v14 }
  0x16   : > { %371 = vmatprep.subr.bf16.mxu0 %v692_v15  ;;  %424 = vmatprep.subr.bf16.mxu1 %v694_v19 }
  0x18   : > { %695 = vmatmul.mubr.msk.bf16.vlgmr.msra.gmra.mrb[0].mxu0 %vm258_vm0, %v750_v18  ;;  %697 = vmatmul.mubr.msk.bf16.vlgmr.msra.gmra.mrb[0].mxu1 %vm258_vm0, %v750_v18 }
  0x19   : > { %372 = vmatpush1.bf16.msra.mxu0 %v691_v20  ;;  %425 = vmatpush1.bf16.msra.mxu1 %v693_v21 }
  0x1a   : > { %307 = vmatprep.mubr.bf16.mxu0 %v760_v0  ;;  %360 = vmatprep.mubr.bf16.mxu1 %v760_v0 }
  0x20   : > { %696 = vmatmul.mubr.msk.bf16.gmra.mrb[4].mxu0 %vm258_vm0, %v751_v22  ;;  %698 = vmatmul.mubr.msk.bf16.gmra.mrb[4].mxu1 %vm258_vm0, %v751_v22 }
  0x21   : > { %403 = vmatprep.mubr.bf16.mxu0 %v760_v0  ;;  %456 = vmatprep.mubr.bf16.mxu1 %v760_v0 }
  0x28   : > { %699 = vmatmul.mubr.msk.bf16.vlgmr.msra.gmra.mrb[8].mxu0 %vm258_vm0, %v750_v18  ;;  %701 = vmatmul.mubr.msk.bf16.vlgmr.msra.gmra.mrb[8].mxu1 %vm258_vm0, %v750_v18 }
  0x29   : > { %413 = vmatprep.mubr.bf16.mxu0 %v760_v0  ;;  %466 = vmatprep.mubr.bf16.mxu1 %v760_v0 }
  0x30   : > { %700 = vmatmul.mubr.msk.bf16.gmra.mrb[12].mxu0 %vm258_vm0, %v751_v22  ;;  %702 = vmatmul.mubr.msk.bf16.gmra.mrb[12].mxu1 %vm258_vm0, %v751_v22 }
  0x87   : > { %v821_v23 = vpop.permute.xlu0 %190  ;;  %v823_v24 = vpop.permute.xlu1 %200 }
  0x8b   : > { %v825_v26 = vpop.permute.xlu0 %195  ;;  %v842_v54 = vpop.permute.xlu1 %205 }
  0xeb   : > { %v299_v25 = vpop.f32.mrb[0].mxu0  ;;  %v352_v28 = vpop.f32.mrb[0].mxu1 }
  0xec   : > { %v300_v27 = vadd.f32 %v299_v25, %v821_v23  ;;  %v301_v29 = vpop.f32.mrb[1].mxu0  ;;  %v353_v30 = vadd.f32 %v352_v28, %v821_v23  ;;  %v354_v32 = vpop.f32.mrb[1].mxu1 }
  0xed   : > { %v302_v31 = vadd.f32 %v301_v29, %v821_v23  ;;  %v303_v33 = vpop.f32.mrb[2].mxu0  ;;  %v355_v35 = vadd.f32 %v354_v32, %v821_v23  ;;  %v356_v37 = vpop.f32.mrb[2].mxu1 }
  0xee   : > { %v477_v34 = vmax.f32 %v300_v27, 0.0  ;;  %v304_v36 = vadd.f32 %v303_v33, %v825_v26  ;;  %v305_v38 = vpop.f32.mrb[3].mxu0  ;;  %v479_v39 = vmax.f32 %v353_v30, 0.0  ;;  %v357_v41 = vadd.f32 %v356_v37, %v825_v26  ;;  %v358_v43 = vpop.f32.mrb[3].mxu1 }
  0xef   : > { %v478_v40 = vmax.f32 %v302_v31, 0.0  ;;  %v306_v42 = vadd.f32 %v305_v38, %v825_v26  ;;  %v480_v44 = vmax.f32 %v355_v35, 0.0  ;;  %v359_v46 = vadd.f32 %v358_v43, %v825_v26 }
  0xf0   : > { %v485_v45 = vmax.f32 %v304_v36, 0.0  ;;  %v487_v48 = vmax.f32 %v357_v41, 0.0 }
  0xf1   : > { %v723_v47 = vpack.c.bf16 %v478_v40, %v477_v34  ;;  %v486_v49 = vmax.f32 %v306_v42, 0.0  ;;  %v724_v50 = vpack.c.bf16 %v480_v44, %v479_v39  ;;  %v488_v51 = vmax.f32 %v359_v46, 0.0 }
  0xf3   : > { %605 = vst [vmem:[%s838_s6] sm:$0xff] %v723_v47  ;;  %v727_v52 = vpack.c.bf16 %v486_v49, %v485_v45  ;;  %v309_v53 = vpop.f32.mrb[4].mxu0  ;;  %606 = vst [vmem:[%s838_s6 + $0x8] sm:$0xff] %v724_v50  ;;  %v728_v55 = vpack.c.bf16 %v488_v51, %v487_v48  ;;  %v362_v57 = vpop.f32.mrb[4].mxu1 }
  0xf4   : > { %v310_v56 = vadd.f32 %v309_v53, %v823_v24  ;;  %v311_v58 = vpop.f32.mrb[5].mxu0  ;;  %v363_v59 = vadd.f32 %v362_v57, %v823_v24  ;;  %v364_v61 = vpop.f32.mrb[5].mxu1 }
  0xf5   : > { %609 = vst [vmem:[%s838_s6 + $0x20] sm:$0xff] %v727_v52  ;;  %v312_v60 = vadd.f32 %v311_v58, %v823_v24  ;;  %v313_v62 = vpop.f32.mrb[6].mxu0  ;;  %610 = vst [vmem:[%s838_s6 + $0x28] sm:$0xff] %v728_v55  ;;  %v365_v0 = vadd.f32 %v364_v61, %v823_v24  ;;  %v366_v2 = vpop.f32.mrb[6].mxu1 }
  0xf6   : > { %v493_v63 = vmax.f32 %v310_v56, 0.0  ;;  %v314_v1 = vadd.f32 %v313_v62, %v842_v54  ;;  %v315_v3 = vpop.f32.mrb[7].mxu0  ;;  %v495_v4 = vmax.f32 %v363_v59, 0.0  ;;  %v367_v6 = vadd.f32 %v366_v2, %v842_v54  ;;  %v368_v8 = vpop.f32.mrb[7].mxu1 }
  0xf7   : > { %v494_v5 = vmax.f32 %v312_v60, 0.0  ;;  %v316_v7 = vadd.f32 %v315_v3, %v842_v54  ;;  %v496_v9 = vmax.f32 %v365_v0, 0.0  ;;  %v369_v11 = vadd.f32 %v368_v8, %v842_v54 }
  0xf8   : > { %v501_v10 = vmax.f32 %v314_v1, 0.0  ;;  %v503_v13 = vmax.f32 %v367_v6, 0.0 }
  0xf9   : > { %v731_v12 = vpack.c.bf16 %v494_v5, %v493_v63  ;;  %v502_v14 = vmax.f32 %v316_v7, 0.0  ;;  %v732_v15 = vpack.c.bf16 %v496_v9, %v495_v4  ;;  %v504_v16 = vmax.f32 %v369_v11, 0.0 }
  0xfb   : > { %613 = vst [vmem:[%s838_s6 + $0x40] sm:$0xff] %v731_v12  ;;  %v735_v17 = vpack.c.bf16 %v502_v14, %v501_v10  ;;  %v405_v18 = vpop.f32.mrb[8].mxu0  ;;  %614 = vst [vmem:[%s838_s6 + $0x48] sm:$0xff] %v732_v15  ;;  %v736_v19 = vpack.c.bf16 %v504_v16, %v503_v13  ;;  %v458_v21 = vpop.f32.mrb[8].mxu1 }
  0xfc   : > { %v406_v20 = vadd.f32 %v405_v18, %v821_v23  ;;  %v407_v22 = vpop.f32.mrb[9].mxu0  ;;  %v459_v25 = vadd.f32 %v458_v21, %v821_v23  ;;  %v460_v28 = vpop.f32.mrb[9].mxu1 }
  0xfd   : > { %617 = vst [vmem:[%s838_s6 + $0x60] sm:$0xff] %v735_v17  ;;  %v408_v27 = vadd.f32 %v407_v22, %v821_v23  ;;  %v409_v29 = vpop.f32.mrb[10].mxu0  ;;  %618 = vst [vmem:[%s838_s6 + $0x68] sm:$0xff] %v736_v19  ;;  %v461_v31 = vadd.f32 %v460_v28, %v821_v23  ;;  %v462_v33 = vpop.f32.mrb[10].mxu1 }
  0xfe   : > { %v481_v30 = vmax.f32 %v406_v20, 0.0  ;;  %v410_v32 = vadd.f32 %v409_v29, %v825_v26  ;;  %v411_v34 = vpop.f32.mrb[11].mxu0  ;;  %v483_v35 = vmax.f32 %v459_v25, 0.0  ;;  %v463_v37 = vadd.f32 %v462_v33, %v825_v26  ;;  %v464_v39 = vpop.f32.mrb[11].mxu1 }
  0xff   : > { %v482_v36 = vmax.f32 %v408_v27, 0.0  ;;  %v412_v38 = vadd.f32 %v411_v34, %v825_v26  ;;  %v484_v40 = vmax.f32 %v461_v31, 0.0  ;;  %v465_v42 = vadd.f32 %v464_v39, %v825_v26 }
 0x100   : > { %v489_v41 = vmax.f32 %v410_v32, 0.0  ;;  %v491_v23 = vmax.f32 %v463_v37, 0.0 }
 0x101   : > { %v725_v43 = vpack.c.bf16 %v482_v36, %v481_v30  ;;  %v490_v44 = vmax.f32 %v412_v38, 0.0  ;;  %v726_v45 = vpack.c.bf16 %v484_v40, %v483_v35  ;;  %v492_v46 = vmax.f32 %v465_v42, 0.0 }
 0x103   : > { %607 = vst [vmem:[%s838_s6 + $0x10] sm:$0xff] %v725_v43  ;;  %v729_v47 = vpack.c.bf16 %v490_v44, %v489_v41  ;;  %v415_v48 = vpop.f32.mrb[12].mxu0  ;;  %608 = vst [vmem:[%s838_s6 + $0x18] sm:$0xff] %v726_v45  ;;  %v730_v49 = vpack.c.bf16 %v492_v46, %v491_v23  ;;  %v468_v51 = vpop.f32.mrb[12].mxu1 }
 0x104   : > { %v416_v50 = vadd.f32 %v415_v48, %v823_v24  ;;  %v417_v52 = vpop.f32.mrb[13].mxu0  ;;  %v469_v53 = vadd.f32 %v468_v51, %v823_v24  ;;  %v470_v55 = vpop.f32.mrb[13].mxu1 }
 0x105   : > { %611 = vst [vmem:[%s838_s6 + $0x30] sm:$0xff] %v729_v47  ;;  %v418_v26 = vadd.f32 %v417_v52, %v823_v24  ;;  %v419_v56 = vpop.f32.mrb[14].mxu0  ;;  %612 = vst [vmem:[%s838_s6 + $0x38] sm:$0xff] %v730_v49  ;;  %v471_v58 = vadd.f32 %v470_v55, %v823_v24  ;;  %v472_v60 = vpop.f32.mrb[14].mxu1 }
 0x106   : > { %v497_v57 = vmax.f32 %v416_v50, 0.0  ;;  %v420_v59 = vadd.f32 %v419_v56, %v842_v54  ;;  %v421_v61 = vpop.f32.mrb[15].mxu0  ;;  %v499_v62 = vmax.f32 %v469_v53, 0.0  ;;  %v473_v0 = vadd.f32 %v472_v60, %v842_v54  ;;  %v474_v2 = vpop.f32.mrb[15].mxu1 }
 0x107   : > { %v498_v63 = vmax.f32 %v418_v26, 0.0  ;;  %v422_v1 = vadd.f32 %v421_v61, %v842_v54  ;;  %v500_v3 = vmax.f32 %v471_v58, 0.0  ;;  %v475_v5 = vadd.f32 %v474_v2, %v842_v54 }
 0x108   : > { %v505_v4 = vmax.f32 %v420_v59, 0.0  ;;  %v507_v6 = vmax.f32 %v473_v0, 0.0 }
 0x109   : > { %v733_v24 = vpack.c.bf16 %v498_v63, %v497_v57  ;;  %v506_v7 = vmax.f32 %v422_v1, 0.0  ;;  %v734_v8 = vpack.c.bf16 %v500_v3, %v499_v62  ;;  %v508_v9 = vmax.f32 %v475_v5, 0.0 }
 0x10b   : > { %615 = vst [vmem:[%s838_s6 + $0x50] sm:$0xff] %v733_v24  ;;  %v737_v10 = vpack.c.bf16 %v506_v7, %v505_v4  ;;  %616 = vst [vmem:[%s838_s6 + $0x58] sm:$0xff] %v734_v8  ;;  %v738_v11 = vpack.c.bf16 %v508_v9, %v507_v6 }
 0x10d   : > { %619 = vst [vmem:[%s838_s6 + $0x70] sm:$0xff] %v737_v10  ;;  %620 = vst [vmem:[%s838_s6 + $0x78] sm:$0xff] %v738_v11 }
 0x10e PF: > { %s13_s12 = sadd.s32 1, %s758_s12  }
 0x10f   : > { %p10_p4 = scmp.ge.s32.totalorder %s13_s12, 4  }
 0x111   :  { %12 = sbr.rel (!%p10_p4) target bundleno = 1 (0x1), region = 62 }

// kernel: encoder2d_forward.4
= control target key start
LH: loop header
LB: loop body
LE: loop exit
PB: predicated region body
PF: predicated region fallthrough
CT: control target
= control target key end

     0   :  { %s1273_s12 = smov 0   ;;  %s1442_s0 = inlined_call_operand.vmem [shape: bf16[2,512,256], index: 0, kind: input, shape index: {}]   ;;  %s1443_s1 = inlined_call_operand.vmem [shape: bf16[64,512], index: 1, kind: input, shape index: {}]   ;;  %s1444_s2 = inlined_call_operand.vmem [shape: f32[64,1], index: 2, kind: input, shape index: {}]   ;;  %s1445_s3 = inlined_call_operand.vmem [shape: bf16[2,64,256], index: 3, kind: output, shape index: {}]  }
   0x1 LB: > { %s972_s13 = sadd.s32 4294967295, %s1250_s12   ;;  %p976_p0 = scmp.ge.s32.totalorder %s1250_s12, 1  ;;  %s1250_s12 = sphi %s1273_s12, %s13_s12  }
   0x2   : > { %p137_p1 = scmp.lt.s32.totalorder %s1250_s12, 3 }
   0x4   : > { %p138_p2 = pnand %p976_p0, %p137_p1 }
   0x5   : > { %p161_p3 = scmp.lt.s32.totalorder (!%p138_p2), %s972_s13, 1  ;;  %v1222_v0 = vld [vmem:[%s1443_s1 + $0x4] ss:$16 sps:$4 sm:$0xff] (!%p138_p2)   ;;  %v1252_v1 = vmov (!%p138_p2), 0   ;;  %v1225_v2 = vld [vmem:[%s1443_s1 + $0xc] ss:$16 sps:$4 sm:$0xff] (!%p138_p2)  }
   0x6   : > { %141 = sbr.rel (%p138_p2) target bundleno = 329 (0x149), region = 32  ;;  %1122 = vset.pattern.permute.xlu0 (!%p138_p2), %v1252_v1  ;;  %1123 = vset.pattern.permute.xlu1 (!%p138_p2), %v1252_v1  ;;  %v251_v53 = vld [vmem:[%s1444_s2] sm:$0xff] (!%p138_p2)  ;;  %v253_v56 = vld [vmem:[%s1444_s2 + $0x10] sm:$0xff] (!%p138_p2)  ;;  %v252_v59 = vld [vmem:[%s1444_s2 + $0x8] sm:$0xff] (!%p138_p2) }
   0x7   : > { %731 = vmatprep.mubr.bf16.mxu1 (!%p138_p2), %v1222_v0  ;;  %804 = vmatprep.mubr.bf16.mxu0 (!%p138_p2), %v1225_v2  ;;  %v254_v60 = vld [vmem:[%s1444_s2 + $0x18] sm:$0xff] (!%p138_p2)  ;;  %v256_v1 = vld [vmem:[%s1444_s2 + $0x28] sm:$0xff] (!%p138_p2)  ;;  %v255_v2 = vld [vmem:[%s1444_s2 + $0x20] sm:$0xff] (!%p138_p2) }
   0x8   : > { %261 = vperm.xlu0 (!%p138_p2), %1122, %v251_v53   ;;  %271 = vperm.xlu1 (!%p138_p2), %1123, %v253_v56  }
   0xc   : > { %266 = vperm.xlu0 (!%p138_p2), %1122, %v252_v59   ;;  %276 = vperm.xlu1 (!%p138_p2), %1123, %v254_v60  }
   0xd   : > { %s1447_s13 = smov (!%p161_p3, %s972_s13), 1 }
   0xe   : > { %s1071_s18 = sshll.u32 %s1447_s13, 9  ;;  %s1072_s16 = sshll.u32 %s1447_s13, 6 }
   0xf   : > { %s1293_s21 = scalar_lea.vmem %s1442_s0, %s1071_s18  ;;  %s1429_s19 = scalar_lea.vmem %s1445_s3, %s1072_s16 }
  0x10   : > { %v1124_v3 = vld [vmem:[%s1293_s21 + $0x4] ss:$8 sps:$4 sm:$0xff]   ;;  %v1128_v5 = vld [vmem:[%s1293_s21] ss:$8 sps:$4 sm:$0xff]   ;;  %v1130_v7 = vld [vmem:[%s1293_s21 + $0x14] ss:$8 sps:$4 sm:$0xff]   ;;  %286 = vperm.xlu1 %1123, %v256_v1   ;;  %281 = vperm.xlu0 %1122, %v255_v2  }
  0x11   : > { %v1126_v4 = vld [vmem:[%s1293_s21 + $0x104] ss:$8 sps:$4 sm:$0xff]   ;;  %699 = vmatprep.subr.bf16.mxu1 %v1124_v3  ;;  %v1129_v6 = vld [vmem:[%s1293_s21 + $0x100] ss:$8 sps:$4 sm:$0xff]   ;;  %v1132_v8 = vld [vmem:[%s1293_s21 + $0x114] ss:$8 sps:$4 sm:$0xff]  }
  0x12   : > { %772 = vmatprep.subr.bf16.mxu0 %v1126_v4  ;;  %700 = vmatpush1.bf16.msra.mxu1 %v1128_v5  ;;  %v1134_v9 = vld [vmem:[%s1293_s21 + $0x10] ss:$8 sps:$4 sm:$0xff]   ;;  %v1136_v11 = vld [vmem:[%s1293_s21 + $0x24] ss:$8 sps:$4 sm:$0xff]   ;;  %v1140_v13 = vld [vmem:[%s1293_s21 + $0x20] ss:$8 sps:$4 sm:$0xff]  }
  0x13   : > { %773 = vmatpush1.bf16.msra.mxu0 %v1129_v6  ;;  %701 = vmatprep.subr.bf16.mxu1 %v1130_v7  ;;  %v1135_v10 = vld [vmem:[%s1293_s21 + $0x110] ss:$8 sps:$4 sm:$0xff]   ;;  %v1138_v12 = vld [vmem:[%s1293_s21 + $0x124] ss:$8 sps:$4 sm:$0xff]   ;;  %v1141_v14 = vld [vmem:[%s1293_s21 + $0x120] ss:$8 sps:$4 sm:$0xff]  }
  0x14   : > { %774 = vmatprep.subr.bf16.mxu0 %v1132_v8  ;;  %v1142_v15 = vld [vmem:[%s1293_s21 + $0x34] ss:$8 sps:$4 sm:$0xff]   ;;  %v1146_v17 = vld [vmem:[%s1293_s21 + $0x30] ss:$8 sps:$4 sm:$0xff]   ;;  %v1148_v19 = vld [vmem:[%s1293_s21 + $0x44] ss:$8 sps:$4 sm:$0xff]  }
  0x15   : > { %v1144_v16 = vld [vmem:[%s1293_s21 + $0x134] ss:$8 sps:$4 sm:$0xff]   ;;  %v1147_v18 = vld [vmem:[%s1293_s21 + $0x130] ss:$8 sps:$4 sm:$0xff]   ;;  %v1150_v20 = vld [vmem:[%s1293_s21 + $0x144] ss:$8 sps:$4 sm:$0xff]  }
  0x16   : > { %702 = vmatpush1.bf16.msra.mxu1 %v1134_v9  ;;  %v1152_v21 = vld [vmem:[%s1293_s21 + $0x40] ss:$8 sps:$4 sm:$0xff]   ;;  %v1154_v23 = vld [vmem:[%s1293_s21 + $0x54] ss:$8 sps:$4 sm:$0xff]   ;;  %v1158_v25 = vld [vmem:[%s1293_s21 + $0x50] ss:$8 sps:$4 sm:$0xff]  }
  0x17   : > { %775 = vmatpush1.bf16.msra.mxu0 %v1135_v10  ;;  %703 = vmatprep.subr.bf16.mxu1 %v1136_v11  ;;  %v1153_v22 = vld [vmem:[%s1293_s21 + $0x140] ss:$8 sps:$4 sm:$0xff]   ;;  %v1156_v24 = vld [vmem:[%s1293_s21 + $0x154] ss:$8 sps:$4 sm:$0xff]   ;;  %v1159_v26 = vld [vmem:[%s1293_s21 + $0x150] ss:$8 sps:$4 sm:$0xff]  }
  0x18   : > { %776 = vmatprep.subr.bf16.mxu0 %v1138_v12  ;;  %v1160_v27 = vld [vmem:[%s1293_s21 + $0x64] ss:$8 sps:$4 sm:$0xff]   ;;  %v1164_v29 = vld [vmem:[%s1293_s21 + $0x60] ss:$8 sps:$4 sm:$0xff]   ;;  %v1166_v31 = vld [vmem:[%s1293_s21 + $0x74] ss:$8 sps:$4 sm:$0xff]  }
  0x19   : > { %v1162_v28 = vld [vmem:[%s1293_s21 + $0x164] ss:$8 sps:$4 sm:$0xff]   ;;  %v1165_v30 = vld [vmem:[%s1293_s21 + $0x160] ss:$8 sps:$4 sm:$0xff]   ;;  %v1168_v32 = vld [vmem:[%s1293_s21 + $0x174] ss:$8 sps:$4 sm:$0xff]  }
  0x1a   : > { %704 = vmatpush1.bf16.msra.mxu1 %v1140_v13  ;;  %v1170_v33 = vld [vmem:[%s1293_s21 + $0x70] ss:$8 sps:$4 sm:$0xff]   ;;  %v1172_v35 = vld [vmem:[%s1293_s21 + $0x84] ss:$8 sps:$4 sm:$0xff]   ;;  %v1176_v37 = vld [vmem:[%s1293_s21 + $0x80] ss:$8 sps:$4 sm:$0xff]  }
  0x1b   : > { %777 = vmatpush1.bf16.msra.mxu0 %v1141_v14  ;;  %705 = vmatprep.subr.bf16.mxu1 %v1142_v15  ;;  %v1171_v34 = vld [vmem:[%s1293_s21 + $0x170] ss:$8 sps:$4 sm:$0xff]   ;;  %v1174_v36 = vld [vmem:[%s1293_s21 + $0x184] ss:$8 sps:$4 sm:$0xff]   ;;  %v1177_v38 = vld [vmem:[%s1293_s21 + $0x180] ss:$8 sps:$4 sm:$0xff]  }
  0x1c   : > { %778 = vmatprep.subr.bf16.mxu0 %v1144_v16  ;;  %v1178_v39 = vld [vmem:[%s1293_s21 + $0x94] ss:$8 sps:$4 sm:$0xff]   ;;  %v1182_v41 = vld [vmem:[%s1293_s21 + $0x90] ss:$8 sps:$4 sm:$0xff]   ;;  %v1184_v43 = vld [vmem:[%s1293_s21 + $0xa4] ss:$8 sps:$4 sm:$0xff]  }
  0x1d   : > { %v1180_v40 = vld [vmem:[%s1293_s21 + $0x194] ss:$8 sps:$4 sm:$0xff]   ;;  %v1183_v42 = vld [vmem:[%s1293_s21 + $0x190] ss:$8 sps:$4 sm:$0xff]   ;;  %v1186_v44 = vld [vmem:[%s1293_s21 + $0x1a4] ss:$8 sps:$4 sm:$0xff]  }
  0x1e   : > { %706 = vmatpush1.bf16.msra.mxu1 %v1146_v17  ;;  %v1188_v45 = vld [vmem:[%s1293_s21 + $0xa0] ss:$8 sps:$4 sm:$0xff]   ;;  %v1190_v47 = vld [vmem:[%s1293_s21 + $0xb4] ss:$8 sps:$4 sm:$0xff]   ;;  %v1194_v49 = vld [vmem:[%s1293_s21 + $0xb0] ss:$8 sps:$4 sm:$0xff]  }
  0x1f   : > { %779 = vmatpush1.bf16.msra.mxu0 %v1147_v18  ;;  %707 = vmatprep.subr.bf16.mxu1 %v1148_v19  ;;  %v1189_v46 = vld [vmem:[%s1293_s21 + $0x1a0] ss:$8 sps:$4 sm:$0xff]   ;;  %v1192_v48 = vld [vmem:[%s1293_s21 + $0x1b4] ss:$8 sps:$4 sm:$0xff]   ;;  %v1195_v50 = vld [vmem:[%s1293_s21 + $0x1b0] ss:$8 sps:$4 sm:$0xff]  }
  0x20   : > { %780 = vmatprep.subr.bf16.mxu0 %v1150_v20  ;;  %v1196_v51 = vld [vmem:[%s1293_s21 + $0xc4] ss:$8 sps:$4 sm:$0xff]   ;;  %v1200_v54 = vld [vmem:[%s1293_s21 + $0xc0] ss:$8 sps:$4 sm:$0xff]   ;;  %v1202_v57 = vld [vmem:[%s1293_s21 + $0xd4] ss:$8 sps:$4 sm:$0xff]  }
  0x21   : > { %v1198_v52 = vld [vmem:[%s1293_s21 + $0x1c4] ss:$8 sps:$4 sm:$0xff]   ;;  %v1201_v55 = vld [vmem:[%s1293_s21 + $0x1c0] ss:$8 sps:$4 sm:$0xff]   ;;  %v1204_v58 = vld [vmem:[%s1293_s21 + $0x1d4] ss:$8 sps:$4 sm:$0xff]  }
  0x22   : > { %708 = vmatpush1.bf16.msra.mxu1 %v1152_v21  ;;  %v1206_v61 = vld [vmem:[%s1293_s21 + $0xd0] ss:$8 sps:$4 sm:$0xff]   ;;  %v1208_v63 = vld [vmem:[%s1293_s21 + $0xe4] ss:$8 sps:$4 sm:$0xff]   ;;  %v1212_v3 = vld [vmem:[%s1293_s21 + $0xe0] ss:$8 sps:$4 sm:$0xff]  }
  0x23   : > { %781 = vmatpush1.bf16.msra.mxu0 %v1153_v22  ;;  %709 = vmatprep.subr.bf16.mxu1 %v1154_v23  ;;  %v1207_v62 = vld [vmem:[%s1293_s21 + $0x1d0] ss:$8 sps:$4 sm:$0xff]   ;;  %v1210_v0 = vld [vmem:[%s1293_s21 + $0x1e4] ss:$8 sps:$4 sm:$0xff]   ;;  %v1213_v4 = vld [vmem:[%s1293_s21 + $0x1e0] ss:$8 sps:$4 sm:$0xff]  }
  0x24   : > { %782 = vmatprep.subr.bf16.mxu0 %v1156_v24  ;;  %v1214_v5 = vld [vmem:[%s1293_s21 + $0xf4] ss:$8 sps:$4 sm:$0xff]   ;;  %v1218_v9 = vld [vmem:[%s1293_s21 + $0xf0] ss:$8 sps:$4 sm:$0xff]  }
  0x25   : > { %v1216_v6 = vld [vmem:[%s1293_s21 + $0x1f4] ss:$8 sps:$4 sm:$0xff]   ;;  %v1219_v10 = vld [vmem:[%s1293_s21 + $0x1f0] ss:$8 sps:$4 sm:$0xff]  }
  0x26   : > { %710 = vmatpush1.bf16.msra.mxu1 %v1158_v25  ;;  %v258_v7 = vld [vmem:[%s1444_s2 + $0x38] sm:$0xff]  ;;  %v257_v8 = vld [vmem:[%s1444_s2 + $0x30] sm:$0xff] }
  0x27   : > { %783 = vmatpush1.bf16.msra.mxu0 %v1159_v26  ;;  %711 = vmatprep.subr.bf16.mxu1 %v1160_v27  ;;  %v1220_v11 = vld [vmem:[%s1443_s1] ss:$16 sps:$4 sm:$0xff]   ;;  %v1223_v12 = vld [vmem:[%s1443_s1 + $0x8] ss:$16 sps:$4 sm:$0xff]   ;;  %v1226_v13 = vld [vmem:[%s1443_s1 + $0x24] ss:$16 sps:$4 sm:$0xff]  }
  0x28   : > { %784 = vmatprep.subr.bf16.mxu0 %v1162_v28  ;;  %296 = vperm.xlu1 %1123, %v258_v7   ;;  %v1228_v14 = vld [vmem:[%s1443_s1 + $0x2c] ss:$16 sps:$4 sm:$0xff]   ;;  %v1230_v15 = vld [vmem:[%s1443_s1 + $0x20] ss:$16 sps:$4 sm:$0xff]   ;;  %v1231_v16 = vld [vmem:[%s1443_s1 + $0x28] ss:$16 sps:$4 sm:$0xff]  }
  0x29   : > { %291 = vperm.xlu0 %1122, %v257_v8   ;;  %v1232_v17 = vld [vmem:[%s1443_s1 + $0x44] ss:$16 sps:$4 sm:$0xff]   ;;  %v1234_v18 = vld [vmem:[%s1443_s1 + $0x4c] ss:$16 sps:$4 sm:$0xff]   ;;  %v1236_v19 = vld [vmem:[%s1443_s1 + $0x40] ss:$16 sps:$4 sm:$0xff]  }
  0x2a   : > { %712 = vmatpush1.bf16.msra.mxu1 %v1164_v29  ;;  %v1237_v20 = vld [vmem:[%s1443_s1 + $0x48] ss:$16 sps:$4 sm:$0xff]   ;;  %v1238_v21 = vld [vmem:[%s1443_s1 + $0x64] ss:$16 sps:$4 sm:$0xff]   ;;  %v1240_v22 = vld [vmem:[%s1443_s1 + $0x6c] ss:$16 sps:$4 sm:$0xff]  }
  0x2b   : > { %785 = vmatpush1.bf16.msra.mxu0 %v1165_v30  ;;  %713 = vmatprep.subr.bf16.mxu1 %v1166_v31  ;;  %v1242_v23 = vld [vmem:[%s1443_s1 + $0x60] ss:$16 sps:$4 sm:$0xff]   ;;  %v1243_v24 = vld [vmem:[%s1443_s1 + $0x68] ss:$16 sps:$4 sm:$0xff]  }
  0x2c   : > { %786 = vmatprep.subr.bf16.mxu0 %v1168_v32 }
  0x2e   : > { %714 = vmatpush1.bf16.msra.mxu1 %v1170_v33 }
  0x2f   : > { %787 = vmatpush1.bf16.msra.mxu0 %v1171_v34  ;;  %715 = vmatprep.subr.bf16.mxu1 %v1172_v35 }
  0x30   : > { %788 = vmatprep.subr.bf16.mxu0 %v1174_v36 }
  0x32   : > { %716 = vmatpush1.bf16.msra.mxu1 %v1176_v37 }
  0x33   : > { %789 = vmatpush1.bf16.msra.mxu0 %v1177_v38  ;;  %717 = vmatprep.subr.bf16.mxu1 %v1178_v39 }
  0x34   : > { %790 = vmatprep.subr.bf16.mxu0 %v1180_v40 }
  0x36   : > { %718 = vmatpush1.bf16.msra.mxu1 %v1182_v41 }
  0x37   : > { %791 = vmatpush1.bf16.msra.mxu0 %v1183_v42  ;;  %719 = vmatprep.subr.bf16.mxu1 %v1184_v43 }
  0x38   : > { %792 = vmatprep.subr.bf16.mxu0 %v1186_v44 }
  0x3a   : > { %720 = vmatpush1.bf16.msra.mxu1 %v1188_v45 }
  0x3b   : > { %793 = vmatpush1.bf16.msra.mxu0 %v1189_v46  ;;  %721 = vmatprep.subr.bf16.mxu1 %v1190_v47 }
  0x3c   : > { %794 = vmatprep.subr.bf16.mxu0 %v1192_v48 }
  0x3e   : > { %722 = vmatpush1.bf16.msra.mxu1 %v1194_v49 }
  0x3f   : > { %795 = vmatpush1.bf16.msra.mxu0 %v1195_v50  ;;  %723 = vmatprep.subr.bf16.mxu1 %v1196_v51 }
  0x40   : > { %796 = vmatprep.subr.bf16.mxu0 %v1198_v52 }
  0x42   : > { %724 = vmatpush1.bf16.msra.mxu1 %v1200_v54 }
  0x43   : > { %797 = vmatpush1.bf16.msra.mxu0 %v1201_v55  ;;  %725 = vmatprep.subr.bf16.mxu1 %v1202_v57 }
  0x44   : > { %798 = vmatprep.subr.bf16.mxu0 %v1204_v58 }
  0x46   : > { %726 = vmatpush1.bf16.msra.mxu1 %v1206_v61 }
  0x47   : > { %799 = vmatpush1.bf16.msra.mxu0 %v1207_v62  ;;  %727 = vmatprep.subr.bf16.mxu1 %v1208_v63 }
  0x48   : > { %800 = vmatprep.subr.bf16.mxu0 %v1210_v0 }
  0x4a   : > { %728 = vmatpush1.bf16.msra.mxu1 %v1212_v3 }
  0x4b   : > { %801 = vmatpush1.bf16.msra.mxu0 %v1213_v4  ;;  %729 = vmatprep.subr.bf16.mxu1 %v1214_v5 }
  0x4c   : > { %802 = vmatprep.subr.bf16.mxu0 %v1216_v6 }
  0x4e   : > { %730 = vmatpush1.bf16.msra.mxu1 %v1218_v9 }
  0x4f   : > { %803 = vmatpush1.bf16.msra.mxu0 %v1219_v10 }
  0x51   : > { %732 = vmatmul.mubr.bf16.vlgmr.msra.gmra.mrb[0].mxu1 %v1220_v11 }
  0x52   : > { %805 = vmatmul.mubr.bf16.vlgmr.msra.gmra.mrb[0].mxu0 %v1223_v12  ;;  %741 = vmatprep.mubr.bf16.mxu1 %v1226_v13 }
  0x53   : > { %814 = vmatprep.mubr.bf16.mxu0 %v1228_v14 }
  0x59   : > { %742 = vmatmul.mubr.bf16.gmra.mrb[4].mxu1 %v1230_v15 }
  0x5a   : > { %815 = vmatmul.mubr.bf16.gmra.mrb[4].mxu0 %v1231_v16  ;;  %751 = vmatprep.mubr.bf16.mxu1 %v1232_v17 }
  0x5b   : > { %824 = vmatprep.mubr.bf16.mxu0 %v1234_v18 }
  0x61   : > { %752 = vmatmul.mubr.bf16.gmra.mrb[8].mxu1 %v1236_v19 }
  0x62   : > { %825 = vmatmul.mubr.bf16.gmra.mrb[8].mxu0 %v1237_v20  ;;  %761 = vmatprep.mubr.bf16.mxu1 %v1238_v21 }
  0x63   : > { %834 = vmatprep.mubr.bf16.mxu0 %v1240_v22 }
  0x69   : > { %762 = vmatmul.mubr.bf16.gmra.mrb[12].mxu1 %v1242_v23 }
  0x6a   : > { %835 = vmatmul.mubr.bf16.gmra.mrb[12].mxu0 %v1243_v24 }
  0x87   : > { %v262_v25 = vpop.permute.xlu0 %261  ;;  %v272_v27 = vpop.permute.xlu1 %271 }
  0x8b   : > { %v267_v26 = vpop.permute.xlu0 %266  ;;  %v277_v47 = vpop.permute.xlu1 %276 }
  0x8f   : > { %v287_v6 = vpop.permute.xlu1 %286  ;;  %v282_v7 = vpop.permute.xlu0 %281 }
 0x124   : > { %v733_v28 = vpop.f32.mrb[0].mxu1 }
 0x125   : > { %v806_v29 = vpop.f32.mrb[0].mxu0  ;;  %v734_v30 = vadd.f32 %v733_v28, %v262_v25  ;;  %v735_v31 = vpop.f32.mrb[1].mxu1 }
 0x126   : > { %v808_v32 = vpop.f32.mrb[1].mxu0  ;;  %v736_v33 = vadd.f32 %v735_v31, %v262_v25  ;;  %v737_v34 = vpop.f32.mrb[2].mxu1 }
 0x127   : > { %v810_v35 = vpop.f32.mrb[2].mxu0  ;;  %v807_v36 = vadd.f32 %v806_v29, %v734_v30  ;;  %v738_v37 = vadd.f32 %v737_v34, %v267_v26  ;;  %v739_v38 = vpop.f32.mrb[3].mxu1 }
 0x128   : > { %v812_v39 = vpop.f32.mrb[3].mxu0  ;;  %v809_v40 = vadd.f32 %v808_v32, %v736_v33  ;;  %v740_v41 = vadd.f32 %v739_v38, %v267_v26  ;;  %v297_v29 = vpop.permute.xlu1 %296 }
 0x129   : > { %v845_v42 = vmax.f32 %v807_v36, 0.0  ;;  %v811_v43 = vadd.f32 %v810_v35, %v738_v37  ;;  %v292_v30 = vpop.permute.xlu0 %291 }
 0x12a   : > { %v846_v44 = vmax.f32 %v809_v40, 0.0  ;;  %v813_v45 = vadd.f32 %v812_v39, %v740_v41 }
 0x12b   : > { %v847_v46 = vmax.f32 %v811_v43, 0.0 }
 0x12c   : > { %v1073_v48 = vpack.c.bf16 %v846_v44, %v845_v42  ;;  %v848_v49 = vmax.f32 %v813_v45, 0.0  ;;  %v743_v50 = vpop.f32.mrb[4].mxu1 }
 0x12d   : > { %v816_v51 = vpop.f32.mrb[4].mxu0  ;;  %v744_v52 = vadd.f32 %v743_v50, %v272_v27  ;;  %v745_v53 = vpop.f32.mrb[5].mxu1 }
 0x12e   : > { %v818_v54 = vpop.f32.mrb[5].mxu0  ;;  %909 = vst [vmem:[%s1429_s19] sm:$0xff] %v1073_v48  ;;  %v1074_v55 = vpack.c.bf16 %v848_v49, %v847_v46  ;;  %v746_v56 = vadd.f32 %v745_v53, %v272_v27  ;;  %v747_v57 = vpop.f32.mrb[6].mxu1 }
 0x12f   : > { %v820_v58 = vpop.f32.mrb[6].mxu0  ;;  %v817_v59 = vadd.f32 %v816_v51, %v744_v52  ;;  %v748_v60 = vadd.f32 %v747_v57, %v277_v47  ;;  %v749_v61 = vpop.f32.mrb[7].mxu1 }
 0x130   : > { %v822_v62 = vpop.f32.mrb[7].mxu0  ;;  %910 = vst [vmem:[%s1429_s19 + $0x8] sm:$0xff] %v1074_v55  ;;  %v819_v63 = vadd.f32 %v818_v54, %v746_v56  ;;  %v750_v0 = vadd.f32 %v749_v61, %v277_v47 }
 0x131   : > { %v849_v1 = vmax.f32 %v817_v59, 0.0  ;;  %v821_v2 = vadd.f32 %v820_v58, %v748_v60 }
 0x132   : > { %v850_v3 = vmax.f32 %v819_v63, 0.0  ;;  %v823_v4 = vadd.f32 %v822_v62, %v750_v0 }
 0x133   : > { %v851_v5 = vmax.f32 %v821_v2, 0.0 }
 0x134   : > { %v1075_v8 = vpack.c.bf16 %v850_v3, %v849_v1  ;;  %v852_v9 = vmax.f32 %v823_v4, 0.0  ;;  %v753_v10 = vpop.f32.mrb[8].mxu1 }
 0x135   : > { %v826_v11 = vpop.f32.mrb[8].mxu0  ;;  %v754_v12 = vadd.f32 %v753_v10, %v282_v7  ;;  %v755_v13 = vpop.f32.mrb[9].mxu1 }
 0x136   : > { %v828_v14 = vpop.f32.mrb[9].mxu0  ;;  %911 = vst [vmem:[%s1429_s19 + $0x10] sm:$0xff] %v1075_v8  ;;  %v1076_v15 = vpack.c.bf16 %v852_v9, %v851_v5  ;;  %v756_v16 = vadd.f32 %v755_v13, %v282_v7  ;;  %v757_v17 = vpop.f32.mrb[10].mxu1 }
 0x137   : > { %v830_v18 = vpop.f32.mrb[10].mxu0  ;;  %v827_v19 = vadd.f32 %v826_v11, %v754_v12  ;;  %v758_v20 = vadd.f32 %v757_v17, %v287_v6  ;;  %v759_v21 = vpop.f32.mrb[11].mxu1 }
 0x138   : > { %v832_v22 = vpop.f32.mrb[11].mxu0  ;;  %912 = vst [vmem:[%s1429_s19 + $0x18] sm:$0xff] %v1076_v15  ;;  %v829_v23 = vadd.f32 %v828_v14, %v756_v16  ;;  %v760_v24 = vadd.f32 %v759_v21, %v287_v6 }
 0x139   : > { %v853_v25 = vmax.f32 %v827_v19, 0.0  ;;  %v831_v26 = vadd.f32 %v830_v18, %v758_v20 }
 0x13a   : > { %v854_v27 = vmax.f32 %v829_v23, 0.0  ;;  %v833_v28 = vadd.f32 %v832_v22, %v760_v24 }
 0x13b   : > { %v855_v31 = vmax.f32 %v831_v26, 0.0 }
 0x13c   : > { %v1077_v32 = vpack.c.bf16 %v854_v27, %v853_v25  ;;  %v856_v33 = vmax.f32 %v833_v28, 0.0  ;;  %v763_v34 = vpop.f32.mrb[12].mxu1 }
 0x13d   : > { %v836_v35 = vpop.f32.mrb[12].mxu0  ;;  %v764_v36 = vadd.f32 %v763_v34, %v292_v30  ;;  %v765_v37 = vpop.f32.mrb[13].mxu1 }
 0x13e   : > { %v838_v38 = vpop.f32.mrb[13].mxu0  ;;  %913 = vst [vmem:[%s1429_s19 + $0x20] sm:$0xff] %v1077_v32  ;;  %v1078_v39 = vpack.c.bf16 %v856_v33, %v855_v31  ;;  %v766_v40 = vadd.f32 %v765_v37, %v292_v30  ;;  %v767_v41 = vpop.f32.mrb[14].mxu1 }
 0x13f   : > { %v840_v42 = vpop.f32.mrb[14].mxu0  ;;  %v837_v43 = vadd.f32 %v836_v35, %v764_v36  ;;  %v768_v44 = vadd.f32 %v767_v41, %v297_v29  ;;  %v769_v45 = vpop.f32.mrb[15].mxu1 }
 0x140   : > { %v842_v46 = vpop.f32.mrb[15].mxu0  ;;  %914 = vst [vmem:[%s1429_s19 + $0x28] sm:$0xff] %v1078_v39  ;;  %v839_v47 = vadd.f32 %v838_v38, %v766_v40  ;;  %v770_v48 = vadd.f32 %v769_v45, %v297_v29 }
 0x141   : > { %v857_v49 = vmax.f32 %v837_v43, 0.0  ;;  %v841_v50 = vadd.f32 %v840_v42, %v768_v44 }
 0x142   : > { %v858_v51 = vmax.f32 %v839_v47, 0.0  ;;  %v843_v52 = vadd.f32 %v842_v46, %v770_v48 }
 0x143   : > { %v859_v53 = vmax.f32 %v841_v50, 0.0 }
 0x144   : > { %v1079_v54 = vpack.c.bf16 %v858_v51, %v857_v49  ;;  %v860_v55 = vmax.f32 %v843_v52, 0.0 }
 0x146   : > { %915 = vst [vmem:[%s1429_s19 + $0x30] sm:$0xff] %v1079_v54  ;;  %v1080_v56 = vpack.c.bf16 %v860_v55, %v859_v53 }
 0x148   : > { %916 = vst [vmem:[%s1429_s19 + $0x38] sm:$0xff] %v1080_v56 }
 0x149 PF: > { %s13_s12 = sadd.s32 1, %s1250_s12  }
 0x14a   : > { %p10_p4 = scmp.ge.s32.totalorder %s13_s12, 4  }
 0x14c   :  { %12 = sbr.rel (!%p10_p4) target bundleno = 1 (0x1), region = 62 }

// kernel: encoder2d_forward.5
= control target key start
LH: loop header
LB: loop body
LE: loop exit
PB: predicated region body
PF: predicated region fallthrough
CT: control target
= control target key end

     0   :  { %s9672_s18 = smov 0   ;;  %s13706_s0 = inlined_call_operand.vmem [shape: bf16[2,1024,64], index: 0, kind: input, shape index: {}]   ;;  %s13707_s1 = inlined_call_operand.vmem [shape: bf16[128,1024], index: 1, kind: input, shape index: {}]   ;;  %s13708_s2 = inlined_call_operand.vmem [shape: f32[128,1], index: 2, kind: input, shape index: {}]   ;;  %s13709_s3 = inlined_call_operand.vmem [shape: bf16[32,128,64], index: 3, kind: input, shape index: {}]   ;;  %s13710_s4 = inlined_call_operand.vmem [shape: f32[32,1], index: 4, kind: input, shape index: {}]   ;;  %s13711_s5 = inlined_call_operand.vmem [shape: f32[2,32,1], index: 5, kind: output, shape index: {}]  }
   0x1 LB: > { %s7882_s19 = sadd.s32 4294967295, %s9639_s18   ;;  %p7886_p0 = scmp.ge.s32.totalorder %s9639_s18, 1  ;;  %s9639_s18 = sphi %s9672_s18, %s15_s18  }
   0x2   : > { %p187_p1 = scmp.lt.s32.totalorder %s9639_s18, 3 }
   0x4   : > { %p188_p2 = pnand %p7886_p0, %p187_p1 }
   0x6   : > { %191 = sbr.rel (%p188_p2) target bundleno = 1655 (0x677), region = 40 }
   0xd   : > { %p215_p3 = scmp.lt.s32.totalorder %s7882_s19, 1  ;;  %v9683_v0 = vld [vmem:[%s13707_s1] sm:$0xff]  ;;  %v9693_v2 = vld [vmem:[%s13707_s1 + $0x8] sm:$0xff]  ;;  %v9641_v5 = vmov 0   ;;  %vm3158_vm0 = vcmask 523264   ;;  %vm13716_vm1 = vcmask 130112  }
   0xe   : > { %v9688_v1 = vld [vmem:[%s13707_s1 + $0x20] sm:$0xff]  ;;  %v9700_v4 = vld [vmem:[%s13707_s1 + $0x28] sm:$0xff]  ;;  %9567 = vset.pattern.permute.xlu0 %v9641_v5  ;;  %9568 = vset.pattern.permute.xlu1 %v9641_v5  ;;  %vm13715_vm2 = vcmask 195712   ;;  %vm13714_vm3 = vcmask 261312   ;;  %vm5239_vm4 = vcmask 326912   ;;  %vm5246_vm5 = vcmask 392512  }
   0xf   : > { %v7892_v3 = vcombine.high %v9683_v0, %v9688_v1  ;;  %s13823_s19 = smov (!%p215_p3, %s7882_s19), 1  ;;  %v7894_v6 = vcombine.high %v9693_v2, %v9700_v4  ;;  %v234_v36 = vld [vmem:[%s13707_s1 + $0x40] sm:$0xff]  ;;  %v235_v39 = vld [vmem:[%s13707_s1 + $0x48] sm:$0xff]  ;;  %v7891_v43 = vcombine.low %v9683_v0, %v9688_v1  ;;  %v7893_v44 = vcombine.low %v9693_v2, %v9700_v4 }
  0x10   : > { %s8021_s28 = sshll.u32 %s13823_s19, 9  ;;  %v238_v37 = vld [vmem:[%s13707_s1 + $0x60] sm:$0xff]  ;;  %v239_v40 = vld [vmem:[%s13707_s1 + $0x68] sm:$0xff]  ;;  %vm5253_vm6 = vcmask 458112   ;;  %vm5260_vm7 = vcmask 523712   ;;  %vm5267_vm8 = vcmask 589312  }
  0x11   : > { %1250 = vmatprep.mubr.bf16.mxu0 %v7892_v3  ;;  %1347 = vmatprep.mubr.bf16.mxu1 %v7894_v6  ;;  %s9710_s6 = scalar_lea.vmem %s13706_s0, %s8021_s28  ;;  %v7900_v47 = vcombine.high %v234_v36, %v238_v37  ;;  %v7902_v49 = vcombine.high %v235_v39, %v239_v40  ;;  %v242_v51 = vld [vmem:[%s13707_s1 + $0x80] sm:$0xff]  ;;  %v243_v54 = vld [vmem:[%s13707_s1 + $0x88] sm:$0xff]  ;;  %v7899_v58 = vcombine.low %v234_v36, %v238_v37  ;;  %vm5274_vm9 = vcmask 654912   ;;  %s8022_s30 = sshll.u32 %s13823_s19, 5 }
  0x12   : > { %v9569_v7 = vld [vmem:[%s9710_s6 + $0x40] sm:$0xff]   ;;  %v9573_v11 = vld [vmem:[%s9710_s6 + $0x48] sm:$0xff]   ;;  %v9577_v15 = vld [vmem:[%s9710_s6 + $0x50] sm:$0xff]   ;;  %v7901_v60 = vcombine.low %v235_v39, %v239_v40  ;;  %vm5281_vm10 = vcmask 720512   ;;  %vm5288_vm11 = vcmask 786112   ;;  %vm5295_vm12 = vcmask 851712   ;;  %s13671_s10 = scalar_lea.vmem %s13711_s5, %s8022_s30 }
  0x13   : > { %v9570_v8 = vld [vmem:[%s9710_s6 + $0xc0] sm:$0xff]   ;;  %9302 = vmatprep.subr.bf16.mxu0 %v9569_v7  ;;  %v9574_v12 = vld [vmem:[%s9710_s6 + $0xc8] sm:$0xff]   ;;  %v9578_v16 = vld [vmem:[%s9710_s6 + $0xd0] sm:$0xff]   ;;  %vm5302_vm13 = vcmask 917312   ;;  %vm5309_vm14 = vcmask 982912   ;;  %vm5316_vm15 = vcmask 1048512  }
  0x14   : > { %v9571_v9 = vld [vmem:[%s9710_s6] sm:$0xff]   ;;  %9366 = vmatprep.subr.bf16.mxu1 %v9570_v8  ;;  %v9575_v13 = vld [vmem:[%s9710_s6 + $0x8] sm:$0xff]   ;;  %v9579_v17 = vld [vmem:[%s9710_s6 + $0x10] sm:$0xff]  }
  0x15   : > { %v9572_v10 = vld [vmem:[%s9710_s6 + $0x80] sm:$0xff]   ;;  %9303 = vmatpush3.bf16.msra.mxu0 %v9571_v9  ;;  %v9576_v14 = vld [vmem:[%s9710_s6 + $0x88] sm:$0xff]   ;;  %v9580_v18 = vld [vmem:[%s9710_s6 + $0x90] sm:$0xff]  }
  0x16   : > { %9367 = vmatpush3.bf16.msra.mxu1 %v9572_v10  ;;  %9304 = vmatprep.subr.bf16.mxu0 %v9573_v11  ;;  %v9581_v19 = vld [vmem:[%s9710_s6 + $0x58] sm:$0xff]   ;;  %v9585_v23 = vld [vmem:[%s9710_s6 + $0x60] sm:$0xff]   ;;  %v9589_v27 = vld [vmem:[%s9710_s6 + $0x68] sm:$0xff]  }
  0x17   : > { %9368 = vmatprep.subr.bf16.mxu1 %v9574_v12  ;;  %v9582_v20 = vld [vmem:[%s9710_s6 + $0xd8] sm:$0xff]   ;;  %v9586_v24 = vld [vmem:[%s9710_s6 + $0xe0] sm:$0xff]   ;;  %v9590_v28 = vld [vmem:[%s9710_s6 + $0xe8] sm:$0xff]  }
  0x18   : > { %v9583_v21 = vld [vmem:[%s9710_s6 + $0x18] sm:$0xff]   ;;  %v9587_v25 = vld [vmem:[%s9710_s6 + $0x20] sm:$0xff]   ;;  %v9591_v29 = vld [vmem:[%s9710_s6 + $0x28] sm:$0xff]  }
  0x19   : > { %9305 = vmatpush3.bf16.msra.mxu0 %v9575_v13  ;;  %v9584_v22 = vld [vmem:[%s9710_s6 + $0x98] sm:$0xff]   ;;  %v9588_v26 = vld [vmem:[%s9710_s6 + $0xa0] sm:$0xff]   ;;  %v9592_v30 = vld [vmem:[%s9710_s6 + $0xa8] sm:$0xff]  }
  0x1a   : > { %9369 = vmatpush3.bf16.msra.mxu1 %v9576_v14  ;;  %9306 = vmatprep.subr.bf16.mxu0 %v9577_v15  ;;  %v9593_v31 = vld [vmem:[%s9710_s6 + $0x70] sm:$0xff]   ;;  %v9597_v35 = vld [vmem:[%s9710_s6 + $0x78] sm:$0xff]   ;;  %v9601_v45 = vld [vmem:[%s9710_s6 + $0x140] sm:$0xff]  }
  0x1b   : > { %9370 = vmatprep.subr.bf16.mxu1 %v9578_v16  ;;  %v9594_v32 = vld [vmem:[%s9710_s6 + $0xf0] sm:$0xff]   ;;  %v9598_v38 = vld [vmem:[%s9710_s6 + $0xf8] sm:$0xff]   ;;  %v9602_v46 = vld [vmem:[%s9710_s6 + $0x100] sm:$0xff]  }
  0x1c   : > { %v9595_v33 = vld [vmem:[%s9710_s6 + $0x30] sm:$0xff]   ;;  %v9599_v41 = vld [vmem:[%s9710_s6 + $0x38] sm:$0xff]   ;;  %v9603_v48 = vld [vmem:[%s9710_s6 + $0x1c0] sm:$0xff]  }
  0x1d   : > { %9307 = vmatpush3.bf16.msra.mxu0 %v9579_v17  ;;  %v9596_v34 = vld [vmem:[%s9710_s6 + $0xb0] sm:$0xff]   ;;  %v9600_v42 = vld [vmem:[%s9710_s6 + $0xb8] sm:$0xff]   ;;  %v9604_v50 = vld [vmem:[%s9710_s6 + $0x180] sm:$0xff]  }
  0x1e   : > { %9371 = vmatpush3.bf16.msra.mxu1 %v9580_v18  ;;  %9308 = vmatprep.subr.bf16.mxu0 %v9581_v19  ;;  %v246_v52 = vld [vmem:[%s13707_s1 + $0xa0] sm:$0xff]  ;;  %v9605_v53 = vld [vmem:[%s9710_s6 + $0x148] sm:$0xff]   ;;  %v9609_v62 = vld [vmem:[%s9710_s6 + $0x150] sm:$0xff]  }
  0x1f   : > { %9372 = vmatprep.subr.bf16.mxu1 %v9582_v20  ;;  %v247_v55 = vld [vmem:[%s13707_s1 + $0xa8] sm:$0xff]  ;;  %v7908_v61 = vcombine.high %v242_v51, %v246_v52  ;;  %v9610_v0 = vld [vmem:[%s9710_s6 + $0x110] sm:$0xff]   ;;  %v250_v3 = vld [vmem:[%s13707_s1 + $0xc0] sm:$0xff]  ;;  %v7907_v10 = vcombine.low %v242_v51, %v246_v52 }
  0x20   : > { %v9606_v56 = vld [vmem:[%s9710_s6 + $0x108] sm:$0xff]   ;;  %v7910_v63 = vcombine.high %v243_v54, %v247_v55  ;;  %v9611_v1 = vld [vmem:[%s9710_s6 + $0x1d0] sm:$0xff]   ;;  %v254_v4 = vld [vmem:[%s13707_s1 + $0xe0] sm:$0xff]  ;;  %v7909_v12 = vcombine.low %v243_v54, %v247_v55 }
  0x21   : > { %9309 = vmatpush3.bf16.msra.mxu0 %v9583_v21  ;;  %v9607_v57 = vld [vmem:[%s9710_s6 + $0x1c8] sm:$0xff]   ;;  %v9612_v2 = vld [vmem:[%s9710_s6 + $0x190] sm:$0xff]   ;;  %v9613_v7 = vld [vmem:[%s9710_s6 + $0x158] sm:$0xff]   ;;  %v7916_v13 = vcombine.high %v250_v3, %v254_v4 }
  0x22   : > { %9373 = vmatpush3.bf16.msra.mxu1 %v9584_v22  ;;  %9310 = vmatprep.subr.bf16.mxu0 %v9585_v23  ;;  %v9608_v59 = vld [vmem:[%s9710_s6 + $0x188] sm:$0xff]   ;;  %v9614_v8 = vld [vmem:[%s9710_s6 + $0x118] sm:$0xff]   ;;  %v9617_v15 = vld [vmem:[%s9710_s6 + $0x160] sm:$0xff]  }
  0x23   : > { %9374 = vmatprep.subr.bf16.mxu1 %v9586_v24  ;;  %v251_v5 = vld [vmem:[%s13707_s1 + $0xc8] sm:$0xff]  ;;  %v9615_v9 = vld [vmem:[%s9710_s6 + $0x1d8] sm:$0xff]   ;;  %v9618_v16 = vld [vmem:[%s9710_s6 + $0x120] sm:$0xff]   ;;  %v7915_v24 = vcombine.low %v250_v3, %v254_v4 }
  0x24   : > { %v255_v6 = vld [vmem:[%s13707_s1 + $0xe8] sm:$0xff]  ;;  %v9616_v11 = vld [vmem:[%s9710_s6 + $0x198] sm:$0xff]   ;;  %v9619_v17 = vld [vmem:[%s9710_s6 + $0x1e0] sm:$0xff]  }
  0x25   : > { %9311 = vmatpush3.bf16.msra.mxu0 %v9587_v25  ;;  %v7918_v14 = vcombine.high %v251_v5, %v255_v6  ;;  %v258_v18 = vld [vmem:[%s13707_s1 + $0x100] sm:$0xff]  ;;  %v259_v21 = vld [vmem:[%s13707_s1 + $0x108] sm:$0xff]  ;;  %v9626_v36 = vld [vmem:[%s9710_s6 + $0x130] sm:$0xff]  }
  0x26   : > { %9375 = vmatpush3.bf16.msra.mxu1 %v9588_v26  ;;  %9312 = vmatprep.subr.bf16.mxu0 %v9589_v27  ;;  %v9620_v19 = vld [vmem:[%s9710_s6 + $0x1a0] sm:$0xff]   ;;  %v263_v22 = vld [vmem:[%s13707_s1 + $0x128] sm:$0xff]  ;;  %v7917_v26 = vcombine.low %v251_v5, %v255_v6  ;;  %v9627_v37 = vld [vmem:[%s9710_s6 + $0x1f0] sm:$0xff]  }
  0x27   : > { %9376 = vmatprep.subr.bf16.mxu1 %v9590_v28  ;;  %v262_v20 = vld [vmem:[%s13707_s1 + $0x120] sm:$0xff]  ;;  %v9621_v23 = vld [vmem:[%s9710_s6 + $0x168] sm:$0xff]   ;;  %v9628_v39 = vld [vmem:[%s9710_s6 + $0x1b0] sm:$0xff]   ;;  %v7925_v40 = vcombine.low %v259_v21, %v263_v22 }
  0x28   : > { %v9622_v25 = vld [vmem:[%s9710_s6 + $0x128] sm:$0xff]   ;;  %v7924_v27 = vcombine.high %v258_v18, %v262_v20  ;;  %v418_v54 = vld [vmem:[%s13708_s2] sm:$0xff]  ;;  %v424_v5 = vld [vmem:[%s13708_s2 + $0x30] sm:$0xff] }
  0x29   : > { %9313 = vmatpush3.bf16.msra.mxu0 %v9591_v29  ;;  %v9623_v28 = vld [vmem:[%s9710_s6 + $0x1e8] sm:$0xff]   ;;  %v7926_v29 = vcombine.high %v259_v21, %v263_v22  ;;  %436 = vperm.xlu0 %9567, %v418_v54   ;;  %v425_v6 = vld [vmem:[%s13708_s2 + $0x38] sm:$0xff] }
  0x2a   : > { %9377 = vmatpush3.bf16.msra.mxu1 %v9592_v30  ;;  %9314 = vmatprep.subr.bf16.mxu0 %v9593_v31  ;;  %v9624_v30 = vld [vmem:[%s9710_s6 + $0x1a8] sm:$0xff]   ;;  %v266_v31 = vld [vmem:[%s13707_s1 + $0x140] sm:$0xff]  ;;  %v237_v21 = vld [vmem:[%s13707_s1 + $0x58] sm:$0xff] }
  0x2b   : > { %9378 = vmatprep.subr.bf16.mxu1 %v9594_v32  ;;  %v270_v32 = vld [vmem:[%s13707_s1 + $0x160] sm:$0xff]  ;;  %v423_v3 = vld [vmem:[%s13708_s2 + $0x28] sm:$0xff]  ;;  %v241_v22 = vld [vmem:[%s13707_s1 + $0x78] sm:$0xff] }
  0x2c   : > { %v7931_v51 = vcombine.low %v266_v31, %v270_v32 }
  0x2d   : > { %9315 = vmatpush3.bf16.msra.mxu0 %v9595_v33  ;;  %v267_v33 = vld [vmem:[%s13707_s1 + $0x148] sm:$0xff] }
  0x2e   : > { %9379 = vmatpush3.bf16.msra.mxu1 %v9596_v34  ;;  %9316 = vmatprep.subr.bf16.mxu0 %v9597_v35  ;;  %v271_v34 = vld [vmem:[%s13707_s1 + $0x168] sm:$0xff]  ;;  %v9625_v35 = vld [vmem:[%s9710_s6 + $0x170] sm:$0xff]  }
  0x2f   : > { %9380 = vmatprep.subr.bf16.mxu1 %v9598_v38  ;;  %v7923_v38 = vcombine.low %v258_v18, %v262_v20  ;;  %v7933_v52 = vcombine.low %v267_v33, %v271_v34  ;;  %v429_v18 = vld [vmem:[%s13708_s2 + $0x58] sm:$0xff]  ;;  %v240_v20 = vld [vmem:[%s13707_s1 + $0x70] sm:$0xff] }
  0x31   : > { %9317 = vmatpush3.bf16.msra.mxu0 %v9599_v41  ;;  %v7932_v41 = vcombine.high %v266_v31, %v270_v32  ;;  %v244_v31 = vld [vmem:[%s13707_s1 + $0x90] sm:$0xff] }
  0x32   : > { %9381 = vmatpush3.bf16.msra.mxu1 %v9600_v42  ;;  %9430 = vmatprep.subr.bf16.mxu0 %v9601_v45  ;;  %v7934_v42 = vcombine.high %v267_v33, %v271_v34  ;;  %v9631_v45 = vld [vmem:[%s9710_s6 + $0x1f8] sm:$0xff]   ;;  %v248_v32 = vld [vmem:[%s13707_s1 + $0xb0] sm:$0xff] }
  0x33   : > { %9494 = vmatprep.subr.bf16.mxu1 %v9603_v48  ;;  %v278_v48 = vld [vmem:[%s13707_s1 + $0x1a0] sm:$0xff]  ;;  %v245_v33 = vld [vmem:[%s13707_s1 + $0x98] sm:$0xff] }
  0x34   : > { %1251 = vmatmul.mubr.bf16.vlgmr.msra.gmra.mrb[0].mxu0 %v7891_v43  ;;  %v9629_v43 = vld [vmem:[%s9710_s6 + $0x178] sm:$0xff]  }
  0x35   : > { %1348 = vmatmul.mubr.bf16.vlgmr.msra.gmra.mrb[0].mxu1 %v7893_v44  ;;  %9431 = vmatpush3.bf16.msra.mxu0 %v9602_v46  ;;  %v9630_v44 = vld [vmem:[%s9710_s6 + $0x138] sm:$0xff]  }
  0x36   : > { %1258 = vmatprep.mubr.bf16.mxu0 %v7900_v47  ;;  %9495 = vmatpush3.bf16.msra.mxu1 %v9604_v50  ;;  %v9632_v46 = vld [vmem:[%s9710_s6 + $0x1b8] sm:$0xff]   ;;  %v274_v47 = vld [vmem:[%s13707_s1 + $0x180] sm:$0xff]  ;;  %v279_v50 = vld [vmem:[%s13707_s1 + $0x1a8] sm:$0xff] }
  0x37   : > { %1355 = vmatprep.mubr.bf16.mxu1 %v7902_v49  ;;  %9432 = vmatprep.subr.bf16.mxu0 %v9605_v53  ;;  %v275_v49 = vld [vmem:[%s13707_s1 + $0x188] sm:$0xff]  ;;  %v7940_v53 = vcombine.high %v274_v47, %v278_v48  ;;  %v249_v34 = vld [vmem:[%s13707_s1 + $0xb8] sm:$0xff] }
  0x38   : > { %9496 = vmatprep.subr.bf16.mxu1 %v9607_v57  ;;  %v7942_v55 = vcombine.high %v275_v49, %v279_v50  ;;  %v420_v57 = vld [vmem:[%s13708_s2 + $0x10] sm:$0xff] }
  0x39   : > { %9433 = vmatpush3.bf16.msra.mxu0 %v9606_v56  ;;  %v419_v56 = vld [vmem:[%s13708_s2 + $0x8] sm:$0xff]  ;;  %446 = vperm.xlu1 %9568, %v420_v57   ;;  %v269_v57 = vld [vmem:[%s13707_s1 + $0x158] sm:$0xff] }
  0x3a   : > { %9497 = vmatpush3.bf16.msra.mxu1 %v9608_v59  ;;  %9434 = vmatprep.subr.bf16.mxu0 %v9609_v62  ;;  %v282_v59 = vld [vmem:[%s13707_s1 + $0x1c0] sm:$0xff]  ;;  %v287_v62 = vld [vmem:[%s13707_s1 + $0x1e8] sm:$0xff] }
  0x3b   : > { %9498 = vmatprep.subr.bf16.mxu1 %v9611_v1  ;;  %441 = vperm.xlu0 %9567, %v419_v56   ;;  %v7941_v1 = vcombine.low %v275_v49, %v279_v50  ;;  %v261_v49 = vld [vmem:[%s13707_s1 + $0x118] sm:$0xff]  ;;  %v272_v56 = vld [vmem:[%s13707_s1 + $0x170] sm:$0xff] }
  0x3c   : > { %1259 = vmatmul.mubr.bf16.gmra.mrb[4].mxu0 %v7899_v58  ;;  %v421_v58 = vld [vmem:[%s13708_s2 + $0x18] sm:$0xff] }
  0x3d   : > { %1356 = vmatmul.mubr.bf16.gmra.mrb[4].mxu1 %v7901_v60  ;;  %1266 = vmatprep.mubr.bf16.mxu0 %v7908_v61  ;;  %v286_v60 = vld [vmem:[%s13707_s1 + $0x1e0] sm:$0xff]  ;;  %v283_v61 = vld [vmem:[%s13707_s1 + $0x1c8] sm:$0xff]  ;;  %v265_v50 = vld [vmem:[%s13707_s1 + $0x138] sm:$0xff] }
  0x3e   : > { %1363 = vmatprep.mubr.bf16.mxu1 %v7910_v63  ;;  %9435 = vmatpush3.bf16.msra.mxu0 %v9610_v0  ;;  %v422_v63 = vld [vmem:[%s13708_s2 + $0x20] sm:$0xff]  ;;  %v7939_v0 = vcombine.low %v274_v47, %v278_v48  ;;  %v7950_v4 = vcombine.high %v283_v61, %v287_v62  ;;  %v260_v47 = vld [vmem:[%s13707_s1 + $0x110] sm:$0xff]  ;;  %v7930_v54 = vcombine.high %v261_v49, %v265_v50 }
  0x3f   : > { %9436 = vmatprep.subr.bf16.mxu0 %v9613_v7  ;;  %9499 = vmatpush3.bf16.msra.mxu1 %v9612_v2  ;;  %v7948_v2 = vcombine.high %v282_v59, %v286_v60  ;;  %v228_v7 = vld [vmem:[%s13707_s1 + $0x10] sm:$0xff] }
  0x40   : > { %9500 = vmatprep.subr.bf16.mxu1 %v9615_v9  ;;  %451 = vperm.xlu1 %9568, %v421_v58   ;;  %v229_v9 = vld [vmem:[%s13707_s1 + $0x18] sm:$0xff]  ;;  %v264_v48 = vld [vmem:[%s13707_s1 + $0x130] sm:$0xff] }
  0x41   : > { %456 = vperm.xlu0 %9567, %v422_v63   ;;  %v273_v58 = vld [vmem:[%s13707_s1 + $0x178] sm:$0xff]  ;;  %v276_v63 = vld [vmem:[%s13707_s1 + $0x190] sm:$0xff] }
  0x42   : > { %9437 = vmatpush3.bf16.msra.mxu0 %v9614_v8  ;;  %v232_v8 = vld [vmem:[%s13707_s1 + $0x30] sm:$0xff] }
  0x43   : > { %9501 = vmatpush3.bf16.msra.mxu1 %v9616_v11  ;;  %9438 = vmatprep.subr.bf16.mxu0 %v9617_v15  ;;  %v426_v11 = vld [vmem:[%s13708_s2 + $0x40] sm:$0xff]  ;;  %v427_v15 = vld [vmem:[%s13708_s2 + $0x48] sm:$0xff] }
  0x44   : > { %1267 = vmatmul.mubr.bf16.gmra.mrb[8].mxu0 %v7907_v10  ;;  %9502 = vmatprep.subr.bf16.mxu1 %v9619_v17  ;;  %v233_v10 = vld [vmem:[%s13707_s1 + $0x38] sm:$0xff]  ;;  %v428_v17 = vld [vmem:[%s13708_s2 + $0x50] sm:$0xff] }
  0x45   : > { %1364 = vmatmul.mubr.bf16.gmra.mrb[8].mxu1 %v7909_v12  ;;  %1274 = vmatprep.mubr.bf16.mxu0 %v7916_v13  ;;  %v7947_v12 = vcombine.low %v282_v59, %v286_v60  ;;  %v7949_v13 = vcombine.low %v283_v61, %v287_v62  ;;  %v7927_v59 = vcombine.low %v260_v47, %v264_v48 }
  0x46   : > { %1371 = vmatprep.mubr.bf16.mxu1 %v7918_v14  ;;  %9439 = vmatpush3.bf16.msra.mxu0 %v9618_v16  ;;  %v7896_v14 = vcombine.high %v228_v7, %v232_v8  ;;  %v7898_v16 = vcombine.high %v229_v9, %v233_v10  ;;  %v7929_v60 = vcombine.low %v261_v49, %v265_v50 }
  0x47   : > { %9503 = vmatpush3.bf16.msra.mxu1 %v9620_v19  ;;  %9440 = vmatprep.subr.bf16.mxu0 %v9621_v23  ;;  %v236_v19 = vld [vmem:[%s13707_s1 + $0x50] sm:$0xff]  ;;  %v430_v23 = vld [vmem:[%s13708_s2 + $0x60] sm:$0xff]  ;;  %v7938_v62 = vcombine.high %v269_v57, %v273_v58 }
  0x48   : > { %9504 = vmatprep.subr.bf16.mxu1 %v9623_v28  ;;  %461 = vperm.xlu1 %9568, %v423_v3   ;;  %v7906_v28 = vcombine.high %v237_v21, %v241_v22 }
  0x49   : > { %466 = vperm.xlu0 %9567, %v424_v5  }
  0x4a   : > { %9441 = vmatpush3.bf16.msra.mxu0 %v9622_v25  ;;  %v7897_v25 = vcombine.low %v229_v9, %v233_v10  ;;  %v285_v9 = vld [vmem:[%s13707_s1 + $0x1d8] sm:$0xff] }
  0x4b   : > { %9505 = vmatpush3.bf16.msra.mxu1 %v9624_v30  ;;  %9442 = vmatprep.subr.bf16.mxu0 %v9625_v35  ;;  %v433_v30 = vld [vmem:[%s13708_s2 + $0x78] sm:$0xff]  ;;  %v7903_v35 = vcombine.low %v236_v19, %v240_v20 }
  0x4c   : > { %1275 = vmatmul.mubr.bf16.gmra.mrb[12].mxu0 %v7915_v24  ;;  %9506 = vmatprep.subr.bf16.mxu1 %v9627_v37  ;;  %v7895_v24 = vcombine.low %v228_v7, %v232_v8  ;;  %v7912_v37 = vcombine.high %v244_v31, %v248_v32  ;;  %v284_v7 = vld [vmem:[%s13707_s1 + $0x1d0] sm:$0xff]  ;;  %v289_v10 = vld [vmem:[%s13707_s1 + $0x1f8] sm:$0xff] }
  0x4d   : > { %1372 = vmatmul.mubr.bf16.gmra.mrb[12].mxu1 %v7917_v26  ;;  %1282 = vmatprep.mubr.bf16.mxu0 %v7924_v27  ;;  %v7904_v26 = vcombine.high %v236_v19, %v240_v20  ;;  %v431_v27 = vld [vmem:[%s13708_s2 + $0x68] sm:$0xff]  ;;  %v288_v8 = vld [vmem:[%s13707_s1 + $0x1f0] sm:$0xff] }
  0x4e   : > { %1379 = vmatprep.mubr.bf16.mxu1 %v7926_v29  ;;  %9443 = vmatpush3.bf16.msra.mxu0 %v9626_v36  ;;  %v432_v29 = vld [vmem:[%s13708_s2 + $0x70] sm:$0xff]  ;;  %v7905_v36 = vcombine.low %v237_v21, %v241_v22 }
  0x4f   : > { %9507 = vmatpush3.bf16.msra.mxu1 %v9628_v39  ;;  %9444 = vmatprep.subr.bf16.mxu0 %v9629_v43  ;;  %v252_v39 = vld [vmem:[%s13707_s1 + $0xd0] sm:$0xff]  ;;  %v7911_v43 = vcombine.low %v244_v31, %v248_v32 }
  0x50   : > { %9508 = vmatprep.subr.bf16.mxu1 %v9631_v45  ;;  %471 = vperm.xlu1 %9568, %v425_v6  }
  0x51   : > { %476 = vperm.xlu0 %9567, %v426_v11  }
  0x52   : > { %9445 = vmatpush3.bf16.msra.mxu0 %v9630_v44  ;;  %v7913_v44 = vcombine.low %v245_v33, %v249_v34 }
  0x53   : > { %9509 = vmatpush3.bf16.msra.mxu1 %v9632_v46 }
  0x54   : > { %1283 = vmatmul.mubr.bf16.gmra.mrb[16].mxu0 %v7923_v38  ;;  %481 = vperm.xlu1 %9568, %v427_v15   ;;  %v7914_v38 = vcombine.high %v245_v33, %v249_v34  ;;  %v7951_v15 = vcombine.low %v284_v7, %v288_v8 }
  0x55   : > { %1380 = vmatmul.mubr.bf16.gmra.mrb[16].mxu1 %v7925_v40  ;;  %1290 = vmatprep.mubr.bf16.mxu0 %v7932_v41  ;;  %v256_v40 = vld [vmem:[%s13707_s1 + $0xf0] sm:$0xff]  ;;  %v253_v41 = vld [vmem:[%s13707_s1 + $0xd8] sm:$0xff] }
  0x56   : > { %1387 = vmatprep.mubr.bf16.mxu1 %v7934_v42  ;;  %486 = vperm.xlu0 %9567, %v428_v17   ;;  %v257_v42 = vld [vmem:[%s13707_s1 + $0xf8] sm:$0xff]  ;;  %v7920_v45 = vcombine.high %v252_v39, %v256_v40 }
  0x57   : > { %v7922_v46 = vcombine.high %v253_v41, %v257_v42 }
  0x58   : > { %491 = vperm.xlu1 %9568, %v429_v18  }
  0x5a   : > { %496 = vperm.xlu0 %9567, %v430_v23  }
  0x5c   : > { %1291 = vmatmul.mubr.bf16.gmra.mrb[20].mxu0 %v7931_v51  ;;  %501 = vperm.xlu1 %9568, %v431_v27   ;;  %v7919_v51 = vcombine.low %v252_v39, %v256_v40 }
  0x5d   : > { %1388 = vmatmul.mubr.bf16.gmra.mrb[20].mxu1 %v7933_v52  ;;  %1298 = vmatprep.mubr.bf16.mxu0 %v7940_v53  ;;  %v7921_v52 = vcombine.low %v253_v41, %v257_v42  ;;  %v7928_v53 = vcombine.high %v260_v47, %v264_v48 }
  0x5e   : > { %1395 = vmatprep.mubr.bf16.mxu1 %v7942_v55  ;;  %506 = vperm.xlu0 %9567, %v432_v29   ;;  %v268_v55 = vld [vmem:[%s13707_s1 + $0x150] sm:$0xff] }
  0x5f   : > { %v7936_v61 = vcombine.high %v268_v55, %v272_v56  ;;  %v7935_v3 = vcombine.low %v268_v55, %v272_v56 }
  0x60   : > { %511 = vperm.xlu1 %9568, %v433_v30  }
  0x64   : > { %1299 = vmatmul.mubr.bf16.gmra.mrb[24].mxu0 %v7939_v0  ;;  %v280_v0 = vld [vmem:[%s13707_s1 + $0x1b0] sm:$0xff] }
  0x65   : > { %1396 = vmatmul.mubr.bf16.gmra.mrb[24].mxu1 %v7941_v1  ;;  %1306 = vmatprep.mubr.bf16.mxu0 %v7948_v2  ;;  %v277_v1 = vld [vmem:[%s13707_s1 + $0x198] sm:$0xff]  ;;  %v7944_v5 = vcombine.high %v276_v63, %v280_v0  ;;  %v7943_v11 = vcombine.low %v276_v63, %v280_v0 }
  0x66   : > { %1403 = vmatprep.mubr.bf16.mxu1 %v7950_v4  ;;  %v281_v2 = vld [vmem:[%s13707_s1 + $0x1b8] sm:$0xff]  ;;  %v7937_v4 = vcombine.low %v269_v57, %v273_v58 }
  0x67   : > { %v7946_v6 = vcombine.high %v277_v1, %v281_v2 }
  0x6c   : > { %1307 = vmatmul.mubr.bf16.gmra.mrb[28].mxu0 %v7947_v12  ;;  %v7945_v12 = vcombine.low %v277_v1, %v281_v2 }
  0x6d   : > { %1404 = vmatmul.mubr.bf16.gmra.mrb[28].mxu1 %v7949_v13  ;;  %1444 = vmatprep.mubr.bf16.mxu0 %v7896_v14  ;;  %v7952_v13 = vcombine.high %v284_v7, %v288_v8  ;;  %v7954_v14 = vcombine.high %v285_v9, %v289_v10 }
  0x6e   : > { %1541 = vmatprep.mubr.bf16.mxu1 %v7898_v16  ;;  %v7953_v16 = vcombine.low %v285_v9, %v289_v10 }
  0x74   : > { %1445 = vmatmul.mubr.bf16.vlgmr.msra.gmra.mrb[32].mxu0 %v7895_v24 }
  0x75   : > { %1542 = vmatmul.mubr.bf16.vlgmr.msra.gmra.mrb[32].mxu1 %v7897_v25  ;;  %1452 = vmatprep.mubr.bf16.mxu0 %v7904_v26 }
  0x76   : > { %1549 = vmatprep.mubr.bf16.mxu1 %v7906_v28 }
  0x7c   : > { %1453 = vmatmul.mubr.bf16.gmra.mrb[36].mxu0 %v7903_v35 }
  0x7d   : > { %1550 = vmatmul.mubr.bf16.gmra.mrb[36].mxu1 %v7905_v36  ;;  %1460 = vmatprep.mubr.bf16.mxu0 %v7912_v37 }
  0x7e   : > { %1557 = vmatprep.mubr.bf16.mxu1 %v7914_v38 }
  0x84   : > { %1461 = vmatmul.mubr.bf16.gmra.mrb[40].mxu0 %v7911_v43 }
  0x85   : > { %1558 = vmatmul.mubr.bf16.gmra.mrb[40].mxu1 %v7913_v44  ;;  %1468 = vmatprep.mubr.bf16.mxu0 %v7920_v45 }
  0x86   : > { %1565 = vmatprep.mubr.bf16.mxu1 %v7922_v46 }
  0x8c   : > { %1469 = vmatmul.mubr.bf16.gmra.mrb[44].mxu0 %v7919_v51 }
  0x8d   : > { %1566 = vmatmul.mubr.bf16.gmra.mrb[44].mxu1 %v7921_v52  ;;  %1476 = vmatprep.mubr.bf16.mxu0 %v7928_v53 }
  0x8e   : > { %1573 = vmatprep.mubr.bf16.mxu1 %v7930_v54 }
  0x94   : > { %1477 = vmatmul.mubr.bf16.gmra.mrb[48].mxu0 %v7927_v59 }
  0x95   : > { %1574 = vmatmul.mubr.bf16.gmra.mrb[48].mxu1 %v7929_v60  ;;  %1484 = vmatprep.mubr.bf16.mxu0 %v7936_v61 }
  0x96   : > { %1581 = vmatprep.mubr.bf16.mxu1 %v7938_v62 }
  0x9c   : > { %1485 = vmatmul.mubr.bf16.gmra.mrb[52].mxu0 %v7935_v3 }
  0x9d   : > { %1582 = vmatmul.mubr.bf16.gmra.mrb[52].mxu1 %v7937_v4  ;;  %1492 = vmatprep.mubr.bf16.mxu0 %v7944_v5 }
  0x9e   : > { %1589 = vmatprep.mubr.bf16.mxu1 %v7946_v6 }
  0xa4   : > { %1493 = vmatmul.mubr.bf16.gmra.mrb[56].mxu0 %v7943_v11 }
  0xa5   : > { %1590 = vmatmul.mubr.bf16.gmra.mrb[56].mxu1 %v7945_v12  ;;  %1500 = vmatprep.mubr.bf16.mxu0 %v7952_v13 }
  0xa6   : > { %1597 = vmatprep.mubr.bf16.mxu1 %v7954_v14 }
  0xa8   : > { %v437_v17 = vpop.permute.xlu0 %436 }
  0xac   : > { %1501 = vmatmul.mubr.bf16.gmra.mrb[60].mxu0 %v7951_v15 }
  0xad   : > { %1598 = vmatmul.mubr.bf16.gmra.mrb[60].mxu1 %v7953_v16 }
  0xb8   : > { %v447_v18 = vpop.permute.xlu1 %446 }
  0xba   : > { %v442_v20 = vpop.permute.xlu0 %441 }
  0xbf   : > { %v452_v37 = vpop.permute.xlu1 %451 }
  0xc0   : > { %v457_v52 = vpop.permute.xlu0 %456 }
  0xc7   : > { %v462_v55 = vpop.permute.xlu1 %461 }
  0xc8   : > { %v467_v6 = vpop.permute.xlu0 %466 }
  0xcf   : > { %v472_v9 = vpop.permute.xlu1 %471 }
 0x107   : > { %v9318_v19 = vpop.f32.mrb[0].mxu0 }
 0x108   : > { %v9382_v21 = vpop.f32.mrb[0].mxu1  ;;  %v9319_v22 = vpop.f32.mrb[1].mxu0 }
 0x109   : > { %v9320_v23 = vadd.f32 %v9319_v22, %v9318_v19  ;;  %v9383_v24 = vpop.f32.mrb[1].mxu1  ;;  %v9321_v25 = vpop.f32.mrb[2].mxu0 }
 0x10a   : > { %v9384_v26 = vadd.f32 %v9383_v24, %v9382_v21  ;;  %v9385_v27 = vpop.f32.mrb[2].mxu1  ;;  %v9322_v28 = vpop.f32.mrb[3].mxu0 }
 0x10b   : > { %v1253_v29 = vadd.f32 %v9320_v23, %v437_v17  ;;  %v9323_v30 = vadd.f32 %v9322_v28, %v9321_v25  ;;  %v9386_v31 = vpop.f32.mrb[3].mxu1  ;;  %v477_v24 = vpop.permute.xlu0 %476 }
 0x10c   : > { %v9387_v32 = vadd.f32 %v9386_v31, %v9385_v27  ;;  %v482_v27 = vpop.permute.xlu1 %481 }
 0x10d   : > { %v10008_v33 = vadd.f32 %v9384_v26, %v1253_v29  ;;  %v1256_v34 = vadd.f32 %v9323_v30, %v442_v20 }
 0x10f   : > { %v10010_v35 = vadd.f32 %v9387_v32, %v1256_v34  ;;  %v9324_v36 = vpop.f32.mrb[4].mxu0 }
 0x110   : > { %v9388_v38 = vpop.f32.mrb[4].mxu1  ;;  %v9325_v39 = vpop.f32.mrb[5].mxu0 }
 0x111   : > { %v9326_v40 = vadd.f32 %v9325_v39, %v9324_v36  ;;  %v9389_v41 = vpop.f32.mrb[5].mxu1  ;;  %v9327_v42 = vpop.f32.mrb[6].mxu0 }
 0x112   : > { %v9390_v43 = vadd.f32 %v9389_v41, %v9388_v38  ;;  %v9391_v44 = vpop.f32.mrb[6].mxu1  ;;  %v9328_v45 = vpop.f32.mrb[7].mxu0 }
 0x113   : > { %v1261_v46 = vadd.f32 %v9326_v40, %v447_v18  ;;  %v9329_v47 = vadd.f32 %v9328_v45, %v9327_v42  ;;  %v9392_v48 = vpop.f32.mrb[7].mxu1 }
 0x114   : > { %v9393_v49 = vadd.f32 %v9392_v48, %v9391_v44  ;;  %v487_v44 = vpop.permute.xlu0 %486 }
 0x115   : > { %v10012_v50 = vadd.f32 %v9390_v43, %v1261_v46  ;;  %v1264_v51 = vadd.f32 %v9329_v47, %v452_v37  ;;  %v492_v47 = vpop.permute.xlu1 %491 }
 0x117   : > { %v10014_v53 = vadd.f32 %v9393_v49, %v1264_v51  ;;  %v9330_v54 = vpop.f32.mrb[8].mxu0 }
 0x118   : > { %v9394_v56 = vpop.f32.mrb[8].mxu1  ;;  %v9331_v57 = vpop.f32.mrb[9].mxu0 }
 0x119   : > { %v9332_v58 = vadd.f32 %v9331_v57, %v9330_v54  ;;  %v9395_v59 = vpop.f32.mrb[9].mxu1  ;;  %v9333_v60 = vpop.f32.mrb[10].mxu0 }
 0x11a   : > { %v9396_v61 = vadd.f32 %v9395_v59, %v9394_v56  ;;  %v9397_v62 = vpop.f32.mrb[10].mxu1  ;;  %v9334_v63 = vpop.f32.mrb[11].mxu0 }
 0x11b   : > { %v1269_v0 = vadd.f32 %v9332_v58, %v457_v52  ;;  %v9335_v1 = vadd.f32 %v9334_v63, %v9333_v60  ;;  %v9398_v2 = vpop.f32.mrb[11].mxu1 }
 0x11c   : > { %v9399_v3 = vadd.f32 %v9398_v2, %v9397_v62 }
 0x11d   : > { %v10016_v4 = vadd.f32 %v9396_v61, %v1269_v0  ;;  %v1272_v5 = vadd.f32 %v9335_v1, %v462_v55  ;;  %v497_v0 = vpop.permute.xlu0 %496 }
 0x11f   : > { %v10018_v7 = vadd.f32 %v9399_v3, %v1272_v5  ;;  %v9336_v8 = vpop.f32.mrb[12].mxu0  ;;  %v502_v3 = vpop.permute.xlu1 %501 }
 0x120   : > { %v9400_v10 = vpop.f32.mrb[12].mxu1  ;;  %v9337_v11 = vpop.f32.mrb[13].mxu0 }
 0x121   : > { %v9338_v12 = vadd.f32 %v9337_v11, %v9336_v8  ;;  %v9401_v13 = vpop.f32.mrb[13].mxu1  ;;  %v9339_v14 = vpop.f32.mrb[14].mxu0 }
 0x122   : > { %v9402_v15 = vadd.f32 %v9401_v13, %v9400_v10  ;;  %v9403_v16 = vpop.f32.mrb[14].mxu1  ;;  %v9340_v17 = vpop.f32.mrb[15].mxu0 }
 0x123   : > { %v1277_v18 = vadd.f32 %v9338_v12, %v467_v6  ;;  %v9341_v19 = vadd.f32 %v9340_v17, %v9339_v14  ;;  %v9404_v20 = vpop.f32.mrb[15].mxu1 }
 0x124   : > { %v9405_v21 = vadd.f32 %v9404_v20, %v9403_v16  ;;  %v507_v20 = vpop.permute.xlu0 %506 }
 0x125   : > { %v10020_v22 = vadd.f32 %v9402_v15, %v1277_v18  ;;  %v1280_v23 = vadd.f32 %v9341_v19, %v472_v9 }
 0x127   : > { %v10022_v25 = vadd.f32 %v9405_v21, %v1280_v23  ;;  %v9342_v26 = vpop.f32.mrb[16].mxu0 }
 0x128   : > { %v9406_v28 = vpop.f32.mrb[16].mxu1  ;;  %v9343_v29 = vpop.f32.mrb[17].mxu0 }
 0x129   : > { %v9344_v30 = vadd.f32 %v9343_v29, %v9342_v26  ;;  %v9407_v31 = vpop.f32.mrb[17].mxu1  ;;  %v9345_v32 = vpop.f32.mrb[18].mxu0 }
 0x12a   : > { %v9408_v34 = vadd.f32 %v9407_v31, %v9406_v28  ;;  %v9409_v36 = vpop.f32.mrb[18].mxu1  ;;  %v9346_v37 = vpop.f32.mrb[19].mxu0 }
 0x12b   : > { %v1285_v38 = vadd.f32 %v9344_v30, %v477_v24  ;;  %v9347_v39 = vadd.f32 %v9346_v37, %v9345_v32  ;;  %v9410_v40 = vpop.f32.mrb[19].mxu1  ;;  %v512_v24 = vpop.permute.xlu1 %511 }
 0x12c   : > { %v9411_v41 = vadd.f32 %v9410_v40, %v9409_v36 }
 0x12d   : > { %v10024_v42 = vadd.f32 %v9408_v34, %v1285_v38  ;;  %v1288_v43 = vadd.f32 %v9347_v39, %v482_v27 }
 0x12f   : > { %v10026_v45 = vadd.f32 %v9411_v41, %v1288_v43  ;;  %v9348_v46 = vpop.f32.mrb[20].mxu0 }
 0x130   : > { %v9412_v48 = vpop.f32.mrb[20].mxu1  ;;  %v9349_v49 = vpop.f32.mrb[21].mxu0 }
 0x131   : > { %v9350_v51 = vadd.f32 %v9349_v49, %v9348_v46  ;;  %v9413_v52 = vpop.f32.mrb[21].mxu1  ;;  %v9351_v54 = vpop.f32.mrb[22].mxu0 }
 0x132   : > { %v9414_v55 = vadd.f32 %v9413_v52, %v9412_v48  ;;  %v9415_v56 = vpop.f32.mrb[22].mxu1  ;;  %v9352_v57 = vpop.f32.mrb[23].mxu0 }
 0x133   : > { %v1293_v58 = vadd.f32 %v9350_v51, %v487_v44  ;;  %v9353_v59 = vadd.f32 %v9352_v57, %v9351_v54  ;;  %v9416_v60 = vpop.f32.mrb[23].mxu1  ;;  %v10046_v57 = vld [vmem:[%s13709_s3] sm:$0xff]  }
 0x134   : > { %v9417_v61 = vadd.f32 %v9416_v60, %v9415_v56  ;;  %v9054_v56 = vld [vmem:[%s13709_s3 + $0x40] sm:$0xff]  }
 0x135   : > { %v10028_v62 = vadd.f32 %v9414_v55, %v1293_v58  ;;  %v1296_v63 = vadd.f32 %v9353_v59, %v492_v47 }
 0x137   : > { %v10030_v1 = vadd.f32 %v9417_v61, %v1296_v63  ;;  %v9354_v2 = vpop.f32.mrb[24].mxu0  ;;  %v9062_v61 = vld [vmem:[%s13709_s3 + $0x80] sm:$0xff]  }
 0x138   : > { %v9418_v5 = vpop.f32.mrb[24].mxu1  ;;  %v9355_v6 = vpop.f32.mrb[25].mxu0 }
 0x139   : > { %v9356_v8 = vadd.f32 %v9355_v6, %v9354_v2  ;;  %v9419_v9 = vpop.f32.mrb[25].mxu1  ;;  %v9357_v10 = vpop.f32.mrb[26].mxu0  ;;  %v8089_v6 = vunpack.c.l.bf16 %v9062_v61 }
 0x13a   : > { %v9420_v11 = vadd.f32 %v9419_v9, %v9418_v5  ;;  %v9421_v12 = vpop.f32.mrb[26].mxu1  ;;  %v9358_v13 = vpop.f32.mrb[27].mxu0  ;;  %v8025_v5 = vunpack.c.l.bf16 %v10046_v57 }
 0x13b   : > { %v1301_v14 = vadd.f32 %v9356_v8, %v497_v0  ;;  %v9359_v15 = vadd.f32 %v9358_v13, %v9357_v10  ;;  %v9422_v16 = vpop.f32.mrb[27].mxu1  ;;  %v8058_v13 = vunpack.c.h.bf16 %v9054_v56 }
 0x13c   : > { %v9423_v17 = vadd.f32 %v9422_v16, %v9421_v12 }
 0x13d   : > { %v10032_v18 = vadd.f32 %v9420_v11, %v1301_v14  ;;  %v1304_v19 = vadd.f32 %v9359_v15, %v502_v3  ;;  %v8057_v3 = vunpack.c.l.bf16 %v9054_v56 }
 0x13f   : > { %v10034_v21 = vadd.f32 %v9423_v17, %v1304_v19  ;;  %v9360_v23 = vpop.f32.mrb[28].mxu0 }
 0x140   : > { %v9424_v26 = vpop.f32.mrb[28].mxu1  ;;  %v9361_v27 = vpop.f32.mrb[29].mxu0 }
 0x141   : > { %v9362_v28 = vadd.f32 %v9361_v27, %v9360_v23  ;;  %v9425_v29 = vpop.f32.mrb[29].mxu1  ;;  %v9363_v30 = vpop.f32.mrb[30].mxu0 }
 0x142   : > { %v9426_v31 = vadd.f32 %v9425_v29, %v9424_v26  ;;  %v9427_v32 = vpop.f32.mrb[30].mxu1  ;;  %v9364_v34 = vpop.f32.mrb[31].mxu0 }
 0x143   : > { %v1309_v36 = vadd.f32 %v9362_v28, %v507_v20  ;;  %v9365_v37 = vadd.f32 %v9364_v34, %v9363_v30  ;;  %v9428_v38 = vpop.f32.mrb[31].mxu1  ;;  %v8090_v28 = vunpack.c.h.bf16 %v9062_v61 }
 0x144   : > { %v9429_v39 = vadd.f32 %v9428_v38, %v9427_v32 }
 0x145   : > { %v10036_v40 = vadd.f32 %v9426_v31, %v1309_v36  ;;  %v1312_v41 = vadd.f32 %v9365_v37, %v512_v24  ;;  %v9078_v36 = vld [vmem:[%s13709_s3 + $0x100] sm:$0xff]  }
 0x147   : > { %v10038_v43 = vadd.f32 %v9429_v39, %v1312_v41  ;;  %v9446_v44 = vpop.f32.mrb[32].mxu0 }
 0x148   : > { %v9510_v46 = vpop.f32.mrb[32].mxu1  ;;  %v9447_v47 = vpop.f32.mrb[33].mxu0 }
 0x149   : > { %v9448_v48 = vadd.f32 %v9447_v47, %v9446_v44  ;;  %v9511_v49 = vpop.f32.mrb[33].mxu1  ;;  %v9449_v51 = vpop.f32.mrb[34].mxu0  ;;  %v8153_v44 = vunpack.c.l.bf16 %v9078_v36  ;;  %v9086_v47 = vld [vmem:[%s13709_s3 + $0x140] sm:$0xff]  }
 0x14a   : > { %v9512_v52 = vadd.f32 %v9511_v49, %v9510_v46  ;;  %v9513_v54 = vpop.f32.mrb[34].mxu1  ;;  %v9450_v55 = vpop.f32.mrb[35].mxu0 }
 0x14b   : > { %v1447_v58 = vadd.f32 %v9448_v48, %v10008_v33  ;;  %v9451_v59 = vadd.f32 %v9450_v55, %v9449_v51  ;;  %v9514_v60 = vpop.f32.mrb[35].mxu1  ;;  %v9070_v33 = vld [vmem:[%s13709_s3 + $0xc0] sm:$0xff]  }
 0x14c   : > { %v9515_v63 = vadd.f32 %v9514_v60, %v9513_v54  ;;  %v8121_v27 = vunpack.c.l.bf16 %v9070_v33  ;;  %v8122_v46 = vunpack.c.h.bf16 %v9070_v33  ;;  %v8185_v60 = vunpack.c.l.bf16 %v9086_v47 }
 0x14d   : > { %v1544_v0 = vadd.f32 %v9512_v52, %v1447_v58  ;;  %v1450_v2 = vadd.f32 %v9451_v59, %v10010_v35 }
 0x14f   : > { %v10054_v8 = vmax.f32 %v1544_v0, 0.0  ;;  %v1547_v9 = vadd.f32 %v9515_v63, %v1450_v2  ;;  %v9452_v10 = vpop.f32.mrb[36].mxu0 }
 0x150   : > { %v9453_v11 = vpop.f32.mrb[37].mxu0  ;;  %v9516_v12 = vpop.f32.mrb[36].mxu1 }
 0x151   : > { %v10059_v14 = vmax.f32 %v1547_v9, 0.0  ;;  %v9454_v15 = vadd.f32 %v9453_v11, %v9452_v10  ;;  %v9455_v35 = vpop.f32.mrb[38].mxu0  ;;  %v9517_v16 = vpop.f32.mrb[37].mxu1  ;;  %v2662_v17 = vmul.f32 %v8057_v3, %v10054_v8  ;;  %v2646_v19 = vmul.f32 %v8025_v5, %v10054_v8 }
 0x152   : > { %v9456_v20 = vpop.f32.mrb[39].mxu0  ;;  %v9518_v23 = vadd.f32 %v9517_v16, %v9516_v12  ;;  %v9519_v24 = vpop.f32.mrb[38].mxu1  ;;  %v2678_v26 = vmul.f32 %v8089_v6, %v10054_v8  ;;  %v2710_v3 = vmul.f32 %v8153_v44, %v10054_v8  ;;  %v8154_v5 = vunpack.c.h.bf16 %v9078_v36  ;;  %v9094_v12 = vld [vmem:[%s13709_s3 + $0x180] sm:$0xff]  }
 0x153   : > { %v1455_v29 = vadd.f32 %v9454_v15, %v10012_v50  ;;  %v9457_v30 = vadd.f32 %v9456_v20, %v9455_v35  ;;  %v9520_v31 = vpop.f32.mrb[39].mxu1  ;;  %v3207_v32 = vsel %vm3158_vm0, %v2662_v17, 0.0  ;;  %v3159_v34 = vsel %vm3158_vm0, %v2646_v19, 0.0  ;;  %v9102_v19 = vld [vmem:[%s13709_s3 + $0x1c0] sm:$0xff]  }
 0x154   : > { %v9521_v37 = vadd.f32 %v9520_v31, %v9519_v24  ;;  %3208 = vadd.xlane.f32.xlu1 %v3207_v32  ;;  %3160 = vadd.xlane.f32.xlu0 %v3159_v34  ;;  %v2663_v38 = vmul.f32 %v8058_v13, %v10059_v14  ;;  %v2694_v50 = vmul.f32 %v8121_v27, %v10054_v8  ;;  %v3255_v51 = vsel %vm3158_vm0, %v2678_v26, 0.0 }
 0x155   : > { %v1458_v39 = vadd.f32 %v9457_v30, %v10014_v53  ;;  %v10072_v41 = vadd.f32 %v9518_v23, %v1455_v29  ;;  %v2679_v54 = vmul.f32 %v8090_v28, %v10059_v14  ;;  %v2695_v11 = vmul.f32 %v8122_v46, %v10059_v14 }
 0x156   : > { %v3210_v52 = vsel %vm3158_vm0, %v2663_v38, 0.0  ;;  %v3303_v2 = vsel %vm3158_vm0, %v2694_v50, 0.0  ;;  %v2726_v16 = vmul.f32 %v8185_v60, %v10054_v8  ;;  %v8186_v17 = vunpack.c.h.bf16 %v9086_v47 }
 0x157   : > { %v10078_v48 = vadd.f32 %v9521_v37, %v1458_v39  ;;  %v9458_v49 = vpop.f32.mrb[40].mxu0  ;;  %v3258_v33 = vsel %vm3158_vm0, %v2679_v54, 0.0  ;;  %v3351_v24 = vsel %vm3158_vm0, %v2710_v3, 0.0  ;;  %v3306_v26 = vsel %vm3158_vm0, %v2695_v11, 0.0 }
 0x158   : > { %v9459_v53 = vpop.f32.mrb[41].mxu0  ;;  %3256 = vadd.xlane.f32.xlu1 %v3255_v51  ;;  %3211 = vadd.xlane.f32.xlu0 %v3210_v52  ;;  %v9522_v55 = vpop.f32.mrb[40].mxu1  ;;  %v2711_v27 = vmul.f32 %v8154_v5, %v10059_v14  ;;  %v8249_v32 = vunpack.c.l.bf16 %v9102_v19  ;;  %v3399_v38 = vsel %vm3158_vm0, %v2726_v16, 0.0  ;;  %v8218_v50 = vunpack.c.h.bf16 %v9094_v12  ;;  %v9110_v52 = vld [vmem:[%s13709_s3 + $0x200] sm:$0xff]  }
 0x159   : > { %v9460_v56 = vadd.f32 %v9459_v53, %v9458_v49  ;;  %v9461_v58 = vpop.f32.mrb[42].mxu0  ;;  %v9523_v59 = vpop.f32.mrb[41].mxu1  ;;  %v2727_v51 = vmul.f32 %v8186_v17, %v10059_v14  ;;  %v8282_v16 = vunpack.c.h.bf16 %v9110_v52 }
 0x15a   : > { %v9462_v61 = vpop.f32.mrb[43].mxu0  ;;  %v9524_v63 = vadd.f32 %v9523_v59, %v9522_v55  ;;  %v9525_v0 = vpop.f32.mrb[42].mxu1  ;;  %v3354_v49 = vsel %vm3158_vm0, %v2711_v27, 0.0  ;;  %v9118_v59 = vld [vmem:[%s13709_s3 + $0x240] sm:$0xff]  }
 0x15b   : > { %v1463_v6 = vadd.f32 %v9460_v56, %v10016_v4  ;;  %v9463_v9 = vadd.f32 %v9462_v61, %v9461_v58  ;;  %v9526_v10 = vpop.f32.mrb[43].mxu1  ;;  %v8217_v4 = vunpack.c.l.bf16 %v9094_v12  ;;  %v2758_v56 = vmul.f32 %v8249_v32, %v10054_v8 }
 0x15c   : > { %v9527_v13 = vadd.f32 %v9526_v10, %v9525_v0  ;;  %3304 = vadd.xlane.f32.xlu1 %v3303_v2  ;;  %3259 = vadd.xlane.f32.xlu0 %v3258_v33  ;;  %v8250_v58 = vunpack.c.h.bf16 %v9102_v19  ;;  %v3402_v0 = vsel %vm3158_vm0, %v2727_v51, 0.0  ;;  %v2743_v2 = vmul.f32 %v8218_v50, %v10059_v14 }
 0x15d   : > { %v1466_v15 = vadd.f32 %v9463_v9, %v10018_v7  ;;  %v10092_v35 = vadd.f32 %v9524_v63, %v1463_v6  ;;  %v2742_v39 = vmul.f32 %v8217_v4, %v10054_v8  ;;  %v8313_v10 = vunpack.c.l.bf16 %v9118_v59 }
 0x15f   : > { %v10098_v20 = vadd.f32 %v9527_v13, %v1466_v15  ;;  %v9464_v23 = vpop.f32.mrb[44].mxu0  ;;  %v3447_v63 = vsel %vm3158_vm0, %v2742_v39, 0.0  ;;  %v3495_v13 = vsel %vm3158_vm0, %v2758_v56, 0.0 }
 0x160   : > { %v9465_v7 = vpop.f32.mrb[45].mxu0  ;;  %3352 = vadd.xlane.f32.xlu1 %v3351_v24  ;;  %3307 = vadd.xlane.f32.xlu0 %v3306_v26  ;;  %v9528_v28 = vpop.f32.mrb[44].mxu1  ;;  %v2759_v24 = vmul.f32 %v8250_v58, %v10059_v14  ;;  %v9126_v26 = vld [vmem:[%s13709_s3 + $0x280] sm:$0xff]  }
 0x161   : > { %v9466_v29 = vadd.f32 %v9465_v7, %v9464_v23  ;;  %v9467_v30 = vpop.f32.mrb[46].mxu0  ;;  %v9529_v31 = vpop.f32.mrb[45].mxu1  ;;  %v3450_v23 = vsel %vm3158_vm0, %v2743_v2, 0.0 }
 0x162   : > { %v9468_v34 = vpop.f32.mrb[47].mxu0  ;;  %v9530_v36 = vadd.f32 %v9529_v31, %v9528_v28  ;;  %v9531_v37 = vpop.f32.mrb[46].mxu1 }
 0x163   : > { %v1471_v44 = vadd.f32 %v9466_v29, %v10020_v22  ;;  %v9469_v46 = vadd.f32 %v9468_v34, %v9467_v30  ;;  %v9532_v47 = vpop.f32.mrb[47].mxu1  ;;  %v8281_v22 = vunpack.c.l.bf16 %v9110_v52  ;;  %v2790_v29 = vmul.f32 %v8313_v10, %v10054_v8 }
 0x164   : > { %v9533_v54 = vadd.f32 %v9532_v47, %v9531_v37  ;;  %3400 = vadd.xlane.f32.xlu1 %v3399_v38  ;;  %3355 = vadd.xlane.f32.xlu0 %v3354_v49  ;;  %v8314_v30 = vunpack.c.h.bf16 %v9118_v59  ;;  %v2775_v37 = vmul.f32 %v8282_v16, %v10059_v14 }
 0x165   : > { %v1474_v53 = vadd.f32 %v9469_v46, %v10022_v25  ;;  %v10112_v55 = vadd.f32 %v9530_v36, %v1471_v44  ;;  %v2774_v15 = vmul.f32 %v8281_v22, %v10054_v8  ;;  %v3498_v36 = vsel %vm3158_vm0, %v2759_v24, 0.0 }
 0x166   : > { %v8026_v46 = vunpack.c.h.bf16 %v10046_v57  ;;  %v3591_v52 = vsel %vm3158_vm0, %v2790_v29, 0.0  ;;  %v3546_v59 = vsel %vm3158_vm0, %v2775_v37, 0.0  ;;  %v10149_v57 = vld [vmem:[%s13709_s3 + $0x48] sm:$0xff]  }
 0x167   : > { %v10118_v60 = vadd.f32 %v9533_v54, %v1474_v53  ;;  %v9470_v61 = vpop.f32.mrb[48].mxu0  ;;  %v3543_v34 = vsel %vm3158_vm0, %v2774_v15, 0.0  ;;  %v8346_v53 = vunpack.c.h.bf16 %v9126_v26 }
 0x168   : > { %v9471_v25 = vpop.f32.mrb[49].mxu0  ;;  %3448 = vadd.xlane.f32.xlu1 %v3447_v63  ;;  %3403 = vadd.xlane.f32.xlu0 %v3402_v0  ;;  %v9534_v3 = vpop.f32.mrb[48].mxu1  ;;  %v9047_v63 = vld [vmem:[%s13709_s3 + $0x8] sm:$0xff]  }
 0x169   : > { %v9472_v5 = vadd.f32 %v9471_v25, %v9470_v61  ;;  %v9473_v6 = vpop.f32.mrb[50].mxu0  ;;  %v9535_v9 = vpop.f32.mrb[49].mxu1  ;;  %v2791_v61 = vmul.f32 %v8314_v30, %v10059_v14  ;;  %v10158_v25 = vmax.f32 %v10072_v41, 0.0  ;;  %v2807_v41 = vmul.f32 %v8346_v53, %v10059_v14 }
 0x16a   : > { %v9474_v33 = vpop.f32.mrb[51].mxu0  ;;  %v9536_v11 = vadd.f32 %v9535_v9, %v9534_v3  ;;  %v9537_v12 = vpop.f32.mrb[50].mxu1  ;;  %v2647_v3 = vmul.f32 %v8026_v46, %v10059_v14  ;;  %v10165_v9 = vld [vmem:[%s13709_s3 + $0x88] sm:$0xff]  }
 0x16b   : > { %v1479_v4 = vadd.f32 %v9472_v5, %v10024_v42  ;;  %v9475_v17 = vadd.f32 %v9474_v33, %v9473_v6  ;;  %v9538_v19 = vpop.f32.mrb[51].mxu1  ;;  %v8345_v42 = vunpack.c.l.bf16 %v9126_v26  ;;  %v8061_v5 = vunpack.c.l.bf16 %v10149_v57 }
 0x16c   : > { %v9539_v27 = vadd.f32 %v9538_v19, %v9537_v12  ;;  %3496 = vadd.xlane.f32.xlu1 %v3495_v13  ;;  %3451 = vadd.xlane.f32.xlu0 %v3450_v23  ;;  %v8029_v6 = vunpack.c.l.bf16 %v9047_v63  ;;  %v8030_v19 = vunpack.c.h.bf16 %v9047_v63  ;;  %v10174_v23 = vmax.f32 %v10078_v48, 0.0  ;;  %v9071_v48 = vld [vmem:[%s13709_s3 + $0xc8] sm:$0xff]  }
 0x16d   : > { %v1482_v7 = vadd.f32 %v9475_v17, %v10026_v45  ;;  %v10132_v28 = vadd.f32 %v9536_v11, %v1479_v4  ;;  %v2806_v54 = vmul.f32 %v8345_v42, %v10054_v8  ;;  %v3594_v11 = vsel %vm3158_vm0, %v2791_v61, 0.0 }
 0x16e   : > { %v8093_v17 = vunpack.c.l.bf16 %v10165_v9  ;;  %v2664_v29 = vmul.f32 %v8061_v5, %v10158_v25 }
 0x16f   : > { %v10135_v31 = vadd.f32 %v9539_v27, %v1482_v7  ;;  %v9476_v32 = vpop.f32.mrb[52].mxu0  ;;  %v3162_v7 = vsel %vm3158_vm0, %v2647_v3, 0.0 }
 0x170   : > { %v9477_v38 = vpop.f32.mrb[53].mxu0  ;;  %3544 = vadd.xlane.f32.xlu1 %v3543_v34  ;;  %3499 = vadd.xlane.f32.xlu0 %v3498_v36  ;;  %v9540_v39 = vpop.f32.mrb[52].mxu1  ;;  %v3642_v34 = vsel %vm3158_vm0, %v2807_v41, 0.0  ;;  %v2648_v36 = vmul.f32 %v8029_v6, %v10158_v25 }
 0x171   : > { %v9478_v45 = vadd.f32 %v9477_v38, %v9476_v32  ;;  %v9479_v50 = vpop.f32.mrb[54].mxu0  ;;  %v9541_v44 = vpop.f32.mrb[53].mxu1 }
 0x172   : > { %v9480_v47 = vpop.f32.mrb[55].mxu0  ;;  %v9542_v49 = vadd.f32 %v9541_v44, %v9540_v39  ;;  %v9543_v51 = vpop.f32.mrb[54].mxu1  ;;  %v9079_v44 = vld [vmem:[%s13709_s3 + $0x108] sm:$0xff]  }
 0x173   : > { %v1487_v56 = vadd.f32 %v9478_v45, %v10028_v62  ;;  %v9481_v22 = vadd.f32 %v9480_v47, %v9479_v50  ;;  %v9544_v58 = vpop.f32.mrb[55].mxu1  ;;  %v2680_v45 = vmul.f32 %v8093_v17, %v10158_v25  ;;  %v8062_v50 = vunpack.c.h.bf16 %v10149_v57 }
 0x174   : > { %v9545_v0 = vadd.f32 %v9544_v58, %v9543_v51  ;;  %3592 = vadd.xlane.f32.xlu1 %v3591_v52  ;;  %3547 = vadd.xlane.f32.xlu0 %v3546_v59  ;;  %v3165_v51 = vsel %vm3158_vm0, %v2648_v36, 0.0  ;;  %v8157_v58 = vunpack.c.l.bf16 %v9079_v44 }
 0x175   : > { %v1490_v62 = vadd.f32 %v9481_v22, %v10030_v1  ;;  %v10155_v2 = vadd.f32 %v9542_v49, %v1487_v56  ;;  %v3639_v1 = vsel %vm3158_vm0, %v2806_v54, 0.0  ;;  %v3213_v49 = vsel %vm3158_vm0, %v2664_v29, 0.0 }
 0x176   : > { %v3261_v63 = vsel %vm3158_vm0, %v2680_v45, 0.0  ;;  %v2712_v17 = vmul.f32 %v8157_v58, %v10158_v25  ;;  %v9111_v45 = vld [vmem:[%s13709_s3 + $0x208] sm:$0xff]  }
 0x177   : > { %v10167_v10 = vadd.f32 %v9545_v0, %v1490_v62  ;;  %v9482_v33 = vpop.f32.mrb[56].mxu0  ;;  %v8094_v62 = vunpack.c.h.bf16 %v10165_v9 }
 0x178   : > { %v9483_v12 = vpop.f32.mrb[57].mxu0  ;;  %3640 = vadd.xlane.f32.xlu1 %v3639_v1  ;;  %3595 = vadd.xlane.f32.xlu0 %v3594_v11  ;;  %v9546_v13 = vpop.f32.mrb[56].mxu1  ;;  %v2665_v1 = vmul.f32 %v8062_v50, %v10174_v23  ;;  %v9087_v11 = vld [vmem:[%s13709_s3 + $0x148] sm:$0xff]  }
 0x179   : > { %v9484_v15 = vadd.f32 %v9483_v12, %v9482_v33  ;;  %v9485_v16 = vpop.f32.mrb[58].mxu0  ;;  %v9547_v4 = vpop.f32.mrb[57].mxu1 }
 0x17a   : > { %v9486_v24 = vpop.f32.mrb[59].mxu0  ;;  %v9548_v26 = vadd.f32 %v9547_v4, %v9546_v13  ;;  %v9549_v27 = vpop.f32.mrb[58].mxu1  ;;  %v3216_v4 = vsel %vm3158_vm0, %v2665_v1, 0.0 }
 0x17b   : > { %v1495_v42 = vadd.f32 %v9484_v15, %v10032_v18  ;;  %v9487_v30 = vadd.f32 %v9486_v24, %v9485_v16  ;;  %v9550_v32 = vpop.f32.mrb[59].mxu1  ;;  %v8125_v18 = vunpack.c.l.bf16 %v9071_v48  ;;  %v8126_v15 = vunpack.c.h.bf16 %v9071_v48  ;;  %v9095_v24 = vld [vmem:[%s13709_s3 + $0x188] sm:$0xff]  }
 0x17c   : > { %v9551_v37 = vadd.f32 %v9550_v32, %v9549_v27  ;;  %3163 = vadd.xlane.f32.xlu1 %v3162_v7  ;;  %3643 = vadd.xlane.f32.xlu0 %v3642_v34  ;;  %v3357_v27 = vsel %vm3158_vm0, %v2712_v17, 0.0  ;;  %v8190_v34 = vunpack.c.h.bf16 %v9087_v11  ;;  %v8222_v50 = vunpack.c.h.bf16 %v9095_v24 }
 0x17d   : > { %v1498_v38 = vadd.f32 %v9487_v30, %v10034_v21  ;;  %v10185_v39 = vadd.f32 %v9548_v26, %v1495_v42  ;;  %v2649_v21 = vmul.f32 %v8030_v19, %v10174_v23  ;;  %v2696_v0 = vmul.f32 %v8125_v18, %v10158_v25  ;;  %v9103_v30 = vld [vmem:[%s13709_s3 + $0x1c8] sm:$0xff]  }
 0x17e   : > { %v2681_v19 = vmul.f32 %v8094_v62, %v10174_v23  ;;  %v8158_v26 = vunpack.c.h.bf16 %v9079_v44  ;;  %v2697_v42 = vmul.f32 %v8126_v15, %v10174_v23  ;;  %v8253_v32 = vunpack.c.l.bf16 %v9103_v30 }
 0x17f   : > { %v10192_v46 = vadd.f32 %v9551_v37, %v1498_v38  ;;  %v9488_v47 = vpop.f32.mrb[60].mxu0  ;;  %v3168_v33 = vsel %vm3158_vm0, %v2649_v21, 0.0  ;;  %v3309_v9 = vsel %vm3158_vm0, %v2696_v0, 0.0  ;;  %v8285_v18 = vunpack.c.l.bf16 %v9111_v45  ;;  %v9119_v21 = vld [vmem:[%s13709_s3 + $0x248] sm:$0xff]  }
 0x180   : > { %v9489_v52 = vpop.f32.mrb[61].mxu0  ;;  %3214 = vadd.xlane.f32.xlu1 %v3213_v49  ;;  %3166 = vadd.xlane.f32.xlu0 %v3165_v51  ;;  %v9552_v54 = vpop.f32.mrb[60].mxu1  ;;  %v3264_v7 = vsel %vm3158_vm0, %v2681_v19, 0.0  ;;  %v3312_v48 = vsel %vm3158_vm0, %v2697_v42, 0.0  ;;  %v2713_v38 = vmul.f32 %v8158_v26, %v10174_v23  ;;  %v2760_v49 = vmul.f32 %v8253_v32, %v10158_v25 }
 0x181   : > { %v9490_v53 = vadd.f32 %v9489_v52, %v9488_v47  ;;  %v9491_v56 = vpop.f32.mrb[62].mxu0  ;;  %v9553_v22 = vpop.f32.mrb[61].mxu1  ;;  %v2729_v51 = vmul.f32 %v8190_v34, %v10174_v23  ;;  %v8317_v52 = vunpack.c.l.bf16 %v9119_v21  ;;  %v2745_v58 = vmul.f32 %v8222_v50, %v10174_v23  ;;  %v9072_v34 = vld [vmem:[%s13709_s3 + $0xd0] sm:$0xff]  }
 0x182   : > { %v9492_v59 = vpop.f32.mrb[63].mxu0  ;;  %v9554_v61 = vadd.f32 %v9553_v22, %v9552_v54  ;;  %v9555_v57 = vpop.f32.mrb[62].mxu1  ;;  %v3360_v47 = vsel %vm3158_vm0, %v2713_v38, 0.0  ;;  %v8254_v54 = vunpack.c.h.bf16 %v9103_v30  ;;  %v2776_v22 = vmul.f32 %v8285_v18, %v10158_v25  ;;  %v9080_v18 = vld [vmem:[%s13709_s3 + $0x110] sm:$0xff]  }
 0x183   : > { %v1503_v3 = vadd.f32 %v9490_v53, %v10036_v40  ;;  %v9493_v5 = vadd.f32 %v9492_v59, %v9491_v56  ;;  %v9556_v6 = vpop.f32.mrb[63].mxu1  ;;  %v8189_v40 = vunpack.c.l.bf16 %v9087_v11  ;;  %v3501_v53 = vsel %vm3158_vm0, %v2760_v49, 0.0  ;;  %v9127_v59 = vld [vmem:[%s13709_s3 + $0x288] sm:$0xff]  }
 0x184   : > { %v9557_v41 = vadd.f32 %v9556_v6, %v9555_v57  ;;  %3262 = vadd.xlane.f32.xlu1 %v3261_v63  ;;  %3169 = vadd.xlane.f32.xlu0 %v3168_v33  ;;  %v3408_v56 = vsel %vm3158_vm0, %v2729_v51, 0.0  ;;  %v8286_v57 = vunpack.c.h.bf16 %v9111_v45  ;;  %v3549_v63 = vsel %vm3158_vm0, %v2776_v22, 0.0 }
 0x185   : > { %v1506_v12 = vadd.f32 %v9493_v5, %v10038_v43  ;;  %v10207_v13 = vadd.f32 %v9554_v61, %v1503_v3  ;;  %v8221_v43 = vunpack.c.l.bf16 %v9095_v24  ;;  %v2728_v29 = vmul.f32 %v8189_v40, %v10158_v25  ;;  %v9048_v5 = vld [vmem:[%s13709_s3 + $0x10] sm:$0xff]  }
 0x186   : > { %v8349_v61 = vunpack.c.l.bf16 %v9127_v59  ;;  %v3456_v0 = vsel %vm3158_vm0, %v2745_v58, 0.0  ;;  %v2792_v62 = vmul.f32 %v8317_v52, %v10158_v25  ;;  %v2761_v3 = vmul.f32 %v8254_v54, %v10174_v23  ;;  %v9056_v40 = vld [vmem:[%s13709_s3 + $0x50] sm:$0xff]  }
 0x187   : > { %v10210_v16 = vadd.f32 %v9557_v41, %v1506_v12  ;;  %v3405_v36 = vsel %vm3158_vm0, %v2728_v29, 0.0  ;;  %v2744_v37 = vmul.f32 %v8221_v43, %v10158_v25  ;;  %v10254_v6 = vmax.f32 %v10092_v35, 0.0  ;;  %v9064_v43 = vld [vmem:[%s13709_s3 + $0x90] sm:$0xff]  }
 0x188   : > { %3310 = vadd.xlane.f32.xlu1 %v3309_v9  ;;  %3217 = vadd.xlane.f32.xlu0 %v3216_v4  ;;  %v8033_v33 = vunpack.c.l.bf16 %v9048_v5  ;;  %v8318_v1 = vunpack.c.h.bf16 %v9119_v21  ;;  %v3597_v11 = vsel %vm3158_vm0, %v2792_v62, 0.0  ;;  %v3504_v41 = vsel %vm3158_vm0, %v2761_v3, 0.0  ;;  %v9088_v52 = vld [vmem:[%s13709_s3 + $0x150] sm:$0xff]  }
 0x189   : > { %v3453_v44 = vsel %vm3158_vm0, %v2744_v37, 0.0  ;;  %v2808_v12 = vmul.f32 %v8349_v61, %v10158_v25  ;;  %v2777_v9 = vmul.f32 %v8286_v57, %v10174_v23  ;;  %v8065_v15 = vunpack.c.l.bf16 %v9056_v40  ;;  %v9096_v61 = vld [vmem:[%s13709_s3 + $0x190] sm:$0xff]  }
 0x18a   : > { %v8350_v4 = vunpack.c.h.bf16 %v9127_v59  ;;  %v2650_v19 = vmul.f32 %v8033_v33, %v10254_v6  ;;  %v2793_v24 = vmul.f32 %v8318_v1, %v10174_v23  ;;  %v10271_v26 = vmax.f32 %v10098_v20, 0.0  ;;  %v9104_v33 = vld [vmem:[%s13709_s3 + $0x1d0] sm:$0xff]  }
 0x18b   : > { %v3645_v35 = vsel %vm3158_vm0, %v2808_v12, 0.0  ;;  %v3552_v17 = vsel %vm3158_vm0, %v2777_v9, 0.0  ;;  %v2666_v30 = vmul.f32 %v8065_v15, %v10254_v6  ;;  %v8161_v50 = vunpack.c.l.bf16 %v9080_v18  ;;  %v9112_v15 = vld [vmem:[%s13709_s3 + $0x210] sm:$0xff]  }
 0x18c   : > { %3358 = vadd.xlane.f32.xlu1 %v3357_v27  ;;  %3265 = vadd.xlane.f32.xlu0 %v3264_v7  ;;  %v8097_v27 = vunpack.c.l.bf16 %v9064_v43  ;;  %v8034_v7 = vunpack.c.h.bf16 %v9048_v5  ;;  %v3171_v29 = vsel %vm3158_vm0, %v2650_v19, 0.0  ;;  %v3600_v42 = vsel %vm3158_vm0, %v2793_v24, 0.0 }
 0x18d   : > { %v2809_v32 = vmul.f32 %v8350_v4, %v10174_v23  ;;  %v3219_v20 = vsel %vm3158_vm0, %v2666_v30, 0.0  ;;  %v8193_v54 = vunpack.c.l.bf16 %v9088_v52  ;;  %v2714_v58 = vmul.f32 %v8161_v50, %v10254_v6 }
 0x18e   : > { %v2682_v38 = vmul.f32 %v8097_v27, %v10254_v6  ;;  %v2651_v45 = vmul.f32 %v8034_v7, %v10271_v26  ;;  %v8225_v57 = vunpack.c.l.bf16 %v9096_v61  ;;  %v8257_v1 = vunpack.c.l.bf16 %v9104_v33  ;;  %v9120_v27 = vld [vmem:[%s13709_s3 + $0x250] sm:$0xff]  }
 0x18f   : > { %v3648_v37 = vsel %vm3158_vm0, %v2809_v32, 0.0  ;;  %v2730_v3 = vmul.f32 %v8193_v54, %v10254_v6  ;;  %v8289_v4 = vunpack.c.l.bf16 %v9112_v15  ;;  %v8321_v7 = vunpack.c.l.bf16 %v9120_v27  ;;  %v9065_v54 = vld [vmem:[%s13709_s3 + $0x98] sm:$0xff]  }
 0x190   : > { %3406 = vadd.xlane.f32.xlu1 %v3405_v36  ;;  %3313 = vadd.xlane.f32.xlu0 %v3312_v48  ;;  %v8129_v36 = vunpack.c.l.bf16 %v9072_v34  ;;  %v8066_v48 = vunpack.c.h.bf16 %v9056_v40  ;;  %v3174_v49 = vsel %vm3158_vm0, %v2651_v45, 0.0  ;;  %v2746_v9 = vmul.f32 %v8225_v57, %v10254_v6 }
 0x191   : > { %v2762_v24 = vmul.f32 %v8257_v1, %v10254_v6  ;;  %v2778_v32 = vmul.f32 %v8289_v4, %v10254_v6  ;;  %v9081_v1 = vld [vmem:[%s13709_s3 + $0x118] sm:$0xff]  }
 0x192   : > { %v2698_v51 = vmul.f32 %v8129_v36, %v10254_v6  ;;  %v2667_v21 = vmul.f32 %v8066_v48, %v10271_v26  ;;  %v9049_v36 = vld [vmem:[%s13709_s3 + $0x18] sm:$0xff]   ;;  %v10330_v48 = vmax.f32 %v10112_v55, 0.0 }
 0x193   : > { %v9089_v4 = vld [vmem:[%s13709_s3 + $0x158] sm:$0xff]  }
 0x194   : > { %3454 = vadd.xlane.f32.xlu1 %v3453_v44  ;;  %3361 = vadd.xlane.f32.xlu0 %v3360_v47  ;;  %v8098_v44 = vunpack.c.h.bf16 %v9064_v43  ;;  %v3267_v47 = vsel %vm3158_vm0, %v2682_v38, 0.0  ;;  %v3222_v22 = vsel %vm3158_vm0, %v2667_v21, 0.0  ;;  %v3555_v38 = vsel %vm3158_vm0, %v2778_v32, 0.0 }
 0x196   : > { %v2683_v59 = vmul.f32 %v8098_v44, %v10271_v26  ;;  %v9057_v44 = vld [vmem:[%s13709_s3 + $0x58] sm:$0xff]  }
 0x198   : > { %3502 = vadd.xlane.f32.xlu1 %v3501_v53  ;;  %3409 = vadd.xlane.f32.xlu0 %v3408_v56  ;;  %v8130_v53 = vunpack.c.h.bf16 %v9072_v34  ;;  %v3315_v56 = vsel %vm3158_vm0, %v2698_v51, 0.0  ;;  %v3270_v62 = vsel %vm3158_vm0, %v2683_v59, 0.0 }
 0x19a   : > { %v2699_v5 = vmul.f32 %v8130_v53, %v10271_v26  ;;  %v10347_v53 = vmax.f32 %v10118_v60, 0.0 }
 0x19c   : > { %3550 = vadd.xlane.f32.xlu1 %v3549_v63  ;;  %3457 = vadd.xlane.f32.xlu0 %v3456_v0  ;;  %v8162_v63 = vunpack.c.h.bf16 %v9080_v18  ;;  %v3363_v0 = vsel %vm3158_vm0, %v2714_v58, 0.0  ;;  %v3318_v12 = vsel %vm3158_vm0, %v2699_v5, 0.0  ;;  %v2794_v18 = vmul.f32 %v8321_v7, %v10254_v6 }
 0x19e   : > { %v2715_v40 = vmul.f32 %v8162_v63, %v10271_v26  ;;  %v3603_v55 = vsel %vm3158_vm0, %v2794_v18, 0.0  ;;  %v9073_v63 = vld [vmem:[%s13709_s3 + $0xd8] sm:$0xff]  }
 0x19f   : > { %v9105_v18 = vld [vmem:[%s13709_s3 + $0x1d8] sm:$0xff]  }
 0x1a0   : > { %3598 = vadd.xlane.f32.xlu1 %v3597_v11  ;;  %3505 = vadd.xlane.f32.xlu0 %v3504_v41  ;;  %v8194_v11 = vunpack.c.h.bf16 %v9088_v52  ;;  %v3411_v41 = vsel %vm3158_vm0, %v2730_v3, 0.0  ;;  %v3366_v19 = vsel %vm3158_vm0, %v2715_v40, 0.0 }
 0x1a2   : > { %v2731_v43 = vmul.f32 %v8194_v11, %v10271_v26  ;;  %v8165_v11 = vunpack.c.l.bf16 %v9081_v1 }
 0x1a4   : > { %3646 = vadd.xlane.f32.xlu1 %v3645_v35  ;;  %3553 = vadd.xlane.f32.xlu0 %v3552_v17  ;;  %v8226_v35 = vunpack.c.h.bf16 %v9096_v61  ;;  %v3459_v17 = vsel %vm3158_vm0, %v2746_v9, 0.0  ;;  %v3414_v30 = vsel %vm3158_vm0, %v2731_v43, 0.0 }
 0x1a6   : > { %v2747_v34 = vmul.f32 %v8226_v35, %v10271_v26  ;;  %v5207_v35 = vlaneseq }
 0x1a8   : > { %3172 = vadd.xlane.f32.xlu1 %v3171_v29  ;;  %3601 = vadd.xlane.f32.xlu0 %v3600_v42  ;;  %v8258_v29 = vunpack.c.h.bf16 %v9104_v33  ;;  %v3507_v42 = vsel %vm3158_vm0, %v2762_v24, 0.0  ;;  %v3462_v45 = vsel %vm3158_vm0, %v2747_v34, 0.0 }
 0x1aa   : > { %v2763_v50 = vmul.f32 %v8258_v29, %v10271_v26  ;;  %v9097_v29 = vld [vmem:[%s13709_s3 + $0x198] sm:$0xff]  }
 0x1ab   : > { %v8229_v34 = vunpack.c.l.bf16 %v9097_v29 }
 0x1ac   : > { %3220 = vadd.xlane.f32.xlu1 %v3219_v20  ;;  %3649 = vadd.xlane.f32.xlu0 %v3648_v37  ;;  %v8037_v20 = vunpack.c.l.bf16 %v9049_v36  ;;  %v8290_v37 = vunpack.c.h.bf16 %v9112_v15  ;;  %v3510_v51 = vsel %vm3158_vm0, %v2763_v50, 0.0 }
 0x1ae   : > { %v2652_v21 = vmul.f32 %v8037_v20, %v10330_v48  ;;  %v2779_v52 = vmul.f32 %v8290_v37, %v10271_v26 }
 0x1b0   : > { %3268 = vadd.xlane.f32.xlu1 %v3267_v47  ;;  %3175 = vadd.xlane.f32.xlu0 %v3174_v49  ;;  %v8069_v47 = vunpack.c.l.bf16 %v9057_v44  ;;  %v8322_v49 = vunpack.c.h.bf16 %v9120_v27  ;;  %v3177_v58 = vsel %vm3158_vm0, %v2652_v21, 0.0  ;;  %v3558_v59 = vsel %vm3158_vm0, %v2779_v52, 0.0 }
 0x1b1   : > { %v2716_v27 = vmul.f32 %v8165_v11, %v10330_v48 }
 0x1b2   : > { %v2668_v61 = vmul.f32 %v8069_v47, %v10330_v48  ;;  %v2795_v57 = vmul.f32 %v8322_v49, %v10271_v26 }
 0x1b3   : > { %v3369_v20 = vsel %vm3158_vm0, %v2716_v27, 0.0 }
 0x1b4   : > { %3316 = vadd.xlane.f32.xlu1 %v3315_v56  ;;  %3223 = vadd.xlane.f32.xlu0 %v3222_v22  ;;  %v8101_v56 = vunpack.c.l.bf16 %v9065_v54  ;;  %v8038_v22 = vunpack.c.h.bf16 %v9049_v36  ;;  %v3225_v60 = vsel %vm3158_vm0, %v2668_v61, 0.0  ;;  %v3606_v3 = vsel %vm3158_vm0, %v2795_v57, 0.0 }
 0x1b5   : > { %v8166_v36 = vunpack.c.h.bf16 %v9081_v1 }
 0x1b6   : > { %v2684_v5 = vmul.f32 %v8101_v56, %v10330_v48  ;;  %v2653_v33 = vmul.f32 %v8038_v22, %v10347_v53  ;;  %v9113_v22 = vld [vmem:[%s13709_s3 + $0x218] sm:$0xff]  }
 0x1b7   : > { %v2717_v56 = vmul.f32 %v8166_v36, %v10347_v53 }
 0x1b8   : > { %3364 = vadd.xlane.f32.xlu1 %v3363_v0  ;;  %3271 = vadd.xlane.f32.xlu0 %v3270_v62  ;;  %v8133_v0 = vunpack.c.l.bf16 %v9073_v63  ;;  %v8070_v62 = vunpack.c.h.bf16 %v9057_v44  ;;  %v3180_v9 = vsel %vm3158_vm0, %v2653_v33, 0.0  ;;  %v9121_v33 = vld [vmem:[%s13709_s3 + $0x258] sm:$0xff]  }
 0x1ba   : > { %v2700_v40 = vmul.f32 %v8133_v0, %v10330_v48  ;;  %v2669_v15 = vmul.f32 %v8070_v62, %v10347_v53  ;;  %v8230_v0 = vunpack.c.h.bf16 %v9097_v29  ;;  %v8294_v29 = vunpack.c.h.bf16 %v9113_v22 }
 0x1bc   : > { %3412 = vadd.xlane.f32.xlu1 %v3411_v41  ;;  %3319 = vadd.xlane.f32.xlu0 %v3318_v12  ;;  %v8102_v41 = vunpack.c.h.bf16 %v9065_v54  ;;  %v3273_v12 = vsel %vm3158_vm0, %v2684_v5, 0.0  ;;  %v3321_v24 = vsel %vm3158_vm0, %v2700_v40, 0.0  ;;  %v3228_v43 = vsel %vm3158_vm0, %v2669_v15, 0.0 }
 0x1bd   : > { %v2748_v54 = vmul.f32 %v8229_v34, %v10330_v48  ;;  %v8325_v40 = vunpack.c.l.bf16 %v9121_v33  ;;  %v8262_v15 = vunpack.c.h.bf16 %v9105_v18 }
 0x1be   : > { %v2685_v7 = vmul.f32 %v8102_v41, %v10347_v53 }
 0x1bf   : > { %v3465_v62 = vsel %vm3158_vm0, %v2748_v54, 0.0 }
 0x1c0   : > { %3460 = vadd.xlane.f32.xlu1 %v3459_v17  ;;  %3367 = vadd.xlane.f32.xlu0 %v3366_v19  ;;  %v8197_v17 = vunpack.c.l.bf16 %v9089_v4  ;;  %v8134_v19 = vunpack.c.h.bf16 %v9073_v63  ;;  %v3276_v37 = vsel %vm3158_vm0, %v2685_v7, 0.0  ;;  %v8293_v63 = vunpack.c.l.bf16 %v9113_v22  ;;  %v9066_v22 = vld [vmem:[%s13709_s3 + $0xa0] sm:$0xff]  }
 0x1c4   : > { %3508 = vadd.xlane.f32.xlu1 %v3507_v42  ;;  %3415 = vadd.xlane.f32.xlu0 %v3414_v30  ;;  %v10377_v42 = vand.u32 127, %v5207_v35  ;;  %v10379_v30 = vshrl.u32 %v5207_v35, 7 }
 0x1c6   : > { %v5213_v32 = vadd.s32 4294967288, %v10377_v42  ;;  %v10393_v47 = vsub.s32 %v10377_v42, %v10379_v30 }
 0x1c8   : > { %3556 = vadd.xlane.f32.xlu1 %v3555_v38  ;;  %3463 = vadd.xlane.f32.xlu0 %v3462_v45  ;;  %v2732_v38 = vmul.f32 %v8197_v17, %v10330_v48  ;;  %v2701_v45 = vmul.f32 %v8134_v19, %v10347_v53  ;;  %v10396_v49 = vsub.s32 %v5213_v32, %v10379_v30  ;;  %v10430_v32 = vmax.f32 %v10132_v28, 0.0 }
 0x1c9   : > { %v2780_v17 = vmul.f32 %v8293_v63, %v10330_v48  ;;  %v2749_v19 = vmul.f32 %v8230_v0, %v10347_v53 }
 0x1ca   : > { %v3417_v21 = vsel %vm3158_vm0, %v2732_v38, 0.0  ;;  %v3324_v52 = vsel %vm3158_vm0, %v2701_v45, 0.0  ;;  %v2796_v45 = vmul.f32 %v8325_v40, %v10330_v48 }
 0x1cb   : > { %v3468_v38 = vsel %vm3158_vm0, %v2749_v19, 0.0 }
 0x1cc   : > { %3604 = vadd.xlane.f32.xlu1 %v3603_v55  ;;  %3511 = vadd.xlane.f32.xlu0 %v3510_v51  ;;  %v8261_v55 = vunpack.c.l.bf16 %v9105_v18  ;;  %v8198_v51 = vunpack.c.h.bf16 %v9089_v4  ;;  %v2765_v18 = vmul.f32 %v8262_v15, %v10347_v53  ;;  %v9074_v15 = vld [vmem:[%s13709_s3 + $0xe0] sm:$0xff]  }
 0x1ce   : > { %v2733_v5 = vmul.f32 %v8198_v51, %v10347_v53 }
 0x1d0   : > { %3178 = vadd.xlane.f32.xlu1 %v3177_v58  ;;  %3559 = vadd.xlane.f32.xlu0 %v3558_v59  ;;  %v3420_v35 = vsel %vm3158_vm0, %v2733_v5, 0.0 }
 0x1d4   : > { %3226 = vadd.xlane.f32.xlu1 %v3225_v60  ;;  %3607 = vadd.xlane.f32.xlu0 %v3606_v3  ;;  %v3372_v60 = vsel %vm3158_vm0, %v2717_v56, 0.0  ;;  %v2764_v3 = vmul.f32 %v8261_v55, %v10330_v48  ;;  %v8326_v56 = vunpack.c.h.bf16 %v9121_v33 }
 0x1d6   : > { %v3513_v4 = vsel %vm3158_vm0, %v2764_v3, 0.0  ;;  %v10457_v3 = vmax.f32 %v10135_v31, 0.0  ;;  %v2797_v40 = vmul.f32 %v8326_v56, %v10347_v53 }
 0x1d8   : > { %3274 = vadd.xlane.f32.xlu1 %v3273_v12  ;;  %3181 = vadd.xlane.f32.xlu0 %v3180_v9 }
 0x1dc   : > { %3322 = vadd.xlane.f32.xlu1 %v3321_v24  ;;  %3229 = vadd.xlane.f32.xlu0 %v3228_v43  ;;  %v9050_v24 = vld [vmem:[%s13709_s3 + $0x20] sm:$0xff]  }
 0x1e0   : > { %3370 = vadd.xlane.f32.xlu1 %v3369_v20  ;;  %3277 = vadd.xlane.f32.xlu0 %v3276_v37  ;;  %v8041_v20 = vunpack.c.l.bf16 %v9050_v24  ;;  %v3561_v37 = vsel %vm3158_vm0, %v2780_v17, 0.0 }
 0x1e1   : > { %v3209_v50 = vpop.xlane.xlu1 %3208  ;;  %v10389_v44 = vpop.xlane.xlu0 %3160 }
 0x1e2   : > { %v5321_v61 = vrot.slane %v3209_v50, %v10393_v47  ;;  %v9058_v50 = vld [vmem:[%s13709_s3 + $0x60] sm:$0xff]  }
 0x1e3   : > { %v8073_v54 = vunpack.c.l.bf16 %v9058_v50 }
 0x1e4   : > { %3418 = vadd.xlane.f32.xlu1 %v3417_v21  ;;  %3325 = vadd.xlane.f32.xlu0 %v3324_v52 }
 0x1e5   : > { %v3257_v58 = vpop.xlane.xlu1 %3256  ;;  %v3212_v59 = vpop.xlane.xlu0 %3211 }
 0x1e6   : > { %v5325_v57 = vrot.slane %v3212_v59, %v10396_v49  ;;  %v5400_v12 = vrot.slane %v3257_v58, %v10393_v47  ;;  %v3609_v58 = vsel %vm3158_vm0, %v2796_v45, 0.0  ;;  %v3516_v59 = vsel %vm3158_vm0, %v2765_v18, 0.0 }
 0x1e8   : > { %v10415_v1 = vsel %vm13716_vm1, %v5325_v57, %v5321_v61  ;;  %3466 = vadd.xlane.f32.xlu1 %v3465_v62  ;;  %3373 = vadd.xlane.f32.xlu0 %v3372_v60  ;;  %v2654_v61 = vmul.f32 %v8041_v20, %v10430_v32  ;;  %v2781_v57 = vmul.f32 %v8294_v29, %v10347_v53  ;;  %v8105_v60 = vunpack.c.l.bf16 %v9066_v22  ;;  %v9082_v20 = vld [vmem:[%s13709_s3 + $0x120] sm:$0xff]  }
 0x1e9   : > { %v3305_v11 = vpop.xlane.xlu1 %3304  ;;  %v3260_v41 = vpop.xlane.xlu0 %3259  ;;  %v3612_v29 = vsel %vm3158_vm0, %v2797_v40, 0.0 }
 0x1ea   : > { %v5404_v9 = vrot.slane %v3260_v41, %v10396_v49  ;;  %v5479_v34 = vrot.slane %v3305_v11, %v10393_v47  ;;  %v8042_v11 = vunpack.c.h.bf16 %v9050_v24  ;;  %v3183_v41 = vsel %vm3158_vm0, %v2654_v61, 0.0 }
 0x1eb   : > { %v8137_v24 = vunpack.c.l.bf16 %v9074_v15 }
 0x1ec   : > { %v10427_v43 = vsel %vm13716_vm1, %v5404_v9, %v5400_v12  ;;  %3514 = vadd.xlane.f32.xlu1 %v3513_v4  ;;  %3421 = vadd.xlane.f32.xlu0 %v3420_v35  ;;  %v3564_v12 = vsel %vm3158_vm0, %v2781_v57, 0.0  ;;  %v2670_v9 = vmul.f32 %v8073_v54, %v10430_v32 }
 0x1ed   : > { %v3353_v27 = vpop.xlane.xlu1 %3352  ;;  %v3308_v7 = vpop.xlane.xlu0 %3307  ;;  %v2702_v54 = vmul.f32 %v8137_v24, %v10430_v32  ;;  %v8170_v24 = vunpack.c.h.bf16 %v9082_v20 }
 0x1ee   : > { %v5483_v36 = vrot.slane %v3308_v7, %v10396_v49  ;;  %v5558_v21 = vrot.slane %v3353_v27, %v10393_v47  ;;  %v8074_v27 = vunpack.c.h.bf16 %v9058_v50  ;;  %v3231_v7 = vsel %vm3158_vm0, %v2670_v9, 0.0 }
 0x1f0   : > { %v10442_v28 = vsel %vm13716_vm1, %v5483_v36, %v5479_v34  ;;  %3562 = vadd.xlane.f32.xlu1 %v3561_v37  ;;  %3469 = vadd.xlane.f32.xlu0 %v3468_v38  ;;  %v2686_v34 = vmul.f32 %v8105_v60, %v10430_v32  ;;  %v2655_v36 = vmul.f32 %v8042_v11, %v10457_v3  ;;  %v8138_v60 = vunpack.c.h.bf16 %v9074_v15 }
 0x1f1   : > { %v3401_v55 = vpop.xlane.xlu1 %3400  ;;  %v3356_v51 = vpop.xlane.xlu0 %3355  ;;  %v2671_v56 = vmul.f32 %v8074_v27, %v10457_v3  ;;  %v10519_v27 = vld [vmem:[%s13709_s3 + $0x1e0] sm:$0xff]  }
 0x1f2   : > { %v5562_v52 = vrot.slane %v3356_v51, %v10396_v49  ;;  %v5637_v5 = vrot.slane %v3401_v55, %v10393_v47  ;;  %v8169_v55 = vunpack.c.l.bf16 %v9082_v20  ;;  %v8106_v51 = vunpack.c.h.bf16 %v9066_v22 }
 0x1f4   : > { %v10454_v63 = vsel %vm13716_vm1, %v5562_v52, %v5558_v21  ;;  %3610 = vadd.xlane.f32.xlu1 %v3609_v58  ;;  %3517 = vadd.xlane.f32.xlu0 %v3516_v59  ;;  %v3279_v21 = vsel %vm3158_vm0, %v2686_v34, 0.0  ;;  %v3186_v52 = vsel %vm3158_vm0, %v2655_v36, 0.0  ;;  %v10492_v58 = vld [vmem:[%s13709_s3 + $0x160] sm:$0xff]   ;;  %v2718_v11 = vmul.f32 %v8169_v55, %v10430_v32 }
 0x1f5   : > { %v3449_v0 = vpop.xlane.xlu1 %3448  ;;  %v3404_v62 = vpop.xlane.xlu0 %3403  ;;  %v2703_v36 = vmul.f32 %v8138_v60, %v10457_v3  ;;  %v8265_v55 = vunpack.c.l.bf16 %v10519_v27 }
 0x1f6   : > { %v5641_v33 = vrot.slane %v3404_v62, %v10396_v49  ;;  %v5716_v17 = vrot.slane %v3449_v0, %v10393_v47  ;;  %v8201_v62 = vunpack.c.l.bf16 %v10492_v58 }
 0x1f8   : > { %v10469_v31 = vsel %vm13716_vm1, %v5641_v33, %v5637_v5  ;;  %3184 = vadd.xlane.f32.xlu1 %v3183_v41  ;;  %3565 = vadd.xlane.f32.xlu0 %v3564_v12  ;;  %v3327_v5 = vsel %vm3158_vm0, %v2702_v54, 0.0  ;;  %v3234_v33 = vsel %vm3158_vm0, %v2671_v56, 0.0  ;;  %v2687_v41 = vmul.f32 %v8106_v51, %v10457_v3  ;;  %v10507_v12 = vld [vmem:[%s13709_s3 + $0x1a0] sm:$0xff]  }
 0x1f9   : > { %v3497_v4 = vpop.xlane.xlu1 %3496  ;;  %v3452_v35 = vpop.xlane.xlu0 %3451  ;;  %v2734_v34 = vmul.f32 %v8201_v62, %v10430_v32  ;;  %v8202_v51 = vunpack.c.h.bf16 %v10492_v58 }
 0x1fa   : > { %v5720_v19 = vrot.slane %v3452_v35, %v10396_v49  ;;  %v5795_v18 = vrot.slane %v3497_v4, %v10393_v47  ;;  %v5220_v4 = vadd.s32 4294967280, %v10377_v42 }
 0x1fc   : > { %v10481_v37 = vsel %vm13716_vm1, %v5720_v19, %v5716_v17  ;;  %3232 = vadd.xlane.f32.xlu1 %v3231_v7  ;;  %3613 = vadd.xlane.f32.xlu0 %v3612_v29  ;;  %v8233_v19 = vunpack.c.l.bf16 %v10507_v12  ;;  %v3375_v7 = vsel %vm3158_vm0, %v2718_v11, 0.0  ;;  %v3282_v29 = vsel %vm3158_vm0, %v2687_v41, 0.0 }
 0x1fd   : > { %v3545_v38 = vpop.xlane.xlu1 %3544  ;;  %v3500_v45 = vpop.xlane.xlu0 %3499 }
 0x1fe   : > { %v5799_v50 = vrot.slane %v3500_v45, %v10396_v49  ;;  %v5874_v57 = vrot.slane %v3545_v38, %v10393_v47  ;;  %v2750_v58 = vmul.f32 %v8233_v19, %v10430_v32  ;;  %v2735_v19 = vmul.f32 %v8202_v51, %v10457_v3 }
 0x200   : > { %v10495_v59 = vsel %vm13716_vm1, %v5799_v50, %v5795_v18  ;;  %3280 = vadd.xlane.f32.xlu1 %v3279_v21  ;;  %3187 = vadd.xlane.f32.xlu0 %v3186_v52  ;;  %v10529_v18 = vsub.s32 %v5220_v4, %v10379_v30  ;;  %v5227_v50 = vadd.s32 4294967272, %v10377_v42  ;;  %v5212_v21 = vrot.slane %v10389_v44, %v10393_v47 }
 0x201   : > { %v3593_v61 = vpop.xlane.xlu1 %3592  ;;  %v3548_v22 = vpop.xlane.xlu0 %3547  ;;  %v3471_v4 = vsel %vm3158_vm0, %v2750_v58, 0.0  ;;  %v3426_v51 = vsel %vm3158_vm0, %v2735_v19, 0.0  ;;  %v10589_v58 = vmax.f32 %v10155_v2, 0.0 }
 0x202   : > { %v5878_v0 = vrot.slane %v3548_v22, %v10396_v49  ;;  %v5953_v35 = vrot.slane %v3593_v61, %v10393_v47  ;;  %v10542_v61 = vld [vmem:[%s13709_s3 + $0x220] sm:$0xff]   ;;  %v3423_v22 = vsel %vm3158_vm0, %v2734_v34, 0.0 }
 0x204   : > { %v10510_v9 = vsel %vm13716_vm1, %v5878_v0, %v5874_v57  ;;  %3328 = vadd.xlane.f32.xlu1 %v3327_v5  ;;  %3235 = vadd.xlane.f32.xlu0 %v3234_v33  ;;  %v3330_v57 = vsel %vm3158_vm0, %v2703_v36, 0.0  ;;  %v2719_v0 = vmul.f32 %v8170_v24, %v10457_v3  ;;  %v8297_v33 = vunpack.c.l.bf16 %v10542_v61  ;;  %v10566_v24 = vld [vmem:[%s13709_s3 + $0x260] sm:$0xff]  }
 0x205   : > { %v3641_v40 = vpop.xlane.xlu1 %3640  ;;  %v3596_v15 = vpop.xlane.xlu0 %3595 }
 0x206   : > { %v5957_v17 = vrot.slane %v3596_v15, %v10396_v49  ;;  %v6032_v52 = vrot.slane %v3641_v40, %v10393_v47  ;;  %v10556_v40 = vsub.s32 %v5227_v50, %v10379_v30  ;;  %v8234_v15 = vunpack.c.h.bf16 %v10507_v12 }
 0x207   : > { %v8266_v50 = vunpack.c.h.bf16 %v10519_v27 }
 0x208   : > { %v10526_v38 = vsel %vm13716_vm1, %v5957_v17, %v5953_v35  ;;  %3376 = vadd.xlane.f32.xlu1 %v3375_v7  ;;  %3283 = vadd.xlane.f32.xlu0 %v3282_v29  ;;  %13724 = vst [vmem:[#allocation2_spill] sm:$0xff] %v10556_v40  ;;  %v3378_v35 = vsel %vm3158_vm0, %v2719_v0, 0.0  ;;  %v2766_v17 = vmul.f32 %v8265_v55, %v10430_v32 }
 0x209   : > { %v3164_v45 = vpop.xlane.xlu1 %3163  ;;  %v3644_v20 = vpop.xlane.xlu0 %3643 }
 0x20a   : > { %v5217_v54 = vrot.slane %v3164_v45, %v10396_v49  ;;  %v6036_v56 = vrot.slane %v3644_v20, %v10396_v49  ;;  %v8329_v20 = vunpack.c.l.bf16 %v10566_v24  ;;  %v3519_v55 = vsel %vm3158_vm0, %v2766_v17, 0.0 }
 0x20c   : > { %v5219_v44 = vsel %vm13716_vm1, %v5217_v54, %v5212_v21  ;;  %v10550_v62 = vsel %vm13716_vm1, %v6036_v56, %v6032_v52  ;;  %3424 = vadd.xlane.f32.xlu1 %v3423_v22  ;;  %3331 = vadd.xlane.f32.xlu0 %v3330_v57  ;;  %v2751_v21 = vmul.f32 %v8234_v15, %v10457_v3  ;;  %v9051_v52 = vld [vmem:[%s13709_s3 + $0x28] sm:$0xff]   ;;  %v8298_v57 = vunpack.c.h.bf16 %v10542_v61 }
 0x20d   : > { %v3215_v60 = vpop.xlane.xlu1 %3214  ;;  %v3167_v5 = vpop.xlane.xlu0 %3166  ;;  %v9059_v61 = vld [vmem:[%s13709_s3 + $0x68] sm:$0xff]   ;;  %vm13721_vm1 = vcmask 1043459  }
 0x20e   : > { %v5330_v11 = vrot.slane %v3215_v60, %v10529_v18  ;;  %v5224_v41 = vrot.slane %v3167_v5, %v10529_v18  ;;  %v8045_v60 = vunpack.c.l.bf16 %v9051_v52  ;;  %v8077_v19 = vunpack.c.l.bf16 %v9059_v61 }
 0x210   : > { %v5331_v7 = vsel %vm13715_vm2, %v5330_v11, %v10415_v1  ;;  %v5226_v29 = vsel %vm13715_vm2, %v5224_v41, %v5219_v44  ;;  %3472 = vadd.xlane.f32.xlu1 %v3471_v4  ;;  %3379 = vadd.xlane.f32.xlu0 %v3378_v35  ;;  %v2782_v1 = vmul.f32 %v8297_v33, %v10430_v32 }
 0x211   : > { %v3263_v12 = vpop.xlane.xlu1 %3262  ;;  %v3170_v34 = vpop.xlane.xlu0 %3169  ;;  %v2798_v33 = vmul.f32 %v8329_v20, %v10430_v32  ;;  %v2767_v11 = vmul.f32 %v8266_v50, %v10457_v3 }
 0x212   : > { %v5409_v36 = vrot.slane %v3263_v12, %v10529_v18  ;;  %v5231_v45 = vrot.slane %v3170_v34, %v10556_v40  ;;  %v3567_v5 = vsel %vm3158_vm0, %v2782_v1, 0.0  ;;  %v10611_v12 = vld [vmem:[%s13709_s3 + $0xa8] sm:$0xff]   ;;  %v2656_v34 = vmul.f32 %v8045_v60, %v10589_v58 }
 0x214   : > { %v5410_v54 = vsel %vm13715_vm2, %v5409_v36, %v10427_v43  ;;  %v10585_v56 = vsel %vm13714_vm3, %v5231_v45, %v5226_v29  ;;  %3520 = vadd.xlane.f32.xlu1 %v3519_v55  ;;  %3427 = vadd.xlane.f32.xlu0 %v3426_v51  ;;  %v3474_v43 = vsel %vm3158_vm0, %v2751_v21, 0.0  ;;  %v8330_v29 = vunpack.c.h.bf16 %v10566_v24 }
 0x215   : > { %v3311_v27 = vpop.xlane.xlu1 %3310  ;;  %v3218_v22 = vpop.xlane.xlu0 %3217  ;;  %v2783_v36 = vmul.f32 %v8298_v57, %v10457_v3  ;;  %v8109_v55 = vunpack.c.l.bf16 %v10611_v12  ;;  %v10624_v51 = vmax.f32 %v10167_v10, 0.0 }
 0x216   : > { %v5488_v0 = vrot.slane %v3311_v27, %v10529_v18  ;;  %v5335_v44 = vrot.slane %v3218_v22, %v10556_v40  ;;  %v8046_v27 = vunpack.c.h.bf16 %v9051_v52  ;;  %v3189_v22 = vsel %vm3158_vm0, %v2656_v34, 0.0 }
 0x217   : > { %v2799_v57 = vmul.f32 %v8330_v29, %v10457_v3 }
 0x218   : > { %v5489_v2 = vsel %vm13715_vm2, %v5488_v0, %v10442_v28  ;;  %v10603_v41 = vsel %vm13714_vm3, %v5335_v44, %v5331_v7  ;;  %3568 = vadd.xlane.f32.xlu1 %v3567_v5  ;;  %3475 = vadd.xlane.f32.xlu0 %v3474_v43  ;;  %v3615_v28 = vsel %vm3158_vm0, %v2798_v33, 0.0  ;;  %v3522_v7 = vsel %vm3158_vm0, %v2767_v11, 0.0  ;;  %v9075_v0 = vld [vmem:[%s13709_s3 + $0xe8] sm:$0xff]  }
 0x219   : > { %v3359_v15 = vpop.xlane.xlu1 %3358  ;;  %v3266_v4 = vpop.xlane.xlu0 %3265  ;;  %v8141_v33 = vunpack.c.l.bf16 %v9075_v0  ;;  %v8078_v11 = vunpack.c.h.bf16 %v9059_v61 }
 0x21a   : > { %v5567_v35 = vrot.slane %v3359_v15, %v10529_v18  ;;  %v5414_v17 = vrot.slane %v3266_v4, %v10556_v40  ;;  %v3618_v4 = vsel %vm3158_vm0, %v2799_v57, 0.0  ;;  %v8142_v57 = vunpack.c.h.bf16 %v9075_v0 }
 0x21c   : > { %v5568_v45 = vsel %vm13715_vm2, %v5567_v35, %v10454_v63  ;;  %v10620_v20 = vsel %vm13714_vm3, %v5414_v17, %v5410_v54  ;;  %3616 = vadd.xlane.f32.xlu1 %v3615_v28  ;;  %3523 = vadd.xlane.f32.xlu0 %v3522_v7  ;;  %v3570_v63 = vsel %vm3158_vm0, %v2783_v36, 0.0  ;;  %v2672_v54 = vmul.f32 %v8077_v19, %v10589_v58 }
 0x21d   : > { %v3407_v24 = vpop.xlane.xlu1 %3406  ;;  %v3314_v50 = vpop.xlane.xlu0 %3313  ;;  %v2688_v35 = vmul.f32 %v8109_v55, %v10589_v58  ;;  %v8110_v36 = vunpack.c.h.bf16 %v10611_v12  ;;  %v10667_v55 = vld [vmem:[%s13709_s3 + $0x168] sm:$0xff]  }
 0x21e   : > { %v5646_v1 = vrot.slane %v3407_v24, %v10529_v18  ;;  %v5493_v21 = vrot.slane %v3314_v50, %v10556_v40  ;;  %v3237_v15 = vsel %vm3158_vm0, %v2672_v54, 0.0  ;;  %v8205_v54 = vunpack.c.l.bf16 %v10667_v55 }
 0x21f   : > { %v3285_v24 = vsel %vm3158_vm0, %v2688_v35, 0.0 }
 0x220   : > { %v5647_v10 = vsel %vm13715_vm2, %v5646_v1, %v10469_v31  ;;  %v10638_v44 = vsel %vm13714_vm3, %v5493_v21, %v5489_v2  ;;  %3190 = vadd.xlane.f32.xlu1 %v3189_v22  ;;  %3571 = vadd.xlane.f32.xlu0 %v3570_v63  ;;  %v2657_v31 = vmul.f32 %v8046_v27, %v10624_v51  ;;  %v10649_v2 = vld [vmem:[%s13709_s3 + $0x128] sm:$0xff]  }
 0x221   : > { %v3455_v52 = vpop.xlane.xlu1 %3454  ;;  %v3362_v60 = vpop.xlane.xlu0 %3361  ;;  %v8173_v34 = vunpack.c.l.bf16 %v10649_v2 }
 0x222   : > { %v5725_v5 = vrot.slane %v3455_v52, %v10529_v18  ;;  %v5572_v43 = vrot.slane %v3362_v60, %v10556_v40  ;;  %v3192_v50 = vsel %vm3158_vm0, %v2657_v31, 0.0  ;;  %v10680_v52 = vld [vmem:[%s13709_s3 + $0x1a8] sm:$0xff]   ;;  %v5234_v31 = vadd.s32 4294967264, %v10377_v42 }
 0x223   : > { %v2720_v60 = vmul.f32 %v8173_v34, %v10589_v58 }
 0x224   : > { %v5726_v17 = vsel %vm13715_vm2, %v5725_v5, %v10481_v37  ;;  %v10654_v19 = vsel %vm13714_vm3, %v5572_v43, %v5568_v45  ;;  %3238 = vadd.xlane.f32.xlu1 %v3237_v15  ;;  %3619 = vadd.xlane.f32.xlu0 %v3618_v4  ;;  %v2704_v37 = vmul.f32 %v8141_v33, %v10589_v58  ;;  %v8237_v15 = vunpack.c.l.bf16 %v10680_v52 }
 0x225   : > { %v3503_v61 = vpop.xlane.xlu1 %3502  ;;  %v3410_v29 = vpop.xlane.xlu0 %3409  ;;  %v2673_v45 = vmul.f32 %v8078_v11, %v10624_v51  ;;  %v2689_v5 = vmul.f32 %v8110_v36, %v10624_v51 }
 0x226   : > { %v5804_v28 = vrot.slane %v3503_v61, %v10529_v18  ;;  %v5651_v7 = vrot.slane %v3410_v29, %v10556_v40  ;;  %v8174_v61 = vunpack.c.h.bf16 %v10649_v2 }
 0x227   : > { %v3288_v29 = vsel %vm3158_vm0, %v2689_v5, 0.0 }
 0x228   : > { %v5805_v1 = vsel %vm13715_vm2, %v5804_v28, %v10495_v59  ;;  %v10672_v21 = vsel %vm13714_vm3, %v5651_v7, %v5647_v10  ;;  %3286 = vadd.xlane.f32.xlu1 %v3285_v24  ;;  %3193 = vadd.xlane.f32.xlu0 %v3192_v50  ;;  %v3333_v59 = vsel %vm3158_vm0, %v2704_v37, 0.0  ;;  %v3240_v10 = vsel %vm3158_vm0, %v2673_v45, 0.0 }
 0x229   : > { %v3551_v12 = vpop.xlane.xlu1 %3550  ;;  %v3458_v27 = vpop.xlane.xlu0 %3457  ;;  %v2736_v28 = vmul.f32 %v8205_v54, %v10589_v58  ;;  %v2705_v7 = vmul.f32 %v8142_v57, %v10624_v51  ;;  %v2721_v54 = vmul.f32 %v8174_v61, %v10624_v51 }
 0x22a   : > { %v5883_v22 = vrot.slane %v3551_v12, %v10529_v18  ;;  %v5730_v63 = vrot.slane %v3458_v27, %v10556_v40  ;;  %v10714_v12 = vsub.s32 %v5234_v31, %v10379_v30  ;;  %v8206_v27 = vunpack.c.h.bf16 %v10667_v55 }
 0x22c   : > { %v5884_v43 = vsel %vm13715_vm2, %v5883_v22, %v10510_v9  ;;  %v10689_v33 = vsel %vm13714_vm3, %v5730_v63, %v5726_v17  ;;  %3334 = vadd.xlane.f32.xlu1 %v3333_v59  ;;  %3241 = vadd.xlane.f32.xlu0 %v3240_v10  ;;  %v10699_v9 = vld [vmem:[%s13709_s3 + $0x1e8] sm:$0xff]   ;;  %v3381_v17 = vsel %vm3158_vm0, %v2720_v60, 0.0  ;;  %v3336_v22 = vsel %vm3158_vm0, %v2705_v7, 0.0 }
 0x22d   : > { %v3599_v0 = vpop.xlane.xlu1 %3598  ;;  %v3506_v11 = vpop.xlane.xlu0 %3505  ;;  %v8269_v50 = vunpack.c.l.bf16 %v10699_v9  ;;  %v2752_v63 = vmul.f32 %v8237_v15, %v10589_v58  ;;  %v8238_v15 = vunpack.c.h.bf16 %v10680_v52  ;;  %v2737_v31 = vmul.f32 %v8206_v27, %v10624_v51  ;;  %v10764_v27 = vld [vmem:[%s13709_s3 + $0x30] sm:$0xff]  }
 0x22e   : > { %v5962_v4 = vrot.slane %v3599_v0, %v10529_v18  ;;  %v5809_v35 = vrot.slane %v3506_v11, %v10556_v40  ;;  %v5241_v11 = vadd.s32 4294967256, %v10377_v42 }
 0x230   : > { %v5963_v34 = vsel %vm13715_vm2, %v5962_v4, %v10526_v38  ;;  %v10708_v36 = vsel %vm13714_vm3, %v5809_v35, %v5805_v1  ;;  %3382 = vadd.xlane.f32.xlu1 %v3381_v17  ;;  %3289 = vadd.xlane.f32.xlu0 %v3288_v29  ;;  %v10720_v38 = vld [vmem:[%s13709_s3 + $0x228] sm:$0xff]   ;;  %v3429_v1 = vsel %vm3158_vm0, %v2736_v28, 0.0  ;;  %v3384_v4 = vsel %vm3158_vm0, %v2721_v54, 0.0 }
 0x231   : > { %v3647_v2 = vpop.xlane.xlu1 %3646  ;;  %v3554_v24 = vpop.xlane.xlu0 %3553  ;;  %v8301_v60 = vunpack.c.l.bf16 %v10720_v38  ;;  %v2768_v35 = vmul.f32 %v8269_v50, %v10589_v58  ;;  %v8270_v50 = vunpack.c.h.bf16 %v10699_v9  ;;  %v8302_v54 = vunpack.c.h.bf16 %v10720_v38  ;;  %v9060_v38 = vld [vmem:[%s13709_s3 + $0x70] sm:$0xff]  }
 0x232   : > { %v6041_v37 = vrot.slane %v3647_v2, %v10529_v18  ;;  %v5888_v45 = vrot.slane %v3554_v24, %v10556_v40  ;;  %v10754_v24 = vsub.s32 %v5241_v11, %v10379_v30 }
 0x233   : > { %v2769_v11 = vmul.f32 %v8270_v50, %v10624_v51 }
 0x234   : > { %v6042_v57 = vsel %vm13715_vm2, %v6041_v37, %v10550_v62  ;;  %v10729_v59 = vsel %vm13714_vm3, %v5888_v45, %v5884_v43  ;;  %3430 = vadd.xlane.f32.xlu1 %v3429_v1  ;;  %3337 = vadd.xlane.f32.xlu0 %v3336_v22  ;;  %v10739_v62 = vld [vmem:[%s13709_s3 + $0x268] sm:$0xff]   ;;  %v3477_v43 = vsel %vm3158_vm0, %v2752_v63, 0.0  ;;  %v2784_v37 = vmul.f32 %v8301_v60, %v10589_v58 }
 0x235   : > { %v3173_v55 = vpop.xlane.xlu1 %3172  ;;  %v3602_v10 = vpop.xlane.xlu0 %3601  ;;  %v8333_v28 = vunpack.c.l.bf16 %v10739_v62  ;;  %v2753_v45 = vmul.f32 %v8238_v15, %v10624_v51  ;;  %vm13717_vm2 = vcmask 1042434  }
 0x236   : > { %v5238_v5 = vrot.slane %v3173_v55, %v10714_v12  ;;  %v5967_v0 = vrot.slane %v3602_v10, %v10556_v40  ;;  %v10773_v55 = vmax.f32 %v10185_v39, 0.0 }
 0x238   : > { %v5240_v61 = vsel %vm5239_vm4, %v5238_v5, %v10585_v56  ;;  %v10748_v17 = vsel %vm13714_vm3, %v5967_v0, %v5963_v34  ;;  %3478 = vadd.xlane.f32.xlu1 %v3477_v43  ;;  %3385 = vadd.xlane.f32.xlu0 %v3384_v4  ;;  %v3525_v56 = vsel %vm3158_vm0, %v2768_v35, 0.0  ;;  %v3432_v34 = vsel %vm3158_vm0, %v2737_v31, 0.0 }
 0x239   : > { %v3221_v52 = vpop.xlane.xlu1 %3220  ;;  %v3650_v29 = vpop.xlane.xlu0 %3649  ;;  %v8049_v5 = vunpack.c.l.bf16 %v10764_v27  ;;  %v2800_v0 = vmul.f32 %v8333_v28, %v10589_v58  ;;  %v10796_v28 = vld [vmem:[%s13709_s3 + $0xb0] sm:$0xff]  }
 0x23a   : > { %v5340_v7 = vrot.slane %v3221_v52, %v10714_v12  ;;  %v6046_v2 = vrot.slane %v3650_v29, %v10556_v40  ;;  %v8081_v52 = vunpack.c.l.bf16 %v9060_v38  ;;  %v8334_v29 = vunpack.c.h.bf16 %v10739_v62 }
 0x23c   : > { %v5341_v1 = vsel %vm5239_vm4, %v5340_v7, %v10603_v41  ;;  %v10769_v22 = vsel %vm13714_vm3, %v6046_v2, %v6042_v57  ;;  %3526 = vadd.xlane.f32.xlu1 %v3525_v56  ;;  %3433 = vadd.xlane.f32.xlu0 %v3432_v34  ;;  %v3573_v41 = vsel %vm3158_vm0, %v2784_v37, 0.0  ;;  %v3480_v57 = vsel %vm3158_vm0, %v2753_v45, 0.0 }
 0x23d   : > { %v3269_v9 = vpop.xlane.xlu1 %3268  ;;  %v3176_v63 = vpop.xlane.xlu0 %3175  ;;  %v2658_v7 = vmul.f32 %v8049_v5, %v10773_v55  ;;  %v2785_v2 = vmul.f32 %v8302_v54, %v10624_v51  ;;  %v8113_v37 = vunpack.c.l.bf16 %v10796_v28  ;;  %v10809_v45 = vmax.f32 %v10192_v46, 0.0  ;;  %v9076_v5 = vld [vmem:[%s13709_s3 + $0xf0] sm:$0xff]  }
 0x23e   : > { %v5419_v10 = vrot.slane %v3269_v9, %v10714_v12  ;;  %v5245_v60 = vrot.slane %v3176_v63, %v10754_v24  ;;  %v8050_v54 = vunpack.c.h.bf16 %v10764_v27  ;;  %vm13718_vm3 = vcmask 1041409  }
 0x240   : > { %v5420_v39 = vsel %vm5239_vm4, %v5419_v10, %v10620_v20  ;;  %v10788_v15 = vsel %vm5246_vm5, %v5245_v60, %v5240_v61  ;;  %3574 = vadd.xlane.f32.xlu1 %v3573_v41  ;;  %3481 = vadd.xlane.f32.xlu0 %v3480_v57  ;;  %v3621_v20 = vsel %vm3158_vm0, %v2800_v0, 0.0  ;;  %v3528_v61 = vsel %vm3158_vm0, %v2769_v11, 0.0 }
 0x241   : > { %v3317_v43 = vpop.xlane.xlu1 %3316  ;;  %v3224_v4 = vpop.xlane.xlu0 %3223  ;;  %v2674_v10 = vmul.f32 %v8081_v52, %v10773_v55  ;;  %v2801_v60 = vmul.f32 %v8334_v29, %v10624_v51  ;;  %v2690_v52 = vmul.f32 %v8113_v37, %v10773_v55 }
 0x242   : > { %v5498_v35 = vrot.slane %v3317_v43, %v10714_v12  ;;  %v5345_v31 = vrot.slane %v3224_v4, %v10754_v24  ;;  %v8145_v43 = vunpack.c.l.bf16 %v9076_v5  ;;  %v8082_v4 = vunpack.c.h.bf16 %v9060_v38 }
 0x243   : > { %v3291_v37 = vsel %vm3158_vm0, %v2690_v52, 0.0 }
 0x244   : > { %v5499_v50 = vsel %vm5239_vm4, %v5498_v35, %v10638_v44  ;;  %v10805_v56 = vsel %vm5246_vm5, %v5345_v31, %v5341_v1  ;;  %3622 = vadd.xlane.f32.xlu1 %v3621_v20  ;;  %3529 = vadd.xlane.f32.xlu0 %v3528_v61  ;;  %v3195_v44 = vsel %vm3158_vm0, %v2658_v7, 0.0  ;;  %v3576_v1 = vsel %vm3158_vm0, %v2785_v2, 0.0 }
 0x245   : > { %v3365_v62 = vpop.xlane.xlu1 %3364  ;;  %v3272_v34 = vpop.xlane.xlu0 %3271  ;;  %v3243_v35 = vsel %vm3158_vm0, %v2674_v10, 0.0  ;;  %v3624_v31 = vsel %vm3158_vm0, %v2801_v60, 0.0 }
 0x246   : > { %v5577_v9 = vrot.slane %v3365_v62, %v10714_v12  ;;  %v5424_v63 = vrot.slane %v3272_v34, %v10754_v24  ;;  %v8114_v34 = vunpack.c.h.bf16 %v10796_v28 }
 0x248   : > { %v5578_v46 = vsel %vm5239_vm4, %v5577_v9, %v10654_v19  ;;  %v10824_v41 = vsel %vm5246_vm5, %v5424_v63, %v5420_v39  ;;  %3196 = vadd.xlane.f32.xlu1 %v3195_v44  ;;  %3577 = vadd.xlane.f32.xlu0 %v3576_v1  ;;  %v2659_v19 = vmul.f32 %v8050_v54, %v10809_v45  ;;  %v10835_v39 = vld [vmem:[%s13709_s3 + $0x130] sm:$0xff]  }
 0x249   : > { %v3413_v27 = vpop.xlane.xlu1 %3412  ;;  %v3320_v57 = vpop.xlane.xlu0 %3319  ;;  %v8177_v62 = vunpack.c.l.bf16 %v10835_v39  ;;  %v10853_v63 = vld [vmem:[%s13709_s3 + $0x170] sm:$0xff]  }
 0x24a   : > { %v5656_v0 = vrot.slane %v3413_v27, %v10714_v12  ;;  %v5503_v11 = vrot.slane %v3320_v57, %v10754_v24  ;;  %v3198_v9 = vsel %vm3158_vm0, %v2659_v19, 0.0  ;;  %v8209_v27 = vunpack.c.l.bf16 %v10853_v63 }
 0x24b   : > { %v8146_v57 = vunpack.c.h.bf16 %v9076_v5 }
 0x24c   : > { %v5657_v29 = vsel %vm5239_vm4, %v5656_v0, %v10672_v21  ;;  %v10840_v20 = vsel %vm5246_vm5, %v5503_v11, %v5499_v50  ;;  %3244 = vadd.xlane.f32.xlu1 %v3243_v35  ;;  %3625 = vadd.xlane.f32.xlu0 %v3624_v31  ;;  %v2706_v21 = vmul.f32 %v8145_v43, %v10773_v55  ;;  %v10866_v0 = vld [vmem:[%s13709_s3 + $0x1b0] sm:$0xff]  }
 0x24d   : > { %v3461_v38 = vpop.xlane.xlu1 %3460  ;;  %v3368_v61 = vpop.xlane.xlu0 %3367  ;;  %v2675_v50 = vmul.f32 %v8082_v4, %v10809_v45  ;;  %v2722_v11 = vmul.f32 %v8177_v62, %v10773_v55  ;;  %v2691_v43 = vmul.f32 %v8114_v34, %v10809_v45  ;;  %v8241_v52 = vunpack.c.l.bf16 %v10866_v0 }
 0x24e   : > { %v5735_v7 = vrot.slane %v3461_v38, %v10714_v12  ;;  %v5582_v2 = vrot.slane %v3368_v61, %v10754_v24  ;;  %v5248_v61 = vadd.s32 4294967248, %v10377_v42  ;;  %v2738_v62 = vmul.f32 %v8209_v27, %v10773_v55 }
 0x24f   : > { %v2707_v34 = vmul.f32 %v8146_v57, %v10809_v45  ;;  %v2754_v57 = vmul.f32 %v8241_v52, %v10773_v55  ;;  %v5255_v52 = vadd.s32 4294967240, %v10377_v42 }
 0x250   : > { %v5736_v54 = vsel %vm5239_vm4, %v5735_v7, %v10689_v33  ;;  %v10858_v44 = vsel %vm5246_vm5, %v5582_v2, %v5578_v46  ;;  %3292 = vadd.xlane.f32.xlu1 %v3291_v37  ;;  %3199 = vadd.xlane.f32.xlu0 %v3198_v9  ;;  %v3339_v33 = vsel %vm3158_vm0, %v2706_v21, 0.0  ;;  %v3246_v46 = vsel %vm3158_vm0, %v2675_v50, 0.0 }
 0x251   : > { %v3509_v28 = vpop.xlane.xlu1 %3508  ;;  %v3416_v1 = vpop.xlane.xlu0 %3415  ;;  %v8178_v7 = vunpack.c.h.bf16 %v10835_v39  ;;  %v3294_v2 = vsel %vm3158_vm0, %v2691_v43, 0.0  ;;  %v3342_v27 = vsel %vm3158_vm0, %v2707_v34, 0.0 }
 0x252   : > { %v5814_v10 = vrot.slane %v3509_v28, %v10714_v12  ;;  %v5661_v60 = vrot.slane %v3416_v1, %v10754_v24 }
 0x254   : > { %v5815_v4 = vsel %vm5239_vm4, %v5814_v10, %v10708_v36  ;;  %v10875_v35 = vsel %vm5246_vm5, %v5661_v60, %v5657_v29  ;;  %3340 = vadd.xlane.f32.xlu1 %v3339_v33  ;;  %3247 = vadd.xlane.f32.xlu0 %v3246_v46  ;;  %v10885_v36 = vld [vmem:[%s13709_s3 + $0x1f0] sm:$0xff]   ;;  %v3387_v29 = vsel %vm3158_vm0, %v2722_v11, 0.0  ;;  %v10900_v10 = vsub.s32 %v5248_v61, %v10379_v30 }
 0x255   : > { %v3557_v5 = vpop.xlane.xlu1 %3556  ;;  %v3464_v31 = vpop.xlane.xlu0 %3463  ;;  %v8273_v50 = vunpack.c.l.bf16 %v10885_v36  ;;  %v8210_v60 = vunpack.c.h.bf16 %v10853_v63  ;;  %v2723_v33 = vmul.f32 %v8178_v7, %v10809_v45 }
 0x256   : > { %v5893_v19 = vrot.slane %v3557_v5, %v10714_v12  ;;  %v5740_v38 = vrot.slane %v3464_v31, %v10754_v24 }
 0x257   : > { %v3390_v61 = vsel %vm3158_vm0, %v2723_v33, 0.0  ;;  %v2770_v7 = vmul.f32 %v8273_v50, %v10773_v55  ;;  %v10940_v50 = vsub.s32 %v5255_v52, %v10379_v30 }
 0x258   : > { %v5894_v37 = vsel %vm5239_vm4, %v5893_v19, %v10729_v59  ;;  %v10894_v9 = vsel %vm5246_vm5, %v5740_v38, %v5736_v54  ;;  %3388 = vadd.xlane.f32.xlu1 %v3387_v29  ;;  %3295 = vadd.xlane.f32.xlu0 %v3294_v2  ;;  %v10906_v59 = vld [vmem:[%s13709_s3 + $0x230] sm:$0xff]   ;;  %v3435_v54 = vsel %vm3158_vm0, %v2738_v62, 0.0  ;;  %v8242_v38 = vunpack.c.h.bf16 %v10866_v0 }
 0x259   : > { %v3605_v39 = vpop.xlane.xlu1 %3604  ;;  %v3512_v21 = vpop.xlane.xlu0 %3511  ;;  %v8305_v5 = vunpack.c.l.bf16 %v10906_v59  ;;  %v2739_v29 = vmul.f32 %v8210_v60, %v10809_v45 }
 0x25a   : > { %v5972_v28 = vrot.slane %v3605_v39, %v10714_v12  ;;  %v5819_v1 = vrot.slane %v3512_v21, %v10754_v24 }
 0x25b   : > { %v2786_v60 = vmul.f32 %v8305_v5, %v10773_v55  ;;  %v10959_v5 = vmax.f32 %v10207_v13, 0.0 }
 0x25c   : > { %v5973_v46 = vsel %vm5239_vm4, %v5972_v28, %v10748_v17  ;;  %v10915_v11 = vsel %vm5246_vm5, %v5819_v1, %v5815_v4  ;;  %3436 = vadd.xlane.f32.xlu1 %v3435_v54  ;;  %3343 = vadd.xlane.f32.xlu0 %v3342_v27  ;;  %v10925_v17 = vld [vmem:[%s13709_s3 + $0x270] sm:$0xff]   ;;  %v3483_v4 = vsel %vm3158_vm0, %v2754_v57, 0.0  ;;  %v8274_v1 = vunpack.c.h.bf16 %v10885_v36  ;;  %v10950_v27 = vld [vmem:[%s13709_s3 + $0x38] sm:$0xff]  }
 0x25d   : > { %v3179_v63 = vpop.xlane.xlu1 %3178  ;;  %v3560_v43 = vpop.xlane.xlu0 %3559  ;;  %v8337_v39 = vunpack.c.l.bf16 %v10925_v17  ;;  %v2755_v54 = vmul.f32 %v8242_v38, %v10809_v45  ;;  %v8053_v52 = vunpack.c.l.bf16 %v10950_v27 }
 0x25e   : > { %v5252_v31 = vrot.slane %v3179_v63, %v10900_v10  ;;  %v5898_v19 = vrot.slane %v3560_v43, %v10754_v24  ;;  %v8306_v43 = vunpack.c.h.bf16 %v10906_v59  ;;  %v9061_v59 = vld [vmem:[%s13709_s3 + $0x78] sm:$0xff]  }
 0x25f   : > { %v2802_v38 = vmul.f32 %v8337_v39, %v10773_v55  ;;  %v8085_v39 = vunpack.c.l.bf16 %v9061_v59 }
 0x260   : > { %v5254_v2 = vsel %vm5253_vm6, %v5252_v31, %v10788_v15  ;;  %v10934_v62 = vsel %vm5246_vm5, %v5898_v19, %v5894_v37  ;;  %3484 = vadd.xlane.f32.xlu1 %v3483_v4  ;;  %3391 = vadd.xlane.f32.xlu0 %v3390_v61  ;;  %v3531_v15 = vsel %vm3158_vm0, %v2770_v7, 0.0  ;;  %v3438_v37 = vsel %vm3158_vm0, %v2739_v29, 0.0 }
 0x261   : > { %v3227_v0 = vpop.xlane.xlu1 %3226  ;;  %v3608_v34 = vpop.xlane.xlu0 %3607  ;;  %v2771_v4 = vmul.f32 %v8274_v1, %v10809_v45  ;;  %v2660_v1 = vmul.f32 %v8053_v52, %v10959_v5  ;;  %v2676_v52 = vmul.f32 %v8085_v39, %v10959_v5 }
 0x262   : > { %v5350_v21 = vrot.slane %v3227_v0, %v10900_v10  ;;  %v5977_v28 = vrot.slane %v3608_v34, %v10754_v24 }
 0x263   : > { %v3249_v39 = vsel %vm3158_vm0, %v2676_v52, 0.0 }
 0x264   : > { %v5351_v57 = vsel %vm5253_vm6, %v5350_v21, %v10805_v56  ;;  %v10955_v33 = vsel %vm5246_vm5, %v5977_v28, %v5973_v46  ;;  %3532 = vadd.xlane.f32.xlu1 %v3531_v15  ;;  %3439 = vadd.xlane.f32.xlu0 %v3438_v37  ;;  %v3579_v56 = vsel %vm3158_vm0, %v2786_v60, 0.0  ;;  %v3486_v46 = vsel %vm3158_vm0, %v2755_v54, 0.0  ;;  %v10982_v28 = vld [vmem:[%s13709_s3 + $0xb8] sm:$0xff]  }
 0x265   : > { %v3275_v36 = vpop.xlane.xlu1 %3274  ;;  %v3182_v63 = vpop.xlane.xlu0 %3181  ;;  %v8338_v21 = vunpack.c.h.bf16 %v10925_v17  ;;  %v2787_v15 = vmul.f32 %v8306_v43, %v10809_v45  ;;  %v8054_v43 = vunpack.c.h.bf16 %v10950_v27 }
 0x266   : > { %v5429_v31 = vrot.slane %v3275_v36, %v10900_v10  ;;  %v5259_v19 = vrot.slane %v3182_v63, %v10940_v50  ;;  %v8117_v36 = vunpack.c.l.bf16 %v10982_v28  ;;  %v10995_v63 = vmax.f32 %v10210_v16, 0.0 }
 0x268   : > { %v5430_v13 = vsel %vm5253_vm6, %v5429_v31, %v10824_v41  ;;  %v10974_v61 = vsel %vm5260_vm7, %v5259_v19, %v5254_v2  ;;  %3580 = vadd.xlane.f32.xlu1 %v3579_v56  ;;  %3487 = vadd.xlane.f32.xlu0 %v3486_v46  ;;  %v3627_v41 = vsel %vm3158_vm0, %v2802_v38, 0.0  ;;  %v3534_v2 = vsel %vm3158_vm0, %v2771_v4, 0.0  ;;  %v9077_v46 = vld [vmem:[%s13709_s3 + $0xf8] sm:$0xff]  }
 0x269   : > { %v3323_v7 = vpop.xlane.xlu1 %3322  ;;  %v3230_v29 = vpop.xlane.xlu0 %3229  ;;  %v2803_v56 = vmul.f32 %v8338_v21, %v10809_v45 }
 0x26a   : > { %v5508_v0 = vrot.slane %v3323_v7, %v10900_v10  ;;  %v5355_v34 = vrot.slane %v3230_v29, %v10940_v50 }
 0x26b   : > { %v3630_v21 = vsel %vm3158_vm0, %v2803_v56, 0.0 }
 0x26c   : > { %v5509_v37 = vsel %vm5253_vm6, %v5508_v0, %v10840_v20  ;;  %v10991_v60 = vsel %vm5260_vm7, %v5355_v34, %v5351_v57  ;;  %3628 = vadd.xlane.f32.xlu1 %v3627_v41  ;;  %3535 = vadd.xlane.f32.xlu0 %v3534_v2  ;;  %v3201_v20 = vsel %vm3158_vm0, %v2660_v1, 0.0  ;;  %v3582_v57 = vsel %vm3158_vm0, %v2787_v15, 0.0 }
 0x26d   : > { %v3371_v17 = vpop.xlane.xlu1 %3370  ;;  %v3278_v54 = vpop.xlane.xlu0 %3277  ;;  %v8149_v0 = vunpack.c.l.bf16 %v9077_v46  ;;  %v8086_v34 = vunpack.c.h.bf16 %v9061_v59  ;;  %v2692_v41 = vmul.f32 %v8117_v36, %v10959_v5 }
 0x26e   : > { %v5587_v31 = vrot.slane %v3371_v17, %v10900_v10  ;;  %v5434_v19 = vrot.slane %v3278_v54, %v10940_v50 }
 0x270   : > { %v5588_v16 = vsel %vm5253_vm6, %v5587_v31, %v10858_v44  ;;  %v11010_v38 = vsel %vm5260_vm7, %v5434_v19, %v5430_v13  ;;  %3202 = vadd.xlane.f32.xlu1 %v3201_v20  ;;  %3583 = vadd.xlane.f32.xlu0 %v3582_v57  ;;  %v2661_v44 = vmul.f32 %v8054_v43, %v10995_v63  ;;  %v11021_v13 = vld [vmem:[%s13709_s3 + $0x138] sm:$0xff]   ;;  %v8118_v31 = vunpack.c.h.bf16 %v10982_v28 }
 0x271   : > { %v3419_v27 = vpop.xlane.xlu1 %3418  ;;  %v3326_v4 = vpop.xlane.xlu0 %3325  ;;  %v8181_v36 = vunpack.c.l.bf16 %v11021_v13  ;;  %v3297_v19 = vsel %vm3158_vm0, %v2692_v41, 0.0  ;;  %v11039_v20 = vld [vmem:[%s13709_s3 + $0x178] sm:$0xff]  }
 0x272   : > { %v5666_v7 = vrot.slane %v3419_v27, %v10900_v10  ;;  %v5513_v29 = vrot.slane %v3326_v4, %v10940_v50  ;;  %v3204_v43 = vsel %vm3158_vm0, %v2661_v44, 0.0 }
 0x274   : > { %v5667_v2 = vsel %vm5253_vm6, %v5666_v7, %v10875_v35  ;;  %v11026_v1 = vsel %vm5260_vm7, %v5513_v29, %v5509_v37  ;;  %3250 = vadd.xlane.f32.xlu1 %v3249_v39  ;;  %3631 = vadd.xlane.f32.xlu0 %v3630_v21  ;;  %v2708_v35 = vmul.f32 %v8149_v0, %v10959_v5  ;;  %v8213_v7 = vunpack.c.l.bf16 %v11039_v20  ;;  %v11052_v0 = vld [vmem:[%s13709_s3 + $0x1b8] sm:$0xff]  }
 0x275   : > { %v3467_v59 = vpop.xlane.xlu1 %3466  ;;  %v3374_v15 = vpop.xlane.xlu0 %3373  ;;  %v2677_v37 = vmul.f32 %v8086_v34, %v10995_v63  ;;  %v8150_v29 = vunpack.c.h.bf16 %v9077_v46  ;;  %v2724_v34 = vmul.f32 %v8181_v36, %v10959_v5  ;;  %v2693_v39 = vmul.f32 %v8118_v31, %v10995_v63 }
 0x276   : > { %v5745_v17 = vrot.slane %v3467_v59, %v10900_v10  ;;  %v5592_v54 = vrot.slane %v3374_v15, %v10940_v50  ;;  %v8245_v59 = vunpack.c.l.bf16 %v11052_v0  ;;  %v8182_v36 = vunpack.c.h.bf16 %v11021_v13 }
 0x277   : > { %v3300_v31 = vsel %vm3158_vm0, %v2693_v39, 0.0 }
 0x278   : > { %v5746_v57 = vsel %vm5253_vm6, %v5745_v17, %v10894_v9  ;;  %v11044_v52 = vsel %vm5260_vm7, %v5592_v54, %v5588_v16  ;;  %3298 = vadd.xlane.f32.xlu1 %v3297_v19  ;;  %3205 = vadd.xlane.f32.xlu0 %v3204_v43  ;;  %v3345_v9 = vsel %vm3158_vm0, %v2708_v35, 0.0  ;;  %v3252_v16 = vsel %vm3158_vm0, %v2677_v37, 0.0 }
 0x279   : > { %v3515_v28 = vpop.xlane.xlu1 %3514  ;;  %v3422_v56 = vpop.xlane.xlu0 %3421  ;;  %v5262_v54 = vadd.s32 4294967232, %v10377_v42  ;;  %v2740_v19 = vmul.f32 %v8213_v7, %v10959_v5  ;;  %v2709_v43 = vmul.f32 %v8150_v29, %v10995_v63  ;;  %v8214_v29 = vunpack.c.h.bf16 %v11039_v20 }
 0x27a   : > { %v5824_v27 = vrot.slane %v3515_v28, %v10900_v10  ;;  %v5671_v4 = vrot.slane %v3422_v56, %v10940_v50 }
 0x27b   : > { %v11086_v7 = vsub.s32 %v5262_v54, %v10379_v30 }
 0x27c   : > { %v5825_v21 = vsel %vm5253_vm6, %v5824_v27, %v10915_v11  ;;  %v11061_v41 = vsel %vm5260_vm7, %v5671_v4, %v5667_v2  ;;  %3346 = vadd.xlane.f32.xlu1 %v3345_v9  ;;  %3253 = vadd.xlane.f32.xlu0 %v3252_v16  ;;  %v11071_v11 = vld [vmem:[%s13709_s3 + $0x1f8] sm:$0xff]   ;;  %v3393_v2 = vsel %vm3158_vm0, %v2724_v34, 0.0  ;;  %v3348_v9 = vsel %vm3158_vm0, %v2709_v43, 0.0 }
 0x27d   : > { %v3563_v46 = vpop.xlane.xlu1 %3562  ;;  %v3470_v44 = vpop.xlane.xlu0 %3469  ;;  %v8277_v56 = vunpack.c.l.bf16 %v11071_v11  ;;  %v2756_v16 = vmul.f32 %v8245_v59, %v10959_v5  ;;  %v2725_v34 = vmul.f32 %v8182_v36, %v10995_v63  ;;  %v5269_v59 = vadd.s32 4294967224, %v10377_v42 }
 0x27e   : > { %v5903_v15 = vrot.slane %v3563_v46, %v10900_v10  ;;  %v5750_v17 = vrot.slane %v3470_v44, %v10940_v50  ;;  %v8246_v36 = vunpack.c.h.bf16 %v11052_v0 }
 0x280   : > { %v5904_v35 = vsel %vm5253_vm6, %v5903_v15, %v10934_v62  ;;  %v11080_v37 = vsel %vm5260_vm7, %v5750_v17, %v5746_v57  ;;  %3394 = vadd.xlane.f32.xlu1 %v3393_v2  ;;  %3301 = vadd.xlane.f32.xlu0 %v3300_v31  ;;  %v11092_v62 = vld [vmem:[%s13709_s3 + $0x238] sm:$0xff]   ;;  %v3441_v57 = vsel %vm3158_vm0, %v2740_v19, 0.0  ;;  %v3396_v2 = vsel %vm3158_vm0, %v2725_v34, 0.0  ;;  %v9128_v34 = vld [vmem:[%s13709_s3 + $0x290] sm:$0xff]  }
 0x281   : > { %v3611_v13 = vpop.xlane.xlu1 %3610  ;;  %v3518_v28 = vpop.xlane.xlu0 %3517  ;;  %v8309_v15 = vunpack.c.l.bf16 %v11092_v62  ;;  %v2772_v31 = vmul.f32 %v8277_v56, %v10959_v5  ;;  %v2741_v19 = vmul.f32 %v8214_v29, %v10995_v63  ;;  %v11126_v56 = vsub.s32 %v5269_v59, %v10379_v30 }
 0x282   : > { %v5982_v27 = vrot.slane %v3611_v13, %v10900_v10  ;;  %v5829_v4 = vrot.slane %v3518_v28, %v10940_v50  ;;  %v8278_v29 = vunpack.c.h.bf16 %v11071_v11 }
 0x284   : > { %v5983_v39 = vsel %vm5253_vm6, %v5982_v27, %v10955_v33  ;;  %v11101_v46 = vsel %vm5260_vm7, %v5829_v4, %v5825_v21  ;;  %3442 = vadd.xlane.f32.xlu1 %v3441_v57  ;;  %3349 = vadd.xlane.f32.xlu0 %v3348_v9  ;;  %v11111_v33 = vld [vmem:[%s13709_s3 + $0x278] sm:$0xff]   ;;  %v3489_v21 = vsel %vm3158_vm0, %v2756_v16, 0.0  ;;  %v2788_v9 = vmul.f32 %v8309_v15, %v10959_v5 }
 0x285   : > { %v3185_v20 = vpop.xlane.xlu1 %3184  ;;  %v3566_v44 = vpop.xlane.xlu0 %3565  ;;  %v8341_v27 = vunpack.c.l.bf16 %v11111_v33  ;;  %v2757_v16 = vmul.f32 %v8246_v36, %v10995_v63  ;;  %v8353_v36 = vunpack.c.l.bf16 %v9128_v34 }
 0x286   : > { %v5266_v17 = vrot.slane %v3185_v20, %v11086_v7  ;;  %v5908_v54 = vrot.slane %v3566_v44, %v10940_v50 }
 0x287   : > { %v2804_v59 = vmul.f32 %v8341_v27, %v10959_v5 }
 0x288   : > { %v5268_v43 = vsel %vm5267_vm8, %v5266_v17, %v10974_v61  ;;  %v11120_v13 = vsel %vm5260_vm7, %v5908_v54, %v5904_v35  ;;  %3490 = vadd.xlane.f32.xlu1 %v3489_v21  ;;  %3397 = vadd.xlane.f32.xlu0 %v3396_v2  ;;  %v3537_v61 = vsel %vm3158_vm0, %v2772_v31, 0.0  ;;  %v3444_v35 = vsel %vm3158_vm0, %v2741_v19, 0.0  ;;  %v9129_v31 = vld [vmem:[%s13709_s3 + $0x298] sm:$0xff]  }
 0x289   : > { %v3233_v0 = vpop.xlane.xlu1 %3232  ;;  %v3614_v28 = vpop.xlane.xlu0 %3613  ;;  %v3585_v21 = vsel %vm3158_vm0, %v2788_v9, 0.0  ;;  %v3492_v2 = vsel %vm3158_vm0, %v2757_v16, 0.0  ;;  %v9130_v9 = vld [vmem:[%s13709_s3 + $0x2a0] sm:$0xff]  }
 0x28a   : > { %v5360_v4 = vrot.slane %v3233_v0, %v11086_v7  ;;  %v5987_v57 = vrot.slane %v3614_v28, %v10940_v50 }
 0x28c   : > { %v5361_v20 = vsel %vm5267_vm8, %v5360_v4, %v10991_v60  ;;  %v11139_v44 = vsel %vm5260_vm7, %v5987_v57, %v5983_v39  ;;  %3538 = vadd.xlane.f32.xlu1 %v3537_v61  ;;  %3445 = vadd.xlane.f32.xlu0 %v3444_v35  ;;  %v2773_v60 = vmul.f32 %v8278_v29, %v10995_v63  ;;  %v8310_v39 = vunpack.c.h.bf16 %v11092_v62 }
 0x28d   : > { %v3281_v11 = vpop.xlane.xlu1 %3280  ;;  %v3188_v17 = vpop.xlane.xlu0 %3187  ;;  %v2810_v62 = vmul.f32 %v8353_v36, %v10254_v6  ;;  %v8357_v29 = vunpack.c.l.bf16 %v9129_v31  ;;  %v3633_v61 = vsel %vm3158_vm0, %v2804_v59, 0.0  ;;  %v8361_v36 = vunpack.c.l.bf16 %v9130_v9 }
 0x28e   : > { %v5439_v54 = vrot.slane %v3281_v11, %v11086_v7  ;;  %v5273_v15 = vrot.slane %v3188_v17, %v11126_v56  ;;  %v3540_v35 = vsel %vm3158_vm0, %v2773_v60, 0.0 }
 0x28f   : > { %v2812_v60 = vmul.f32 %v8357_v29, %v10330_v48  ;;  %v8358_v29 = vunpack.c.h.bf16 %v9129_v31  ;;  %v9132_v31 = vld [vmem:[%s13709_s3 + $0x2b0] sm:$0xff]  }
 0x290   : > { %v5440_v19 = vsel %vm5267_vm8, %v5439_v54, %v11010_v38  ;;  %v11154_v0 = vsel %vm5274_vm9, %v5273_v15, %v5268_v43  ;;  %3586 = vadd.xlane.f32.xlu1 %v3585_v21  ;;  %3493 = vadd.xlane.f32.xlu0 %v3492_v2  ;;  %v2789_v38 = vmul.f32 %v8310_v39, %v10995_v63  ;;  %v8342_v43 = vunpack.c.h.bf16 %v11111_v33 }
 0x291   : > { %v3329_v28 = vpop.xlane.xlu1 %3328  ;;  %v3236_v27 = vpop.xlane.xlu0 %3235  ;;  %v8354_v33 = vunpack.c.h.bf16 %v9128_v34  ;;  %v3651_v21 = vsel %vm3158_vm0, %v2810_v62, 0.0 }
 0x292   : > { %v5518_v4 = vrot.slane %v3329_v28, %v11086_v7  ;;  %v5365_v57 = vrot.slane %v3236_v27, %v11126_v56  ;;  %v3588_v2 = vsel %vm3158_vm0, %v2789_v38, 0.0  ;;  %v2814_v38 = vmul.f32 %v8361_v36, %v10430_v32 }
 0x294   : > { %v5519_v16 = vsel %vm5267_vm8, %v5518_v4, %v11026_v1  ;;  %v11169_v11 = vsel %vm5274_vm9, %v5365_v57, %v5361_v20  ;;  %3634 = vadd.xlane.f32.xlu1 %v3633_v61  ;;  %3541 = vadd.xlane.f32.xlu0 %v3540_v35  ;;  %v2805_v1 = vmul.f32 %v8342_v43, %v10995_v63  ;;  %v9131_v20 = vld [vmem:[%s13709_s3 + $0x2a8] sm:$0xff]   ;;  %v3657_v61 = vsel %vm3158_vm0, %v2812_v60, 0.0 }
 0x295   : > { %v3377_v17 = vpop.xlane.xlu1 %3376  ;;  %v3284_v54 = vpop.xlane.xlu0 %3283  ;;  %v8365_v62 = vunpack.c.l.bf16 %v9131_v20 }
 0x296   : > { %v5597_v15 = vrot.slane %v3377_v17, %v11086_v7  ;;  %v5444_v59 = vrot.slane %v3284_v54, %v11126_v56  ;;  %v3636_v35 = vsel %vm3158_vm0, %v2805_v1, 0.0 }
 0x297   : > { %v2816_v36 = vmul.f32 %v8365_v62, %v10589_v58 }
 0x298   : > { %v5598_v39 = vsel %vm5267_vm8, %v5597_v15, %v11044_v52  ;;  %v11183_v28 = vsel %vm5274_vm9, %v5444_v59, %v5440_v19  ;;  %3652 = vadd.xlane.f32.xlu1 %v3651_v21  ;;  %3589 = vadd.xlane.f32.xlu0 %v3588_v2  ;;  %v2811_v52 = vmul.f32 %v8354_v33, %v10271_v26  ;;  %v8362_v33 = vunpack.c.h.bf16 %v9130_v9 }
 0x299   : > { %v3425_v34 = vpop.xlane.xlu1 %3424  ;;  %v3332_v27 = vpop.xlane.xlu0 %3331  ;;  %v2813_v21 = vmul.f32 %v8358_v29, %v10347_v53  ;;  %v8369_v2 = vunpack.c.l.bf16 %v9132_v31  ;;  %v8366_v29 = vunpack.c.h.bf16 %v9131_v20 }
 0x29a   : > { %v5676_v4 = vrot.slane %v3425_v34, %v11086_v7  ;;  %v5523_v57 = vrot.slane %v3332_v27, %v11126_v56  ;;  %v9133_v34 = vld [vmem:[%s13709_s3 + $0x2b8] sm:$0xff]   ;;  %v2815_v62 = vmul.f32 %v8362_v33, %v10457_v3 }
 0x29c   : > { %v5677_v19 = vsel %vm5267_vm8, %v5676_v4, %v11061_v41  ;;  %v11194_v43 = vsel %vm5274_vm9, %v5523_v57, %v5519_v16  ;;  %3658 = vadd.xlane.f32.xlu1 %v3657_v61  ;;  %3637 = vadd.xlane.f32.xlu0 %v3636_v35  ;;  %v3663_v41 = vsel %vm3158_vm0, %v2814_v38, 0.0  ;;  %v3654_v16 = vsel %vm3158_vm0, %v2811_v52, 0.0 }
 0x29d   : > { %v3473_v17 = vpop.xlane.xlu1 %3472  ;;  %v3380_v54 = vpop.xlane.xlu0 %3379  ;;  %v3660_v61 = vsel %vm3158_vm0, %v2813_v21, 0.0  ;;  %v2818_v35 = vmul.f32 %v8369_v2, %v10773_v55  ;;  %v8373_v38 = vunpack.c.l.bf16 %v9133_v34  ;;  %v3666_v33 = vsel %vm3158_vm0, %v2815_v62, 0.0 }
 0x29e   : > { %v5755_v15 = vrot.slane %v3473_v17, %v11086_v7  ;;  %v5602_v59 = vrot.slane %v3380_v54, %v11126_v56  ;;  %v2817_v21 = vmul.f32 %v8366_v29, %v10624_v51  ;;  %v8370_v2 = vunpack.c.h.bf16 %v9132_v31 }
 0x2a0   : > { %v5756_v60 = vsel %vm5267_vm8, %v5755_v15, %v11080_v37  ;;  %v11208_v1 = vsel %vm5274_vm9, %v5602_v59, %v5598_v39  ;;  %3664 = vadd.xlane.f32.xlu1 %v3663_v41  ;;  %3655 = vadd.xlane.f32.xlu0 %v3654_v16  ;;  %v11219_v37 = vld [vmem:[%s13709_s3 + $0x2c0] sm:$0xff]   ;;  %v3669_v39 = vsel %vm3158_vm0, %v2816_v36, 0.0  ;;  %v5276_v41 = vadd.s32 4294967216, %v10377_v42 }
 0x2a1   : > { %v3521_v9 = vpop.xlane.xlu1 %3520  ;;  %v3428_v27 = vpop.xlane.xlu0 %3427  ;;  %v8377_v15 = vunpack.c.l.bf16 %v11219_v37  ;;  %v2820_v16 = vmul.f32 %v8373_v38, %v10959_v5  ;;  %v2819_v29 = vmul.f32 %v8370_v2, %v10809_v45  ;;  %v8374_v38 = vunpack.c.h.bf16 %v9133_v34 }
 0x2a2   : > { %v5834_v4 = vrot.slane %v3521_v9, %v11086_v7  ;;  %v5681_v57 = vrot.slane %v3428_v27, %v11126_v56 }
 0x2a3   : > { %v2822_v31 = vmul.f32 %v8377_v15, %v10054_v8  ;;  %v2821_v2 = vmul.f32 %v8374_v38, %v10995_v63 }
 0x2a4   : > { %v5835_v52 = vsel %vm5267_vm8, %v5834_v4, %v11101_v46  ;;  %v11227_v17 = vsel %vm5274_vm9, %v5681_v57, %v5677_v19  ;;  %3670 = vadd.xlane.f32.xlu1 %v3669_v39  ;;  %3661 = vadd.xlane.f32.xlu0 %v3660_v61  ;;  %v11237_v46 = vld [vmem:[%s13709_s3 + $0x2c8] sm:$0xff]   ;;  %v3675_v19 = vsel %vm3158_vm0, %v2818_v35, 0.0  ;;  %v11251_v35 = vsub.s32 %v5276_v41, %v10379_v30 }
 0x2a5   : > { %v3569_v20 = vpop.xlane.xlu1 %3568  ;;  %v3476_v54 = vpop.xlane.xlu0 %3475  ;;  %v8381_v62 = vunpack.c.l.bf16 %v11237_v46 }
 0x2a6   : > { %v5913_v59 = vrot.slane %v3569_v20, %v11086_v7  ;;  %v5760_v36 = vrot.slane %v3476_v54, %v11126_v56  ;;  %v9136_v20 = vld [vmem:[%s13709_s3 + $0x2d0] sm:$0xff]  }
 0x2a8   : > { %v5914_v9 = vsel %vm5267_vm8, %v5913_v59, %v11120_v13  ;;  %v11245_v27 = vsel %vm5274_vm9, %v5760_v36, %v5756_v60  ;;  %3676 = vadd.xlane.f32.xlu1 %v3675_v19  ;;  %3667 = vadd.xlane.f32.xlu0 %v3666_v33  ;;  %v3681_v13 = vsel %vm3158_vm0, %v2820_v16, 0.0  ;;  %v3672_v60 = vsel %vm3158_vm0, %v2817_v21, 0.0 }
 0x2a9   : > { %v3617_v4 = vpop.xlane.xlu1 %3616  ;;  %v3524_v57 = vpop.xlane.xlu0 %3523  ;;  %v8378_v33 = vunpack.c.h.bf16 %v11219_v37  ;;  %v5283_v19 = vadd.s32 4294967208, %v10377_v42  ;;  %v8385_v16 = vunpack.c.l.bf16 %v9136_v20  ;;  %v3687_v21 = vsel %vm3158_vm0, %v2822_v31, 0.0 }
 0x2aa   : > { %v5992_v39 = vrot.slane %v3617_v4, %v11086_v7  ;;  %v5839_v61 = vrot.slane %v3524_v57, %v11126_v56  ;;  %v9137_v57 = vld [vmem:[%s13709_s3 + $0x2d8] sm:$0xff]   ;;  %v8382_v31 = vunpack.c.h.bf16 %v11237_v46 }
 0x2ab   : > { %v2823_v38 = vmul.f32 %v8378_v33, %v10059_v14 }
 0x2ac   : > { %v5993_v54 = vsel %vm5267_vm8, %v5992_v39, %v11139_v44  ;;  %v11263_v59 = vsel %vm5274_vm9, %v5839_v61, %v5835_v52  ;;  %3682 = vadd.xlane.f32.xlu1 %v3681_v13  ;;  %3673 = vadd.xlane.f32.xlu0 %v3672_v60  ;;  %v3678_v44 = vsel %vm3158_vm0, %v2819_v29, 0.0  ;;  %v2824_v52 = vmul.f32 %v8381_v62, %v10158_v25 }
 0x2ad   : > { %v3191_v15 = vpop.xlane.xlu1 %3190  ;;  %v3572_v36 = vpop.xlane.xlu0 %3571  ;;  %v11285_v60 = vsub.s32 %v5283_v19, %v10379_v30  ;;  %v3684_v29 = vsel %vm3158_vm0, %v2821_v2, 0.0 }
 0x2ae   : > { %v5280_v41 = vrot.slane %v3191_v15, %v11251_v35  ;;  %v5918_v34 = vrot.slane %v3572_v36, %v11126_v56  ;;  %v8389_v15 = vunpack.c.l.bf16 %v9137_v57 }
 0x2b0   : > { %v5282_v4 = vsel %vm5281_vm10, %v5280_v41, %v11154_v0  ;;  %v11276_v37 = vsel %vm5274_vm9, %v5918_v34, %v5914_v9  ;;  %3688 = vadd.xlane.f32.xlu1 %v3687_v21  ;;  %3679 = vadd.xlane.f32.xlu0 %v3678_v44  ;;  %v2826_v0 = vmul.f32 %v8385_v16, %v10254_v6  ;;  %v3693_v9 = vsel %vm3158_vm0, %v2824_v52, 0.0  ;;  %v9138_v41 = vld [vmem:[%s13709_s3 + $0x2e0] sm:$0xff]  }
 0x2b1   : > { %v3239_v39 = vpop.xlane.xlu1 %3238  ;;  %v3620_v61 = vpop.xlane.xlu0 %3619  ;;  %v2825_v21 = vmul.f32 %v8382_v31, %v10174_v23  ;;  %v8386_v44 = vunpack.c.h.bf16 %v9136_v20  ;;  %v2828_v52 = vmul.f32 %v8389_v15, %v10330_v48  ;;  %v8393_v2 = vunpack.c.l.bf16 %v9138_v41  ;;  %v9139_v31 = vld [vmem:[%s13709_s3 + $0x2e8] sm:$0xff]  }
 0x2b2   : > { %v5370_v62 = vrot.slane %v3239_v39, %v11251_v35  ;;  %v5997_v13 = vrot.slane %v3620_v61, %v11126_v56  ;;  %v8390_v15 = vunpack.c.h.bf16 %v9137_v57 }
 0x2b4   : > { %v5371_v36 = vsel %vm5281_vm10, %v5370_v62, %v11169_v11  ;;  %v11294_v46 = vsel %vm5274_vm9, %v5997_v13, %v5993_v54  ;;  %3694 = vadd.xlane.f32.xlu1 %v3693_v9  ;;  %3685 = vadd.xlane.f32.xlu0 %v3684_v29  ;;  %v3699_v11 = vsel %vm3158_vm0, %v2826_v0, 0.0  ;;  %v3690_v54 = vsel %vm3158_vm0, %v2823_v38, 0.0 }
 0x2b5   : > { %v3287_v34 = vpop.xlane.xlu1 %3286  ;;  %v3194_v19 = vpop.xlane.xlu0 %3193  ;;  %v3696_v9 = vsel %vm3158_vm0, %v2825_v21, 0.0  ;;  %v2827_v29 = vmul.f32 %v8386_v44, %v10271_v26  ;;  %v8397_v38 = vunpack.c.l.bf16 %v9139_v31 }
 0x2b6   : > { %v5449_v16 = vrot.slane %v3287_v34, %v11251_v35  ;;  %v5287_v33 = vrot.slane %v3194_v19, %v11285_v60  ;;  %v9140_v34 = vld [vmem:[%s13709_s3 + $0x2f0] sm:$0xff]  }
 0x2b7   : > { %v3702_v57 = vsel %vm3158_vm0, %v2827_v29, 0.0 }
 0x2b8   : > { %v5450_v39 = vsel %vm5281_vm10, %v5449_v16, %v11183_v28  ;;  %v11308_v61 = vsel %vm5288_vm11, %v5287_v33, %v5282_v4  ;;  %3700 = vadd.xlane.f32.xlu1 %v3699_v11  ;;  %3691 = vadd.xlane.f32.xlu0 %v3690_v54  ;;  %v3705_v28 = vsel %vm3158_vm0, %v2828_v52, 0.0  ;;  %v2830_v4 = vmul.f32 %v8393_v2, %v10430_v32 }
 0x2b9   : > { %v3335_v20 = vpop.xlane.xlu1 %3334  ;;  %v3242_v62 = vpop.xlane.xlu0 %3241  ;;  %v8401_v54 = vunpack.c.l.bf16 %v9140_v34  ;;  %v2832_v2 = vmul.f32 %v8397_v38, %v10589_v58 }
 0x2ba   : > { %v5528_v13 = vrot.slane %v3335_v20, %v11251_v35  ;;  %v5375_v0 = vrot.slane %v3242_v62, %v11285_v60  ;;  %v3711_v52 = vsel %vm3158_vm0, %v2830_v4, 0.0  ;;  %v8394_v20 = vunpack.c.h.bf16 %v9138_v41 }
 0x2bb   : > { %v2834_v41 = vmul.f32 %v8401_v54, %v10773_v55  ;;  %v3717_v38 = vsel %vm3158_vm0, %v2832_v2, 0.0 }
 0x2bc   : > { %v5529_v19 = vsel %vm5281_vm10, %v5528_v13, %v11194_v43  ;;  %v11325_v16 = vsel %vm5288_vm11, %v5375_v0, %v5371_v36  ;;  %3706 = vadd.xlane.f32.xlu1 %v3705_v28  ;;  %3697 = vadd.xlane.f32.xlu0 %v3696_v9  ;;  %v2829_v43 = vmul.f32 %v8390_v15, %v10347_v53  ;;  %v9141_v36 = vld [vmem:[%s13709_s3 + $0x2f8] sm:$0xff]  }
 0x2bd   : > { %v3383_v33 = vpop.xlane.xlu1 %3382  ;;  %v3290_v21 = vpop.xlane.xlu0 %3289  ;;  %v8405_v4 = vunpack.c.l.bf16 %v9141_v36 }
 0x2be   : > { %v5607_v44 = vrot.slane %v3383_v33, %v11251_v35  ;;  %v5454_v11 = vrot.slane %v3290_v21, %v11285_v60  ;;  %v3708_v15 = vsel %vm3158_vm0, %v2829_v43, 0.0  ;;  %v8398_v33 = vunpack.c.h.bf16 %v9139_v31 }
 0x2bf   : > { %v2836_v31 = vmul.f32 %v8405_v4, %v10959_v5  ;;  %v3723_v43 = vsel %vm3158_vm0, %v2834_v41, 0.0 }
 0x2c0   : > { %v5608_v62 = vsel %vm5281_vm10, %v5607_v44, %v11208_v1  ;;  %v11339_v13 = vsel %vm5288_vm11, %v5454_v11, %v5450_v39  ;;  %3712 = vadd.xlane.f32.xlu1 %v3711_v52  ;;  %3703 = vadd.xlane.f32.xlu0 %v3702_v57  ;;  %v2831_v1 = vmul.f32 %v8394_v20, %v10457_v3  ;;  %v9142_v39 = vld [vmem:[%s13709_s3 + $0x300] sm:$0xff]  }
 0x2c1   : > { %v3431_v0 = vpop.xlane.xlu1 %3430  ;;  %v3338_v9 = vpop.xlane.xlu0 %3337  ;;  %v8409_v2 = vunpack.c.l.bf16 %v9142_v39 }
 0x2c2   : > { %v5686_v29 = vrot.slane %v3431_v0, %v11251_v35  ;;  %v5533_v28 = vrot.slane %v3338_v9, %v11285_v60  ;;  %v3714_v20 = vsel %vm3158_vm0, %v2831_v1, 0.0  ;;  %v8402_v0 = vunpack.c.h.bf16 %v9140_v34 }
 0x2c3   : > { %v2838_v34 = vmul.f32 %v8409_v2, %v10054_v8  ;;  %v3729_v1 = vsel %vm3158_vm0, %v2836_v31, 0.0  ;;  %v8410_v31 = vunpack.c.h.bf16 %v9142_v39 }
 0x2c4   : > { %v5687_v21 = vsel %vm5281_vm10, %v5686_v29, %v11227_v17  ;;  %v11353_v44 = vsel %vm5288_vm11, %v5533_v28, %v5529_v19  ;;  %3718 = vadd.xlane.f32.xlu1 %v3717_v38  ;;  %3709 = vadd.xlane.f32.xlu0 %v3708_v15  ;;  %v2833_v17 = vmul.f32 %v8398_v33, %v10624_v51  ;;  %v11364_v19 = vld [vmem:[%s13709_s3 + $0x308] sm:$0xff]  }
 0x2c5   : > { %v3479_v11 = vpop.xlane.xlu1 %3478  ;;  %v3386_v57 = vpop.xlane.xlu0 %3385  ;;  %v8413_v15 = vunpack.c.l.bf16 %v11364_v19 }
 0x2c6   : > { %v5765_v54 = vrot.slane %v3479_v11, %v11251_v35  ;;  %v5612_v52 = vrot.slane %v3386_v57, %v11285_v60  ;;  %v3720_v33 = vsel %vm3158_vm0, %v2833_v17, 0.0 }
 0x2c8   : > { %v5766_v9 = vsel %vm5281_vm10, %v5765_v54, %v11245_v27  ;;  %v11369_v29 = vsel %vm5288_vm11, %v5612_v52, %v5608_v62  ;;  %3724 = vadd.xlane.f32.xlu1 %v3723_v43  ;;  %3715 = vadd.xlane.f32.xlu0 %v3714_v20  ;;  %v2835_v27 = vmul.f32 %v8402_v0, %v10809_v45  ;;  %v8406_v62 = vunpack.c.h.bf16 %v9141_v36  ;;  %v9144_v54 = vld [vmem:[%s13709_s3 + $0x310] sm:$0xff]  }
 0x2c9   : > { %v3527_v28 = vpop.xlane.xlu1 %3526  ;;  %v3434_v41 = vpop.xlane.xlu0 %3433  ;;  %v2840_v36 = vmul.f32 %v8413_v15, %v10158_v25 }
 0x2ca   : > { %v5844_v4 = vrot.slane %v3527_v28, %v11251_v35  ;;  %v5691_v38 = vrot.slane %v3434_v41, %v11285_v60  ;;  %v3726_v17 = vsel %vm3158_vm0, %v2835_v27, 0.0  ;;  %v2837_v0 = vmul.f32 %v8406_v62, %v10995_v63 }
 0x2cb   : > { %v8417_v28 = vunpack.c.l.bf16 %v9144_v54  ;;  %v3741_v27 = vsel %vm3158_vm0, %v2840_v36, 0.0 }
 0x2cc   : > { %v5845_v11 = vsel %vm5281_vm10, %v5844_v4, %v11263_v59  ;;  %v11381_v57 = vsel %vm5288_vm11, %v5691_v38, %v5687_v21  ;;  %3730 = vadd.xlane.f32.xlu1 %v3729_v1  ;;  %3721 = vadd.xlane.f32.xlu0 %v3720_v33  ;;  %v5290_v59 = vadd.s32 4294967200, %v10377_v42  ;;  %v3735_v21 = vsel %vm3158_vm0, %v2838_v34, 0.0  ;;  %v9145_v4 = vld [vmem:[%s13709_s3 + $0x318] sm:$0xff]  }
 0x2cd   : > { %v3575_v52 = vpop.xlane.xlu1 %3574  ;;  %v3482_v2 = vpop.xlane.xlu0 %3481  ;;  %v2839_v34 = vmul.f32 %v8410_v31, %v10059_v14  ;;  %v3732_v62 = vsel %vm3158_vm0, %v2837_v0, 0.0  ;;  %v8414_v31 = vunpack.c.h.bf16 %v11364_v19  ;;  %v5297_v19 = vadd.s32 4294967192, %v10377_v42 }
 0x2ce   : > { %v5923_v43 = vrot.slane %v3575_v52, %v11251_v35  ;;  %v5770_v20 = vrot.slane %v3482_v2, %v11285_v60  ;;  %v2842_v52 = vmul.f32 %v8417_v28, %v10254_v6  ;;  %v8421_v2 = vunpack.c.l.bf16 %v9145_v4 }
 0x2cf   : > { %v3738_v28 = vsel %vm3158_vm0, %v2839_v34, 0.0 }
 0x2d0   : > { %v5924_v41 = vsel %vm5281_vm10, %v5923_v43, %v11276_v37  ;;  %v11396_v39 = vsel %vm5288_vm11, %v5770_v20, %v5766_v9  ;;  %3736 = vadd.xlane.f32.xlu1 %v3735_v21  ;;  %3727 = vadd.xlane.f32.xlu0 %v3726_v17  ;;  %v11406_v37 = vsub.s32 %v5290_v59, %v10379_v30  ;;  %v11411_v9 = vld [vmem:[%s13709_s3 + $0x320] sm:$0xff]  }
 0x2d1   : > { %v3623_v38 = vpop.xlane.xlu1 %3622  ;;  %v3530_v15 = vpop.xlane.xlu0 %3529  ;;  %v8425_v21 = vunpack.c.l.bf16 %v11411_v9 }
 0x2d2   : > { %v6002_v1 = vrot.slane %v3623_v38, %v11251_v35  ;;  %v5849_v33 = vrot.slane %v3530_v15, %v11285_v60  ;;  %v2841_v38 = vmul.f32 %v8414_v31, %v10174_v23  ;;  %v8418_v15 = vunpack.c.h.bf16 %v9144_v54 }
 0x2d3   : > { %v11441_v31 = vsub.s32 %v5297_v19, %v10379_v30 }
 0x2d4   : > { %v6003_v43 = vsel %vm5281_vm10, %v6002_v1, %v11294_v46  ;;  %v11419_v20 = vsel %vm5288_vm11, %v5849_v33, %v5845_v11  ;;  %3742 = vadd.xlane.f32.xlu1 %v3741_v27  ;;  %3733 = vadd.xlane.f32.xlu0 %v3732_v62  ;;  %v3747_v46 = vsel %vm3158_vm0, %v2842_v52, 0.0  ;;  %v2844_v11 = vmul.f32 %v8421_v2, %v10330_v48  ;;  %v9147_v1 = vld [vmem:[%s13709_s3 + $0x328] sm:$0xff]  }
 0x2d5   : > { %v3197_v36 = vpop.xlane.xlu1 %3196  ;;  %v3578_v59 = vpop.xlane.xlu0 %3577  ;;  %v2846_v52 = vmul.f32 %v8425_v21, %v10430_v32 }
 0x2d6   : > { %v5294_v17 = vrot.slane %v3197_v36, %v11406_v37  ;;  %v5928_v0 = vrot.slane %v3578_v59, %v11285_v60  ;;  %v8429_v36 = vunpack.c.l.bf16 %v9147_v1  ;;  %v3753_v59 = vsel %vm3158_vm0, %v2844_v11, 0.0 }
 0x2d8   : > { %v5296_v33 = vsel %vm5295_vm12, %v5294_v17, %v11308_v61  ;;  %v11435_v27 = vsel %vm5288_vm11, %v5928_v0, %v5924_v41  ;;  %3748 = vadd.xlane.f32.xlu1 %v3747_v46  ;;  %3739 = vadd.xlane.f32.xlu0 %v3738_v28  ;;  %v3744_v61 = vsel %vm3158_vm0, %v2841_v38, 0.0  ;;  %v2843_v41 = vmul.f32 %v8418_v15, %v10271_v26  ;;  %v9148_v0 = vld [vmem:[%s13709_s3 + $0x330] sm:$0xff]  }
 0x2d9   : > { %v3245_v34 = vpop.xlane.xlu1 %3244  ;;  %v3626_v62 = vpop.xlane.xlu0 %3625  ;;  %v8422_v17 = vunpack.c.h.bf16 %v9145_v4  ;;  %v3759_v4 = vsel %vm3158_vm0, %v2846_v52, 0.0  ;;  %v8433_v15 = vunpack.c.l.bf16 %v9148_v0 }
 0x2da   : > { %v5380_v2 = vrot.slane %v3245_v34, %v11406_v37  ;;  %v6007_v54 = vrot.slane %v3626_v62, %v11285_v60  ;;  %v3750_v34 = vsel %vm3158_vm0, %v2843_v41, 0.0  ;;  %v2848_v62 = vmul.f32 %v8429_v36, %v10589_v58 }
 0x2dc   : > { %v5381_v21 = vsel %vm5295_vm12, %v5380_v2, %v11325_v16  ;;  %v11452_v28 = vsel %vm5288_vm11, %v6007_v54, %v6003_v43  ;;  %3754 = vadd.xlane.f32.xlu1 %v3753_v59  ;;  %3745 = vadd.xlane.f32.xlu0 %v3744_v61  ;;  %v2845_v16 = vmul.f32 %v8422_v17, %v10347_v53  ;;  %v8426_v43 = vunpack.c.h.bf16 %v11411_v9  ;;  %v9149_v2 = vld [vmem:[%s13709_s3 + $0x338] sm:$0xff]  }
 0x2dd   : > { %v3293_v19 = vpop.xlane.xlu1 %3292  ;;  %v3200_v46 = vpop.xlane.xlu0 %3199  ;;  %v2850_v9 = vmul.f32 %v8433_v15, %v10773_v55  ;;  %v8437_v17 = vunpack.c.l.bf16 %v9149_v2 }
 0x2de   : > { %v5459_v11 = vrot.slane %v3293_v19, %v11406_v37  ;;  %v5301_v38 = vrot.slane %v3200_v46, %v11441_v31  ;;  %v3765_v19 = vsel %vm3158_vm0, %v2848_v62, 0.0  ;;  %v3756_v46 = vsel %vm3158_vm0, %v2845_v16, 0.0 }
 0x2e0   : > { %v5460_v54 = vsel %vm5295_vm12, %v5459_v11, %v11339_v13  ;;  %v11467_v59 = vsel %vm5302_vm13, %v5301_v38, %v5296_v33  ;;  %3760 = vadd.xlane.f32.xlu1 %v3759_v4  ;;  %3751 = vadd.xlane.f32.xlu0 %v3750_v34  ;;  %v2847_v13 = vmul.f32 %v8426_v43, %v10457_v3  ;;  %v8430_v11 = vunpack.c.h.bf16 %v9147_v1  ;;  %v9150_v33 = vld [vmem:[%s13709_s3 + $0x340] sm:$0xff]  }
 0x2e1   : > { %v3341_v52 = vpop.xlane.xlu1 %3340  ;;  %v3248_v61 = vpop.xlane.xlu0 %3247  ;;  %v3771_v1 = vsel %vm3158_vm0, %v2850_v9, 0.0  ;;  %v8441_v43 = vunpack.c.l.bf16 %v9150_v33 }
 0x2e2   : > { %v5538_v36 = vrot.slane %v3341_v52, %v11406_v37  ;;  %v5385_v41 = vrot.slane %v3248_v61, %v11441_v31  ;;  %v3762_v52 = vsel %vm3158_vm0, %v2847_v13, 0.0  ;;  %v2852_v61 = vmul.f32 %v8437_v17, %v10959_v5 }
 0x2e4   : > { %v5539_v38 = vsel %vm5295_vm12, %v5538_v36, %v11353_v44  ;;  %v11481_v4 = vsel %vm5302_vm13, %v5385_v41, %v5381_v21  ;;  %3766 = vadd.xlane.f32.xlu1 %v3765_v19  ;;  %3757 = vadd.xlane.f32.xlu0 %v3756_v46  ;;  %v2849_v44 = vmul.f32 %v8430_v11, %v10624_v51  ;;  %v8434_v36 = vunpack.c.h.bf16 %v9148_v0  ;;  %v9151_v21 = vld [vmem:[%s13709_s3 + $0x348] sm:$0xff]  }
 0x2e5   : > { %v3389_v15 = vpop.xlane.xlu1 %3388  ;;  %v3296_v34 = vpop.xlane.xlu0 %3295  ;;  %v2854_v0 = vmul.f32 %v8441_v43, %v10054_v8  ;;  %v8445_v11 = vunpack.c.l.bf16 %v9151_v21 }
 0x2e6   : > { %v5617_v62 = vrot.slane %v3389_v15, %v11406_v37  ;;  %v5464_v16 = vrot.slane %v3296_v34, %v11441_v31  ;;  %v3777_v15 = vsel %vm3158_vm0, %v2852_v61, 0.0  ;;  %v3768_v34 = vsel %vm3158_vm0, %v2849_v44, 0.0 }
 0x2e8   : > { %v5618_v41 = vsel %vm5295_vm12, %v5617_v62, %v11369_v29  ;;  %v11495_v19 = vsel %vm5302_vm13, %v5464_v16, %v5460_v54  ;;  %3772 = vadd.xlane.f32.xlu1 %v3771_v1  ;;  %3763 = vadd.xlane.f32.xlu0 %v3762_v52  ;;  %v2851_v29 = vmul.f32 %v8434_v36, %v10809_v45  ;;  %v8438_v62 = vunpack.c.h.bf16 %v9149_v2  ;;  %v9152_v54 = vld [vmem:[%s13709_s3 + $0x350] sm:$0xff]  }
 0x2e9   : > { %v3437_v9 = vpop.xlane.xlu1 %3436  ;;  %v3344_v46 = vpop.xlane.xlu0 %3343  ;;  %v3783_v2 = vsel %vm3158_vm0, %v2854_v0, 0.0  ;;  %v8449_v36 = vunpack.c.l.bf16 %v9152_v54 }
 0x2ea   : > { %v5696_v13 = vrot.slane %v3437_v9, %v11406_v37  ;;  %v5543_v17 = vrot.slane %v3344_v46, %v11441_v31  ;;  %v3774_v9 = vsel %vm3158_vm0, %v2851_v29, 0.0  ;;  %v2856_v46 = vmul.f32 %v8445_v11, %v10158_v25 }
 0x2ec   : > { %v5697_v16 = vsel %vm5295_vm12, %v5696_v13, %v11381_v57  ;;  %v11509_v1 = vsel %vm5302_vm13, %v5543_v17, %v5539_v38  ;;  %3778 = vadd.xlane.f32.xlu1 %v3777_v15  ;;  %3769 = vadd.xlane.f32.xlu0 %v3768_v34  ;;  %v2853_v57 = vmul.f32 %v8438_v62, %v10995_v63  ;;  %v8442_v13 = vunpack.c.h.bf16 %v9150_v33  ;;  %v11520_v38 = vld [vmem:[%s13709_s3 + $0x358] sm:$0xff]  }
 0x2ed   : > { %v3485_v43 = vpop.xlane.xlu1 %3484  ;;  %v3392_v52 = vpop.xlane.xlu0 %3391  ;;  %v2858_v33 = vmul.f32 %v8449_v36, %v10254_v6  ;;  %v8453_v62 = vunpack.c.l.bf16 %v11520_v38 }
 0x2ee   : > { %v5775_v61 = vrot.slane %v3485_v43, %v11406_v37  ;;  %v5622_v44 = vrot.slane %v3392_v52, %v11441_v31  ;;  %v11534_v43 = vld [vmem:[%s13709_s3 + $0x360] sm:$0xff]   ;;  %v2855_v52 = vmul.f32 %v8442_v13, %v10059_v14 }
 0x2ef   : > { %v3795_v13 = vsel %vm3158_vm0, %v2858_v33, 0.0 }
 0x2f0   : > { %v5776_v17 = vsel %vm5295_vm12, %v5775_v61, %v11396_v39  ;;  %v11525_v15 = vsel %vm5302_vm13, %v5622_v44, %v5618_v41  ;;  %3784 = vadd.xlane.f32.xlu1 %v3783_v2  ;;  %3775 = vadd.xlane.f32.xlu0 %v3774_v9  ;;  %v3789_v39 = vsel %vm3158_vm0, %v2856_v46, 0.0  ;;  %v3780_v41 = vsel %vm3158_vm0, %v2853_v57, 0.0 }
 0x2f1   : > { %v3533_v0 = vpop.xlane.xlu1 %3532  ;;  %v3440_v34 = vpop.xlane.xlu0 %3439  ;;  %v8446_v61 = vunpack.c.h.bf16 %v9151_v21  ;;  %v2860_v57 = vmul.f32 %v8453_v62, %v10330_v48  ;;  %v5304_v21 = vadd.s32 4294967184, %v10377_v42 }
 0x2f2   : > { %v5854_v11 = vrot.slane %v3533_v0, %v11406_v37  ;;  %v5701_v29 = vrot.slane %v3440_v34, %v11441_v31  ;;  %v8457_v0 = vunpack.c.l.bf16 %v11534_v43 }
 0x2f3   : > { %v3801_v40 = vsel %vm3158_vm0, %v2860_v57, 0.0 }
 0x2f4   : > { %v5855_v44 = vsel %vm5295_vm12, %v5854_v11, %v11419_v20  ;;  %v11542_v2 = vsel %vm5302_vm13, %v5701_v29, %v5697_v16  ;;  %3790 = vadd.xlane.f32.xlu1 %v3789_v39  ;;  %3781 = vadd.xlane.f32.xlu0 %v3780_v41  ;;  %v3786_v20 = vsel %vm3158_vm0, %v2855_v52, 0.0  ;;  %v2857_v16 = vmul.f32 %v8446_v61, %v10174_v23  ;;  %v9155_v29 = vld [vmem:[%s13709_s3 + $0x368] sm:$0xff]  }
 0x2f5   : > { %v3581_v36 = vpop.xlane.xlu1 %3580  ;;  %v3488_v9 = vpop.xlane.xlu0 %3487  ;;  %v8450_v11 = vunpack.c.h.bf16 %v9152_v54  ;;  %v2862_v33 = vmul.f32 %v8457_v0, %v10430_v32  ;;  %v11564_v61 = vsub.s32 %v5304_v21, %v10379_v30  ;;  %v9156_v21 = vld [vmem:[%s13709_s3 + $0x370] sm:$0xff]  }
 0x2f6   : > { %v5933_v34 = vrot.slane %v3581_v36, %v11406_v37  ;;  %v5780_v46 = vrot.slane %v3488_v9, %v11441_v31  ;;  %v8461_v9 = vunpack.c.l.bf16 %v9155_v29 }
 0x2f8   : > { %v5934_v39 = vsel %vm5295_vm12, %v5933_v34, %v11435_v27  ;;  %v11558_v41 = vsel %vm5302_vm13, %v5780_v46, %v5776_v17  ;;  %3796 = vadd.xlane.f32.xlu1 %v3795_v13  ;;  %3787 = vadd.xlane.f32.xlu0 %v3786_v20  ;;  %v3792_v27 = vsel %vm3158_vm0, %v2857_v16, 0.0  ;;  %v2859_v17 = vmul.f32 %v8450_v11, %v10271_v26 }
 0x2f9   : > { %v3629_v62 = vpop.xlane.xlu1 %3628  ;;  %v3536_v36 = vpop.xlane.xlu0 %3535  ;;  %v8454_v34 = vunpack.c.h.bf16 %v11520_v38  ;;  %v3807_v20 = vsel %vm3158_vm0, %v2862_v33, 0.0  ;;  %v8458_v33 = vunpack.c.h.bf16 %v11534_v43  ;;  %v8462_v43 = vunpack.c.h.bf16 %v9155_v29 }
 0x2fa   : > { %v6012_v52 = vrot.slane %v3629_v62, %v11406_v37  ;;  %v5859_v54 = vrot.slane %v3536_v36, %v11441_v31  ;;  %v3798_v11 = vsel %vm3158_vm0, %v2859_v17, 0.0  ;;  %v8465_v36 = vunpack.c.l.bf16 %v9156_v21 }
 0x2fb   : > { %v2861_v62 = vmul.f32 %v8454_v34, %v10347_v53 }
 0x2fc   : > { %v6013_v46 = vsel %vm5295_vm12, %v6012_v52, %v11452_v28  ;;  %v11573_v0 = vsel %vm5302_vm13, %v5859_v54, %v5855_v44  ;;  %3802 = vadd.xlane.f32.xlu1 %v3801_v40  ;;  %3793 = vadd.xlane.f32.xlu0 %v3792_v27  ;;  %v2864_v28 = vmul.f32 %v8461_v9, %v10589_v58  ;;  %v5311_v44 = vadd.s32 4294967176, %v10377_v42  ;;  %v11586_v40 = vld [vmem:[%s13709_s3 + $0x378] sm:$0xff]  }
 0x2fd   : > { %v3203_v57 = vpop.xlane.xlu1 %3202  ;;  %v3584_v13 = vpop.xlane.xlu0 %3583  ;;  %v8469_v27 = vunpack.c.l.bf16 %v11586_v40 }
 0x2fe   : > { %v5308_v16 = vrot.slane %v3203_v57, %v11564_v61  ;;  %v5938_v38 = vrot.slane %v3584_v13, %v11441_v31  ;;  %v11600_v34 = vsub.s32 %v5311_v44, %v10379_v30  ;;  %v3813_v13 = vsel %vm3158_vm0, %v2864_v28, 0.0  ;;  %v9158_v30 = vld [vmem:[%s13709_s3 + $0x380] sm:$0xff]  }
 0x300   : > { %v5310_v52 = vsel %vm5309_vm14, %v5308_v16, %v11467_v59  ;;  %v11594_v54 = vsel %vm5302_vm13, %v5938_v38, %v5934_v39  ;;  %3808 = vadd.xlane.f32.xlu1 %v3807_v20  ;;  %3799 = vadd.xlane.f32.xlu0 %v3798_v11  ;;  %v3804_v59 = vsel %vm3158_vm0, %v2861_v62, 0.0  ;;  %v2866_v39 = vmul.f32 %v8465_v36, %v10773_v55 }
 0x301   : > { %v3251_v42 = vpop.xlane.xlu1 %3250  ;;  %v3632_v9 = vpop.xlane.xlu0 %3631  ;;  %v2863_v20 = vmul.f32 %v8458_v33, %v10457_v3  ;;  %v2868_v62 = vmul.f32 %v8469_v27, %v10959_v5 }
 0x302   : > { %v5390_v57 = vrot.slane %v3251_v42, %v11564_v61  ;;  %v6017_v17 = vrot.slane %v3632_v9, %v11441_v31  ;;  %v3819_v36 = vsel %vm3158_vm0, %v2866_v39, 0.0  ;;  %v8473_v42 = vunpack.c.l.bf16 %v9158_v30 }
 0x303   : > { %v3810_v33 = vsel %vm3158_vm0, %v2863_v20, 0.0  ;;  %v8466_v9 = vunpack.c.h.bf16 %v9156_v21  ;;  %v8470_v20 = vunpack.c.h.bf16 %v11586_v40  ;;  %v3825_v21 = vsel %vm3158_vm0, %v2868_v62, 0.0 }
 0x304   : > { %v5391_v16 = vsel %vm5309_vm14, %v5390_v57, %v11481_v4  ;;  %v11609_v38 = vsel %vm5302_vm13, %v6017_v17, %v6013_v46  ;;  %3814 = vadd.xlane.f32.xlu1 %v3813_v13  ;;  %3805 = vadd.xlane.f32.xlu0 %v3804_v59  ;;  %v2865_v4 = vmul.f32 %v8462_v43, %v10624_v51  ;;  %v11621_v46 = vld [vmem:[%s13709_s3 + $0x388] sm:$0xff]  }
 0x305   : > { %v3299_v29 = vpop.xlane.xlu1 %3298  ;;  %v3206_v28 = vpop.xlane.xlu0 %3205  ;;  %v8477_v13 = vunpack.c.l.bf16 %v11621_v46 }
 0x306   : > { %v5469_v44 = vrot.slane %v3299_v29, %v11564_v61  ;;  %v5315_v11 = vrot.slane %v3206_v28, %v11600_v34  ;;  %v3816_v29 = vsel %vm3158_vm0, %v2865_v4, 0.0 }
 0x307   : > { %v2872_v4 = vmul.f32 %v8477_v13, %v10158_v25 }
 0x308   : > { %v5470_v57 = vsel %vm5309_vm14, %v5469_v44, %v11495_v19  ;;  %v5317_v17 = vsel %vm5316_vm15, %v5315_v11, %v5310_v52  ;;  %3820 = vadd.xlane.f32.xlu1 %v3819_v36  ;;  %3811 = vadd.xlane.f32.xlu0 %v3810_v33  ;;  %v2870_v19 = vmul.f32 %v8473_v42, %v10054_v8  ;;  %v9160_v11 = vld [vmem:[%s13709_s3 + $0x390] sm:$0xff]  }
 0x309   : > { %v3347_v27 = vpop.xlane.xlu1 %3346  ;;  %v3254_v43 = vpop.xlane.xlu0 %3253  ;;  %v2867_v52 = vmul.f32 %v8466_v9, %v10809_v45 }
 0x30a   : > { %v5548_v59 = vrot.slane %v3347_v27, %v11564_v61  ;;  %v5395_v39 = vrot.slane %v3254_v43, %v11600_v34  ;;  %v3831_v9 = vsel %vm3158_vm0, %v2870_v19, 0.0  ;;  %v8481_v27 = vunpack.c.l.bf16 %v9160_v11 }
 0x30b   : > { %v8474_v43 = vunpack.c.h.bf16 %v9158_v30  ;;  %v3837_v30 = vsel %vm3158_vm0, %v2872_v4, 0.0 }
 0x30c   : > { %v5549_v28 = vsel %vm5309_vm14, %v5548_v59, %v11509_v1  ;;  %v5396_v44 = vsel %vm5316_vm15, %v5395_v39, %v5391_v16  ;;  %3826 = vadd.xlane.f32.xlu1 %v3825_v21  ;;  %3817 = vadd.xlane.f32.xlu0 %v3816_v29  ;;  %v2869_v1 = vmul.f32 %v8470_v20, %v10995_v63  ;;  %v11650_v16 = vld [vmem:[%s13709_s3 + $0x398] sm:$0xff]  }
 0x30d   : > { %v7768_v40 = vsel %vm13718_vm3, %v5396_v44, %v5317_v17  ;;  %v3395_v62 = vpop.xlane.xlu1 %3394  ;;  %v3302_v36 = vpop.xlane.xlu0 %3301  ;;  %v3822_v17 = vsel %vm3158_vm0, %v2867_v52, 0.0  ;;  %v8485_v29 = vunpack.c.l.bf16 %v11650_v16 }
 0x30e   : > { %v5627_v33 = vrot.slane %v3395_v62, %v11564_v61  ;;  %v5474_v42 = vrot.slane %v3302_v36, %v11600_v34  ;;  %v3828_v52 = vsel %vm3158_vm0, %v2869_v1, 0.0  ;;  %v8478_v62 = vunpack.c.h.bf16 %v11621_v46 }
 0x310   : > { %v5628_v13 = vsel %vm5309_vm14, %v5627_v33, %v11525_v15  ;;  %v5475_v59 = vsel %vm5316_vm15, %v5474_v42, %v5470_v57  ;;  %3832 = vadd.xlane.f32.xlu1 %v3831_v9  ;;  %3823 = vadd.xlane.f32.xlu0 %v3822_v17  ;;  %v2874_v15 = vmul.f32 %v8481_v27, %v10254_v6 }
 0x311   : > { %v7770_v39 = vsel %vm13717_vm2, %v5475_v59, %v7768_v40  ;;  %v3443_v20 = vpop.xlane.xlu1 %3442  ;;  %v3350_v21 = vpop.xlane.xlu0 %3349  ;;  %v2871_v57 = vmul.f32 %v8474_v43, %v10059_v14  ;;  %v9162_v40 = vld [vmem:[%s13709_s3 + $0x3a0] sm:$0xff]   ;;  %v2876_v17 = vmul.f32 %v8485_v29, %v10330_v48  ;;  %v8482_v59 = vunpack.c.h.bf16 %v9160_v11 }
 0x312   : > { %v5706_v44 = vrot.slane %v3443_v20, %v11564_v61  ;;  %v5553_v19 = vrot.slane %v3350_v21, %v11600_v34  ;;  %v8489_v27 = vunpack.c.l.bf16 %v9162_v40  ;;  %v3843_v43 = vsel %vm3158_vm0, %v2874_v15, 0.0  ;;  %v9163_v21 = vld [vmem:[%s13709_s3 + $0x3a8] sm:$0xff]  }
 0x313   : > { %v3849_v11 = vsel %vm3158_vm0, %v2876_v17, 0.0  ;;  %v8486_v15 = vunpack.c.h.bf16 %v11650_v16 }
 0x314   : > { %v5707_v36 = vsel %vm5309_vm14, %v5706_v44, %v11542_v2  ;;  %v5554_v33 = vsel %vm5316_vm15, %v5553_v19, %v5549_v28  ;;  %3838 = vadd.xlane.f32.xlu1 %v3837_v30  ;;  %3829 = vadd.xlane.f32.xlu0 %v3828_v52  ;;  %v3834_v2 = vsel %vm3158_vm0, %v2871_v57, 0.0  ;;  %v2873_v28 = vmul.f32 %v8478_v62, %v10174_v23  ;;  %v9164_v57 = vld [vmem:[%s13709_s3 + $0x3b0] sm:$0xff]  }
 0x315   : > { %v11673_v4 = vsel %vm13721_vm1, %v5554_v33, %v7770_v39  ;;  %v3491_v42 = vpop.xlane.xlu1 %3490  ;;  %v3398_v1 = vpop.xlane.xlu0 %3397  ;;  %v2878_v30 = vmul.f32 %v8489_v27, %v10430_v32  ;;  %v8493_v52 = vunpack.c.l.bf16 %v9163_v21  ;;  %v2877_v27 = vmul.f32 %v8486_v15, %v10347_v53 }
 0x316   : > { %v5785_v9 = vrot.slane %v3491_v42, %v11564_v61  ;;  %v5632_v46 = vrot.slane %v3398_v1, %v11600_v34 }
 0x317   : > { %v2880_v16 = vmul.f32 %v8493_v52, %v10589_v58  ;;  %v9166_v52 = vld [vmem:[%s13709_s3 + $0x3c0] sm:$0xff]  }
 0x318   : > { %v11683_v39 = vsel %vm5309_vm14, %v5785_v9, %v11558_v41  ;;  %v11686_v20 = vsel %vm5316_vm15, %v5632_v46, %v5628_v13  ;;  %3844 = vadd.xlane.f32.xlu1 %v3843_v43  ;;  %3835 = vadd.xlane.f32.xlu0 %v3834_v2  ;;  %v3840_v41 = vsel %vm3158_vm0, %v2873_v28, 0.0  ;;  %v2875_v13 = vmul.f32 %v8482_v59, %v10271_v26 }
 0x319   : > { %13725 = vst [vmem:[#allocation3_spill] sm:$0xff] %v11683_v39  ;;  %v11691_v29 = vpop.xlane.xlu1 %3538  ;;  %v3446_v44 = vpop.xlane.xlu0 %3445  ;;  %v3855_v9 = vsel %vm3158_vm0, %v2878_v30, 0.0  ;;  %v8497_v46 = vunpack.c.l.bf16 %v9164_v57  ;;  %v8490_v43 = vunpack.c.h.bf16 %v9162_v40  ;;  %v3861_v30 = vsel %vm3158_vm0, %v2880_v16, 0.0 }
 0x31a   : > { %v5711_v19 = vrot.slane %v3446_v44, %v11600_v34  ;;  %v3846_v17 = vsel %vm3158_vm0, %v2875_v13, 0.0  ;;  %v3852_v40 = vsel %vm3158_vm0, %v2877_v27, 0.0  ;;  %v8494_v13 = vunpack.c.h.bf16 %v9163_v21 }
 0x31b   : > { %v8505_v16 = vunpack.c.l.bf16 %v9166_v52  ;;  %v8498_v27 = vunpack.c.h.bf16 %v9164_v57 }
 0x31c   : > { %v11703_v62 = vsel %vm5316_vm15, %v5711_v19, %v5707_v36  ;;  %3850 = vadd.xlane.f32.xlu1 %v3849_v11  ;;  %3841 = vadd.xlane.f32.xlu0 %v3840_v41  ;;  %v9165_v36 = vld [vmem:[%s13709_s3 + $0x3b8] sm:$0xff]   ;;  %v2882_v19 = vmul.f32 %v8497_v46, %v10773_v55  ;;  %v2879_v41 = vmul.f32 %v8490_v43, %v10457_v3  ;;  %v9167_v43 = vld [vmem:[%s13709_s3 + $0x3c8] sm:$0xff]  }
 0x31d   : > { %v3587_v33 = vpop.xlane.xlu1 %3586  ;;  %v11705_v42 = vpop.xlane.xlu0 %3493  ;;  %v8501_v11 = vunpack.c.l.bf16 %v9165_v36 }
 0x31e   : > { %v5943_v1 = vrot.slane %v3587_v33, %v11564_v61  ;;  %v3867_v46 = vsel %vm3158_vm0, %v2882_v19, 0.0  ;;  %v3858_v21 = vsel %vm3158_vm0, %v2879_v41, 0.0  ;;  %v8502_v41 = vunpack.c.h.bf16 %v9165_v36 }
 0x320   : > { %v5944_v2 = vsel %vm5309_vm14, %v5943_v1, %v11594_v54  ;;  %3856 = vadd.xlane.f32.xlu1 %v3855_v9  ;;  %3847 = vadd.xlane.f32.xlu0 %v3846_v17  ;;  %v2884_v17 = vmul.f32 %v8501_v11, %v10959_v5 }
 0x321   : > { %v3635_v28 = vpop.xlane.xlu1 %3634  ;;  %v11717_v59 = vpop.xlane.xlu0 %3541 }
 0x322   : > { %13726 = vst [vmem:[#allocation4_spill] sm:$0xff] %v11717_v59  ;;  %v6022_v44 = vrot.slane %v3635_v28, %v11564_v61 }
 0x324   : > { %v6023_v54 = vsel %vm5309_vm14, %v6022_v44, %v11609_v38  ;;  %3862 = vadd.xlane.f32.xlu1 %v3861_v30  ;;  %3853 = vadd.xlane.f32.xlu0 %v3852_v40  ;;  %v2881_v38 = vmul.f32 %v8494_v13, %v10624_v51  ;;  %v8509_v40 = vunpack.c.l.bf16 %v9167_v43  ;;  %v3873_v13 = vsel %vm3158_vm0, %v2884_v17, 0.0 }
 0x325   : > { %v3653_v15 = vpop.xlane.xlu1 %3652  ;;  %v3590_v33 = vpop.xlane.xlu0 %3589 }
 0x326   : > { %v6051_v1 = vrot.slane %v3653_v15, %v10714_v12  ;;  %v5948_v9 = vrot.slane %v3590_v33, %v11600_v34  ;;  %v3864_v57 = vsel %vm3158_vm0, %v2881_v38, 0.0  ;;  %v2886_v15 = vmul.f32 %v8505_v16, %v10054_v8 }
 0x327   : > { %v2883_v33 = vmul.f32 %v8498_v27, %v10809_v45  ;;  %v2888_v17 = vmul.f32 %v8509_v40, %v10158_v25 }
 0x328   : > { %v6052_v28 = vsel %vm5239_vm4, %v6051_v1, %v10769_v22  ;;  %v5949_v44 = vsel %vm5316_vm15, %v5948_v9, %v5944_v2  ;;  %3868 = vadd.xlane.f32.xlu1 %v3867_v46  ;;  %3859 = vadd.xlane.f32.xlu0 %v3858_v21  ;;  %v9168_v22 = vld [vmem:[%s13709_s3 + $0x3d0] sm:$0xff]   ;;  %v2885_v21 = vmul.f32 %v8502_v41, %v10995_v63  ;;  %v3879_v27 = vsel %vm3158_vm0, %v2886_v15, 0.0 }
 0x329   : > { %v3659_v19 = vpop.xlane.xlu1 %3658  ;;  %v3638_v30 = vpop.xlane.xlu0 %3637  ;;  %v8513_v38 = vunpack.c.l.bf16 %v9168_v22 }
 0x32a   : > { %v6027_v11 = vrot.slane %v3638_v30, %v11600_v34  ;;  %v6061_v16 = vrot.slane %v3659_v19, %v10900_v10  ;;  %v8506_v30 = vunpack.c.h.bf16 %v9166_v52  ;;  %v3885_v19 = vsel %vm3158_vm0, %v2888_v17, 0.0 }
 0x32b   : > { %v2890_v15 = vmul.f32 %v8513_v38, %v10254_v6 }
 0x32c   : > { %v6028_v2 = vsel %vm5316_vm15, %v6027_v11, %v6023_v54  ;;  %3874 = vadd.xlane.f32.xlu1 %v3873_v13  ;;  %3865 = vadd.xlane.f32.xlu0 %v3864_v57  ;;  %v3870_v54 = vsel %vm3158_vm0, %v2883_v33, 0.0 }
 0x32d   : > { %v11751_v1 = vsel %vm13718_vm3, %v6028_v2, %v5949_v44  ;;  %v3665_v36 = vpop.xlane.xlu1 %3664  ;;  %v3656_v9 = vpop.xlane.xlu0 %3655  ;;  %v9169_v44 = vld [vmem:[%s13709_s3 + $0x3d8] sm:$0xff]   ;;  %v3876_v2 = vsel %vm3158_vm0, %v2885_v21, 0.0  ;;  %vm13728_vm3 = vcmask 195712  }
 0x32e   : > { %v6056_v46 = vrot.slane %v3656_v9, %v10754_v24  ;;  %v8517_v33 = vunpack.c.l.bf16 %v9169_v44  ;;  %v6071_v52 = vrot.slane %v3665_v36, %v11086_v7  ;;  %v2887_v9 = vmul.f32 %v8506_v30, %v10059_v14 }
 0x32f   : > { %v3891_v36 = vsel %vm3158_vm0, %v2890_v15, 0.0 }
 0x330   : > { %v6057_v11 = vsel %vm5246_vm5, %v6056_v46, %v6052_v28  ;;  %3880 = vadd.xlane.f32.xlu1 %v3879_v27  ;;  %3871 = vadd.xlane.f32.xlu0 %v3870_v54  ;;  %v8510_v28 = vunpack.c.h.bf16 %v9167_v43  ;;  %v9170_v46 = vld [vmem:[%s13709_s3 + $0x3e0] sm:$0xff]   ;;  %v2892_v21 = vmul.f32 %v8517_v33, %v10330_v48 }
 0x331   : > { %v3671_v13 = vpop.xlane.xlu1 %3670  ;;  %v6062_v40 = vsel %vm5253_vm6, %v6061_v16, %v6057_v11  ;;  %v3662_v41 = vpop.xlane.xlu0 %3661  ;;  %v8521_v30 = vunpack.c.l.bf16 %v9170_v46  ;;  %v3882_v11 = vsel %vm3158_vm0, %v2887_v9, 0.0 }
 0x332   : > { %v6066_v57 = vrot.slane %v3662_v41, %v10940_v50  ;;  %v6081_v43 = vrot.slane %v3671_v13, %v11251_v35  ;;  %v2889_v41 = vmul.f32 %v8510_v28, %v10174_v23  ;;  %v3897_v13 = vsel %vm3158_vm0, %v2892_v21, 0.0 }
 0x333   : > { %v2894_v9 = vmul.f32 %v8521_v30, %v10430_v32 }
 0x334   : > { %v6067_v16 = vsel %vm5260_vm7, %v6066_v57, %v6062_v40  ;;  %3886 = vadd.xlane.f32.xlu1 %v3885_v19  ;;  %3877 = vadd.xlane.f32.xlu0 %v3876_v2  ;;  %v8514_v40 = vunpack.c.h.bf16 %v9168_v22  ;;  %v9171_v57 = vld [vmem:[%s13709_s3 + $0x3e8] sm:$0xff]  }
 0x335   : > { %v3677_v27 = vpop.xlane.xlu1 %3676  ;;  %v6072_v17 = vsel %vm5267_vm8, %v6071_v52, %v6067_v16  ;;  %v3668_v38 = vpop.xlane.xlu0 %3667  ;;  %v8525_v28 = vunpack.c.l.bf16 %v9171_v57  ;;  %v3888_v16 = vsel %vm3158_vm0, %v2889_v41, 0.0 }
 0x336   : > { %v6076_v54 = vrot.slane %v3668_v38, %v11126_v56  ;;  %v6091_v22 = vrot.slane %v3677_v27, %v11406_v37  ;;  %v2891_v38 = vmul.f32 %v8514_v40, %v10271_v26  ;;  %v3903_v27 = vsel %vm3158_vm0, %v2894_v9, 0.0 }
 0x337   : > { %v2896_v41 = vmul.f32 %v8525_v28, %v10589_v58 }
 0x338   : > { %v6077_v19 = vsel %vm5274_vm9, %v6076_v54, %v6072_v17  ;;  %3892 = vadd.xlane.f32.xlu1 %v3891_v36  ;;  %3883 = vadd.xlane.f32.xlu0 %v3882_v11  ;;  %v8518_v17 = vunpack.c.h.bf16 %v9169_v44  ;;  %v9172_v54 = vld [vmem:[%s13709_s3 + $0x3f0] sm:$0xff]  }
 0x339   : > { %v3683_v52 = vpop.xlane.xlu1 %3682  ;;  %v6082_v15 = vsel %vm5281_vm10, %v6081_v43, %v6077_v19  ;;  %v3674_v33 = vpop.xlane.xlu0 %3673  ;;  %v8529_v40 = vunpack.c.l.bf16 %v9172_v54  ;;  %v3894_v19 = vsel %vm3158_vm0, %v2891_v38, 0.0 }
 0x33a   : > { %v6086_v2 = vrot.slane %v3674_v33, %v11285_v60  ;;  %v6101_v44 = vrot.slane %v3683_v52, %v11564_v61  ;;  %v2893_v33 = vmul.f32 %v8518_v17, %v10347_v53  ;;  %v3909_v17 = vsel %vm3158_vm0, %v2896_v41, 0.0 }
 0x33b   : > { %v2898_v52 = vmul.f32 %v8529_v40, %v10773_v55 }
 0x33c   : > { %v6087_v36 = vsel %vm5288_vm11, %v6086_v2, %v6082_v15  ;;  %3898 = vadd.xlane.f32.xlu1 %v3897_v13  ;;  %3889 = vadd.xlane.f32.xlu0 %v3888_v16  ;;  %v8522_v15 = vunpack.c.h.bf16 %v9170_v46  ;;  %v9173_v2 = vld [vmem:[%s13709_s3 + $0x3f8] sm:$0xff]   ;;  %v11813_v46 = vld [vmem:[%s13709_s3 + $0x400] sm:$0xff]  }
 0x33d   : > { %v3689_v43 = vpop.xlane.xlu1 %3688  ;;  %v6092_v21 = vsel %vm5295_vm12, %v6091_v22, %v6087_v36  ;;  %v3680_v30 = vpop.xlane.xlu0 %3679  ;;  %v8533_v38 = vunpack.c.l.bf16 %v9173_v2  ;;  %v3900_v36 = vsel %vm3158_vm0, %v2893_v33, 0.0  ;;  %v3915_v33 = vsel %vm3158_vm0, %v2898_v52, 0.0 }
 0x33e   : > { %v6096_v11 = vrot.slane %v3680_v30, %v11441_v31  ;;  %v8526_v30 = vunpack.c.h.bf16 %v9171_v57 }
 0x33f   : > { %v2900_v57 = vmul.f32 %v8533_v38, %v10959_v5  ;;  %v13729_v38 = vld [vmem:[#allocation2_spill] sm:$0xff] }
 0x340   : > { %v6097_v13 = vsel %vm5302_vm13, %v6096_v11, %v6092_v21  ;;  %3904 = vadd.xlane.f32.xlu1 %v3903_v27  ;;  %3895 = vadd.xlane.f32.xlu0 %v3894_v19  ;;  %v2895_v21 = vmul.f32 %v8522_v15, %v10457_v3  ;;  %v8537_v19 = vunpack.c.l.bf16 %v11813_v46 }
 0x341   : > { %v3695_v22 = vpop.xlane.xlu1 %3694  ;;  %v6102_v9 = vsel %vm5309_vm14, %v6101_v44, %v6097_v13  ;;  %v3686_v28 = vpop.xlane.xlu0 %3685  ;;  %v6111_v13 = vrot.slane %v3689_v43, %v10393_v47 }
 0x342   : > { %v6106_v16 = vrot.slane %v3686_v28, %v11600_v34  ;;  %v6120_v15 = vrot.slane %v3695_v22, %v10529_v18  ;;  %v2897_v28 = vmul.f32 %v8526_v30, %v10624_v51  ;;  %v2902_v22 = vmul.f32 %v8537_v19, %v10054_v8 }
 0x343   : > { %v3921_v30 = vsel %vm3158_vm0, %v2900_v57, 0.0 }
 0x344   : > { %v6107_v11 = vsel %vm5316_vm15, %v6106_v16, %v6102_v9  ;;  %3910 = vadd.xlane.f32.xlu1 %v3909_v17  ;;  %3901 = vadd.xlane.f32.xlu0 %v3900_v36  ;;  %v3906_v9 = vsel %vm3158_vm0, %v2895_v21, 0.0  ;;  %v9175_v16 = vld [vmem:[%s13709_s3 + $0x408] sm:$0xff]   ;;  %v3912_v39 = vsel %vm3158_vm0, %v2897_v28, 0.0  ;;  %v3927_v57 = vsel %vm3158_vm0, %v2902_v22, 0.0 }
 0x345   : > { %v11821_v27 = vsel %vm13717_vm2, %v6107_v11, %v11751_v1  ;;  %v3701_v40 = vpop.xlane.xlu1 %3700  ;;  %v3692_v44 = vpop.xlane.xlu0 %3691  ;;  %v8530_v1 = vunpack.c.h.bf16 %v9172_v54  ;;  %vm13727_vm2 = vcmask 130112   ;;  %v8541_v21 = vunpack.c.l.bf16 %v9175_v16 }
 0x346   : > { %v6115_v41 = vrot.slane %v3692_v44, %v10396_v49  ;;  %v8534_v44 = vunpack.c.h.bf16 %v9173_v2  ;;  %v6130_v54 = vrot.slane %v3701_v40, %v10714_v12 }
 0x348   : > { %v6116_v17 = vsel %vm13727_vm2, %v6115_v41, %v6111_v13  ;;  %3916 = vadd.xlane.f32.xlu1 %v3915_v33  ;;  %3907 = vadd.xlane.f32.xlu0 %v3906_v9  ;;  %v2899_v13 = vmul.f32 %v8530_v1, %v10809_v45  ;;  %v9176_v41 = vld [vmem:[%s13709_s3 + $0x410] sm:$0xff]   ;;  %vm13730_vm2 = vcmask 261312   ;;  %v2904_v9 = vmul.f32 %v8541_v21, %v10158_v25 }
 0x349   : > { %v3707_v43 = vpop.xlane.xlu1 %3706  ;;  %v6121_v52 = vsel %vm13728_vm3, %v6120_v15, %v6116_v17  ;;  %v3698_v36 = vpop.xlane.xlu0 %3697  ;;  %v8545_v28 = vunpack.c.l.bf16 %v9176_v41  ;;  %vm13731_vm3 = vcmask 130112  }
 0x34a   : > { %v6125_v11 = vrot.slane %v3698_v36, %v13729_v38  ;;  %v6140_v1 = vrot.slane %v3707_v43, %v10900_v10  ;;  %v3918_v17 = vsel %vm3158_vm0, %v2899_v13, 0.0  ;;  %v2901_v36 = vmul.f32 %v8534_v44, %v10995_v63 }
 0x34b   : > { %v2906_v44 = vmul.f32 %v8545_v28, %v10254_v6 }
 0x34c   : > { %v6126_v33 = vsel %vm13730_vm2, %v6125_v11, %v6121_v52  ;;  %3922 = vadd.xlane.f32.xlu1 %v3921_v30  ;;  %3913 = vadd.xlane.f32.xlu0 %v3912_v39  ;;  %v8538_v52 = vunpack.c.h.bf16 %v11813_v46  ;;  %v9177_v39 = vld [vmem:[%s13709_s3 + $0x418] sm:$0xff]   ;;  %v3933_v30 = vsel %vm3158_vm0, %v2904_v9, 0.0  ;;  %vm13732_vm2 = vcmask 195712  }
 0x34d   : > { %v3713_v15 = vpop.xlane.xlu1 %3712  ;;  %v6131_v19 = vsel %vm5239_vm4, %v6130_v54, %v6126_v33  ;;  %v3704_v2 = vpop.xlane.xlu0 %3703  ;;  %v8549_v13 = vunpack.c.l.bf16 %v9177_v39  ;;  %v3924_v33 = vsel %vm3158_vm0, %v2901_v36, 0.0 }
 0x34e   : > { %v6135_v40 = vrot.slane %v3704_v2, %v10754_v24  ;;  %v6150_v46 = vrot.slane %v3713_v15, %v11086_v7  ;;  %v2903_v2 = vmul.f32 %v8538_v52, %v10059_v14  ;;  %v3939_v15 = vsel %vm3158_vm0, %v2906_v44, 0.0 }
 0x34f   : > { %v2908_v36 = vmul.f32 %v8549_v13, %v10330_v48 }
 0x350   : > { %v6136_v11 = vsel %vm5246_vm5, %v6135_v40, %v6131_v19  ;;  %3928 = vadd.xlane.f32.xlu1 %v3927_v57  ;;  %3919 = vadd.xlane.f32.xlu0 %v3918_v17  ;;  %v8542_v19 = vunpack.c.h.bf16 %v9175_v16  ;;  %v9178_v40 = vld [vmem:[%s13709_s3 + $0x420] sm:$0xff]  }
 0x351   : > { %v3719_v22 = vpop.xlane.xlu1 %3718  ;;  %v6141_v21 = vsel %vm5253_vm6, %v6140_v1, %v6136_v11  ;;  %v3710_v54 = vpop.xlane.xlu0 %3709  ;;  %v8553_v52 = vunpack.c.l.bf16 %v9178_v40  ;;  %v3930_v11 = vsel %vm3158_vm0, %v2903_v2, 0.0  ;;  %v8554_v59 = vunpack.c.h.bf16 %v9178_v40 }
 0x352   : > { %v6145_v43 = vrot.slane %v3710_v54, %v10940_v50  ;;  %v6160_v16 = vrot.slane %v3719_v22, %v11251_v35  ;;  %v2905_v54 = vmul.f32 %v8542_v19, %v10174_v23  ;;  %v3945_v22 = vsel %vm3158_vm0, %v2908_v36, 0.0 }
 0x353   : > { %v2910_v2 = vmul.f32 %v8553_v52, %v10430_v32 }
 0x354   : > { %v6146_v57 = vsel %vm5260_vm7, %v6145_v43, %v6141_v21  ;;  %3934 = vadd.xlane.f32.xlu1 %v3933_v30  ;;  %3925 = vadd.xlane.f32.xlu0 %v3924_v33  ;;  %v8546_v21 = vunpack.c.h.bf16 %v9176_v41  ;;  %v9179_v43 = vld [vmem:[%s13709_s3 + $0x428] sm:$0xff]   ;;  %v9180_v41 = vld [vmem:[%s13709_s3 + $0x430] sm:$0xff]  }
 0x355   : > { %v3725_v1 = vpop.xlane.xlu1 %3724  ;;  %v6151_v9 = vsel %vm5267_vm8, %v6150_v46, %v6146_v57  ;;  %v3716_v28 = vpop.xlane.xlu0 %3715  ;;  %v8557_v19 = vunpack.c.l.bf16 %v9179_v43 }
 0x356   : > { %v6155_v17 = vrot.slane %v3716_v28, %v11126_v56  ;;  %v6170_v57 = vrot.slane %v3725_v1, %v11406_v37  ;;  %v2907_v28 = vmul.f32 %v8546_v21, %v10271_v26 }
 0x358   : > { %v6156_v30 = vsel %vm5274_vm9, %v6155_v17, %v6151_v9  ;;  %3940 = vadd.xlane.f32.xlu1 %v3939_v15  ;;  %3931 = vadd.xlane.f32.xlu0 %v3930_v11  ;;  %v3936_v9 = vsel %vm3158_vm0, %v2905_v54, 0.0  ;;  %v8550_v17 = vunpack.c.h.bf16 %v9177_v39  ;;  %v8561_v11 = vunpack.c.l.bf16 %v9180_v41 }
 0x359   : > { %v3731_v46 = vpop.xlane.xlu1 %3730  ;;  %v6161_v44 = vsel %vm5281_vm10, %v6160_v16, %v6156_v30  ;;  %v3722_v13 = vpop.xlane.xlu0 %3721  ;;  %v3942_v54 = vsel %vm3158_vm0, %v2907_v28, 0.0  ;;  %v2912_v39 = vmul.f32 %v8557_v19, %v10589_v58  ;;  %v2911_v19 = vmul.f32 %v8554_v59, %v10457_v3 }
 0x35a   : > { %v6165_v33 = vrot.slane %v3722_v13, %v11285_v60  ;;  %v3951_v13 = vsel %vm3158_vm0, %v2910_v2, 0.0  ;;  %v6180_v1 = vrot.slane %v3731_v46, %v11564_v61  ;;  %v2909_v21 = vmul.f32 %v8550_v17, %v10347_v53 }
 0x35b   : > { %v2914_v46 = vmul.f32 %v8561_v11, %v10773_v55 }
 0x35c   : > { %v6166_v15 = vsel %vm5288_vm11, %v6165_v33, %v6161_v44  ;;  %3946 = vadd.xlane.f32.xlu1 %v3945_v22  ;;  %3937 = vadd.xlane.f32.xlu0 %v3936_v9  ;;  %v9181_v33 = vld [vmem:[%s13709_s3 + $0x438] sm:$0xff]   ;;  %v3957_v9 = vsel %vm3158_vm0, %v2912_v39, 0.0  ;;  %v3948_v28 = vsel %vm3158_vm0, %v2909_v21, 0.0  ;;  %v8562_v39 = vunpack.c.h.bf16 %v9180_v41 }
 0x35d   : > { %v3737_v16 = vpop.xlane.xlu1 %3736  ;;  %v6171_v36 = vsel %vm5295_vm12, %v6170_v57, %v6166_v15  ;;  %v3728_v52 = vpop.xlane.xlu0 %3727  ;;  %v8565_v17 = vunpack.c.l.bf16 %v9181_v33  ;;  %v8558_v15 = vunpack.c.h.bf16 %v9179_v43 }
 0x35e   : > { %v6175_v30 = vrot.slane %v3728_v52, %v11441_v31 }
 0x360   : > { %v6176_v44 = vsel %vm5302_vm13, %v6175_v30, %v6171_v36  ;;  %3952 = vadd.xlane.f32.xlu1 %v3951_v13  ;;  %3943 = vadd.xlane.f32.xlu0 %v3942_v54  ;;  %v9182_v36 = vld [vmem:[%s13709_s3 + $0x440] sm:$0xff]   ;;  %v3963_v13 = vsel %vm3158_vm0, %v2914_v46, 0.0 }
 0x361   : > { %v3743_v22 = vpop.xlane.xlu1 %3742  ;;  %v6181_v2 = vsel %vm5309_vm14, %v6180_v1, %v6176_v44  ;;  %v3734_v40 = vpop.xlane.xlu0 %3733  ;;  %v6190_v1 = vrot.slane %v3737_v16, %v10393_v47  ;;  %v8569_v54 = vunpack.c.l.bf16 %v9182_v36  ;;  %v3954_v44 = vsel %vm3158_vm0, %v2911_v19, 0.0 }
 0x362   : > { %v6185_v57 = vrot.slane %v3734_v40, %v11600_v34  ;;  %v6199_v21 = vrot.slane %v3743_v22, %v10529_v18  ;;  %v2913_v40 = vmul.f32 %v8558_v15, %v10624_v51 }
 0x363   : > { %v2918_v19 = vmul.f32 %v8569_v54, %v10054_v8 }
 0x364   : > { %v6186_v52 = vsel %vm5316_vm15, %v6185_v57, %v6181_v2  ;;  %3958 = vadd.xlane.f32.xlu1 %v3957_v9  ;;  %3949 = vadd.xlane.f32.xlu0 %v3948_v28  ;;  %v2916_v2 = vmul.f32 %v8565_v17, %v10959_v5  ;;  %v2915_v9 = vmul.f32 %v8562_v39, %v10809_v45 }
 0x365   : > { %v11914_v11 = vsel %vm13721_vm1, %v6186_v52, %v11821_v27  ;;  %v3749_v30 = vpop.xlane.xlu1 %3748  ;;  %v3740_v59 = vpop.xlane.xlu0 %3739  ;;  %v9183_v27 = vld [vmem:[%s13709_s3 + $0x448] sm:$0xff]   ;;  %v3960_v52 = vsel %vm3158_vm0, %v2913_v40, 0.0  ;;  %vm13761_vm1 = vcmask 195712  }
 0x366   : > { %v6194_v43 = vrot.slane %v3740_v59, %v10396_v49  ;;  %v8573_v28 = vunpack.c.l.bf16 %v9183_v27  ;;  %v6209_v17 = vrot.slane %v3749_v30, %v10714_v12  ;;  %v3969_v15 = vsel %vm3158_vm0, %v2916_v2, 0.0 }
 0x367   : > { %v8566_v59 = vunpack.c.h.bf16 %v9181_v33  ;;  %v3975_v30 = vsel %vm3158_vm0, %v2918_v19, 0.0 }
 0x368   : > { %v6195_v46 = vsel %vm13731_vm3, %v6194_v43, %v6190_v1  ;;  %3964 = vadd.xlane.f32.xlu1 %v3963_v13  ;;  %3955 = vadd.xlane.f32.xlu0 %v3954_v44  ;;  %vm13733_vm3 = vcmask 261312   ;;  %v9184_v1 = vld [vmem:[%s13709_s3 + $0x450] sm:$0xff]   ;;  %v3966_v44 = vsel %vm3158_vm0, %v2915_v9, 0.0  ;;  %v2920_v33 = vmul.f32 %v8573_v28, %v10158_v25 }
 0x369   : > { %v3755_v16 = vpop.xlane.xlu1 %3754  ;;  %v6200_v57 = vsel %vm13732_vm2, %v6199_v21, %v6195_v46  ;;  %v3746_v41 = vpop.xlane.xlu0 %3745  ;;  %v2917_v40 = vmul.f32 %v8566_v59, %v10995_v63  ;;  %v8577_v46 = vunpack.c.l.bf16 %v9184_v1  ;;  %vm13735_vm2 = vcmask 130112  }
 0x36a   : > { %v6204_v22 = vrot.slane %v3746_v41, %v13729_v38  ;;  %v6219_v2 = vrot.slane %v3755_v16, %v10900_v10  ;;  %v9185_v41 = vld [vmem:[%s13709_s3 + $0x458] sm:$0xff]   ;;  %v3981_v16 = vsel %vm3158_vm0, %v2920_v33, 0.0 }
 0x36b   : > { %v3972_v59 = vsel %vm3158_vm0, %v2917_v40, 0.0 }
 0x36c   : > { %v6205_v13 = vsel %vm13733_vm3, %v6204_v22, %v6200_v57  ;;  %3970 = vadd.xlane.f32.xlu1 %v3969_v15  ;;  %3961 = vadd.xlane.f32.xlu0 %v3960_v52  ;;  %v8570_v57 = vunpack.c.h.bf16 %v9182_v36  ;;  %v8581_v15 = vunpack.c.l.bf16 %v9185_v41  ;;  %v8574_v52 = vunpack.c.h.bf16 %v9183_v27 }
 0x36d   : > { %v3761_v43 = vpop.xlane.xlu1 %3760  ;;  %v6210_v54 = vsel %vm5239_vm4, %v6209_v17, %v6205_v13  ;;  %v3752_v39 = vpop.xlane.xlu0 %3751  ;;  %v2922_v13 = vmul.f32 %v8577_v46, %v10254_v6  ;;  %vm13736_vm3 = vcmask 195712  }
 0x36e   : > { %v6214_v21 = vrot.slane %v3752_v39, %v10754_v24  ;;  %v6229_v36 = vrot.slane %v3761_v43, %v11086_v7  ;;  %v9186_v39 = vld [vmem:[%s13709_s3 + $0x460] sm:$0xff]   ;;  %v2924_v33 = vmul.f32 %v8581_v15, %v10330_v48 }
 0x36f   : > { %v8585_v40 = vunpack.c.l.bf16 %v9186_v39 }
 0x370   : > { %v6215_v22 = vsel %vm5246_vm5, %v6214_v21, %v6210_v54  ;;  %3976 = vadd.xlane.f32.xlu1 %v3975_v30  ;;  %3967 = vadd.xlane.f32.xlu0 %v3966_v44  ;;  %v2919_v54 = vmul.f32 %v8570_v57, %v10059_v14  ;;  %v3987_v57 = vsel %vm3158_vm0, %v2922_v13, 0.0 }
 0x371   : > { %v3767_v17 = vpop.xlane.xlu1 %3766  ;;  %v6220_v19 = vsel %vm5253_vm6, %v6219_v2, %v6215_v22  ;;  %v3758_v9 = vpop.xlane.xlu0 %3757  ;;  %v2921_v2 = vmul.f32 %v8574_v52, %v10174_v23 }
 0x372   : > { %v6224_v28 = vrot.slane %v3758_v9, %v10940_v50  ;;  %v6239_v46 = vrot.slane %v3767_v17, %v11251_v35  ;;  %v3978_v22 = vsel %vm3158_vm0, %v2919_v54, 0.0  ;;  %v3993_v17 = vsel %vm3158_vm0, %v2924_v33, 0.0 }
 0x374   : > { %v6225_v21 = vsel %vm5260_vm7, %v6224_v28, %v6220_v19  ;;  %3982 = vadd.xlane.f32.xlu1 %v3981_v16  ;;  %3973 = vadd.xlane.f32.xlu0 %v3972_v59  ;;  %v8578_v19 = vunpack.c.h.bf16 %v9184_v1  ;;  %v9187_v28 = vld [vmem:[%s13709_s3 + $0x468] sm:$0xff]   ;;  %v3984_v59 = vsel %vm3158_vm0, %v2921_v2, 0.0  ;;  %v2926_v1 = vmul.f32 %v8585_v40, %v10430_v32 }
 0x375   : > { %v3773_v30 = vpop.xlane.xlu1 %3772  ;;  %v6230_v44 = vsel %vm5267_vm8, %v6229_v36, %v6225_v21  ;;  %v3764_v27 = vpop.xlane.xlu0 %3763  ;;  %v8589_v21 = vunpack.c.l.bf16 %v9187_v28 }
 0x376   : > { %v6234_v43 = vrot.slane %v3764_v27, %v11126_v56  ;;  %v6249_v13 = vrot.slane %v3773_v30, %v11406_v37  ;;  %v2923_v54 = vmul.f32 %v8578_v19, %v10271_v26  ;;  %v9188_v27 = vld [vmem:[%s13709_s3 + $0x470] sm:$0xff]   ;;  %v3999_v30 = vsel %vm3158_vm0, %v2926_v1, 0.0 }
 0x378   : > { %v6235_v9 = vsel %vm5274_vm9, %v6234_v43, %v6230_v44  ;;  %3988 = vadd.xlane.f32.xlu1 %v3987_v57  ;;  %3979 = vadd.xlane.f32.xlu0 %v3978_v22  ;;  %v8582_v44 = vunpack.c.h.bf16 %v9185_v41  ;;  %v8593_v57 = vunpack.c.l.bf16 %v9188_v27  ;;  %v8586_v22 = vunpack.c.h.bf16 %v9186_v39  ;;  %v9189_v41 = vld [vmem:[%s13709_s3 + $0x478] sm:$0xff]  }
 0x379   : > { %v3779_v16 = vpop.xlane.xlu1 %3778  ;;  %v6240_v15 = vsel %vm5281_vm10, %v6239_v46, %v6235_v9  ;;  %v3770_v52 = vpop.xlane.xlu0 %3769  ;;  %v3990_v9 = vsel %vm3158_vm0, %v2923_v54, 0.0  ;;  %v8597_v1 = vunpack.c.l.bf16 %v9189_v41 }
 0x37a   : > { %v6244_v36 = vrot.slane %v3770_v52, %v11285_v60  ;;  %v6259_v19 = vrot.slane %v3779_v16, %v11564_v61  ;;  %v2925_v52 = vmul.f32 %v8582_v44, %v10347_v53  ;;  %v2927_v16 = vmul.f32 %v8586_v22, %v10457_v3 }
 0x37b   : > { %v8590_v44 = vunpack.c.h.bf16 %v9187_v28 }
 0x37c   : > { %v6245_v43 = vsel %vm5288_vm11, %v6244_v36, %v6240_v15  ;;  %3994 = vadd.xlane.f32.xlu1 %v3993_v17  ;;  %3985 = vadd.xlane.f32.xlu0 %v3984_v59  ;;  %v2928_v15 = vmul.f32 %v8589_v21, %v10589_v58  ;;  %v3996_v21 = vsel %vm3158_vm0, %v2925_v52, 0.0  ;;  %v4002_v28 = vsel %vm3158_vm0, %v2927_v16, 0.0 }
 0x37d   : > { %v3785_v46 = vpop.xlane.xlu1 %3784  ;;  %v6250_v33 = vsel %vm5295_vm12, %v6249_v13, %v6245_v43  ;;  %v3776_v2 = vpop.xlane.xlu0 %3775  ;;  %v2930_v43 = vmul.f32 %v8593_v57, %v10773_v55  ;;  %v2932_v57 = vmul.f32 %v8597_v1, %v10959_v5  ;;  %v2929_v52 = vmul.f32 %v8590_v44, %v10624_v51 }
 0x37e   : > { %v6254_v40 = vrot.slane %v3776_v2, %v11441_v31  ;;  %v4005_v54 = vsel %vm3158_vm0, %v2928_v15, 0.0  ;;  %v9190_v2 = vld [vmem:[%s13709_s3 + $0x480] sm:$0xff]   ;;  %v6269_v22 = vrot.slane %v3785_v46, %v10393_v47 }
 0x37f   : > { %v4008_v44 = vsel %vm3158_vm0, %v2929_v52, 0.0 }
 0x380   : > { %v6255_v36 = vsel %vm5302_vm13, %v6254_v40, %v6250_v33  ;;  %4000 = vadd.xlane.f32.xlu1 %v3999_v30  ;;  %3991 = vadd.xlane.f32.xlu0 %v3990_v9  ;;  %v4011_v9 = vsel %vm3158_vm0, %v2930_v43, 0.0 }
 0x381   : > { %v3791_v17 = vpop.xlane.xlu1 %3790  ;;  %v6260_v59 = vsel %vm5309_vm14, %v6259_v19, %v6255_v36  ;;  %v3782_v39 = vpop.xlane.xlu0 %3781  ;;  %v8601_v36 = vunpack.c.l.bf16 %v9190_v2 }
 0x382   : > { %v6264_v13 = vrot.slane %v3782_v39, %v11600_v34  ;;  %v6278_v15 = vrot.slane %v3791_v17, %v10529_v18  ;;  %v9191_v39 = vld [vmem:[%s13709_s3 + $0x488] sm:$0xff]   ;;  %v4017_v17 = vsel %vm3158_vm0, %v2932_v57, 0.0 }
 0x384   : > { %v12000_v33 = vsel %vm5316_vm15, %v6264_v13, %v6260_v59  ;;  %4006 = vadd.xlane.f32.xlu1 %v4005_v54  ;;  %3997 = vadd.xlane.f32.xlu0 %v3996_v21  ;;  %v8594_v59 = vunpack.c.h.bf16 %v9188_v27  ;;  %v8605_v54 = vunpack.c.l.bf16 %v9191_v39  ;;  %v8598_v21 = vunpack.c.h.bf16 %v9189_v41 }
 0x385   : > { %13734 = vst [vmem:[#allocation2_spill] sm:$0xff] %v12000_v33  ;;  %v3797_v40 = vpop.xlane.xlu1 %3796  ;;  %v3788_v30 = vpop.xlane.xlu0 %3787 }
 0x386   : > { %v6273_v19 = vrot.slane %v3788_v30, %v10396_v49  ;;  %v6288_v27 = vrot.slane %v3797_v40, %v10714_v12  ;;  %v2934_v30 = vmul.f32 %v8601_v36, %v10054_v8  ;;  %v2933_v52 = vmul.f32 %v8598_v21, %v10995_v63 }
 0x388   : > { %v6274_v1 = vsel %vm13735_vm2, %v6273_v19, %v6269_v22  ;;  %4012 = vadd.xlane.f32.xlu1 %v4011_v9  ;;  %4003 = vadd.xlane.f32.xlu0 %v4002_v28  ;;  %v2931_v22 = vmul.f32 %v8594_v59, %v10809_v45  ;;  %v9192_v19 = vld [vmem:[%s13709_s3 + $0x490] sm:$0xff]   ;;  %vm13737_vm2 = vcmask 261312  }
 0x389   : > { %v3803_v46 = vpop.xlane.xlu1 %3802  ;;  %v6279_v13 = vsel %vm13736_vm3, %v6278_v15, %v6274_v1  ;;  %v3794_v43 = vpop.xlane.xlu0 %3793  ;;  %v2936_v15 = vmul.f32 %v8605_v54, %v10158_v25  ;;  %v8609_v36 = vunpack.c.l.bf16 %v9192_v19  ;;  %v4023_v1 = vsel %vm3158_vm0, %v2934_v30, 0.0 }
 0x38a   : > { %v6283_v16 = vrot.slane %v3794_v43, %v13729_v38  ;;  %v6298_v59 = vrot.slane %v3803_v46, %v10900_v10  ;;  %v4014_v43 = vsel %vm3158_vm0, %v2931_v22, 0.0  ;;  %v4020_v30 = vsel %vm3158_vm0, %v2933_v52, 0.0 }
 0x38b   : > { %v4029_v46 = vsel %vm3158_vm0, %v2936_v15, 0.0  ;;  %vm13739_vm3 = vcmask 130112  }
 0x38c   : > { %v6284_v9 = vsel %vm13737_vm2, %v6283_v16, %v6279_v13  ;;  %4018 = vadd.xlane.f32.xlu1 %v4017_v17  ;;  %4009 = vadd.xlane.f32.xlu0 %v4008_v44  ;;  %v8602_v13 = vunpack.c.h.bf16 %v9190_v2  ;;  %v9193_v17 = vld [vmem:[%s13709_s3 + $0x498] sm:$0xff]   ;;  %v2938_v2 = vmul.f32 %v8609_v36, %v10254_v6  ;;  %vm13740_vm2 = vcmask 195712  }
 0x38d   : > { %v3809_v28 = vpop.xlane.xlu1 %3808  ;;  %v6289_v57 = vsel %vm5239_vm4, %v6288_v27, %v6284_v9  ;;  %v3800_v41 = vpop.xlane.xlu0 %3799 }
 0x38e   : > { %v6293_v40 = vrot.slane %v3800_v41, %v10754_v24  ;;  %v6308_v22 = vrot.slane %v3809_v28, %v11086_v7  ;;  %v2935_v9 = vmul.f32 %v8602_v13, %v10059_v14  ;;  %v8606_v41 = vunpack.c.h.bf16 %v9191_v39 }
 0x38f   : > { %v4035_v28 = vsel %vm3158_vm0, %v2938_v2, 0.0  ;;  %v8610_v13 = vunpack.c.h.bf16 %v9192_v19 }
 0x390   : > { %v6294_v16 = vsel %vm5246_vm5, %v6293_v40, %v6289_v57  ;;  %4024 = vadd.xlane.f32.xlu1 %v4023_v1  ;;  %4015 = vadd.xlane.f32.xlu0 %v4014_v43  ;;  %v8613_v57 = vunpack.c.l.bf16 %v9193_v17  ;;  %v9194_v40 = vld [vmem:[%s13709_s3 + $0x4a0] sm:$0xff]  }
 0x391   : > { %v3815_v27 = vpop.xlane.xlu1 %3814  ;;  %v6299_v54 = vsel %vm5253_vm6, %v6298_v59, %v6294_v16  ;;  %v3806_v21 = vpop.xlane.xlu0 %3805  ;;  %v8617_v43 = vunpack.c.l.bf16 %v9194_v40  ;;  %v4026_v16 = vsel %vm3158_vm0, %v2935_v9, 0.0  ;;  %v2939_v9 = vmul.f32 %v8610_v13, %v10271_v26 }
 0x392   : > { %v6303_v44 = vrot.slane %v3806_v21, %v10940_v50  ;;  %v6318_v39 = vrot.slane %v3815_v27, %v11251_v35  ;;  %v2940_v21 = vmul.f32 %v8613_v57, %v10330_v48 }
 0x394   : > { %v6304_v59 = vsel %vm5260_vm7, %v6303_v44, %v6299_v54  ;;  %4030 = vadd.xlane.f32.xlu1 %v4029_v46  ;;  %4021 = vadd.xlane.f32.xlu0 %v4020_v30  ;;  %v2937_v54 = vmul.f32 %v8606_v41, %v10174_v23  ;;  %v9195_v44 = vld [vmem:[%s13709_s3 + $0x4a8] sm:$0xff]  }
 0x395   : > { %v3821_v1 = vpop.xlane.xlu1 %3820  ;;  %v6309_v15 = vsel %vm5267_vm8, %v6308_v22, %v6304_v59  ;;  %v3812_v52 = vpop.xlane.xlu0 %3811  ;;  %v2942_v22 = vmul.f32 %v8617_v43, %v10430_v32  ;;  %v8621_v57 = vunpack.c.l.bf16 %v9195_v44  ;;  %v4041_v59 = vsel %vm3158_vm0, %v2940_v21, 0.0 }
 0x396   : > { %v6313_v36 = vrot.slane %v3812_v52, %v11126_v56  ;;  %v6328_v41 = vrot.slane %v3821_v1, %v11406_v37  ;;  %v4032_v52 = vsel %vm3158_vm0, %v2937_v54, 0.0  ;;  %v4038_v21 = vsel %vm3158_vm0, %v2939_v9, 0.0  ;;  %v9197_v54 = vld [vmem:[%s13709_s3 + $0x4b8] sm:$0xff]  }
 0x397   : > { %v4047_v1 = vsel %vm3158_vm0, %v2942_v22, 0.0 }
 0x398   : > { %v6314_v46 = vsel %vm5274_vm9, %v6313_v36, %v6309_v15  ;;  %4036 = vadd.xlane.f32.xlu1 %v4035_v28  ;;  %4027 = vadd.xlane.f32.xlu0 %v4026_v16  ;;  %v8614_v15 = vunpack.c.h.bf16 %v9193_v17  ;;  %v9196_v28 = vld [vmem:[%s13709_s3 + $0x4b0] sm:$0xff]   ;;  %v2944_v17 = vmul.f32 %v8621_v57, %v10589_v58 }
 0x399   : > { %v3827_v30 = vpop.xlane.xlu1 %3826  ;;  %v6319_v2 = vsel %vm5281_vm10, %v6318_v39, %v6314_v46  ;;  %v3818_v19 = vpop.xlane.xlu0 %3817 }
 0x39a   : > { %v6323_v27 = vrot.slane %v3818_v19, %v11285_v60  ;;  %v6338_v46 = vrot.slane %v3827_v30, %v11564_v61  ;;  %v8625_v19 = vunpack.c.l.bf16 %v9196_v28 }
 0x39c   : > { %v6324_v36 = vsel %vm5288_vm11, %v6323_v27, %v6319_v2  ;;  %4042 = vadd.xlane.f32.xlu1 %v4041_v59  ;;  %4033 = vadd.xlane.f32.xlu0 %v4032_v52  ;;  %v2941_v2 = vmul.f32 %v8614_v15, %v10347_v53  ;;  %v8618_v27 = vunpack.c.h.bf16 %v9194_v40  ;;  %v8629_v52 = vunpack.c.l.bf16 %v9197_v54 }
 0x39d   : > { %v3833_v39 = vpop.xlane.xlu1 %3832  ;;  %v6329_v43 = vsel %vm5295_vm12, %v6328_v41, %v6324_v36  ;;  %v3824_v13 = vpop.xlane.xlu0 %3823  ;;  %v4053_v36 = vsel %vm3158_vm0, %v2944_v17, 0.0  ;;  %v2946_v30 = vmul.f32 %v8625_v19, %v10773_v55  ;;  %v8622_v40 = vunpack.c.h.bf16 %v9195_v44 }
 0x39e   : > { %v6333_v16 = vrot.slane %v3824_v13, %v11441_v31  ;;  %v4044_v13 = vsel %vm3158_vm0, %v2941_v2, 0.0  ;;  %v2943_v15 = vmul.f32 %v8618_v27, %v10457_v3  ;;  %v2948_v17 = vmul.f32 %v8629_v52, %v10959_v5 }
 0x39f   : > { %v8626_v27 = vunpack.c.h.bf16 %v9196_v28 }
 0x3a0   : > { %v6334_v41 = vsel %vm5302_vm13, %v6333_v16, %v6329_v43  ;;  %4048 = vadd.xlane.f32.xlu1 %v4047_v1  ;;  %4039 = vadd.xlane.f32.xlu0 %v4038_v21  ;;  %v9198_v43 = vld [vmem:[%s13709_s3 + $0x4c0] sm:$0xff]  }
 0x3a1   : > { %v3839_v59 = vpop.xlane.xlu1 %3838  ;;  %v6339_v22 = vsel %vm5309_vm14, %v6338_v46, %v6334_v41  ;;  %v3830_v9 = vpop.xlane.xlu0 %3829  ;;  %v6348_v46 = vrot.slane %v3833_v39, %v10393_v47  ;;  %v8633_v19 = vunpack.c.l.bf16 %v9198_v43  ;;  %v4059_v41 = vsel %vm3158_vm0, %v2946_v30, 0.0  ;;  %v9199_v39 = vld [vmem:[%s13709_s3 + $0x4c8] sm:$0xff]  }
 0x3a2   : > { %v6343_v57 = vrot.slane %v3830_v9, %v11600_v34  ;;  %v6357_v44 = vrot.slane %v3839_v59, %v10529_v18  ;;  %v4050_v9 = vsel %vm3158_vm0, %v2943_v15, 0.0  ;;  %v2947_v15 = vmul.f32 %v8626_v27, %v10809_v45 }
 0x3a3   : > { %v2950_v30 = vmul.f32 %v8633_v19, %v10054_v8 }
 0x3a4   : > { %v12092_v16 = vsel %vm5316_vm15, %v6343_v57, %v6339_v22  ;;  %4054 = vadd.xlane.f32.xlu1 %v4053_v36  ;;  %4045 = vadd.xlane.f32.xlu0 %v4044_v13  ;;  %v2945_v22 = vmul.f32 %v8622_v40, %v10624_v51  ;;  %v4065_v13 = vsel %vm3158_vm0, %v2948_v17, 0.0 }
 0x3a5   : > { %13738 = vst [vmem:[#allocation5_spill] sm:$0xff] %v12092_v16  ;;  %v3845_v1 = vpop.xlane.xlu1 %3844  ;;  %v3836_v21 = vpop.xlane.xlu0 %3835 }
 0x3a6   : > { %v6352_v2 = vrot.slane %v3836_v21, %v10396_v49  ;;  %v6367_v40 = vrot.slane %v3845_v1, %v10714_v12  ;;  %v4056_v21 = vsel %vm3158_vm0, %v2945_v22, 0.0  ;;  %v4071_v1 = vsel %vm3158_vm0, %v2950_v30, 0.0 }
 0x3a7   : > { %v4062_v22 = vsel %vm3158_vm0, %v2947_v15, 0.0 }
 0x3a8   : > { %v6353_v57 = vsel %vm13739_vm3, %v6352_v2, %v6348_v46  ;;  %4060 = vadd.xlane.f32.xlu1 %v4059_v41  ;;  %4051 = vadd.xlane.f32.xlu0 %v4050_v9  ;;  %v8637_v46 = vunpack.c.l.bf16 %v9199_v39  ;;  %v8630_v2 = vunpack.c.h.bf16 %v9197_v54  ;;  %v9200_v41 = vld [vmem:[%s13709_s3 + $0x4d0] sm:$0xff]   ;;  %vm13741_vm3 = vcmask 261312  }
 0x3a9   : > { %v3851_v52 = vpop.xlane.xlu1 %3850  ;;  %v6358_v36 = vsel %vm13740_vm2, %v6357_v44, %v6353_v57  ;;  %v3842_v28 = vpop.xlane.xlu0 %3841  ;;  %v8641_v57 = vunpack.c.l.bf16 %v9200_v41  ;;  %vm13745_vm2 = vcmask 130112  }
 0x3aa   : > { %v6362_v59 = vrot.slane %v3842_v28, %v13729_v38  ;;  %v6377_v54 = vrot.slane %v3851_v52, %v10900_v10  ;;  %v2952_v28 = vmul.f32 %v8637_v46, %v10158_v25  ;;  %v2949_v16 = vmul.f32 %v8630_v2, %v10995_v63 }
 0x3ab   : > { %v2954_v52 = vmul.f32 %v8641_v57, %v10254_v6 }
 0x3ac   : > { %v6363_v44 = vsel %vm13741_vm3, %v6362_v59, %v6358_v36  ;;  %4066 = vadd.xlane.f32.xlu1 %v4065_v13  ;;  %4057 = vadd.xlane.f32.xlu0 %v4056_v21  ;;  %v8634_v36 = vunpack.c.h.bf16 %v9198_v43  ;;  %v9201_v59 = vld [vmem:[%s13709_s3 + $0x4d8] sm:$0xff]   ;;  %v4077_v2 = vsel %vm3158_vm0, %v2952_v28, 0.0  ;;  %vm13746_vm3 = vcmask 195712  }
 0x3ad   : > { %v3857_v9 = vpop.xlane.xlu1 %3856  ;;  %v6368_v17 = vsel %vm5239_vm4, %v6367_v40, %v6363_v44  ;;  %v3848_v19 = vpop.xlane.xlu0 %3847  ;;  %v8645_v46 = vunpack.c.l.bf16 %v9201_v59  ;;  %v8638_v44 = vunpack.c.h.bf16 %v9199_v39 }
 0x3ae   : > { %v6372_v27 = vrot.slane %v3848_v19, %v10754_v24  ;;  %v6387_v43 = vrot.slane %v3857_v9, %v11086_v7  ;;  %v4068_v19 = vsel %vm3158_vm0, %v2949_v16, 0.0 }
 0x3af   : > { %v2956_v16 = vmul.f32 %v8645_v46, %v10330_v48  ;;  %v2953_v28 = vmul.f32 %v8638_v44, %v10174_v23 }
 0x3b0   : > { %v6373_v13 = vsel %vm5246_vm5, %v6372_v27, %v6368_v17  ;;  %4072 = vadd.xlane.f32.xlu1 %v4071_v1  ;;  %4063 = vadd.xlane.f32.xlu0 %v4062_v22  ;;  %v2951_v17 = vmul.f32 %v8634_v36, %v10059_v14  ;;  %v9202_v1 = vld [vmem:[%s13709_s3 + $0x4e0] sm:$0xff]  }
 0x3b1   : > { %v3863_v40 = vpop.xlane.xlu1 %3862  ;;  %v6378_v30 = vsel %vm5253_vm6, %v6377_v54, %v6373_v13  ;;  %v3854_v15 = vpop.xlane.xlu0 %3853  ;;  %v4083_v54 = vsel %vm3158_vm0, %v2954_v52, 0.0 }
 0x3b2   : > { %v6382_v21 = vrot.slane %v3854_v15, %v10940_v50  ;;  %v6397_v36 = vrot.slane %v3863_v40, %v11251_v35  ;;  %v4074_v13 = vsel %vm3158_vm0, %v2951_v17, 0.0  ;;  %v8642_v15 = vunpack.c.h.bf16 %v9200_v41  ;;  %v9204_v17 = vld [vmem:[%s13709_s3 + $0x4f0] sm:$0xff]  }
 0x3b3   : > { %v4089_v40 = vsel %vm3158_vm0, %v2956_v16, 0.0 }
 0x3b4   : > { %v6383_v27 = vsel %vm5260_vm7, %v6382_v21, %v6378_v30  ;;  %4078 = vadd.xlane.f32.xlu1 %v4077_v2  ;;  %4069 = vadd.xlane.f32.xlu0 %v4068_v19  ;;  %v8649_v30 = vunpack.c.l.bf16 %v9202_v1  ;;  %v9203_v21 = vld [vmem:[%s13709_s3 + $0x4e8] sm:$0xff]   ;;  %v4080_v19 = vsel %vm3158_vm0, %v2953_v28, 0.0 }
 0x3b5   : > { %v3869_v22 = vpop.xlane.xlu1 %3868  ;;  %v6388_v57 = vsel %vm5267_vm8, %v6387_v43, %v6383_v27  ;;  %v3860_v39 = vpop.xlane.xlu0 %3859  ;;  %v8653_v41 = vunpack.c.l.bf16 %v9203_v21 }
 0x3b6   : > { %v6392_v9 = vrot.slane %v3860_v39, %v11126_v56  ;;  %v6407_v27 = vrot.slane %v3869_v22, %v11406_v37  ;;  %v2955_v39 = vmul.f32 %v8642_v15, %v10271_v26 }
 0x3b8   : > { %v6393_v43 = vsel %vm5274_vm9, %v6392_v9, %v6388_v57  ;;  %4084 = vadd.xlane.f32.xlu1 %v4083_v54  ;;  %4075 = vadd.xlane.f32.xlu0 %v4074_v13  ;;  %v2958_v57 = vmul.f32 %v8649_v30, %v10430_v32  ;;  %v8646_v9 = vunpack.c.h.bf16 %v9201_v59  ;;  %v8657_v13 = vunpack.c.l.bf16 %v9204_v17 }
 0x3b9   : > { %v12149_v2 = vpop.xlane.xlu1 %3874  ;;  %v6398_v52 = vsel %vm5281_vm10, %v6397_v36, %v6393_v43  ;;  %v3866_v46 = vpop.xlane.xlu0 %3865  ;;  %v4086_v22 = vsel %vm3158_vm0, %v2955_v39, 0.0  ;;  %v2960_v30 = vmul.f32 %v8653_v41, %v10589_v58  ;;  %v8654_v39 = vunpack.c.h.bf16 %v9203_v21 }
 0x3ba   : > { %13742 = vst [vmem:[#allocation6_spill] sm:$0xff] %v12149_v2  ;;  %v6402_v44 = vrot.slane %v3866_v46, %v11285_v60  ;;  %v8650_v46 = vunpack.c.h.bf16 %v9202_v1  ;;  %v4095_v2 = vsel %vm3158_vm0, %v2958_v57, 0.0  ;;  %v2957_v59 = vmul.f32 %v8646_v9, %v10347_v53 }
 0x3bb   : > { %v2962_v1 = vmul.f32 %v8657_v13, %v10773_v55  ;;  %v4101_v41 = vsel %vm3158_vm0, %v2960_v30, 0.0  ;;  %v2961_v30 = vmul.f32 %v8654_v39, %v10624_v51 }
 0x3bc   : > { %v6403_v54 = vsel %vm5288_vm11, %v6402_v44, %v6398_v52  ;;  %4090 = vadd.xlane.f32.xlu1 %v4089_v40  ;;  %4081 = vadd.xlane.f32.xlu0 %v4080_v19  ;;  %v9205_v52 = vld [vmem:[%s13709_s3 + $0x4f8] sm:$0xff]   ;;  %v2959_v19 = vmul.f32 %v8650_v46, %v10457_v3 }
 0x3bd   : > { %v3881_v36 = vpop.xlane.xlu1 %3880  ;;  %v6408_v16 = vsel %vm5295_vm12, %v6407_v27, %v6403_v54  ;;  %v3872_v28 = vpop.xlane.xlu0 %3871  ;;  %v4092_v27 = vsel %vm3158_vm0, %v2957_v59, 0.0  ;;  %v8661_v57 = vunpack.c.l.bf16 %v9205_v52  ;;  %v8658_v59 = vunpack.c.h.bf16 %v9204_v17 }
 0x3be   : > { %v6412_v43 = vrot.slane %v3872_v28, %v11441_v31  ;;  %v6427_v28 = vrot.slane %v3881_v36, %v10393_v47 }
 0x3bf   : > { %v2964_v21 = vmul.f32 %v8661_v57, %v10959_v5 }
 0x3c0   : > { %v12169_v15 = vsel %vm5302_vm13, %v6412_v43, %v6408_v16  ;;  %4096 = vadd.xlane.f32.xlu1 %v4095_v2  ;;  %4087 = vadd.xlane.f32.xlu0 %v4086_v22  ;;  %v9206_v2 = vld [vmem:[%s13709_s3 + $0x500] sm:$0xff]   ;;  %v4107_v16 = vsel %vm3158_vm0, %v2962_v1, 0.0  ;;  %v4098_v43 = vsel %vm3158_vm0, %v2959_v19, 0.0 }
 0x3c1   : > { %13743 = vst [vmem:[#allocation7_spill] sm:$0xff] %v12169_v15  ;;  %v3887_v44 = vpop.xlane.xlu1 %3886  ;;  %v12174_v40 = vpop.xlane.xlu0 %3877  ;;  %v8665_v46 = vunpack.c.l.bf16 %v9206_v2  ;;  %v8662_v15 = vunpack.c.h.bf16 %v9205_v52  ;;  %v4113_v39 = vsel %vm3158_vm0, %v2964_v21, 0.0 }
 0x3c2   : > { %13744 = vst [vmem:[#allocation8_spill] sm:$0xff] %v12174_v40  ;;  %v6436_v22 = vrot.slane %v3887_v44, %v10529_v18  ;;  %v4104_v40 = vsel %vm3158_vm0, %v2961_v30, 0.0 }
 0x3c3   : > { %v2966_v44 = vmul.f32 %v8665_v46, %v10054_v8  ;;  %v2965_v30 = vmul.f32 %v8662_v15, %v10995_v63 }
 0x3c4   : > { %4102 = vadd.xlane.f32.xlu1 %v4101_v41  ;;  %4093 = vadd.xlane.f32.xlu0 %v4092_v27  ;;  %v9207_v41 = vld [vmem:[%s13709_s3 + $0x508] sm:$0xff]  }
 0x3c5   : > { %v3893_v9 = vpop.xlane.xlu1 %3892  ;;  %v3884_v54 = vpop.xlane.xlu0 %3883  ;;  %v8669_v57 = vunpack.c.l.bf16 %v9207_v41 }
 0x3c6   : > { %v6431_v13 = vrot.slane %v3884_v54, %v10396_v49  ;;  %v6446_v17 = vrot.slane %v3893_v9, %v10714_v12 }
 0x3c7   : > { %v2968_v21 = vmul.f32 %v8669_v57, %v10158_v25 }
 0x3c8   : > { %v6432_v1 = vsel %vm13745_vm2, %v6431_v13, %v6427_v28  ;;  %4108 = vadd.xlane.f32.xlu1 %v4107_v16  ;;  %4099 = vadd.xlane.f32.xlu0 %v4098_v43  ;;  %v2963_v28 = vmul.f32 %v8658_v59, %v10809_v45  ;;  %vm13747_vm2 = vcmask 261312   ;;  %v9208_v13 = vld [vmem:[%s13709_s3 + $0x510] sm:$0xff]  }
 0x3c9   : > { %v3899_v36 = vpop.xlane.xlu1 %3898  ;;  %v6437_v27 = vsel %vm13746_vm3, %v6436_v22, %v6432_v1  ;;  %v3890_v19 = vpop.xlane.xlu0 %3889  ;;  %v4119_v22 = vsel %vm3158_vm0, %v2966_v44, 0.0  ;;  %v8673_v1 = vunpack.c.l.bf16 %v9208_v13  ;;  %vm13751_vm3 = vcmask 130112  }
 0x3ca   : > { %v6441_v54 = vrot.slane %v3890_v19, %v13729_v38  ;;  %v6456_v59 = vrot.slane %v3899_v36, %v10900_v10  ;;  %v9209_v19 = vld [vmem:[%s13709_s3 + $0x518] sm:$0xff]   ;;  %v4125_v36 = vsel %vm3158_vm0, %v2968_v21, 0.0 }
 0x3cc   : > { %v6442_v16 = vsel %vm13747_vm2, %v6441_v54, %v6437_v27  ;;  %4114 = vadd.xlane.f32.xlu1 %v4113_v39  ;;  %4105 = vadd.xlane.f32.xlu0 %v4104_v40  ;;  %v4110_v40 = vsel %vm3158_vm0, %v2963_v28, 0.0  ;;  %v8666_v27 = vunpack.c.h.bf16 %v9206_v2  ;;  %v4116_v39 = vsel %vm3158_vm0, %v2965_v30, 0.0 }
 0x3cd   : > { %v3905_v43 = vpop.xlane.xlu1 %3904  ;;  %v6447_v46 = vsel %vm5239_vm4, %v6446_v17, %v6442_v16  ;;  %v3896_v52 = vpop.xlane.xlu0 %3895  ;;  %v8677_v28 = vunpack.c.l.bf16 %v9209_v19  ;;  %v2970_v16 = vmul.f32 %v8673_v1, %v10254_v6  ;;  %vm13752_vm2 = vcmask 195712  }
 0x3ce   : > { %v6451_v9 = vrot.slane %v3896_v52, %v10754_v24  ;;  %v6466_v2 = vrot.slane %v3905_v43, %v11086_v7  ;;  %v2967_v52 = vmul.f32 %v8666_v27, %v10059_v14 }
 0x3cf   : > { %v2972_v43 = vmul.f32 %v8677_v28, %v10330_v48  ;;  %v4131_v27 = vsel %vm3158_vm0, %v2970_v16, 0.0 }
 0x3d0   : > { %v6452_v54 = vsel %vm5246_vm5, %v6451_v9, %v6447_v46  ;;  %4120 = vadd.xlane.f32.xlu1 %v4119_v22  ;;  %4111 = vadd.xlane.f32.xlu0 %v4110_v40  ;;  %v8670_v46 = vunpack.c.h.bf16 %v9207_v41  ;;  %v9210_v9 = vld [vmem:[%s13709_s3 + $0x520] sm:$0xff]  }
 0x3d1   : > { %v3911_v17 = vpop.xlane.xlu1 %3910  ;;  %v6457_v44 = vsel %vm5253_vm6, %v6456_v59, %v6452_v54  ;;  %v3902_v57 = vpop.xlane.xlu0 %3901  ;;  %v8681_v1 = vunpack.c.l.bf16 %v9210_v9  ;;  %v8674_v54 = vunpack.c.h.bf16 %v9208_v13 }
 0x3d2   : > { %v6461_v15 = vrot.slane %v3902_v57, %v10940_v50  ;;  %v6476_v41 = vrot.slane %v3911_v17, %v11251_v35  ;;  %v4122_v57 = vsel %vm3158_vm0, %v2967_v52, 0.0 }
 0x3d3   : > { %v2974_v16 = vmul.f32 %v8681_v1, %v10430_v32  ;;  %v2971_v52 = vmul.f32 %v8674_v54, %v10271_v26 }
 0x3d4   : > { %v6462_v22 = vsel %vm5260_vm7, %v6461_v15, %v6457_v44  ;;  %4126 = vadd.xlane.f32.xlu1 %v4125_v36  ;;  %4117 = vadd.xlane.f32.xlu0 %v4116_v39  ;;  %v2969_v44 = vmul.f32 %v8670_v46, %v10174_v23  ;;  %v9211_v36 = vld [vmem:[%s13709_s3 + $0x528] sm:$0xff]   ;;  %v9212_v46 = vld [vmem:[%s13709_s3 + $0x530] sm:$0xff]  }
 0x3d5   : > { %v3917_v59 = vpop.xlane.xlu1 %3916  ;;  %v6467_v21 = vsel %vm5267_vm8, %v6466_v2, %v6462_v22  ;;  %v3908_v30 = vpop.xlane.xlu0 %3907  ;;  %v4137_v2 = vsel %vm3158_vm0, %v2972_v43, 0.0 }
 0x3d6   : > { %v6471_v40 = vrot.slane %v3908_v30, %v11126_v56  ;;  %v6486_v22 = vrot.slane %v3917_v59, %v11406_v37  ;;  %v8685_v30 = vunpack.c.l.bf16 %v9211_v36 }
 0x3d8   : > { %v6472_v15 = vsel %vm5274_vm9, %v6471_v40, %v6467_v21  ;;  %4132 = vadd.xlane.f32.xlu1 %v4131_v27  ;;  %4123 = vadd.xlane.f32.xlu0 %v4122_v57  ;;  %v4128_v21 = vsel %vm3158_vm0, %v2969_v44, 0.0  ;;  %v8678_v40 = vunpack.c.h.bf16 %v9209_v19  ;;  %v8689_v57 = vunpack.c.l.bf16 %v9212_v46 }
 0x3d9   : > { %v12238_v39 = vpop.xlane.xlu1 %3922  ;;  %v6477_v13 = vsel %vm5281_vm10, %v6476_v41, %v6472_v15  ;;  %v3914_v28 = vpop.xlane.xlu0 %3913  ;;  %v4143_v15 = vsel %vm3158_vm0, %v2974_v16, 0.0  ;;  %v2976_v59 = vmul.f32 %v8685_v30, %v10589_v58  ;;  %v8682_v19 = vunpack.c.h.bf16 %v9210_v9 }
 0x3da   : > { %13748 = vst [vmem:[#allocation9_spill] sm:$0xff] %v12238_v39  ;;  %v6481_v17 = vrot.slane %v3914_v28, %v11285_v60  ;;  %v4134_v28 = vsel %vm3158_vm0, %v2971_v52, 0.0  ;;  %v2973_v44 = vmul.f32 %v8678_v40, %v10347_v53  ;;  %v2978_v16 = vmul.f32 %v8689_v57, %v10773_v55 }
 0x3db   : > { %v2975_v9 = vmul.f32 %v8682_v19, %v10457_v3  ;;  %v8686_v40 = vunpack.c.h.bf16 %v9211_v36 }
 0x3dc   : > { %v6482_v41 = vsel %vm5288_vm11, %v6481_v17, %v6477_v13  ;;  %4138 = vadd.xlane.f32.xlu1 %v4137_v2  ;;  %4129 = vadd.xlane.f32.xlu0 %v4128_v21  ;;  %v9213_v13 = vld [vmem:[%s13709_s3 + $0x538] sm:$0xff]   ;;  %v4149_v21 = vsel %vm3158_vm0, %v2976_v59, 0.0  ;;  %v4140_v30 = vsel %vm3158_vm0, %v2973_v44, 0.0 }
 0x3dd   : > { %v3929_v27 = vpop.xlane.xlu1 %3928  ;;  %v6487_v43 = vsel %vm5295_vm12, %v6486_v22, %v6482_v41  ;;  %v3920_v1 = vpop.xlane.xlu0 %3919  ;;  %v8693_v52 = vunpack.c.l.bf16 %v9213_v13  ;;  %v9214_v41 = vld [vmem:[%s13709_s3 + $0x540] sm:$0xff]   ;;  %v4146_v36 = vsel %vm3158_vm0, %v2975_v9, 0.0  ;;  %v2977_v19 = vmul.f32 %v8686_v40, %v10624_v51 }
 0x3de   : > { %v6491_v54 = vrot.slane %v3920_v1, %v11441_v31  ;;  %v6506_v57 = vrot.slane %v3929_v27, %v10393_v47  ;;  %v8697_v59 = vunpack.c.l.bf16 %v9214_v41 }
 0x3df   : > { %v4152_v39 = vsel %vm3158_vm0, %v2977_v19, 0.0 }
 0x3e0   : > { %v12261_v17 = vsel %vm5302_vm13, %v6491_v54, %v6487_v43  ;;  %4144 = vadd.xlane.f32.xlu1 %v4143_v15  ;;  %4135 = vadd.xlane.f32.xlu0 %v4134_v28  ;;  %v4155_v54 = vsel %vm3158_vm0, %v2978_v16, 0.0  ;;  %v2980_v28 = vmul.f32 %v8693_v52, %v10959_v5  ;;  %v2982_v9 = vmul.f32 %v8697_v59, %v10054_v8 }
 0x3e1   : > { %13749 = vst [vmem:[#allocation10_spill] sm:$0xff] %v12261_v17  ;;  %v3935_v2 = vpop.xlane.xlu1 %3934  ;;  %v12263_v22 = vpop.xlane.xlu0 %3925  ;;  %v8690_v17 = vunpack.c.h.bf16 %v9212_v46 }
 0x3e2   : > { %13750 = vst [vmem:[#allocation11_spill] sm:$0xff] %v12263_v22  ;;  %v6515_v44 = vrot.slane %v3935_v2, %v10529_v18  ;;  %v4161_v2 = vsel %vm3158_vm0, %v2980_v28, 0.0 }
 0x3e3   : > { %v2979_v22 = vmul.f32 %v8690_v17, %v10809_v45 }
 0x3e4   : > { %4150 = vadd.xlane.f32.xlu1 %v4149_v21  ;;  %4141 = vadd.xlane.f32.xlu0 %v4140_v30  ;;  %v9215_v21 = vld [vmem:[%s13709_s3 + $0x548] sm:$0xff]  }
 0x3e5   : > { %v3941_v43 = vpop.xlane.xlu1 %3940  ;;  %v3932_v1 = vpop.xlane.xlu0 %3931  ;;  %v8701_v40 = vunpack.c.l.bf16 %v9215_v21 }
 0x3e6   : > { %v6510_v15 = vrot.slane %v3932_v1, %v10396_v49  ;;  %v6525_v46 = vrot.slane %v3941_v43, %v10714_v12  ;;  %v4167_v43 = vsel %vm3158_vm0, %v2982_v9, 0.0 }
 0x3e7   : > { %v2984_v19 = vmul.f32 %v8701_v40, %v10158_v25 }
 0x3e8   : > { %v6511_v16 = vsel %vm13751_vm3, %v6510_v15, %v6506_v57  ;;  %4156 = vadd.xlane.f32.xlu1 %v4155_v54  ;;  %4147 = vadd.xlane.f32.xlu0 %v4146_v36  ;;  %v8694_v57 = vunpack.c.h.bf16 %v9213_v13  ;;  %v9216_v54 = vld [vmem:[%s13709_s3 + $0x550] sm:$0xff]   ;;  %vm13753_vm3 = vcmask 261312  }
 0x3e9   : > { %v3947_v27 = vpop.xlane.xlu1 %3946  ;;  %v6516_v30 = vsel %vm13752_vm2, %v6515_v44, %v6511_v16  ;;  %v3938_v52 = vpop.xlane.xlu0 %3937  ;;  %v8705_v17 = vunpack.c.l.bf16 %v9216_v54  ;;  %v4158_v16 = vsel %vm3158_vm0, %v2979_v22, 0.0  ;;  %vm13754_vm2 = vcmask 130112  }
 0x3ea   : > { %v6520_v1 = vrot.slane %v3938_v52, %v13729_v38  ;;  %v6535_v13 = vrot.slane %v3947_v27, %v10900_v10  ;;  %v2981_v52 = vmul.f32 %v8694_v57, %v10995_v63  ;;  %v4173_v27 = vsel %vm3158_vm0, %v2984_v19, 0.0 }
 0x3eb   : > { %v2986_v22 = vmul.f32 %v8705_v17, %v10254_v6 }
 0x3ec   : > { %v6521_v15 = vsel %vm13753_vm3, %v6520_v1, %v6516_v30  ;;  %4162 = vadd.xlane.f32.xlu1 %v4161_v2  ;;  %4153 = vadd.xlane.f32.xlu0 %v4152_v39  ;;  %v8698_v30 = vunpack.c.h.bf16 %v9214_v41  ;;  %v9217_v39 = vld [vmem:[%s13709_s3 + $0x558] sm:$0xff]   ;;  %vm13755_vm3 = vcmask 195712  }
 0x3ed   : > { %v3953_v44 = vpop.xlane.xlu1 %3952  ;;  %v6526_v28 = vsel %vm5239_vm4, %v6525_v46, %v6521_v15  ;;  %v3944_v59 = vpop.xlane.xlu0 %3943  ;;  %v8709_v57 = vunpack.c.l.bf16 %v9217_v39  ;;  %v4164_v15 = vsel %vm3158_vm0, %v2981_v52, 0.0 }
 0x3ee   : > { %v6530_v36 = vrot.slane %v3944_v59, %v10754_v24  ;;  %v6545_v41 = vrot.slane %v3953_v44, %v11086_v7  ;;  %v2983_v59 = vmul.f32 %v8698_v30, %v10059_v14  ;;  %v4179_v44 = vsel %vm3158_vm0, %v2986_v22, 0.0 }
 0x3ef   : > { %v2988_v52 = vmul.f32 %v8709_v57, %v10330_v48 }
 0x3f0   : > { %v6531_v1 = vsel %vm5246_vm5, %v6530_v36, %v6526_v28  ;;  %4168 = vadd.xlane.f32.xlu1 %v4167_v43  ;;  %4159 = vadd.xlane.f32.xlu0 %v4158_v16  ;;  %v8702_v28 = vunpack.c.h.bf16 %v9215_v21  ;;  %v9218_v36 = vld [vmem:[%s13709_s3 + $0x560] sm:$0xff]  }
 0x3f1   : > { %v3959_v2 = vpop.xlane.xlu1 %3958  ;;  %v6536_v9 = vsel %vm5253_vm6, %v6535_v13, %v6531_v1  ;;  %v3950_v40 = vpop.xlane.xlu0 %3949  ;;  %v8713_v30 = vunpack.c.l.bf16 %v9218_v36  ;;  %v4170_v1 = vsel %vm3158_vm0, %v2983_v59, 0.0 }
 0x3f2   : > { %v6540_v46 = vrot.slane %v3950_v40, %v10940_v50  ;;  %v6555_v21 = vrot.slane %v3959_v2, %v11251_v35  ;;  %v2985_v40 = vmul.f32 %v8702_v28, %v10174_v23  ;;  %v4185_v2 = vsel %vm3158_vm0, %v2988_v52, 0.0 }
 0x3f3   : > { %v2990_v59 = vmul.f32 %v8713_v30, %v10430_v32 }
 0x3f4   : > { %v6541_v43 = vsel %vm5260_vm7, %v6540_v46, %v6536_v9  ;;  %4174 = vadd.xlane.f32.xlu1 %v4173_v27  ;;  %4165 = vadd.xlane.f32.xlu0 %v4164_v15  ;;  %v8706_v9 = vunpack.c.h.bf16 %v9216_v54  ;;  %v9219_v46 = vld [vmem:[%s13709_s3 + $0x568] sm:$0xff]  }
 0x3f5   : > { %v3965_v13 = vpop.xlane.xlu1 %3964  ;;  %v6546_v19 = vsel %vm5267_vm8, %v6545_v41, %v6541_v43  ;;  %v3956_v17 = vpop.xlane.xlu0 %3955  ;;  %v8717_v28 = vunpack.c.l.bf16 %v9219_v46  ;;  %v4176_v43 = vsel %vm3158_vm0, %v2985_v40, 0.0 }
 0x3f6   : > { %v6550_v16 = vrot.slane %v3956_v17, %v11126_v56  ;;  %v6565_v54 = vrot.slane %v3965_v13, %v11406_v37  ;;  %v2987_v17 = vmul.f32 %v8706_v9, %v10271_v26  ;;  %v4191_v13 = vsel %vm3158_vm0, %v2990_v59, 0.0 }
 0x3f8   : > { %v6551_v27 = vsel %vm5274_vm9, %v6550_v16, %v6546_v19  ;;  %4180 = vadd.xlane.f32.xlu1 %v4179_v44  ;;  %4171 = vadd.xlane.f32.xlu0 %v4170_v1  ;;  %v8710_v19 = vunpack.c.h.bf16 %v9217_v39  ;;  %v9220_v16 = vld [vmem:[%s13709_s3 + $0x570] sm:$0xff]   ;;  %v9221_v39 = vld [vmem:[%s13709_s3 + $0x578] sm:$0xff]  }
 0x3f9   : > { %v3971_v41 = vpop.xlane.xlu1 %3970  ;;  %v6556_v22 = vsel %vm5281_vm10, %v6555_v21, %v6551_v27  ;;  %v3962_v57 = vpop.xlane.xlu0 %3961  ;;  %v8721_v40 = vunpack.c.l.bf16 %v9220_v16  ;;  %v8714_v27 = vunpack.c.h.bf16 %v9218_v36 }
 0x3fa   : > { %v6560_v15 = vrot.slane %v3962_v57, %v11285_v60  ;;  %v6575_v9 = vrot.slane %v3971_v41, %v11564_v61  ;;  %v2992_v57 = vmul.f32 %v8717_v28, %v10589_v58 }
 0x3fb   : > { %v2991_v41 = vmul.f32 %v8714_v27, %v10457_v3 }
 0x3fc   : > { %v6561_v44 = vsel %vm5288_vm11, %v6560_v15, %v6556_v22  ;;  %4186 = vadd.xlane.f32.xlu1 %v4185_v2  ;;  %4177 = vadd.xlane.f32.xlu0 %v4176_v43  ;;  %v4182_v22 = vsel %vm3158_vm0, %v2987_v17, 0.0  ;;  %v2989_v15 = vmul.f32 %v8710_v19, %v10347_v53  ;;  %v8725_v43 = vunpack.c.l.bf16 %v9221_v39 }
 0x3fd   : > { %v3977_v21 = vpop.xlane.xlu1 %3976  ;;  %v6566_v52 = vsel %vm5295_vm12, %v6565_v54, %v6561_v44  ;;  %v3968_v30 = vpop.xlane.xlu0 %3967  ;;  %v4197_v17 = vsel %vm3158_vm0, %v2992_v57, 0.0  ;;  %v8718_v19 = vunpack.c.h.bf16 %v9219_v46  ;;  %v4194_v46 = vsel %vm3158_vm0, %v2991_v41, 0.0 }
 0x3fe   : > { %v6570_v1 = vrot.slane %v3968_v30, %v11441_v31  ;;  %v2994_v30 = vmul.f32 %v8721_v40, %v10773_v55  ;;  %v4188_v28 = vsel %vm3158_vm0, %v2989_v15, 0.0  ;;  %v2996_v40 = vmul.f32 %v8725_v43, %v10959_v5 }
 0x3ff   : > { %v6585_v27 = vrot.slane %v3977_v21, %v10393_v47 }
 0x400   : > { %v6571_v2 = vsel %vm5302_vm13, %v6570_v1, %v6566_v52  ;;  %4192 = vadd.xlane.f32.xlu1 %v4191_v13  ;;  %4183 = vadd.xlane.f32.xlu0 %v4182_v22  ;;  %v9222_v1 = vld [vmem:[%s13709_s3 + $0x580] sm:$0xff]   ;;  %v4203_v57 = vsel %vm3158_vm0, %v2994_v30, 0.0 }
 0x401   : > { %v3983_v54 = vpop.xlane.xlu1 %3982  ;;  %v6576_v59 = vsel %vm5309_vm14, %v6575_v9, %v6571_v2  ;;  %v3974_v36 = vpop.xlane.xlu0 %3973  ;;  %v2993_v2 = vmul.f32 %v8718_v19, %v10624_v51  ;;  %v8726_v19 = vunpack.c.h.bf16 %v9221_v39 }
 0x402   : > { %v6580_v44 = vrot.slane %v3974_v36, %v11600_v34  ;;  %v6594_v15 = vrot.slane %v3983_v54, %v10529_v18  ;;  %v8722_v36 = vunpack.c.h.bf16 %v9220_v16  ;;  %v4209_v54 = vsel %vm3158_vm0, %v2996_v40, 0.0 }
 0x404   : > { %v12356_v52 = vsel %vm5316_vm15, %v6580_v44, %v6576_v59  ;;  %4198 = vadd.xlane.f32.xlu1 %v4197_v17  ;;  %4189 = vadd.xlane.f32.xlu0 %v4188_v28  ;;  %v8729_v59 = vunpack.c.l.bf16 %v9222_v1  ;;  %v9223_v44 = vld [vmem:[%s13709_s3 + $0x588] sm:$0xff]  }
 0x405   : > { %v3989_v13 = vpop.xlane.xlu1 %3988  ;;  %v3980_v9 = vpop.xlane.xlu0 %3979  ;;  %v8733_v28 = vunpack.c.l.bf16 %v9223_v44 }
 0x406   : > { %v6589_v22 = vrot.slane %v3980_v9, %v10396_v49  ;;  %v6604_v16 = vrot.slane %v3989_v13, %v10714_v12  ;;  %v4200_v9 = vsel %vm3158_vm0, %v2993_v2, 0.0  ;;  %v2998_v33 = vmul.f32 %v8729_v59, %v10054_v8 }
 0x407   : > { %v2997_v2 = vmul.f32 %v8726_v19, %v10995_v63 }
 0x408   : > { %v6590_v43 = vsel %vm13754_vm2, %v6589_v22, %v6585_v27  ;;  %4204 = vadd.xlane.f32.xlu1 %v4203_v57  ;;  %4195 = vadd.xlane.f32.xlu0 %v4194_v46  ;;  %v2995_v27 = vmul.f32 %v8722_v36, %v10809_v45  ;;  %v9224_v22 = vld [vmem:[%s13709_s3 + $0x590] sm:$0xff]   ;;  %vm13756_vm2 = vcmask 261312  }
 0x409   : > { %v3995_v21 = vpop.xlane.xlu1 %3994  ;;  %v6595_v17 = vsel %vm13755_vm3, %v6594_v15, %v6590_v43  ;;  %v3986_v30 = vpop.xlane.xlu0 %3985  ;;  %v3000_v15 = vmul.f32 %v8733_v28, %v10158_v25  ;;  %v8737_v59 = vunpack.c.l.bf16 %v9224_v22  ;;  %v4215_v43 = vsel %vm3158_vm0, %v2998_v33, 0.0 }
 0x40a   : > { %v6599_v41 = vrot.slane %v3986_v30, %v13729_v38  ;;  %v6614_v36 = vrot.slane %v3995_v21, %v10900_v10  ;;  %v4206_v30 = vsel %vm3158_vm0, %v2995_v27, 0.0  ;;  %v4212_v33 = vsel %vm3158_vm0, %v2997_v2, 0.0  ;;  %v12402_v27 = vld [vmem:[%s13709_s3 + $0x5a0] sm:$0xff]  }
 0x40b   : > { %v4221_v21 = vsel %vm3158_vm0, %v3000_v15, 0.0  ;;  %vm13719_vm3 = vcmask 1044484  }
 0x40c   : > { %v6600_v57 = vsel %vm13756_vm2, %v6599_v41, %v6595_v17  ;;  %4210 = vadd.xlane.f32.xlu1 %v4209_v54  ;;  %4201 = vadd.xlane.f32.xlu0 %v4200_v9  ;;  %v8730_v17 = vunpack.c.h.bf16 %v9222_v1  ;;  %v9225_v54 = vld [vmem:[%s13709_s3 + $0x598] sm:$0xff]   ;;  %v3002_v1 = vmul.f32 %v8737_v59, %v10254_v6  ;;  %v8745_v59 = vunpack.c.l.bf16 %v12402_v27 }
 0x40d   : > { %v4001_v46 = vpop.xlane.xlu1 %4000  ;;  %v6605_v40 = vsel %vm5239_vm4, %v6604_v16, %v6600_v57  ;;  %v3992_v39 = vpop.xlane.xlu0 %3991  ;;  %vm13720_vm2 = vcmask 1045509  }
 0x40e   : > { %v6609_v13 = vrot.slane %v3992_v39, %v10754_v24  ;;  %v6624_v57 = vrot.slane %v4001_v46, %v11086_v7  ;;  %v8741_v39 = vunpack.c.l.bf16 %v9225_v54  ;;  %v12414_v46 = vld [vmem:[%s13709_s3 + $0x5a8] sm:$0xff]  }
 0x410   : > { %v6610_v41 = vsel %vm5246_vm5, %v6609_v13, %v6605_v40  ;;  %4216 = vadd.xlane.f32.xlu1 %v4215_v43  ;;  %4207 = vadd.xlane.f32.xlu0 %v4206_v30  ;;  %v2999_v40 = vmul.f32 %v8730_v17, %v10059_v14  ;;  %v8734_v13 = vunpack.c.h.bf16 %v9223_v44 }
 0x411   : > { %v4007_v16 = vpop.xlane.xlu1 %4006  ;;  %v6615_v28 = vsel %vm5253_vm6, %v6614_v36, %v6610_v41  ;;  %v3998_v19 = vpop.xlane.xlu0 %3997  ;;  %v4227_v41 = vsel %vm3158_vm0, %v3002_v1, 0.0 }
 0x412   : > { %v6619_v9 = vrot.slane %v3998_v19, %v10940_v50  ;;  %v8738_v19 = vunpack.c.h.bf16 %v9224_v22  ;;  %v6634_v44 = vrot.slane %v4007_v16, %v11251_v35  ;;  %v4218_v17 = vsel %vm3158_vm0, %v2999_v40, 0.0 }
 0x414   : > { %v6620_v36 = vsel %vm5260_vm7, %v6619_v9, %v6615_v28  ;;  %4222 = vadd.xlane.f32.xlu1 %v4221_v21  ;;  %4213 = vadd.xlane.f32.xlu0 %v4212_v33  ;;  %v3004_v28 = vmul.f32 %v8741_v39, %v10330_v48  ;;  %v3001_v9 = vmul.f32 %v8734_v13, %v10174_v23  ;;  %v12429_v39 = vld [vmem:[%s13709_s3 + $0x5b0] sm:$0xff]  }
 0x415   : > { %v4013_v15 = vpop.xlane.xlu1 %4012  ;;  %v6625_v2 = vsel %vm5267_vm8, %v6624_v57, %v6620_v36  ;;  %v4004_v43 = vpop.xlane.xlu0 %4003  ;;  %v3006_v57 = vmul.f32 %v8745_v59, %v10430_v32  ;;  %v8749_v36 = vunpack.c.l.bf16 %v12414_v46  ;;  %v3003_v40 = vmul.f32 %v8738_v19, %v10271_v26 }
 0x416   : > { %v6629_v30 = vrot.slane %v4004_v43, %v11126_v56  ;;  %v6644_v13 = vrot.slane %v4013_v15, %v11406_v37  ;;  %v4224_v43 = vsel %vm3158_vm0, %v3001_v9, 0.0  ;;  %v12442_v15 = vld [vmem:[%s13709_s3 + $0x5b8] sm:$0xff]  }
 0x417   : > { %v4230_v9 = vsel %vm3158_vm0, %v3003_v40, 0.0 }
 0x418   : > { %v6630_v21 = vsel %vm5274_vm9, %v6629_v30, %v6625_v2  ;;  %4228 = vadd.xlane.f32.xlu1 %v4227_v41  ;;  %4219 = vadd.xlane.f32.xlu0 %v4218_v17  ;;  %v4233_v2 = vsel %vm3158_vm0, %v3004_v28, 0.0  ;;  %v8742_v30 = vunpack.c.h.bf16 %v9225_v54  ;;  %v4239_v17 = vsel %vm3158_vm0, %v3006_v57, 0.0 }
 0x419   : > { %v4019_v33 = vpop.xlane.xlu1 %4018  ;;  %v6635_v22 = vsel %vm5281_vm10, %v6634_v44, %v6630_v21  ;;  %v4010_v1 = vpop.xlane.xlu0 %4009  ;;  %v3008_v21 = vmul.f32 %v8749_v36, %v10589_v58  ;;  %v5864_v54 = vrot.slane %v11691_v29, %v11564_v61  ;;  %v8746_v36 = vunpack.c.h.bf16 %v12402_v27  ;;  %v12462_v27 = vld [vmem:[%s13709_s3 + $0x5c0] sm:$0xff]  }
 0x41a   : > { %v6639_v16 = vrot.slane %v4010_v1, %v11285_v60  ;;  %v8753_v1 = vunpack.c.l.bf16 %v12429_v39  ;;  %v3005_v57 = vmul.f32 %v8742_v30, %v10347_v53  ;;  %v8757_v29 = vunpack.c.l.bf16 %v12442_v15 }
 0x41b   : > { %v8750_v30 = vunpack.c.h.bf16 %v12414_v46  ;;  %v3007_v46 = vmul.f32 %v8746_v36, %v10457_v3 }
 0x41c   : > { %v6640_v59 = vsel %vm5288_vm11, %v6639_v16, %v6635_v22  ;;  %4234 = vadd.xlane.f32.xlu1 %v4233_v2  ;;  %4225 = vadd.xlane.f32.xlu0 %v4224_v43  ;;  %v6654_v22 = vrot.slane %v4019_v33, %v11564_v61  ;;  %v7774_v16 = vsel %vm13719_vm3, %v11686_v20, %v11673_v4  ;;  %vm13758_vm3 = vcmask 1041409  }
 0x41d   : > { %v4025_v41 = vpop.xlane.xlu1 %4024  ;;  %v6645_v44 = vsel %vm5295_vm12, %v6644_v13, %v6640_v59  ;;  %v4016_v19 = vpop.xlane.xlu0 %4015  ;;  %v3010_v33 = vmul.f32 %v8753_v1, %v10773_v55  ;;  %v5790_v4 = vrot.slane %v11705_v42, %v11600_v34  ;;  %v5865_v59 = vsel %vm5309_vm14, %v5864_v54, %v11573_v0  ;;  %v13757_v0 = vld [vmem:[#allocation4_spill] sm:$0xff] }
 0x41e   : > { %v6649_v28 = vrot.slane %v4016_v19, %v11441_v31  ;;  %v4236_v19 = vsel %vm3158_vm0, %v3005_v57, 0.0  ;;  %v3012_v42 = vmul.f32 %v8757_v29, %v10959_v5  ;;  %v5869_v54 = vrot.slane %v13757_v0, %v11600_v34 }
 0x41f   : > { %v4251_v57 = vsel %vm3158_vm0, %v3010_v33, 0.0  ;;  %v6664_v36 = vrot.slane %v4025_v41, %v10393_v47  ;;  %v9231_v33 = vld [vmem:[%s13709_s3 + $0x5c8] sm:$0xff]  }
 0x420   : > { %v6650_v13 = vsel %vm5302_vm13, %v6649_v28, %v6645_v44  ;;  %4240 = vadd.xlane.f32.xlu1 %v4239_v17  ;;  %4231 = vadd.xlane.f32.xlu0 %v4230_v9  ;;  %v4245_v44 = vsel %vm3158_vm0, %v3008_v21, 0.0  ;;  %v7776_v17 = vsel %vm13720_vm2, %v11703_v62, %v7774_v16  ;;  %v8761_v28 = vunpack.c.l.bf16 %v12462_v27 }
 0x421   : > { %v4031_v2 = vpop.xlane.xlu1 %4030  ;;  %v6655_v40 = vsel %vm5309_vm14, %v6654_v22, %v6650_v13  ;;  %v4022_v43 = vpop.xlane.xlu0 %4021  ;;  %v3009_v62 = vmul.f32 %v8750_v30, %v10624_v51  ;;  %v13759_v13 = vld [vmem:[#allocation3_spill] sm:$0xff]  ;;  %vm13722_vm2 = vcmask 1046534   ;;  %v5870_v0 = vsel %vm5316_vm15, %v5869_v54, %v5865_v59 }
 0x422   : > { %v6659_v20 = vrot.slane %v4022_v43, %v11600_v34  ;;  %v5791_v29 = vsel %vm5316_vm15, %v5790_v4, %v13759_v13  ;;  %v4242_v43 = vsel %vm3158_vm0, %v3007_v46, 0.0  ;;  %v8762_v13 = vunpack.c.h.bf16 %v12462_v27 }
 0x423   : > { %v7778_v30 = vsel %vm13722_vm2, %v5791_v29, %v7776_v17  ;;  %vm13723_vm2 = vcmask 1047559  }
 0x424   : > { %v6660_v1 = vsel %vm5316_vm15, %v6659_v20, %v6655_v40  ;;  %4246 = vadd.xlane.f32.xlu1 %v4245_v44  ;;  %4237 = vadd.xlane.f32.xlu0 %v4236_v19  ;;  %v6673_v40 = vrot.slane %v4031_v2, %v10529_v18  ;;  %v4257_v2 = vsel %vm3158_vm0, %v3012_v42, 0.0  ;;  %v4248_v19 = vsel %vm3158_vm0, %v3009_v62, 0.0  ;;  %v9232_v42 = vld [vmem:[%s13709_s3 + $0x5d0] sm:$0xff]  }
 0x425   : > { %v12481_v21 = vsel %vm13758_vm3, %v6660_v1, %v12356_v52  ;;  %v4037_v9 = vpop.xlane.xlu1 %4036  ;;  %v4028_v22 = vpop.xlane.xlu0 %4027  ;;  %v8754_v52 = vunpack.c.h.bf16 %v12429_v39  ;;  %vm13760_vm3 = vcmask 130112   ;;  %v3014_v39 = vmul.f32 %v8761_v28, %v10054_v8 }
 0x426   : > { %v6668_v16 = vrot.slane %v4028_v22, %v10396_v49  ;;  %v8765_v1 = vunpack.c.l.bf16 %v9231_v33  ;;  %v6683_v17 = vrot.slane %v4037_v9, %v10714_v12  ;;  %v12510_v62 = vsel %vm13723_vm2, %v5870_v0, %v7778_v30  ;;  %v9233_v30 = vld [vmem:[%s13709_s3 + $0x5d8] sm:$0xff]  }
 0x427   : > { %v3011_v22 = vmul.f32 %v8754_v52, %v10809_v45 }
 0x428   : > { %v6669_v41 = vsel %vm13760_vm3, %v6668_v16, %v6664_v36  ;;  %4252 = vadd.xlane.f32.xlu1 %v4251_v57  ;;  %4243 = vadd.xlane.f32.xlu0 %v4242_v43  ;;  %v8758_v57 = vunpack.c.h.bf16 %v12442_v15  ;;  %v4263_v16 = vsel %vm3158_vm0, %v3014_v39, 0.0  ;;  %v8769_v15 = vunpack.c.l.bf16 %v9232_v42 }
 0x429   : > { %v4043_v20 = vpop.xlane.xlu1 %4042  ;;  %v6674_v4 = vsel %vm13761_vm1, %v6673_v40, %v6669_v41  ;;  %v4034_v44 = vpop.xlane.xlu0 %4033  ;;  %vm13762_vm1 = vcmask 261312   ;;  %v4254_v40 = vsel %vm3158_vm0, %v3011_v22, 0.0  ;;  %v3016_v43 = vmul.f32 %v8765_v1, %v10158_v25 }
 0x42a   : > { %v6678_v46 = vrot.slane %v4034_v44, %v13729_v38  ;;  %v6693_v29 = vrot.slane %v4043_v20, %v10900_v10  ;;  %v3013_v52 = vmul.f32 %v8758_v57, %v10995_v63  ;;  %v8766_v39 = vunpack.c.h.bf16 %v9231_v33  ;;  %v9234_v57 = vld [vmem:[%s13709_s3 + $0x5e0] sm:$0xff]  }
 0x42b   : > { %v4269_v1 = vsel %vm3158_vm0, %v3016_v43, 0.0  ;;  %v9235_v43 = vld [vmem:[%s13709_s3 + $0x5e8] sm:$0xff]   ;;  %vm13763_vm3 = vcmask 1042434  }
 0x42c   : > { %v6679_v28 = vsel %vm13762_vm1, %v6678_v46, %v6674_v4  ;;  %4258 = vadd.xlane.f32.xlu1 %v4257_v2  ;;  %4249 = vadd.xlane.f32.xlu0 %v4248_v19  ;;  %v3018_v2 = vmul.f32 %v8769_v15, %v10254_v6  ;;  %v8773_v19 = vunpack.c.l.bf16 %v9233_v30  ;;  %v4260_v0 = vsel %vm3158_vm0, %v3013_v52, 0.0 }
 0x42d   : > { %v4049_v36 = vpop.xlane.xlu1 %4048  ;;  %v6684_v59 = vsel %vm5239_vm4, %v6683_v17, %v6679_v28  ;;  %v4040_v54 = vpop.xlane.xlu0 %4039  ;;  %v3015_v17 = vmul.f32 %v8762_v13, %v10059_v14  ;;  %vm13764_vm1 = vcmask 130112  }
 0x42e   : > { %v6688_v9 = vrot.slane %v4040_v54, %v10754_v24  ;;  %v6703_v46 = vrot.slane %v4049_v36, %v11086_v7  ;;  %v4275_v54 = vsel %vm3158_vm0, %v3018_v2, 0.0 }
 0x42f   : > { %v4266_v13 = vsel %vm3158_vm0, %v3015_v17, 0.0 }
 0x430   : > { %v6689_v41 = vsel %vm5246_vm5, %v6688_v9, %v6684_v59  ;;  %4264 = vadd.xlane.f32.xlu1 %v4263_v16  ;;  %4255 = vadd.xlane.f32.xlu0 %v4254_v40  ;;  %v3020_v9 = vmul.f32 %v8773_v19, %v10330_v48  ;;  %v3017_v16 = vmul.f32 %v8766_v39, %v10174_v23  ;;  %v8770_v40 = vunpack.c.h.bf16 %v9232_v42  ;;  %v12554_v42 = vld [vmem:[%s13709_s3 + $0x5f0] sm:$0xff]  }
 0x431   : > { %v4055_v4 = vpop.xlane.xlu1 %4054  ;;  %v6694_v44 = vsel %vm5253_vm6, %v6693_v29, %v6689_v41  ;;  %v4046_v27 = vpop.xlane.xlu0 %4045  ;;  %v8777_v29 = vunpack.c.l.bf16 %v9234_v57  ;;  %v8781_v19 = vunpack.c.l.bf16 %v9235_v43 }
 0x432   : > { %v6698_v20 = vrot.slane %v4046_v27, %v10940_v50  ;;  %v6713_v15 = vrot.slane %v4055_v4, %v11251_v35  ;;  %v4281_v4 = vsel %vm3158_vm0, %v3020_v9, 0.0  ;;  %v4272_v2 = vsel %vm3158_vm0, %v3017_v16, 0.0 }
 0x433   : > { %v3024_v9 = vmul.f32 %v8781_v19, %v10589_v58 }
 0x434   : > { %v6699_v22 = vsel %vm5260_vm7, %v6698_v20, %v6694_v44  ;;  %4270 = vadd.xlane.f32.xlu1 %v4269_v1  ;;  %4261 = vadd.xlane.f32.xlu0 %v4260_v0  ;;  %v3019_v1 = vmul.f32 %v8770_v40, %v10271_v26  ;;  %v8774_v0 = vunpack.c.h.bf16 %v9233_v30  ;;  %v9237_v40 = vld [vmem:[%s13709_s3 + $0x5f8] sm:$0xff]  }
 0x435   : > { %v4061_v28 = vpop.xlane.xlu1 %4060  ;;  %v6704_v59 = vsel %vm5267_vm8, %v6703_v46, %v6699_v22  ;;  %v4052_v33 = vpop.xlane.xlu0 %4051  ;;  %v3022_v46 = vmul.f32 %v8777_v29, %v10430_v32  ;;  %v8789_v19 = vunpack.c.l.bf16 %v9237_v40 }
 0x436   : > { %v6708_v36 = vrot.slane %v4052_v33, %v11126_v56  ;;  %v6723_v39 = vrot.slane %v4061_v28, %v11406_v37  ;;  %v8778_v28 = vunpack.c.h.bf16 %v9234_v57  ;;  %v4278_v30 = vsel %vm3158_vm0, %v3019_v1, 0.0 }
 0x438   : > { %v6709_v52 = vsel %vm5274_vm9, %v6708_v36, %v6704_v59  ;;  %4276 = vadd.xlane.f32.xlu1 %v4275_v54  ;;  %4267 = vadd.xlane.f32.xlu0 %v4266_v13  ;;  %v8785_v36 = vunpack.c.l.bf16 %v12554_v42  ;;  %v3021_v13 = vmul.f32 %v8774_v0, %v10347_v53 }
 0x439   : > { %v4067_v41 = vpop.xlane.xlu1 %4066  ;;  %v6714_v44 = vsel %vm5281_vm10, %v6713_v15, %v6709_v52  ;;  %v4058_v27 = vpop.xlane.xlu0 %4057  ;;  %v4287_v15 = vsel %vm3158_vm0, %v3022_v46, 0.0  ;;  %v9238_v46 = vld [vmem:[%s13709_s3 + $0x600] sm:$0xff]  }
 0x43a   : > { %v6718_v20 = vrot.slane %v4058_v27, %v11285_v60  ;;  %v6733_v16 = vrot.slane %v4067_v41, %v11564_v61  ;;  %v3026_v41 = vmul.f32 %v8785_v36, %v10773_v55 }
 0x43c   : > { %v6719_v17 = vsel %vm5288_vm11, %v6718_v20, %v6714_v44  ;;  %4282 = vadd.xlane.f32.xlu1 %v4281_v4  ;;  %4273 = vadd.xlane.f32.xlu0 %v4272_v2  ;;  %v3023_v20 = vmul.f32 %v8778_v28, %v10457_v3  ;;  %v4293_v4 = vsel %vm3158_vm0, %v3024_v9, 0.0  ;;  %v4284_v2 = vsel %vm3158_vm0, %v3021_v13, 0.0 }
 0x43d   : > { %v4073_v22 = vpop.xlane.xlu1 %4072  ;;  %v6724_v59 = vsel %vm5295_vm12, %v6723_v39, %v6719_v17  ;;  %v4064_v33 = vpop.xlane.xlu0 %4063  ;;  %v8782_v39 = vunpack.c.h.bf16 %v9235_v43  ;;  %v8793_v9 = vunpack.c.l.bf16 %v9238_v46 }
 0x43e   : > { %v6728_v54 = vrot.slane %v4064_v33, %v11441_v31  ;;  %v4299_v33 = vsel %vm3158_vm0, %v3026_v41, 0.0  ;;  %v6743_v36 = vrot.slane %v4073_v22, %v10393_v47 }
 0x440   : > { %v6729_v29 = vsel %vm5302_vm13, %v6728_v54, %v6724_v59  ;;  %4288 = vadd.xlane.f32.xlu1 %v4287_v15  ;;  %4279 = vadd.xlane.f32.xlu0 %v4278_v30  ;;  %v4290_v54 = vsel %vm3158_vm0, %v3023_v20, 0.0  ;;  %v3025_v15 = vmul.f32 %v8782_v39, %v10624_v51  ;;  %v9239_v30 = vld [vmem:[%s13709_s3 + $0x608] sm:$0xff]   ;;  %v9240_v39 = vld [vmem:[%s13709_s3 + $0x610] sm:$0xff]  }
 0x441   : > { %v4079_v52 = vpop.xlane.xlu1 %4078  ;;  %v6734_v44 = vsel %vm5309_vm14, %v6733_v16, %v6729_v29  ;;  %v4070_v57 = vpop.xlane.xlu0 %4069  ;;  %v3028_v16 = vmul.f32 %v8789_v19, %v10959_v5  ;;  %v8797_v41 = vunpack.c.l.bf16 %v9239_v30 }
 0x442   : > { %v6738_v27 = vrot.slane %v4070_v57, %v11600_v34  ;;  %v6752_v28 = vrot.slane %v4079_v52, %v10529_v18  ;;  %v3030_v57 = vmul.f32 %v8793_v9, %v10054_v8 }
 0x443   : > { %v4305_v20 = vsel %vm3158_vm0, %v3028_v16, 0.0  ;;  %v8794_v16 = vunpack.c.h.bf16 %v9238_v46 }
 0x444   : > { %v6739_v1 = vsel %vm5316_vm15, %v6738_v27, %v6734_v44  ;;  %4294 = vadd.xlane.f32.xlu1 %v4293_v4  ;;  %4285 = vadd.xlane.f32.xlu0 %v4284_v2  ;;  %v8790_v27 = vunpack.c.h.bf16 %v9237_v40  ;;  %v4296_v4 = vsel %vm3158_vm0, %v3025_v15, 0.0  ;;  %v9241_v15 = vld [vmem:[%s13709_s3 + $0x618] sm:$0xff]  }
 0x445   : > { %v12584_v0 = vsel %vm13763_vm3, %v6739_v1, %v12481_v21  ;;  %v4085_v17 = vpop.xlane.xlu1 %4084  ;;  %v4076_v59 = vpop.xlane.xlu0 %4075  ;;  %v8786_v21 = vunpack.c.h.bf16 %v12554_v42  ;;  %vm13765_vm3 = vcmask 195712  }
 0x446   : > { %v6747_v43 = vrot.slane %v4076_v59, %v10396_v49  ;;  %v6762_v42 = vrot.slane %v4085_v17, %v10714_v12 }
 0x447   : > { %v3027_v2 = vmul.f32 %v8786_v21, %v10809_v45 }
 0x448   : > { %v6748_v13 = vsel %vm13764_vm1, %v6747_v43, %v6743_v36  ;;  %4300 = vadd.xlane.f32.xlu1 %v4299_v33  ;;  %4291 = vadd.xlane.f32.xlu0 %v4290_v54  ;;  %vm13766_vm1 = vcmask 261312   ;;  %v4311_v33 = vsel %vm3158_vm0, %v3030_v57, 0.0  ;;  %v3032_v36 = vmul.f32 %v8797_v41, %v10158_v25 }
 0x449   : > { %v4091_v22 = vpop.xlane.xlu1 %4090  ;;  %v6753_v29 = vsel %vm13765_vm3, %v6752_v28, %v6748_v13  ;;  %v4082_v44 = vpop.xlane.xlu0 %4081  ;;  %v3029_v43 = vmul.f32 %v8790_v27, %v10995_v63  ;;  %v4302_v9 = vsel %vm3158_vm0, %v3027_v2, 0.0  ;;  %v8801_v28 = vunpack.c.l.bf16 %v9240_v39 }
 0x44a   : > { %v6757_v52 = vrot.slane %v4082_v44, %v13729_v38  ;;  %v6772_v54 = vrot.slane %v4091_v22, %v10900_v10  ;;  %v4317_v22 = vsel %vm3158_vm0, %v3032_v36, 0.0  ;;  %v8805_v41 = vunpack.c.l.bf16 %v9241_v15 }
 0x44b   : > { %v4308_v57 = vsel %vm3158_vm0, %v3029_v43, 0.0  ;;  %v3034_v27 = vmul.f32 %v8801_v28, %v10254_v6  ;;  %v8802_v36 = vunpack.c.h.bf16 %v9240_v39  ;;  %vm13767_vm3 = vcmask 1043459  }
 0x44c   : > { %v6758_v19 = vsel %vm13766_vm1, %v6757_v52, %v6753_v29  ;;  %4306 = vadd.xlane.f32.xlu1 %v4305_v20  ;;  %4297 = vadd.xlane.f32.xlu0 %v4296_v4  ;;  %v8798_v20 = vunpack.c.h.bf16 %v9239_v30  ;;  %v9242_v4 = vld [vmem:[%s13709_s3 + $0x620] sm:$0xff]   ;;  %vm13768_vm1 = vcmask 130112  }
 0x44d   : > { %v4097_v1 = vpop.xlane.xlu1 %4096  ;;  %v6763_v59 = vsel %vm5239_vm4, %v6762_v42, %v6758_v19  ;;  %v4088_v40 = vpop.xlane.xlu0 %4087  ;;  %v3031_v42 = vmul.f32 %v8794_v16, %v10059_v14  ;;  %v4323_v43 = vsel %vm3158_vm0, %v3034_v27, 0.0  ;;  %v9243_v16 = vld [vmem:[%s13709_s3 + $0x628] sm:$0xff]   ;;  %v8806_v27 = vunpack.c.h.bf16 %v9241_v15  ;;  %v9245_v15 = vld [vmem:[%s13709_s3 + $0x638] sm:$0xff]  }
 0x44e   : > { %v6767_v17 = vrot.slane %v4088_v40, %v10754_v24  ;;  %v6782_v46 = vrot.slane %v4097_v1, %v11086_v7  ;;  %v3036_v1 = vmul.f32 %v8805_v41, %v10330_v48 }
 0x450   : > { %v6768_v21 = vsel %vm5246_vm5, %v6767_v17, %v6763_v59  ;;  %4312 = vadd.xlane.f32.xlu1 %v4311_v33  ;;  %4303 = vadd.xlane.f32.xlu0 %v4302_v9  ;;  %v8809_v33 = vunpack.c.l.bf16 %v9242_v4  ;;  %v3033_v9 = vmul.f32 %v8798_v20, %v10174_v23 }
 0x451   : > { %v4103_v13 = vpop.xlane.xlu1 %4102  ;;  %v6773_v29 = vsel %vm5253_vm6, %v6772_v54, %v6768_v21  ;;  %v4094_v44 = vpop.xlane.xlu0 %4093  ;;  %v4314_v54 = vsel %vm3158_vm0, %v3031_v42, 0.0  ;;  %v9244_v42 = vld [vmem:[%s13709_s3 + $0x630] sm:$0xff]  }
 0x452   : > { %v6777_v52 = vrot.slane %v4094_v44, %v10940_v50  ;;  %v6792_v30 = vrot.slane %v4103_v13, %v11251_v35  ;;  %v4329_v44 = vsel %vm3158_vm0, %v3036_v1, 0.0  ;;  %v4320_v41 = vsel %vm3158_vm0, %v3033_v9, 0.0 }
 0x453   : > { %v8817_v1 = vunpack.c.l.bf16 %v9244_v42 }
 0x454   : > { %v6778_v2 = vsel %vm5260_vm7, %v6777_v52, %v6773_v29  ;;  %4318 = vadd.xlane.f32.xlu1 %v4317_v22  ;;  %4309 = vadd.xlane.f32.xlu0 %v4308_v57  ;;  %v3038_v52 = vmul.f32 %v8809_v33, %v10430_v32  ;;  %v3035_v22 = vmul.f32 %v8802_v36, %v10271_v26  ;;  %v8810_v33 = vunpack.c.h.bf16 %v9242_v4 }
 0x455   : > { %v4109_v19 = vpop.xlane.xlu1 %4108  ;;  %v6783_v59 = vsel %vm5267_vm8, %v6782_v46, %v6778_v2  ;;  %v4100_v40 = vpop.xlane.xlu0 %4099  ;;  %v8813_v46 = vunpack.c.l.bf16 %v9243_v16 }
 0x456   : > { %v6787_v17 = vrot.slane %v4100_v40, %v11126_v56  ;;  %v6802_v57 = vrot.slane %v4109_v19, %v11406_v37  ;;  %v4335_v19 = vsel %vm3158_vm0, %v3038_v52, 0.0 }
 0x458   : > { %v6788_v28 = vsel %vm5274_vm9, %v6787_v17, %v6783_v59  ;;  %4324 = vadd.xlane.f32.xlu1 %v4323_v43  ;;  %4315 = vadd.xlane.f32.xlu0 %v4314_v54  ;;  %v3040_v43 = vmul.f32 %v8813_v46, %v10589_v58  ;;  %v3037_v54 = vmul.f32 %v8806_v27, %v10347_v53  ;;  %v9246_v46 = vld [vmem:[%s13709_s3 + $0x640] sm:$0xff]  }
 0x459   : > { %v4115_v21 = vpop.xlane.xlu1 %4114  ;;  %v6793_v29 = vsel %vm5281_vm10, %v6792_v30, %v6788_v28  ;;  %v4106_v39 = vpop.xlane.xlu0 %4105  ;;  %v4326_v30 = vsel %vm3158_vm0, %v3035_v22, 0.0 }
 0x45a   : > { %v6797_v13 = vrot.slane %v4106_v39, %v11285_v60  ;;  %v6812_v36 = vrot.slane %v4115_v21, %v11564_v61  ;;  %v8821_v39 = vunpack.c.l.bf16 %v9245_v15  ;;  %v3039_v21 = vmul.f32 %v8810_v33, %v10457_v3 }
 0x45b   : > { %v4341_v52 = vsel %vm3158_vm0, %v3040_v43, 0.0  ;;  %v4332_v22 = vsel %vm3158_vm0, %v3037_v54, 0.0  ;;  %v8818_v43 = vunpack.c.h.bf16 %v9244_v42 }
 0x45c   : > { %v6798_v20 = vsel %vm5288_vm11, %v6797_v13, %v6793_v29  ;;  %4330 = vadd.xlane.f32.xlu1 %v4329_v44  ;;  %4321 = vadd.xlane.f32.xlu0 %v4320_v41  ;;  %v3042_v44 = vmul.f32 %v8817_v1, %v10773_v55  ;;  %v4338_v1 = vsel %vm3158_vm0, %v3039_v21, 0.0 }
 0x45d   : > { %v4121_v2 = vpop.xlane.xlu1 %4120  ;;  %v6803_v59 = vsel %vm5295_vm12, %v6802_v57, %v6798_v20  ;;  %v4112_v40 = vpop.xlane.xlu0 %4111  ;;  %v8814_v57 = vunpack.c.h.bf16 %v9243_v16 }
 0x45e   : > { %v6807_v17 = vrot.slane %v4112_v40, %v11441_v31  ;;  %v3044_v40 = vmul.f32 %v8821_v39, %v10959_v5 }
 0x460   : > { %v6808_v9 = vsel %vm5302_vm13, %v6807_v17, %v6803_v59  ;;  %4336 = vadd.xlane.f32.xlu1 %v4335_v19  ;;  %4327 = vadd.xlane.f32.xlu0 %v4326_v30  ;;  %v6822_v17 = vrot.slane %v4121_v2, %v10393_v47  ;;  %v4347_v19 = vsel %vm3158_vm0, %v3042_v44, 0.0  ;;  %v8825_v30 = vunpack.c.l.bf16 %v9246_v46 }
 0x461   : > { %v4127_v28 = vpop.xlane.xlu1 %4126  ;;  %v6813_v29 = vsel %vm5309_vm14, %v6812_v36, %v6808_v9  ;;  %v4118_v4 = vpop.xlane.xlu0 %4117  ;;  %v3041_v36 = vmul.f32 %v8814_v57, %v10624_v51 }
 0x462   : > { %v6817_v13 = vrot.slane %v4118_v4, %v11600_v34  ;;  %v6831_v33 = vrot.slane %v4127_v28, %v10529_v18  ;;  %v4353_v28 = vsel %vm3158_vm0, %v3044_v40, 0.0  ;;  %v3046_v21 = vmul.f32 %v8825_v30, %v10054_v8 }
 0x463   : > { %v4344_v44 = vsel %vm3158_vm0, %v3041_v36, 0.0  ;;  %v8826_v36 = vunpack.c.h.bf16 %v9246_v46 }
 0x464   : > { %v6818_v41 = vsel %vm5316_vm15, %v6817_v13, %v6813_v29  ;;  %4342 = vadd.xlane.f32.xlu1 %v4341_v52  ;;  %4333 = vadd.xlane.f32.xlu0 %v4332_v22  ;;  %v8822_v13 = vunpack.c.h.bf16 %v9245_v15  ;;  %v3043_v52 = vmul.f32 %v8818_v43, %v10809_v45  ;;  %v9248_v22 = vld [vmem:[%s13709_s3 + $0x650] sm:$0xff]   ;;  %v9249_v43 = vld [vmem:[%s13709_s3 + $0x658] sm:$0xff]  }
 0x465   : > { %v12676_v27 = vsel %vm13767_vm3, %v6818_v41, %v12584_v0  ;;  %v4133_v20 = vpop.xlane.xlu1 %4132  ;;  %v4124_v59 = vpop.xlane.xlu0 %4123  ;;  %v9247_v0 = vld [vmem:[%s13709_s3 + $0x648] sm:$0xff]   ;;  %vm13769_vm3 = vcmask 195712  }
 0x466   : > { %v6826_v16 = vrot.slane %v4124_v59, %v10396_v49  ;;  %v8829_v39 = vunpack.c.l.bf16 %v9247_v0  ;;  %v6841_v42 = vrot.slane %v4133_v20, %v10714_v12 }
 0x468   : > { %v6827_v54 = vsel %vm13768_vm1, %v6826_v16, %v6822_v17  ;;  %4348 = vadd.xlane.f32.xlu1 %v4347_v19  ;;  %4339 = vadd.xlane.f32.xlu0 %v4338_v1  ;;  %vm13770_vm1 = vcmask 261312   ;;  %v3048_v40 = vmul.f32 %v8829_v39, %v10158_v25  ;;  %v3045_v17 = vmul.f32 %v8822_v13, %v10995_v63 }
 0x469   : > { %v4139_v2 = vpop.xlane.xlu1 %4138  ;;  %v6832_v9 = vsel %vm13769_vm3, %v6831_v33, %v6827_v54  ;;  %v4130_v29 = vpop.xlane.xlu0 %4129  ;;  %v8833_v16 = vunpack.c.l.bf16 %v9248_v22  ;;  %v4359_v1 = vsel %vm3158_vm0, %v3046_v21, 0.0  ;;  %v4350_v33 = vsel %vm3158_vm0, %v3043_v52, 0.0  ;;  %v9250_v21 = vld [vmem:[%s13709_s3 + $0x660] sm:$0xff]  }
 0x46a   : > { %v6836_v4 = vrot.slane %v4130_v29, %v13729_v38  ;;  %v6851_v19 = vrot.slane %v4139_v2, %v10900_v10  ;;  %v4365_v2 = vsel %vm3158_vm0, %v3048_v40, 0.0  ;;  %v3047_v13 = vmul.f32 %v8826_v36, %v10059_v14 }
 0x46b   : > { %v3050_v46 = vmul.f32 %v8833_v16, %v10254_v6  ;;  %v8841_v40 = vunpack.c.l.bf16 %v9250_v21  ;;  %vm13771_vm3 = vcmask 130112  }
 0x46c   : > { %v6837_v57 = vsel %vm13770_vm1, %v6836_v4, %v6832_v9  ;;  %4354 = vadd.xlane.f32.xlu1 %v4353_v28  ;;  %4345 = vadd.xlane.f32.xlu0 %v4344_v44  ;;  %v4356_v28 = vsel %vm3158_vm0, %v3045_v17, 0.0  ;;  %v8830_v44 = vunpack.c.h.bf16 %v9247_v0  ;;  %v8834_v17 = vunpack.c.h.bf16 %v9248_v22 }
 0x46d   : > { %v4145_v41 = vpop.xlane.xlu1 %4144  ;;  %v6842_v59 = vsel %vm5239_vm4, %v6841_v42, %v6837_v57  ;;  %v4136_v15 = vpop.xlane.xlu0 %4135  ;;  %v8837_v42 = vunpack.c.l.bf16 %v9249_v43  ;;  %v4362_v16 = vsel %vm3158_vm0, %v3047_v13, 0.0  ;;  %v8838_v13 = vunpack.c.h.bf16 %v9249_v43 }
 0x46e   : > { %v6846_v20 = vrot.slane %v4136_v15, %v10754_v24  ;;  %v6861_v39 = vrot.slane %v4145_v41, %v11086_v7  ;;  %v4371_v41 = vsel %vm3158_vm0, %v3050_v46, 0.0  ;;  %vm13772_vm1 = vcmask 195712  }
 0x470   : > { %v6847_v30 = vsel %vm5246_vm5, %v6846_v20, %v6842_v59  ;;  %4360 = vadd.xlane.f32.xlu1 %v4359_v1  ;;  %4351 = vadd.xlane.f32.xlu0 %v4350_v33  ;;  %v3049_v1 = vmul.f32 %v8830_v44, %v10174_v23  ;;  %v9251_v33 = vld [vmem:[%s13709_s3 + $0x668] sm:$0xff]   ;;  %v9252_v44 = vld [vmem:[%s13709_s3 + $0x670] sm:$0xff]  }
 0x471   : > { %v4151_v54 = vpop.xlane.xlu1 %4150  ;;  %v6852_v9 = vsel %vm5253_vm6, %v6851_v19, %v6847_v30  ;;  %v4142_v29 = vpop.xlane.xlu0 %4141  ;;  %v3052_v19 = vmul.f32 %v8837_v42, %v10330_v48 }
 0x472   : > { %v6856_v4 = vrot.slane %v4142_v29, %v10940_v50  ;;  %v6871_v0 = vrot.slane %v4151_v54, %v11251_v35  ;;  %v3054_v29 = vmul.f32 %v8841_v40, %v10430_v32 }
 0x473   : > { %v4377_v46 = vsel %vm3158_vm0, %v3052_v19, 0.0  ;;  %v9253_v19 = vld [vmem:[%s13709_s3 + $0x678] sm:$0xff]  }
 0x474   : > { %v6857_v52 = vsel %vm5260_vm7, %v6856_v4, %v6852_v9  ;;  %4366 = vadd.xlane.f32.xlu1 %v4365_v2  ;;  %4357 = vadd.xlane.f32.xlu0 %v4356_v28  ;;  %v3051_v4 = vmul.f32 %v8834_v17, %v10271_v26  ;;  %v8845_v2 = vunpack.c.l.bf16 %v9251_v33  ;;  %v3053_v17 = vmul.f32 %v8838_v13, %v10347_v53 }
 0x475   : > { %v4157_v57 = vpop.xlane.xlu1 %4156  ;;  %v6862_v59 = vsel %vm5267_vm8, %v6861_v39, %v6857_v52  ;;  %v4148_v15 = vpop.xlane.xlu0 %4147  ;;  %v4368_v39 = vsel %vm3158_vm0, %v3049_v1, 0.0 }
 0x476   : > { %v6866_v20 = vrot.slane %v4148_v15, %v11126_v56  ;;  %v6881_v28 = vrot.slane %v4157_v57, %v11406_v37  ;;  %v4383_v57 = vsel %vm3158_vm0, %v3054_v29, 0.0  ;;  %v3056_v43 = vmul.f32 %v8845_v2, %v10589_v58 }
 0x477   : > { %v8853_v29 = vunpack.c.l.bf16 %v9253_v19  ;;  %v4380_v2 = vsel %vm3158_vm0, %v3053_v17, 0.0  ;;  %v8850_v17 = vunpack.c.h.bf16 %v9252_v44 }
 0x478   : > { %v6867_v36 = vsel %vm5274_vm9, %v6866_v20, %v6862_v59  ;;  %4372 = vadd.xlane.f32.xlu1 %v4371_v41  ;;  %4363 = vadd.xlane.f32.xlu0 %v4362_v16  ;;  %v4374_v41 = vsel %vm3158_vm0, %v3051_v4, 0.0  ;;  %v8842_v16 = vunpack.c.h.bf16 %v9250_v21  ;;  %v12760_v21 = vld [vmem:[%s13709_s3 + $0x680] sm:$0xff]   ;;  %v4389_v4 = vsel %vm3158_vm0, %v3056_v43, 0.0 }
 0x479   : > { %v4163_v30 = vpop.xlane.xlu1 %4162  ;;  %v6872_v9 = vsel %vm5281_vm10, %v6871_v0, %v6867_v36  ;;  %v4154_v22 = vpop.xlane.xlu0 %4153  ;;  %v8849_v0 = vunpack.c.l.bf16 %v9252_v44 }
 0x47a   : > { %v6876_v54 = vrot.slane %v4154_v22, %v11285_v60  ;;  %v6891_v40 = vrot.slane %v4163_v30, %v11564_v61  ;;  %v8846_v30 = vunpack.c.h.bf16 %v9251_v33 }
 0x47c   : > { %v6877_v42 = vsel %vm5288_vm11, %v6876_v54, %v6872_v9  ;;  %4378 = vadd.xlane.f32.xlu1 %v4377_v46  ;;  %4369 = vadd.xlane.f32.xlu0 %v4368_v39  ;;  %v3055_v46 = vmul.f32 %v8842_v16, %v10457_v3 }
 0x47d   : > { %v4169_v52 = vpop.xlane.xlu1 %4168  ;;  %v6882_v59 = vsel %vm5295_vm12, %v6881_v28, %v6877_v42  ;;  %v4160_v15 = vpop.xlane.xlu0 %4159  ;;  %v3058_v28 = vmul.f32 %v8849_v0, %v10773_v55  ;;  %v8857_v42 = vunpack.c.l.bf16 %v12760_v21  ;;  %v9255_v0 = vld [vmem:[%s13709_s3 + $0x688] sm:$0xff]  }
 0x47e   : > { %v6886_v20 = vrot.slane %v4160_v15, %v11441_v31 }
 0x47f   : > { %v4395_v43 = vsel %vm3158_vm0, %v3058_v28, 0.0  ;;  %v9256_v28 = vld [vmem:[%s13709_s3 + $0x690] sm:$0xff]  }
 0x480   : > { %v6887_v1 = vsel %vm5302_vm13, %v6886_v20, %v6882_v59  ;;  %4384 = vadd.xlane.f32.xlu1 %v4383_v57  ;;  %4375 = vadd.xlane.f32.xlu0 %v4374_v41  ;;  %v6901_v59 = vrot.slane %v4169_v52, %v10393_v47  ;;  %v3060_v20 = vmul.f32 %v8853_v29, %v10959_v5  ;;  %v8861_v29 = vunpack.c.l.bf16 %v9255_v0 }
 0x481   : > { %v4175_v36 = vpop.xlane.xlu1 %4174  ;;  %v6892_v9 = vsel %vm5309_vm14, %v6891_v40, %v6887_v1  ;;  %v4166_v22 = vpop.xlane.xlu0 %4165  ;;  %v3057_v57 = vmul.f32 %v8846_v30, %v10624_v51  ;;  %v4386_v40 = vsel %vm3158_vm0, %v3055_v46, 0.0  ;;  %v13773_v46 = vld [vmem:[#allocation2_spill] sm:$0xff] }
 0x482   : > { %v6896_v54 = vrot.slane %v4166_v22, %v11600_v34  ;;  %v6910_v41 = vrot.slane %v4175_v36, %v10529_v18  ;;  %v3062_v22 = vmul.f32 %v8857_v42, %v10054_v8 }
 0x483   : > { %v4392_v44 = vsel %vm3158_vm0, %v3057_v57, 0.0  ;;  %v3064_v57 = vmul.f32 %v8861_v29, %v10158_v25 }
 0x484   : > { %v12767_v39 = vsel %vm5316_vm15, %v6896_v54, %v6892_v9  ;;  %4390 = vadd.xlane.f32.xlu1 %v4389_v4  ;;  %4381 = vadd.xlane.f32.xlu0 %v4380_v2  ;;  %v4401_v54 = vsel %vm3158_vm0, %v3060_v20, 0.0  ;;  %v3059_v4 = vmul.f32 %v8850_v17, %v10809_v45  ;;  %v8854_v2 = vunpack.c.h.bf16 %v9253_v19 }
 0x485   : > { %v4181_v13 = vpop.xlane.xlu1 %4180  ;;  %v4172_v33 = vpop.xlane.xlu0 %4171  ;;  %v4407_v19 = vsel %vm3158_vm0, %v3062_v22, 0.0  ;;  %v8858_v17 = vunpack.c.h.bf16 %v12760_v21 }
 0x486   : > { %v6905_v15 = vrot.slane %v4172_v33, %v10396_v49  ;;  %v6920_v30 = vrot.slane %v4181_v13, %v10714_v12 }
 0x488   : > { %v6906_v16 = vsel %vm13771_vm3, %v6905_v15, %v6901_v59  ;;  %4396 = vadd.xlane.f32.xlu1 %v4395_v43  ;;  %4387 = vadd.xlane.f32.xlu0 %v4386_v40  ;;  %vm13774_vm3 = vcmask 1044484   ;;  %v3061_v40 = vmul.f32 %v8854_v2, %v10995_v63  ;;  %v8862_v2 = vunpack.c.h.bf16 %v9255_v0 }
 0x489   : > { %v4187_v52 = vpop.xlane.xlu1 %4186  ;;  %v6911_v1 = vsel %vm13772_vm1, %v6910_v41, %v6906_v16  ;;  %v4178_v9 = vpop.xlane.xlu0 %4177  ;;  %v12794_v33 = vsel %vm13774_vm3, %v13773_v46, %v11914_v11  ;;  %vm13775_vm1 = vcmask 261312   ;;  %v8865_v41 = vunpack.c.l.bf16 %v9256_v28  ;;  %v9257_v16 = vld [vmem:[%s13709_s3 + $0x698] sm:$0xff]   ;;  %v9258_v46 = vld [vmem:[%s13709_s3 + $0x6a0] sm:$0xff]  }
 0x48a   : > { %v6915_v36 = vrot.slane %v4178_v9, %v13729_v38  ;;  %v6930_v43 = vrot.slane %v4187_v52, %v10900_v10  ;;  %v4398_v11 = vsel %vm3158_vm0, %v3059_v4, 0.0  ;;  %v8869_v29 = vunpack.c.l.bf16 %v9257_v16 }
 0x48b   : > { %v3063_v4 = vmul.f32 %v8858_v17, %v10059_v14  ;;  %v9259_v17 = vld [vmem:[%s13709_s3 + $0x6a8] sm:$0xff]   ;;  %vm13776_vm3 = vcmask 130112  }
 0x48c   : > { %v6916_v42 = vsel %vm13775_vm1, %v6915_v36, %v6911_v1  ;;  %4402 = vadd.xlane.f32.xlu1 %v4401_v54  ;;  %4393 = vadd.xlane.f32.xlu0 %v4392_v44  ;;  %v4413_v54 = vsel %vm3158_vm0, %v3064_v57, 0.0  ;;  %v3066_v44 = vmul.f32 %v8865_v41, %v10254_v6  ;;  %v3068_v57 = vmul.f32 %v8869_v29, %v10330_v48 }
 0x48d   : > { %v4193_v59 = vpop.xlane.xlu1 %4192  ;;  %v6921_v15 = vsel %vm5239_vm4, %v6920_v30, %v6916_v42  ;;  %v4184_v13 = vpop.xlane.xlu0 %4183  ;;  %v4404_v30 = vsel %vm3158_vm0, %v3061_v40, 0.0  ;;  %v8873_v41 = vunpack.c.l.bf16 %v9258_v46  ;;  %v8866_v40 = vunpack.c.h.bf16 %v9256_v28 }
 0x48e   : > { %v6925_v20 = vrot.slane %v4184_v13, %v10754_v24  ;;  %v6940_v21 = vrot.slane %v4193_v59, %v11086_v7  ;;  %v4419_v59 = vsel %vm3158_vm0, %v3066_v44, 0.0  ;;  %v8877_v29 = vunpack.c.l.bf16 %v9259_v17 }
 0x48f   : > { %v3070_v44 = vmul.f32 %v8873_v41, %v10430_v32  ;;  %vm13777_vm1 = vcmask 195712  }
 0x490   : > { %v6926_v1 = vsel %vm5246_vm5, %v6925_v20, %v6921_v15  ;;  %4408 = vadd.xlane.f32.xlu1 %v4407_v19  ;;  %4399 = vadd.xlane.f32.xlu0 %v4398_v11  ;;  %v3065_v11 = vmul.f32 %v8862_v2, %v10174_v23  ;;  %v9260_v2 = vld [vmem:[%s13709_s3 + $0x6b0] sm:$0xff]  }
 0x491   : > { %v4199_v9 = vpop.xlane.xlu1 %4198  ;;  %v6931_v22 = vsel %vm5253_vm6, %v6930_v43, %v6926_v1  ;;  %v4190_v36 = vpop.xlane.xlu0 %4189  ;;  %v4410_v43 = vsel %vm3158_vm0, %v3063_v4, 0.0  ;;  %v8870_v4 = vunpack.c.h.bf16 %v9257_v16  ;;  %v8881_v41 = vunpack.c.l.bf16 %v9260_v2 }
 0x492   : > { %v6935_v52 = vrot.slane %v4190_v36, %v10940_v50  ;;  %v6950_v0 = vrot.slane %v4199_v9, %v11251_v35  ;;  %v4425_v9 = vsel %vm3158_vm0, %v3068_v57, 0.0  ;;  %v3072_v57 = vmul.f32 %v8877_v29, %v10589_v58 }
 0x494   : > { %v6936_v42 = vsel %vm5260_vm7, %v6935_v52, %v6931_v22  ;;  %4414 = vadd.xlane.f32.xlu1 %v4413_v54  ;;  %4405 = vadd.xlane.f32.xlu0 %v4404_v30  ;;  %v3067_v30 = vmul.f32 %v8866_v40, %v10271_v26  ;;  %v9261_v40 = vld [vmem:[%s13709_s3 + $0x6b8] sm:$0xff]   ;;  %v4437_v29 = vsel %vm3158_vm0, %v3072_v57, 0.0 }
 0x495   : > { %v4205_v15 = vpop.xlane.xlu1 %4204  ;;  %v6941_v13 = vsel %vm5267_vm8, %v6940_v21, %v6936_v42  ;;  %v4196_v20 = vpop.xlane.xlu0 %4195  ;;  %v4416_v21 = vsel %vm3158_vm0, %v3065_v11, 0.0  ;;  %v8874_v11 = vunpack.c.h.bf16 %v9258_v46  ;;  %v12859_v46 = vld [vmem:[%s13709_s3 + $0x6c0] sm:$0xff]  }
 0x496   : > { %v6945_v19 = vrot.slane %v4196_v20, %v11126_v56  ;;  %v6960_v28 = vrot.slane %v4205_v15, %v11406_v37  ;;  %v4431_v15 = vsel %vm3158_vm0, %v3070_v44, 0.0  ;;  %v8885_v44 = vunpack.c.l.bf16 %v9261_v40 }
 0x498   : > { %v6946_v1 = vsel %vm5274_vm9, %v6945_v19, %v6941_v13  ;;  %4420 = vadd.xlane.f32.xlu1 %v4419_v59  ;;  %4411 = vadd.xlane.f32.xlu0 %v4410_v43  ;;  %v3069_v43 = vmul.f32 %v8870_v4, %v10347_v53  ;;  %v3076_v57 = vmul.f32 %v8885_v44, %v10959_v5 }
 0x499   : > { %v4211_v22 = vpop.xlane.xlu1 %4210  ;;  %v6951_v36 = vsel %vm5281_vm10, %v6950_v0, %v6946_v1  ;;  %v4202_v52 = vpop.xlane.xlu0 %4201  ;;  %v4422_v0 = vsel %vm3158_vm0, %v3067_v30, 0.0  ;;  %v8878_v30 = vunpack.c.h.bf16 %v9259_v17  ;;  %v12874_v17 = vld [vmem:[%s13709_s3 + $0x6c8] sm:$0xff]  }
 0x49a   : > { %v6955_v54 = vrot.slane %v4202_v52, %v11285_v60  ;;  %v6970_v16 = vrot.slane %v4211_v22, %v11564_v61  ;;  %v3074_v22 = vmul.f32 %v8881_v41, %v10773_v55  ;;  %v8882_v41 = vunpack.c.h.bf16 %v9260_v2 }
 0x49c   : > { %v6956_v42 = vsel %vm5288_vm11, %v6955_v54, %v6951_v36  ;;  %4426 = vadd.xlane.f32.xlu1 %v4425_v9  ;;  %4417 = vadd.xlane.f32.xlu0 %v4416_v21  ;;  %v3071_v21 = vmul.f32 %v8874_v11, %v10457_v3  ;;  %v3073_v11 = vmul.f32 %v8878_v30, %v10624_v51  ;;  %v13778_v30 = vld [vmem:[#allocation5_spill] sm:$0xff] }
 0x49d   : > { %v4217_v13 = vpop.xlane.xlu1 %4216  ;;  %v6961_v20 = vsel %vm5295_vm12, %v6960_v28, %v6956_v42  ;;  %v4208_v19 = vpop.xlane.xlu0 %4207  ;;  %v4428_v28 = vsel %vm3158_vm0, %v3069_v43, 0.0  ;;  %v3075_v44 = vmul.f32 %v8882_v41, %v10809_v45 }
 0x49e   : > { %v6965_v59 = vrot.slane %v4208_v19, %v11441_v31  ;;  %v8889_v19 = vunpack.c.l.bf16 %v12859_v46  ;;  %v4434_v43 = vsel %vm3158_vm0, %v3071_v21, 0.0  ;;  %v8886_v21 = vunpack.c.h.bf16 %v9261_v40 }
 0x4a0   : > { %v6966_v1 = vsel %vm5302_vm13, %v6965_v59, %v6961_v20  ;;  %4432 = vadd.xlane.f32.xlu1 %v4431_v15  ;;  %4423 = vadd.xlane.f32.xlu0 %v4422_v0  ;;  %v6980_v59 = vrot.slane %v4217_v13, %v10393_v47  ;;  %v4443_v0 = vsel %vm3158_vm0, %v3074_v22, 0.0  ;;  %v3078_v22 = vmul.f32 %v8889_v19, %v10054_v8 }
 0x4a1   : > { %v4223_v36 = vpop.xlane.xlu1 %4222  ;;  %v6971_v52 = vsel %vm5309_vm14, %v6970_v16, %v6966_v1  ;;  %v4214_v54 = vpop.xlane.xlu0 %4213 }
 0x4a2   : > { %v6975_v9 = vrot.slane %v4214_v54, %v11600_v34  ;;  %v6989_v16 = vrot.slane %v4223_v36, %v10529_v18  ;;  %v8893_v54 = vunpack.c.l.bf16 %v12874_v17  ;;  %v4449_v36 = vsel %vm3158_vm0, %v3076_v57, 0.0 }
 0x4a4   : > { %v12865_v4 = vsel %vm5316_vm15, %v6975_v9, %v6971_v52  ;;  %4438 = vadd.xlane.f32.xlu1 %v4437_v29  ;;  %4429 = vadd.xlane.f32.xlu0 %v4428_v28  ;;  %v4440_v28 = vsel %vm3158_vm0, %v3073_v11, 0.0  ;;  %v3080_v40 = vmul.f32 %v8893_v54, %v10158_v25 }
 0x4a5   : > { %v4229_v42 = vpop.xlane.xlu1 %4228  ;;  %v4220_v20 = vpop.xlane.xlu0 %4219 }
 0x4a6   : > { %v6984_v15 = vrot.slane %v4220_v20, %v10396_v49  ;;  %v6999_v29 = vrot.slane %v4229_v42, %v10714_v12  ;;  %v4455_v42 = vsel %vm3158_vm0, %v3078_v22, 0.0 }
 0x4a8   : > { %v6985_v13 = vsel %vm13776_vm3, %v6984_v15, %v6980_v59  ;;  %4444 = vadd.xlane.f32.xlu1 %v4443_v0  ;;  %4435 = vadd.xlane.f32.xlu0 %v4434_v43  ;;  %vm13779_vm3 = vcmask 1045509   ;;  %v3077_v43 = vmul.f32 %v8886_v21, %v10995_v63 }
 0x4a9   : > { %v4235_v1 = vpop.xlane.xlu1 %4234  ;;  %v6990_v2 = vsel %vm13777_vm1, %v6989_v16, %v6985_v13  ;;  %v4226_v52 = vpop.xlane.xlu0 %4225  ;;  %v12892_v20 = vsel %vm13779_vm3, %v13778_v30, %v12794_v33  ;;  %vm13780_vm1 = vcmask 261312   ;;  %v4446_v16 = vsel %vm3158_vm0, %v3075_v44, 0.0  ;;  %v9270_v33 = vld [vmem:[%s13709_s3 + $0x700] sm:$0xff]  }
 0x4aa   : > { %v6994_v9 = vrot.slane %v4226_v52, %v13729_v38  ;;  %v7009_v0 = vrot.slane %v4235_v1, %v10900_v10  ;;  %v8922_v11 = vunpack.c.h.bf16 %v9270_v33  ;;  %v8890_v13 = vunpack.c.h.bf16 %v12859_v46 }
 0x4ab   : > { %v4461_v1 = vsel %vm3158_vm0, %v3080_v40, 0.0  ;;  %vm13784_vm3 = vcmask 130112  }
 0x4ac   : > { %v6995_v59 = vsel %vm13780_vm1, %v6994_v9, %v6990_v2  ;;  %4450 = vadd.xlane.f32.xlu1 %v4449_v36  ;;  %4441 = vadd.xlane.f32.xlu0 %v4440_v28  ;;  %v9271_v2 = vld [vmem:[%s13709_s3 + $0x708] sm:$0xff]   ;;  %v4452_v28 = vsel %vm3158_vm0, %v3077_v43, 0.0  ;;  %v3095_v21 = vmul.f32 %v8922_v11, %v10059_v14  ;;  %v3079_v30 = vmul.f32 %v8890_v13, %v10059_v14 }
 0x4ad   : > { %v4241_v15 = vpop.xlane.xlu1 %4240  ;;  %v7000_v57 = vsel %vm5239_vm4, %v6999_v29, %v6995_v59  ;;  %v4232_v19 = vpop.xlane.xlu0 %4231  ;;  %v8925_v44 = vunpack.c.l.bf16 %v9271_v2  ;;  %v8921_v29 = vunpack.c.l.bf16 %v9270_v33  ;;  %v8894_v13 = vunpack.c.h.bf16 %v12874_v17  ;;  %v9286_v17 = vld [vmem:[%s13709_s3 + $0x780] sm:$0xff]  }
 0x4ae   : > { %v7004_v41 = vrot.slane %v4232_v19, %v10754_v24  ;;  %v7019_v46 = vrot.slane %v4241_v15, %v11086_v7  ;;  %v4506_v43 = vsel %vm3158_vm0, %v3095_v21, 0.0  ;;  %v4458_v11 = vsel %vm3158_vm0, %v3079_v30, 0.0 }
 0x4af   : > { %v3094_v40 = vmul.f32 %v8921_v29, %v10054_v8  ;;  %v8926_v21 = vunpack.c.h.bf16 %v9271_v2  ;;  %vm13785_vm1 = vcmask 195712  }
 0x4b0   : > { %v7005_v52 = vsel %vm5246_vm5, %v7004_v41, %v7000_v57  ;;  %4456 = vadd.xlane.f32.xlu1 %v4455_v42  ;;  %4447 = vadd.xlane.f32.xlu0 %v4446_v16  ;;  %v9278_v42 = vld [vmem:[%s13709_s3 + $0x740] sm:$0xff]   ;;  %v3096_v16 = vmul.f32 %v8925_v44, %v10158_v25 }
 0x4b1   : > { %v4247_v54 = vpop.xlane.xlu1 %4246  ;;  %v7010_v9 = vsel %vm5253_vm6, %v7009_v0, %v7005_v52  ;;  %v4238_v36 = vpop.xlane.xlu0 %4237  ;;  %v8954_v33 = vunpack.c.h.bf16 %v9278_v42  ;;  %v8953_v30 = vunpack.c.l.bf16 %v9278_v42  ;;  %v3097_v42 = vmul.f32 %v8926_v21, %v10174_v23 }
 0x4b2   : > { %v7014_v22 = vrot.slane %v4238_v36, %v10940_v50  ;;  %v7029_v0 = vrot.slane %v4247_v54, %v11251_v35  ;;  %v4509_v44 = vsel %vm3158_vm0, %v3096_v16, 0.0  ;;  %v4503_v54 = vsel %vm3158_vm0, %v3094_v40, 0.0 }
 0x4b3   : > { %v3111_v29 = vmul.f32 %v8954_v33, %v10059_v14  ;;  %v8985_v40 = vunpack.c.l.bf16 %v9286_v17 }
 0x4b4   : > { %v7015_v59 = vsel %vm5260_vm7, %v7014_v22, %v7010_v9  ;;  %4462 = vadd.xlane.f32.xlu1 %v4461_v1  ;;  %4453 = vadd.xlane.f32.xlu0 %v4452_v28  ;;  %v3081_v28 = vmul.f32 %v8894_v13, %v10174_v23  ;;  %v9279_v13 = vld [vmem:[%s13709_s3 + $0x748] sm:$0xff]  }
 0x4b5   : > { %v4253_v57 = vpop.xlane.xlu1 %4252  ;;  %v7020_v19 = vsel %vm5267_vm8, %v7019_v46, %v7015_v59  ;;  %v4244_v41 = vpop.xlane.xlu0 %4243 }
 0x4b6   : > { %v7024_v15 = vrot.slane %v4244_v41, %v11126_v56  ;;  %v7039_v46 = vrot.slane %v4253_v57, %v11406_v37  ;;  %v4554_v57 = vsel %vm3158_vm0, %v3111_v29, 0.0  ;;  %v4464_v2 = vsel %vm3158_vm0, %v3081_v28, 0.0  ;;  %v13781_v28 = vld [vmem:[#allocation6_spill] sm:$0xff] }
 0x4b7   : > { %v6417_v21 = vrot.slane %v13781_v28, %v11564_v61 }
 0x4b8   : > { %v7025_v52 = vsel %vm5274_vm9, %v7024_v15, %v7020_v19  ;;  %4507 = vadd.xlane.f32.xlu1 %v4506_v43  ;;  %4459 = vadd.xlane.f32.xlu0 %v4458_v11  ;;  %v9264_v19 = vld [vmem:[%s13709_s3 + $0x6d0] sm:$0xff]  }
 0x4b9   : > { %v12930_v9 = vpop.xlane.xlu1 %4258  ;;  %v7030_v36 = vsel %vm5281_vm10, %v7029_v0, %v7025_v52  ;;  %v4250_v22 = vpop.xlane.xlu0 %4249  ;;  %v3110_v0 = vmul.f32 %v8953_v30, %v10054_v8  ;;  %v8897_v43 = vunpack.c.l.bf16 %v9264_v19 }
 0x4ba   : > { %v7034_v1 = vrot.slane %v4250_v22, %v11285_v60  ;;  %v3126_v22 = vmul.f32 %v8985_v40, %v10054_v8  ;;  %v8958_v40 = vunpack.c.h.bf16 %v9279_v13 }
 0x4bb   : > { %v3082_v29 = vmul.f32 %v8897_v43, %v10254_v6 }
 0x4bc   : > { %v7035_v59 = vsel %vm5288_vm11, %v7034_v1, %v7030_v36  ;;  %4510 = vadd.xlane.f32.xlu1 %v4509_v44  ;;  %4504 = vadd.xlane.f32.xlu0 %v4503_v54  ;;  %v8898_v1 = vunpack.c.h.bf16 %v9264_v19  ;;  %v4512_v44 = vsel %vm3158_vm0, %v3097_v42, 0.0  ;;  %v4551_v54 = vsel %vm3158_vm0, %v3110_v0, 0.0  ;;  %v13782_v19 = vld [vmem:[#allocation8_spill] sm:$0xff]  ;;  %v12975_v0 = vld [vmem:[%s13709_s3 + $0x7c0] sm:$0xff]  }
 0x4bd   : > { %v4265_v41 = vpop.xlane.xlu1 %4264  ;;  %v7040_v15 = vsel %vm5295_vm12, %v7039_v46, %v7035_v59  ;;  %v4256_v16 = vpop.xlane.xlu0 %4255  ;;  %v8957_v46 = vunpack.c.l.bf16 %v9279_v13  ;;  %v8986_v42 = vunpack.c.h.bf16 %v9286_v17  ;;  %v12983_v13 = vld [vmem:[%s13709_s3 + $0x710] sm:$0xff]  }
 0x4be   : > { %v7044_v33 = vrot.slane %v4256_v16, %v11441_v31  ;;  %v3083_v16 = vmul.f32 %v8898_v1, %v10271_v26 }
 0x4bf   : > { %v3112_v1 = vmul.f32 %v8957_v46, %v10158_v25 }
 0x4c0   : > { %v12953_v11 = vsel %vm5302_vm13, %v7044_v33, %v7040_v15  ;;  %4555 = vadd.xlane.f32.xlu1 %v4554_v57  ;;  %4465 = vadd.xlane.f32.xlu0 %v4464_v2  ;;  %v4599_v15 = vsel %vm3158_vm0, %v3126_v22, 0.0  ;;  %v6422_v33 = vrot.slane %v13782_v19, %v11600_v34  ;;  %v7059_v57 = vrot.slane %v4265_v41, %v10393_v47  ;;  %v13783_v41 = vld [vmem:[#allocation7_spill] sm:$0xff] }
 0x4c1   : > { %v4271_v52 = vpop.xlane.xlu1 %4270  ;;  %v12958_v36 = vpop.xlane.xlu0 %4261  ;;  %v4467_v22 = vsel %vm3158_vm0, %v3082_v29, 0.0  ;;  %v4470_v28 = vsel %vm3158_vm0, %v3083_v16, 0.0  ;;  %v9017_v19 = vunpack.c.l.bf16 %v12975_v0 }
 0x4c2   : > { %v7068_v43 = vrot.slane %v4271_v52, %v10529_v18  ;;  %v12991_v52 = vld [vmem:[%s13709_s3 + $0x6d8] sm:$0xff]  }
 0x4c4   : > { %4513 = vadd.xlane.f32.xlu1 %v4512_v44  ;;  %4552 = vadd.xlane.f32.xlu0 %v4551_v54  ;;  %v6418_v44 = vsel %vm5309_vm14, %v6417_v21, %v13783_v41  ;;  %v4557_v41 = vsel %vm3158_vm0, %v3112_v1, 0.0  ;;  %v3142_v1 = vmul.f32 %v9017_v19, %v10054_v8 }
 0x4c5   : > { %v4277_v30 = vpop.xlane.xlu1 %4276  ;;  %v4268_v59 = vpop.xlane.xlu0 %4267 }
 0x4c6   : > { %v7063_v2 = vrot.slane %v4268_v59, %v10396_v49  ;;  %v3113_v59 = vmul.f32 %v8958_v40, %v10174_v23 }
 0x4c8   : > { %v7064_v17 = vsel %vm13784_vm3, %v7063_v2, %v7059_v57  ;;  %4600 = vadd.xlane.f32.xlu1 %v4599_v15  ;;  %4468 = vadd.xlane.f32.xlu0 %v4467_v22  ;;  %v3127_v15 = vmul.f32 %v8986_v42, %v10059_v14  ;;  %v8929_v57 = vunpack.c.l.bf16 %v12983_v13  ;;  %v6423_v2 = vsel %vm5316_vm15, %v6422_v33, %v6418_v44  ;;  %v13012_v42 = vld [vmem:[%s13709_s3 + $0x788] sm:$0xff]  }
 0x4c9   : > { %v4283_v54 = vpop.xlane.xlu1 %4282  ;;  %v7069_v29 = vsel %vm13785_vm1, %v7068_v43, %v7064_v17  ;;  %v4274_v46 = vpop.xlane.xlu0 %4273  ;;  %v7078_v22 = vrot.slane %v4277_v30, %v10714_v12  ;;  %v8901_v43 = vunpack.c.l.bf16 %v12991_v52  ;;  %vm13786_vm3 = vcmask 1046534  }
 0x4ca   : > { %v7073_v21 = vrot.slane %v4274_v46, %v13729_v38  ;;  %v13006_v16 = vsel %vm13786_vm3, %v6423_v2, %v12892_v20  ;;  %vm13787_vm1 = vcmask 261312   ;;  %v4560_v20 = vsel %vm3158_vm0, %v3113_v59, 0.0 }
 0x4cb   : > { %v3098_v46 = vmul.f32 %v8929_v57, %v10254_v6  ;;  %v8989_v2 = vunpack.c.l.bf16 %v13012_v42  ;;  %v7054_v59 = vrot.slane %v12958_v36, %v11600_v34  ;;  %v4647_v57 = vsel %vm3158_vm0, %v3142_v1, 0.0 }
 0x4cc   : > { %v7074_v40 = vsel %vm13787_vm1, %v7073_v21, %v7069_v29  ;;  %4471 = vadd.xlane.f32.xlu1 %v4470_v28  ;;  %4558 = vadd.xlane.f32.xlu0 %v4557_v41  ;;  %v7088_v29 = vrot.slane %v4283_v54, %v10900_v10  ;;  %v4602_v28 = vsel %vm3158_vm0, %v3127_v15, 0.0  ;;  %v3084_v21 = vmul.f32 %v8901_v43, %v10330_v48  ;;  %v13036_v41 = vld [vmem:[%s13709_s3 + $0x7c8] sm:$0xff]  }
 0x4cd   : > { %v4289_v33 = vpop.xlane.xlu1 %4288  ;;  %v7079_v30 = vsel %vm5239_vm4, %v7078_v22, %v7074_v40  ;;  %v4280_v44 = vpop.xlane.xlu0 %4279  ;;  %v13026_v22 = vld [vmem:[%s13709_s3 + $0x750] sm:$0xff]   ;;  %v7049_v43 = vrot.slane %v12930_v9, %v11564_v61  ;;  %v3128_v1 = vmul.f32 %v8989_v2, %v10158_v25  ;;  %v9021_v9 = vunpack.c.l.bf16 %v13036_v41 }
 0x4ce   : > { %v7083_v17 = vrot.slane %v4280_v44, %v10754_v24  ;;  %v8961_v36 = vunpack.c.l.bf16 %v13026_v22  ;;  %v7098_v44 = vrot.slane %v4289_v33, %v11086_v7  ;;  %vm13788_vm3 = vcmask 1044484   ;;  %v13789_v33 = vld [vmem:[#allocation11_spill] sm:$0xff] }
 0x4cf   : > { %vm13790_vm1 = vcmask 1045509  }
 0x4d0   : > { %v7084_v8 = vsel %vm5246_vm5, %v7083_v17, %v7079_v30  ;;  %4561 = vadd.xlane.f32.xlu1 %v4560_v20  ;;  %4603 = vadd.xlane.f32.xlu0 %v4602_v28  ;;  %v4515_v30 = vsel %vm3158_vm0, %v3098_v46, 0.0  ;;  %v4473_v17 = vsel %vm3158_vm0, %v3084_v21, 0.0  ;;  %v9018_v20 = vunpack.c.h.bf16 %v12975_v0 }
 0x4d1   : > { %v4295_v19 = vpop.xlane.xlu1 %4294  ;;  %v7089_v54 = vsel %vm5253_vm6, %v7088_v29, %v7084_v8  ;;  %v4286_v15 = vpop.xlane.xlu0 %4285  ;;  %v7050_v28 = vsel %vm5309_vm14, %v7049_v43, %v12953_v11  ;;  %v7791_v46 = vsel %vm13788_vm3, %v12767_v39, %v12676_v27  ;;  %v6501_v21 = vrot.slane %v13789_v33, %v11600_v34  ;;  %v13067_v27 = vld [vmem:[%s13709_s3 + $0x718] sm:$0xff]  }
 0x4d2   : > { %v7093_v40 = vrot.slane %v4286_v15, %v10940_v50  ;;  %v7792_v15 = vsel %vm13790_vm1, %v12865_v4, %v7791_v46  ;;  %v3114_v43 = vmul.f32 %v8961_v36, %v10254_v6  ;;  %vm13792_vm3 = vcmask 1046534   ;;  %v13793_v36 = vld [vmem:[#allocation10_spill] sm:$0xff] }
 0x4d3   : > { %v3143_v4 = vmul.f32 %v9018_v20, %v10059_v14  ;;  %vm13794_vm1 = vcmask 130112  }
 0x4d4   : > { %v7094_v29 = vsel %vm5260_vm7, %v7093_v40, %v7089_v54  ;;  %4648 = vadd.xlane.f32.xlu1 %v4647_v57  ;;  %4516 = vadd.xlane.f32.xlu0 %v4515_v30  ;;  %v7055_v54 = vsel %vm5316_vm15, %v7054_v59, %v7050_v28  ;;  %v13791_v57 = vld [vmem:[#allocation9_spill] sm:$0xff]  ;;  %v7108_v30 = vrot.slane %v4295_v19, %v11251_v35  ;;  %v4605_v59 = vsel %vm3158_vm0, %v3128_v1, 0.0 }
 0x4d5   : > { %v4301_v8 = vpop.xlane.xlu1 %4300  ;;  %v7099_v2 = vsel %vm5267_vm8, %v7098_v44, %v7094_v29  ;;  %v4292_v0 = vpop.xlane.xlu0 %4291  ;;  %v6496_v40 = vrot.slane %v13791_v57, %v11564_v61  ;;  %v7793_v39 = vsel %vm13792_vm3, %v7055_v54, %v7792_v15  ;;  %v8930_v44 = vunpack.c.h.bf16 %v12983_v13 }
 0x4d6   : > { %v7103_v11 = vrot.slane %v4292_v0, %v11126_v56  ;;  %v8933_v54 = vunpack.c.l.bf16 %v13067_v27  ;;  %v4563_v14 = vsel %vm3158_vm0, %v3114_v43, 0.0  ;;  %v3144_v13 = vmul.f32 %v9021_v9, %v10158_v25 }
 0x4d7   : > { %v6497_v28 = vsel %vm5309_vm14, %v6496_v40, %v13793_v36  ;;  %v7118_v20 = vrot.slane %v4301_v8, %v11406_v37  ;;  %v3099_v15 = vmul.f32 %v8930_v44, %v10271_v26  ;;  %v8990_v57 = vunpack.c.h.bf16 %v13012_v42 }
 0x4d8   : > { %v7104_v29 = vsel %vm5274_vm9, %v7103_v11, %v7099_v2  ;;  %4474 = vadd.xlane.f32.xlu1 %v4473_v17  ;;  %4606 = vadd.xlane.f32.xlu0 %v4605_v59  ;;  %v6502_v19 = vsel %vm5316_vm15, %v6501_v21, %v6497_v28  ;;  %v4650_v2 = vsel %vm3158_vm0, %v3143_v4, 0.0  ;;  %v13094_v21 = vld [vmem:[%s13709_s3 + $0x790] sm:$0xff]   ;;  %v4653_v11 = vsel %vm3158_vm0, %v3144_v13, 0.0 }
 0x4d9   : > { %v4307_v46 = vpop.xlane.xlu1 %4306  ;;  %v7109_v33 = vsel %vm5281_vm10, %v7108_v30, %v7104_v29  ;;  %v4298_v0 = vpop.xlane.xlu0 %4297  ;;  %v13085_v17 = vsel %vm13723_vm2, %v6502_v19, %v13006_v16  ;;  %v3100_v43 = vmul.f32 %v8933_v54, %v10330_v48  ;;  %v8993_v42 = vunpack.c.l.bf16 %v13094_v21  ;;  %v13109_v29 = vld [vmem:[%s13709_s3 + $0x6e0] sm:$0xff]  }
 0x4da   : > { %v7113_v1 = vrot.slane %v4298_v0, %v11285_v60  ;;  %v7128_v30 = vrot.slane %v4307_v46, %v11564_v61  ;;  %v4518_v59 = vsel %vm3158_vm0, %v3099_v15, 0.0  ;;  %v3129_v4 = vmul.f32 %v8990_v57, %v10174_v23 }
 0x4db   : > { %v8902_v44 = vunpack.c.h.bf16 %v12991_v52  ;;  %v3130_v54 = vmul.f32 %v8993_v42, %v10254_v6  ;;  %v8905_v19 = vunpack.c.l.bf16 %v13109_v29  ;;  %v13119_v52 = vld [vmem:[%s13709_s3 + $0x758] sm:$0xff]   ;;  %vm13795_vm3 = vcmask 195712  }
 0x4dc   : > { %v7114_v40 = vsel %vm5288_vm11, %v7113_v1, %v7109_v33  ;;  %4564 = vadd.xlane.f32.xlu1 %v4563_v14  ;;  %4651 = vadd.xlane.f32.xlu0 %v4650_v2  ;;  %v4521_v1 = vsel %vm3158_vm0, %v3100_v43, 0.0  ;;  %v4608_v14 = vsel %vm3158_vm0, %v3129_v4, 0.0 }
 0x4dd   : > { %v4313_v25 = vpop.xlane.xlu1 %4312  ;;  %v7119_v16 = vsel %vm5295_vm12, %v7118_v20, %v7114_v40  ;;  %v4304_v9 = vpop.xlane.xlu0 %4303  ;;  %v3085_v13 = vmul.f32 %v8902_v44, %v10347_v53  ;;  %v8962_v20 = vunpack.c.h.bf16 %v13026_v22  ;;  %v8965_v40 = vunpack.c.l.bf16 %v13119_v52 }
 0x4de   : > { %v7123_v8 = vrot.slane %v4304_v9, %v11441_v31  ;;  %v7138_v9 = vrot.slane %v4313_v25, %v10393_v47  ;;  %v3086_v43 = vmul.f32 %v8905_v19, %v10430_v32 }
 0x4df   : > { %v4476_v42 = vsel %vm3158_vm0, %v3085_v13, 0.0 }
 0x4e0   : > { %v7124_v36 = vsel %vm5302_vm13, %v7123_v8, %v7119_v16  ;;  %4654 = vadd.xlane.f32.xlu1 %v4653_v11  ;;  %4519 = vadd.xlane.f32.xlu0 %v4518_v59  ;;  %v4611_v11 = vsel %vm3158_vm0, %v3130_v54, 0.0  ;;  %v9022_v59 = vunpack.c.h.bf16 %v13036_v41 }
 0x4e1   : > { %v4319_v28 = vpop.xlane.xlu1 %4318  ;;  %v4310_v33 = vpop.xlane.xlu0 %4309  ;;  %v7129_v0 = vsel %vm5309_vm14, %v7128_v30, %v7124_v36  ;;  %v3115_v30 = vmul.f32 %v8962_v20, %v10271_v26 }
 0x4e2   : > { %v7133_v46 = vrot.slane %v4310_v33, %v11600_v34  ;;  %v7147_v22 = vrot.slane %v4319_v28, %v10529_v18  ;;  %v4479_v33 = vsel %vm3158_vm0, %v3086_v43, 0.0  ;;  %v3145_v19 = vmul.f32 %v9022_v59, %v10174_v23 }
 0x4e3   : > { %v4566_v54 = vsel %vm3158_vm0, %v3115_v30, 0.0  ;;  %v8994_v43 = vunpack.c.h.bf16 %v13094_v21 }
 0x4e4   : > { %4522 = vadd.xlane.f32.xlu1 %v4521_v1  ;;  %4609 = vadd.xlane.f32.xlu0 %v4608_v14  ;;  %v7134_v2 = vsel %vm5316_vm15, %v7133_v46, %v7129_v0  ;;  %v3116_v0 = vmul.f32 %v8965_v40, %v10330_v48  ;;  %v8934_v1 = vunpack.c.h.bf16 %v13067_v27  ;;  %v13156_v14 = vld [vmem:[%s13709_s3 + $0x720] sm:$0xff]  }
 0x4e5   : > { %v4325_v15 = vpop.xlane.xlu1 %4324  ;;  %v4316_v57 = vpop.xlane.xlu0 %4315  ;;  %v13128_v16 = vsel %vm13723_vm2, %v7134_v2, %v7793_v39  ;;  %v13141_v39 = vld [vmem:[%s13709_s3 + $0x7d0] sm:$0xff]   ;;  %v8937_v27 = vunpack.c.l.bf16 %v13156_v14  ;;  %vm13807_vm2 = vcmask 261312  }
 0x4e6   : > { %v7142_v8 = vrot.slane %v4316_v57, %v10396_v49  ;;  %v9025_v41 = vunpack.c.l.bf16 %v13141_v39  ;;  %v7157_v46 = vrot.slane %v4325_v15, %v10714_v12  ;;  %v4569_v40 = vsel %vm3158_vm0, %v3116_v0, 0.0 }
 0x4e7   : > { %v8906_v0 = vunpack.c.h.bf16 %v13109_v29 }
 0x4e8   : > { %v7143_v25 = vsel %vm13794_vm1, %v7142_v8, %v7138_v9  ;;  %4612 = vadd.xlane.f32.xlu1 %v4611_v11  ;;  %4477 = vadd.xlane.f32.xlu0 %v4476_v42  ;;  %vm13796_vm1 = vcmask 261312   ;;  %v3146_v23 = vmul.f32 %v9025_v41, %v10254_v6  ;;  %v4656_v8 = vsel %vm3158_vm0, %v3145_v19, 0.0  ;;  %v13186_v41 = vld [vmem:[%s13709_s3 + $0x6e8] sm:$0xff]  }
 0x4e9   : > { %v4331_v4 = vpop.xlane.xlu1 %4330  ;;  %v7148_v44 = vsel %vm13795_vm3, %v7147_v22, %v7143_v25  ;;  %v4322_v36 = vpop.xlane.xlu0 %4321  ;;  %v3101_v11 = vmul.f32 %v8934_v1, %v10347_v53  ;;  %v13171_v22 = vld [vmem:[%s13709_s3 + $0x798] sm:$0xff]   ;;  %v8909_v29 = vunpack.c.l.bf16 %v13186_v41  ;;  %vm13797_vm3 = vcmask 130112  }
 0x4ea   : > { %v7152_v28 = vrot.slane %v4322_v36, %v13729_v38  ;;  %v7167_v9 = vrot.slane %v4331_v4, %v10900_v10  ;;  %v4659_v4 = vsel %vm3158_vm0, %v3146_v23, 0.0  ;;  %v8997_v21 = vunpack.c.l.bf16 %v13171_v22 }
 0x4eb   : > { %v8966_v23 = vunpack.c.h.bf16 %v13119_v52 }
 0x4ec   : > { %v7153_v13 = vsel %vm13796_vm1, %v7152_v28, %v7148_v44  ;;  %4480 = vadd.xlane.f32.xlu1 %v4479_v33  ;;  %4567 = vadd.xlane.f32.xlu0 %v4566_v54  ;;  %v3102_v44 = vmul.f32 %v8937_v27, %v10430_v32  ;;  %v4524_v28 = vsel %vm3158_vm0, %v3101_v11, 0.0  ;;  %v3131_v33 = vmul.f32 %v8994_v43, %v10271_v26  ;;  %v13201_v27 = vld [vmem:[%s13709_s3 + $0x760] sm:$0xff]  }
 0x4ed   : > { %v4337_v20 = vpop.xlane.xlu1 %4336  ;;  %v7158_v2 = vsel %vm5239_vm4, %v7157_v46, %v7153_v13  ;;  %v4328_v57 = vpop.xlane.xlu0 %4327  ;;  %v8969_v52 = vunpack.c.l.bf16 %v13201_v27  ;;  %vm13798_vm1 = vcmask 195712  }
 0x4ee   : > { %v7162_v15 = vrot.slane %v4328_v57, %v10754_v24  ;;  %v7177_v36 = vrot.slane %v4337_v20, %v11086_v7  ;;  %v4527_v20 = vsel %vm3158_vm0, %v3102_v44, 0.0  ;;  %v3117_v44 = vmul.f32 %v8966_v23, %v10347_v53 }
 0x4f0   : > { %v7163_v42 = vsel %vm5246_vm5, %v7162_v15, %v7158_v2  ;;  %4570 = vadd.xlane.f32.xlu1 %v4569_v40  ;;  %4657 = vadd.xlane.f32.xlu0 %v4656_v8  ;;  %v3132_v2 = vmul.f32 %v8997_v21, %v10330_v48  ;;  %v4614_v15 = vsel %vm3158_vm0, %v3131_v33, 0.0  ;;  %v3087_v40 = vmul.f32 %v8906_v0, %v10457_v3 }
 0x4f1   : > { %v4343_v6 = vpop.xlane.xlu1 %4342  ;;  %v7168_v30 = vsel %vm5253_vm6, %v7167_v9, %v7163_v42  ;;  %v4334_v59 = vpop.xlane.xlu0 %4333  ;;  %v9026_v21 = vunpack.c.h.bf16 %v13141_v39  ;;  %v4572_v39 = vsel %vm3158_vm0, %v3117_v44, 0.0 }
 0x4f2   : > { %v7172_v25 = vrot.slane %v4334_v59, %v10940_v50  ;;  %v7187_v57 = vrot.slane %v4343_v6, %v11251_v35  ;;  %v4617_v6 = vsel %vm3158_vm0, %v3132_v2, 0.0  ;;  %v13212_v59 = vld [vmem:[%s13709_s3 + $0x7d8] sm:$0xff]   ;;  %v8938_v2 = vunpack.c.h.bf16 %v13156_v14 }
 0x4f4   : > { %v7173_v46 = vsel %vm5260_vm7, %v7172_v25, %v7168_v30  ;;  %4660 = vadd.xlane.f32.xlu1 %v4659_v4  ;;  %4525 = vadd.xlane.f32.xlu0 %v4524_v28  ;;  %v3088_v30 = vmul.f32 %v8909_v29, %v10589_v58  ;;  %v4482_v4 = vsel %vm3158_vm0, %v3087_v40, 0.0 }
 0x4f5   : > { %v4349_v54 = vpop.xlane.xlu1 %4348  ;;  %v7178_v19 = vsel %vm5267_vm8, %v7177_v36, %v7173_v46  ;;  %v4340_v1 = vpop.xlane.xlu0 %4339  ;;  %v9029_v46 = vunpack.c.l.bf16 %v13212_v59 }
 0x4f6   : > { %v7182_v13 = vrot.slane %v4340_v1, %v11126_v56  ;;  %v7197_v25 = vrot.slane %v4349_v54, %v11406_v37  ;;  %v4485_v54 = vsel %vm3158_vm0, %v3088_v30, 0.0  ;;  %v3118_v1 = vmul.f32 %v8969_v52, %v10430_v32 }
 0x4f8   : > { %v7183_v9 = vsel %vm5274_vm9, %v7182_v13, %v7178_v19  ;;  %4528 = vadd.xlane.f32.xlu1 %v4527_v20  ;;  %4615 = vadd.xlane.f32.xlu0 %v4614_v15  ;;  %v3147_v20 = vmul.f32 %v9026_v21, %v10271_v26  ;;  %v4575_v26 = vsel %vm3158_vm0, %v3118_v1, 0.0  ;;  %v8910_v21 = vunpack.c.h.bf16 %v13186_v41 }
 0x4f9   : > { %v4355_v8 = vpop.xlane.xlu1 %4354  ;;  %v7188_v11 = vsel %vm5281_vm10, %v7187_v57, %v7183_v9  ;;  %v4346_v43 = vpop.xlane.xlu0 %4345  ;;  %v13232_v57 = vld [vmem:[%s13709_s3 + $0x728] sm:$0xff]   ;;  %v3148_v9 = vmul.f32 %v9029_v46, %v10330_v48 }
 0x4fa   : > { %v7192_v42 = vrot.slane %v4346_v43, %v11285_v60  ;;  %v7207_v13 = vrot.slane %v4355_v8, %v11564_v61  ;;  %v4662_v14 = vsel %vm3158_vm0, %v3147_v20, 0.0  ;;  %v8941_v43 = vunpack.c.l.bf16 %v13232_v57 }
 0x4fb   : > { %v3089_v20 = vmul.f32 %v8910_v21, %v10624_v51 }
 0x4fc   : > { %v7193_v36 = vsel %vm5288_vm11, %v7192_v42, %v7188_v11  ;;  %4618 = vadd.xlane.f32.xlu1 %v4617_v6  ;;  %4483 = vadd.xlane.f32.xlu0 %v4482_v4  ;;  %v3103_v11 = vmul.f32 %v8938_v2, %v10457_v3  ;;  %v8998_v42 = vunpack.c.h.bf16 %v13171_v22  ;;  %v13245_v6 = vld [vmem:[%s13709_s3 + $0x7a0] sm:$0xff]  }
 0x4fd   : > { %v4361_v28 = vpop.xlane.xlu1 %4360  ;;  %v7198_v33 = vsel %vm5295_vm12, %v7197_v25, %v7193_v36  ;;  %v4352_v0 = vpop.xlane.xlu0 %4351  ;;  %v4665_v25 = vsel %vm3158_vm0, %v3148_v9, 0.0  ;;  %v9001_v22 = vunpack.c.l.bf16 %v13245_v6 }
 0x4fe   : > { %v7202_v19 = vrot.slane %v4352_v0, %v11441_v31  ;;  %v7217_v4 = vrot.slane %v4361_v28, %v10393_v47  ;;  %v3104_v0 = vmul.f32 %v8941_v43, %v10589_v58  ;;  %v3133_v46 = vmul.f32 %v8998_v42, %v10347_v53 }
 0x500   : > { %v7203_v29 = vsel %vm5302_vm13, %v7202_v19, %v7198_v33  ;;  %4486 = vadd.xlane.f32.xlu1 %v4485_v54  ;;  %4573 = vadd.xlane.f32.xlu0 %v4572_v39  ;;  %v4530_v33 = vsel %vm3158_vm0, %v3103_v11, 0.0  ;;  %v13262_v19 = vld [vmem:[%s13709_s3 + $0x6f0] sm:$0xff]   ;;  %v3134_v39 = vmul.f32 %v9001_v22, %v10430_v32  ;;  %v13292_v22 = vld [vmem:[%s13709_s3 + $0x7e0] sm:$0xff]  }
 0x501   : > { %v4367_v15 = vpop.xlane.xlu1 %4366  ;;  %v7208_v40 = vsel %vm5309_vm14, %v7207_v13, %v7203_v29  ;;  %v4358_v23 = vpop.xlane.xlu0 %4357  ;;  %v8913_v2 = vunpack.c.l.bf16 %v13262_v19 }
 0x502   : > { %v7212_v8 = vrot.slane %v4358_v23, %v11600_v34  ;;  %v7226_v36 = vrot.slane %v4367_v15, %v10529_v18  ;;  %v4533_v15 = vsel %vm3158_vm0, %v3104_v0, 0.0  ;;  %v8970_v23 = vunpack.c.h.bf16 %v13201_v27 }
 0x503   : > { %v4623_v42 = vsel %vm3158_vm0, %v3134_v39, 0.0  ;;  %v3090_v27 = vmul.f32 %v8913_v2, %v10773_v55 }
 0x504   : > { %v13248_v30 = vsel %vm5316_vm15, %v7212_v8, %v7208_v40  ;;  %4576 = vadd.xlane.f32.xlu1 %v4575_v26  ;;  %4663 = vadd.xlane.f32.xlu0 %v4662_v14  ;;  %v4620_v40 = vsel %vm3158_vm0, %v3133_v46, 0.0  ;;  %v13278_v8 = vld [vmem:[%s13709_s3 + $0x768] sm:$0xff]  }
 0x505   : > { %v4373_v48 = vpop.xlane.xlu1 %4372  ;;  %v4364_v52 = vpop.xlane.xlu0 %4363 }
 0x506   : > { %v7221_v44 = vrot.slane %v4364_v52, %v10396_v49  ;;  %v7236_v29 = vrot.slane %v4373_v48, %v10714_v12  ;;  %v4488_v48 = vsel %vm3158_vm0, %v3089_v20, 0.0  ;;  %v13307_v20 = vld [vmem:[%s13709_s3 + $0x730] sm:$0xff]  }
 0x508   : > { %v7222_v28 = vsel %vm13797_vm3, %v7221_v44, %v7217_v4  ;;  %4666 = vadd.xlane.f32.xlu1 %v4665_v25  ;;  %4531 = vadd.xlane.f32.xlu0 %v4530_v33  ;;  %vm13799_vm3 = vcmask 261312   ;;  %v3119_v25 = vmul.f32 %v8970_v23, %v10457_v3  ;;  %v8973_v4 = vunpack.c.l.bf16 %v13278_v8 }
 0x509   : > { %v4379_v54 = vpop.xlane.xlu1 %4378  ;;  %v7227_v41 = vsel %vm13798_vm1, %v7226_v36, %v7222_v28  ;;  %v4370_v1 = vpop.xlane.xlu0 %4369  ;;  %v9030_v44 = vunpack.c.h.bf16 %v13212_v59  ;;  %v4491_v28 = vsel %vm3158_vm0, %v3090_v27, 0.0  ;;  %v8942_v59 = vunpack.c.h.bf16 %v13232_v57 }
 0x50a   : > { %v7231_v13 = vrot.slane %v4370_v1, %v13729_v38  ;;  %v7246_v52 = vrot.slane %v4379_v54, %v10900_v10  ;;  %v9033_v54 = vunpack.c.l.bf16 %v13292_v22  ;;  %v4578_v1 = vsel %vm3158_vm0, %v3119_v25, 0.0 }
 0x50b   : > { %v3149_v39 = vmul.f32 %v9030_v44, %v10347_v53  ;;  %v8945_v53 = vunpack.c.l.bf16 %v13307_v20  ;;  %vm13800_vm1 = vcmask 1041409  }
 0x50c   : > { %v7232_v9 = vsel %vm13799_vm3, %v7231_v13, %v7227_v41  ;;  %4534 = vadd.xlane.f32.xlu1 %v4533_v15  ;;  %4621 = vadd.xlane.f32.xlu0 %v4620_v40  ;;  %v3120_v13 = vmul.f32 %v8973_v4, %v10589_v58  ;;  %v3150_v23 = vmul.f32 %v9033_v54, %v10430_v32  ;;  %v13323_v32 = vld [vmem:[%s13709_s3 + $0x7a8] sm:$0xff]   ;;  %vm13801_vm3 = vcmask 130112  }
 0x50d   : > { %v4385_v26 = vpop.xlane.xlu1 %4384  ;;  %v7237_v14 = vsel %vm5239_vm4, %v7236_v29, %v7232_v9  ;;  %v4376_v11 = vpop.xlane.xlu0 %4375  ;;  %v3105_v9 = vmul.f32 %v8942_v59, %v10624_v51 }
 0x50e   : > { %v7241_v43 = vrot.slane %v4376_v11, %v10754_v24  ;;  %v7256_v41 = vrot.slane %v4385_v26, %v11086_v7  ;;  %v4668_v11 = vsel %vm3158_vm0, %v3149_v39, 0.0  ;;  %v4671_v4 = vsel %vm3158_vm0, %v3150_v23, 0.0 }
 0x50f   : > { %v4536_v44 = vsel %vm3158_vm0, %v3105_v9, 0.0 }
 0x510   : > { %v7242_v21 = vsel %vm5246_vm5, %v7241_v43, %v7237_v14  ;;  %4624 = vadd.xlane.f32.xlu1 %v4623_v42  ;;  %4489 = vadd.xlane.f32.xlu0 %v4488_v48  ;;  %v4581_v14 = vsel %vm3158_vm0, %v3120_v13, 0.0  ;;  %v9002_v43 = vunpack.c.h.bf16 %v13245_v6  ;;  %v3106_v6 = vmul.f32 %v8945_v53, %v10773_v55 }
 0x511   : > { %v4391_v36 = vpop.xlane.xlu1 %4390  ;;  %v7247_v33 = vsel %vm5253_vm6, %v7246_v52, %v7242_v21  ;;  %v4382_v0 = vpop.xlane.xlu0 %4381 }
 0x512   : > { %v7251_v46 = vrot.slane %v4382_v0, %v10940_v50  ;;  %v7266_v26 = vrot.slane %v4391_v36, %v11251_v35  ;;  %v3135_v36 = vmul.f32 %v9002_v43, %v10457_v3  ;;  %v8914_v0 = vunpack.c.h.bf16 %v13262_v19 }
 0x513   : > { %v4539_v13 = vsel %vm3158_vm0, %v3106_v6, 0.0  ;;  %v8974_v19 = vunpack.c.h.bf16 %v13278_v8 }
 0x514   : > { %v7252_v2 = vsel %vm5260_vm7, %v7251_v46, %v7247_v33  ;;  %4492 = vadd.xlane.f32.xlu1 %v4491_v28  ;;  %4579 = vadd.xlane.f32.xlu0 %v4578_v1  ;;  %v9005_v33 = vunpack.c.l.bf16 %v13323_v32  ;;  %v13337_v46 = vld [vmem:[%s13709_s3 + $0x6f8] sm:$0xff]  }
 0x515   : > { %v4397_v29 = vpop.xlane.xlu1 %4396  ;;  %v7257_v57 = vsel %vm5267_vm8, %v7256_v41, %v7252_v2  ;;  %v4388_v15 = vpop.xlane.xlu0 %4387  ;;  %v8917_v39 = vunpack.c.l.bf16 %v13337_v46  ;;  %v13348_v2 = vld [vmem:[%s13709_s3 + $0x770] sm:$0xff]   ;;  %v3121_v43 = vmul.f32 %v8974_v19, %v10624_v51 }
 0x516   : > { %v7261_v40 = vrot.slane %v4388_v15, %v11126_v56  ;;  %v7276_v21 = vrot.slane %v4397_v29, %v11406_v37  ;;  %v3136_v15 = vmul.f32 %v9005_v33, %v10589_v58 }
 0x518   : > { %v7262_v42 = vsel %vm5274_vm9, %v7261_v40, %v7257_v57  ;;  %4582 = vadd.xlane.f32.xlu1 %v4581_v14  ;;  %4669 = vadd.xlane.f32.xlu0 %v4668_v11  ;;  %v4626_v57 = vsel %vm3158_vm0, %v3135_v36, 0.0  ;;  %v3091_v40 = vmul.f32 %v8914_v0, %v10809_v45  ;;  %v3092_v11 = vmul.f32 %v8917_v39, %v10959_v5 }
 0x519   : > { %v4403_v48 = vpop.xlane.xlu1 %4402  ;;  %v7267_v27 = vsel %vm5281_vm10, %v7266_v26, %v7262_v42  ;;  %v4394_v52 = vpop.xlane.xlu0 %4393  ;;  %v8977_v26 = vunpack.c.l.bf16 %v13348_v2  ;;  %v4629_v42 = vsel %vm3158_vm0, %v3136_v15, 0.0  ;;  %v4584_v0 = vsel %vm3158_vm0, %v3121_v43, 0.0 }
 0x51a   : > { %v7271_v25 = vrot.slane %v4394_v52, %v11285_v60  ;;  %v7286_v29 = vrot.slane %v4403_v48, %v11564_v61  ;;  %v4494_v48 = vsel %vm3158_vm0, %v3091_v40, 0.0  ;;  %v4497_v33 = vsel %vm3158_vm0, %v3092_v11, 0.0 }
 0x51b   : > { %v9006_v15 = vunpack.c.h.bf16 %v13323_v32 }
 0x51c   : > { %v7272_v28 = vsel %vm5288_vm11, %v7271_v25, %v7267_v27  ;;  %4672 = vadd.xlane.f32.xlu1 %v4671_v4  ;;  %4537 = vadd.xlane.f32.xlu0 %v4536_v44  ;;  %v9034_v27 = vunpack.c.h.bf16 %v13292_v22  ;;  %v13367_v25 = vld [vmem:[%s13709_s3 + $0x7e8] sm:$0xff]  }
 0x51d   : > { %v4409_v54 = vpop.xlane.xlu1 %4408  ;;  %v7277_v59 = vsel %vm5295_vm12, %v7276_v21, %v7272_v28  ;;  %v4400_v41 = vpop.xlane.xlu0 %4399  ;;  %v3122_v21 = vmul.f32 %v8977_v26, %v10773_v55 }
 0x51e   : > { %v7281_v1 = vrot.slane %v4400_v41, %v11441_v31  ;;  %v7296_v36 = vrot.slane %v4409_v54, %v10393_v47  ;;  %v9037_v41 = vunpack.c.l.bf16 %v13367_v25 }
 0x520   : > { %v7282_v23 = vsel %vm5302_vm13, %v7281_v1, %v7277_v59  ;;  %4540 = vadd.xlane.f32.xlu1 %v4539_v13  ;;  %4627 = vadd.xlane.f32.xlu0 %v4626_v57  ;;  %v3151_v59 = vmul.f32 %v9034_v27, %v10457_v3  ;;  %v9277_v1 = vld [vmem:[%s13709_s3 + $0x738] sm:$0xff]   ;;  %v4587_v3 = vsel %vm3158_vm0, %v3122_v21, 0.0 }
 0x521   : > { %v4415_v9 = vpop.xlane.xlu1 %4414  ;;  %v7287_v8 = vsel %vm5309_vm14, %v7286_v29, %v7282_v23  ;;  %v4406_v53 = vpop.xlane.xlu0 %4405  ;;  %v8949_v57 = vunpack.c.l.bf16 %v9277_v1  ;;  %v3152_v23 = vmul.f32 %v9037_v41, %v10589_v58  ;;  %v3137_v58 = vmul.f32 %v9006_v15, %v10624_v51 }
 0x522   : > { %v7291_v14 = vrot.slane %v4406_v53, %v11600_v34  ;;  %v7305_v28 = vrot.slane %v4415_v9, %v10529_v18  ;;  %v4674_v40 = vsel %vm3158_vm0, %v3151_v59, 0.0 }
 0x523   : > { %v3108_v43 = vmul.f32 %v8949_v57, %v10959_v5  ;;  %v4677_v27 = vsel %vm3158_vm0, %v3152_v23, 0.0 }
 0x524   : > { %v7292_v52 = vsel %vm5316_vm15, %v7291_v14, %v7287_v8  ;;  %4630 = vadd.xlane.f32.xlu1 %v4629_v42  ;;  %4495 = vadd.xlane.f32.xlu0 %v4494_v48  ;;  %v9292_v8 = vld [vmem:[%s13709_s3 + $0x7b0] sm:$0xff]  }
 0x525   : > { %v13371_v4 = vsel %vm13800_vm1, %v7292_v52, %v13248_v30  ;;  %v4421_v44 = vpop.xlane.xlu1 %4420  ;;  %v4412_v6 = vpop.xlane.xlu0 %4411  ;;  %v8946_v30 = vunpack.c.h.bf16 %v13307_v20  ;;  %vm13802_vm1 = vcmask 195712   ;;  %v9009_v42 = vunpack.c.l.bf16 %v9292_v8 }
 0x526   : > { %v7300_v22 = vrot.slane %v4412_v6, %v10396_v49  ;;  %v7315_v20 = vrot.slane %v4421_v44, %v10714_v12  ;;  %v8918_v44 = vunpack.c.h.bf16 %v13337_v46  ;;  %v9010_v15 = vunpack.c.h.bf16 %v9292_v8 }
 0x527   : > { %v3107_v9 = vmul.f32 %v8946_v30, %v10809_v45  ;;  %v3138_v59 = vmul.f32 %v9009_v42, %v10773_v55  ;;  %v8950_v30 = vunpack.c.h.bf16 %v9277_v1 }
 0x528   : > { %v7301_v54 = vsel %vm13801_vm3, %v7300_v22, %v7296_v36  ;;  %4498 = vadd.xlane.f32.xlu1 %v4497_v33  ;;  %4585 = vadd.xlane.f32.xlu0 %v4584_v0  ;;  %vm13803_vm3 = vcmask 261312   ;;  %v4545_v0 = vsel %vm3158_vm0, %v3108_v43, 0.0  ;;  %v3093_v46 = vmul.f32 %v8918_v44, %v10995_v63  ;;  %v9300_v44 = vld [vmem:[%s13709_s3 + $0x7f0] sm:$0xff]  }
 0x529   : > { %v4427_v13 = vpop.xlane.xlu1 %4426  ;;  %v7306_v39 = vsel %vm13802_vm1, %v7305_v28, %v7301_v54  ;;  %v4418_v19 = vpop.xlane.xlu0 %4417  ;;  %v4542_v52 = vsel %vm3158_vm0, %v3107_v9, 0.0  ;;  %v4632_v28 = vsel %vm3158_vm0, %v3137_v58, 0.0  ;;  %v8978_v54 = vunpack.c.h.bf16 %v13348_v2 }
 0x52a   : > { %v7310_v29 = vrot.slane %v4418_v19, %v13729_v38  ;;  %v7325_v48 = vrot.slane %v4427_v13, %v10900_v10  ;;  %v4635_v57 = vsel %vm3158_vm0, %v3138_v59, 0.0  ;;  %v4500_v1 = vsel %vm3158_vm0, %v3093_v46, 0.0 }
 0x52b   : > { %v3109_v2 = vmul.f32 %v8950_v30, %v10995_v63  ;;  %v3123_v23 = vmul.f32 %v8978_v54, %v10809_v45  ;;  %v9041_v46 = vunpack.c.l.bf16 %v9300_v44  ;;  %v9301_v30 = vld [vmem:[%s13709_s3 + $0x7f8] sm:$0xff]   ;;  %vm13804_vm1 = vcmask 1042434  }
 0x52c   : > { %v7311_v53 = vsel %vm13803_vm3, %v7310_v29, %v7306_v39  ;;  %4588 = vadd.xlane.f32.xlu1 %v4587_v3  ;;  %4675 = vadd.xlane.f32.xlu0 %v4674_v40  ;;  %vm13805_vm3 = vcmask 130112  }
 0x52d   : > { %v4433_v26 = vpop.xlane.xlu1 %4432  ;;  %v7316_v14 = vsel %vm5239_vm4, %v7315_v20, %v7311_v53  ;;  %v4424_v32 = vpop.xlane.xlu0 %4423  ;;  %v9038_v20 = vunpack.c.h.bf16 %v13367_v25  ;;  %v9285_v53 = vld [vmem:[%s13709_s3 + $0x778] sm:$0xff]   ;;  %v4548_v42 = vsel %vm3158_vm0, %v3109_v2, 0.0 }
 0x52e   : > { %v7320_v11 = vrot.slane %v4424_v32, %v10754_v24  ;;  %v7335_v41 = vrot.slane %v4433_v26, %v11086_v7  ;;  %v3139_v32 = vmul.f32 %v9010_v15, %v10809_v45  ;;  %v8982_v43 = vunpack.c.h.bf16 %v9285_v53 }
 0x52f   : > { %v9045_v15 = vunpack.c.l.bf16 %v9301_v30 }
 0x530   : > { %v7321_v6 = vsel %vm5246_vm5, %v7320_v11, %v7316_v14  ;;  %4678 = vadd.xlane.f32.xlu1 %v4677_v27  ;;  %4543 = vadd.xlane.f32.xlu0 %v4542_v52  ;;  %v3153_v11 = vmul.f32 %v9038_v20, %v10624_v51  ;;  %v8981_v27 = vunpack.c.l.bf16 %v9285_v53 }
 0x531   : > { %v4439_v21 = vpop.xlane.xlu1 %4438  ;;  %v7326_v36 = vsel %vm5253_vm6, %v7325_v48, %v7321_v6  ;;  %v4430_v22 = vpop.xlane.xlu0 %4429  ;;  %v4590_v48 = vsel %vm3158_vm0, %v3123_v23, 0.0 }
 0x532   : > { %v7330_v33 = vrot.slane %v4430_v22, %v10940_v50  ;;  %v7345_v40 = vrot.slane %v4439_v21, %v11251_v35  ;;  %v4638_v22 = vsel %vm3158_vm0, %v3139_v32, 0.0  ;;  %v3124_v59 = vmul.f32 %v8981_v27, %v10959_v5 }
 0x534   : > { %v7331_v13 = vsel %vm5260_vm7, %v7330_v33, %v7326_v36  ;;  %4546 = vadd.xlane.f32.xlu1 %v4545_v0  ;;  %4633 = vadd.xlane.f32.xlu0 %v4632_v28  ;;  %v4680_v33 = vsel %vm3158_vm0, %v3153_v11, 0.0  ;;  %v3125_v0 = vmul.f32 %v8982_v43, %v10995_v63  ;;  %v4593_v20 = vsel %vm3158_vm0, %v3124_v59, 0.0 }
 0x535   : > { %v4445_v39 = vpop.xlane.xlu1 %4444  ;;  %v7336_v19 = vsel %vm5267_vm8, %v7335_v41, %v7331_v13  ;;  %v4436_v29 = vpop.xlane.xlu0 %4435  ;;  %v9042_v41 = vunpack.c.h.bf16 %v9300_v44  ;;  %v9293_v13 = vld [vmem:[%s13709_s3 + $0x7b8] sm:$0xff]  }
 0x536   : > { %v7340_v3 = vrot.slane %v4436_v29, %v11126_v56  ;;  %v7355_v58 = vrot.slane %v4445_v39, %v11406_v37  ;;  %v9013_v2 = vunpack.c.l.bf16 %v9293_v13 }
 0x538   : > { %v7341_v9 = vsel %vm5274_vm9, %v7340_v3, %v7336_v19  ;;  %4636 = vadd.xlane.f32.xlu1 %v4635_v57  ;;  %4501 = vadd.xlane.f32.xlu0 %v4500_v1  ;;  %v4596_v57 = vsel %vm3158_vm0, %v3125_v0, 0.0  ;;  %v3154_v1 = vmul.f32 %v9041_v46, %v10773_v55  ;;  %v3140_v43 = vmul.f32 %v9013_v2, %v10959_v5 }
 0x539   : > { %v4451_v26 = vpop.xlane.xlu1 %4450  ;;  %v7346_v8 = vsel %vm5281_vm10, %v7345_v40, %v7341_v9  ;;  %v4442_v25 = vpop.xlane.xlu0 %4441  ;;  %v3155_v40 = vmul.f32 %v9042_v41, %v10809_v45  ;;  %v9014_v45 = vunpack.c.h.bf16 %v9293_v13 }
 0x53a   : > { %v7350_v14 = vrot.slane %v4442_v25, %v11285_v60  ;;  %v7365_v28 = vrot.slane %v4451_v26, %v11564_v61  ;;  %v4683_v11 = vsel %vm3158_vm0, %v3154_v1, 0.0 }
 0x53b   : > { %v4686_v32 = vsel %vm3158_vm0, %v3155_v40, 0.0 }
 0x53c   : > { %v7351_v52 = vsel %vm5288_vm11, %v7350_v14, %v7346_v8  ;;  %4549 = vadd.xlane.f32.xlu1 %v4548_v42  ;;  %4591 = vadd.xlane.f32.xlu0 %v4590_v48  ;;  %v3156_v14 = vmul.f32 %v9045_v15, %v10959_v5  ;;  %v3141_v5 = vmul.f32 %v9014_v45, %v10995_v63 }
 0x53d   : > { %v4457_v6 = vpop.xlane.xlu1 %4456  ;;  %v7356_v21 = vsel %vm5295_vm12, %v7355_v58, %v7351_v52  ;;  %v4448_v51 = vpop.xlane.xlu0 %4447 }
 0x53e   : > { %v7360_v36 = vrot.slane %v4448_v51, %v11441_v31  ;;  %v7375_v8 = vrot.slane %v4457_v6, %v10393_v47  ;;  %v4689_v6 = vsel %vm3158_vm0, %v3156_v14, 0.0  ;;  %v9046_v51 = vunpack.c.h.bf16 %v9301_v30 }
 0x53f   : > { %v4644_v59 = vsel %vm3158_vm0, %v3141_v5, 0.0 }
 0x540   : > { %v7361_v54 = vsel %vm5302_vm13, %v7360_v36, %v7356_v21  ;;  %4639 = vadd.xlane.f32.xlu1 %v4638_v22  ;;  %4681 = vadd.xlane.f32.xlu0 %v4680_v33  ;;  %v4641_v21 = vsel %vm3158_vm0, %v3140_v43, 0.0  ;;  %v3157_v41 = vmul.f32 %v9046_v51, %v10995_v63 }
 0x541   : > { %v4463_v39 = vpop.xlane.xlu1 %4462  ;;  %v7366_v19 = vsel %vm5309_vm14, %v7365_v28, %v7361_v54  ;;  %v4454_v29 = vpop.xlane.xlu0 %4453 }
 0x542   : > { %v7370_v3 = vrot.slane %v4454_v29, %v11600_v34  ;;  %v7384_v55 = vrot.slane %v4463_v39, %v10529_v18  ;;  %v4692_v29 = vsel %vm3158_vm0, %v3157_v41, 0.0  ;;  %vm13810_vm0 = vcmask 195712  }
 0x544   : > { %v7371_v23 = vsel %vm5316_vm15, %v7370_v3, %v7366_v19  ;;  %4597 = vadd.xlane.f32.xlu1 %v4596_v57  ;;  %4594 = vadd.xlane.f32.xlu0 %v4593_v20 }
 0x545   : > { %v13462_v9 = vsel %vm13804_vm1, %v7371_v23, %v13371_v4  ;;  %v4508_v53 = vpop.xlane.xlu1 %4507  ;;  %v4460_v26 = vpop.xlane.xlu0 %4459  ;;  %vm13806_vm1 = vcmask 195712  }
 0x546   : > { %v7379_v25 = vrot.slane %v4460_v26, %v10396_v49  ;;  %v7458_v27 = vrot.slane %v4508_v53, %v10396_v49 }
 0x548   : > { %v7380_v4 = vsel %vm13805_vm3, %v7379_v25, %v7375_v8  ;;  %4687 = vadd.xlane.f32.xlu1 %v4686_v32  ;;  %4684 = vadd.xlane.f32.xlu0 %v4683_v11 }
 0x549   : > { %v4511_v58 = vpop.xlane.xlu1 %4510  ;;  %v4505_v42 = vpop.xlane.xlu0 %4504  ;;  %v7385_v48 = vsel %vm13806_vm1, %v7384_v55, %v7380_v4 }
 0x54a   : > { %v7463_v52 = vrot.slane %v4511_v58, %v10529_v18  ;;  %v7454_v44 = vrot.slane %v4505_v42, %v10393_v47 }
 0x54c   : > { %v7459_v36 = vsel %vm13805_vm3, %v7458_v27, %v7454_v44  ;;  %4690 = vadd.xlane.f32.xlu1 %v4689_v6  ;;  %4642 = vadd.xlane.f32.xlu0 %v4641_v21  ;;  %vm13808_vm3 = vmmov %vm13807_vm2 }
 0x54d   : > { %v4556_v22 = vpop.xlane.xlu1 %4555  ;;  %v4466_v33 = vpop.xlane.xlu0 %4465  ;;  %v7464_v0 = vsel %vm13806_vm1, %v7463_v52, %v7459_v36  ;;  %vm13809_vm1 = vcmask 130112  }
 0x54e   : > { %v7389_v28 = vrot.slane %v4466_v33, %v13729_v38  ;;  %v7537_v13 = vrot.slane %v4556_v22, %v10396_v49 }
 0x550   : > { %v7390_v46 = vsel %vm13807_vm2, %v7389_v28, %v7385_v48  ;;  %7806 = vadd.xlane.f32.xlu1 %v12510_v62  ;;  %4645 = vadd.xlane.f32.xlu0 %v4644_v59 }
 0x551   : > { %v4514_v30 = vpop.xlane.xlu1 %4513  ;;  %v4553_v54 = vpop.xlane.xlu0 %4552 }
 0x552   : > { %v7468_v39 = vrot.slane %v4514_v30, %v13729_v38  ;;  %v7533_v19 = vrot.slane %v4553_v54, %v10393_v47 }
 0x554   : > { %v7469_v3 = vsel %vm13808_vm3, %v7468_v39, %v7464_v0  ;;  %v7538_v57 = vsel %vm13809_vm1, %v7537_v13, %v7533_v19  ;;  %7810 = vadd.xlane.f32.xlu1 %v13128_v16  ;;  %4693 = vadd.xlane.f32.xlu0 %v4692_v29  ;;  %vm13811_vm3 = vmmov %vm13809_vm1 }
 0x555   : > { %v4601_v63 = vpop.xlane.xlu1 %4600  ;;  %v4469_v62 = vpop.xlane.xlu0 %4468  ;;  %vm13812_vm1 = vmmov %vm13810_vm0 }
 0x556   : > { %v7394_v15 = vrot.slane %v4469_v62, %v10714_v12  ;;  %v7612_v25 = vrot.slane %v4601_v63, %v10393_v47 }
 0x558   : > { %v7395_v20 = vsel %vm5239_vm4, %v7394_v15, %v7390_v46  ;;  %7808 = vadd.xlane.f32.xlu0 %v13085_v17 }
 0x559   : > { %v4472_v40 = vpop.xlane.xlu1 %4471  ;;  %v4559_v1 = vpop.xlane.xlu0 %4558 }
 0x55a   : > { %v7399_v2 = vrot.slane %v4472_v40, %v10754_v24  ;;  %v7542_v23 = vrot.slane %v4559_v1, %v10529_v18 }
 0x55c   : > { %v7400_v53 = vsel %vm5246_vm5, %v7399_v2, %v7395_v20  ;;  %v7543_v26 = vsel %vm13810_vm0, %v7542_v23, %v7538_v57  ;;  %vm13813_vm0 = vmmov %vm13811_vm3 }
 0x55d   : > { %v4562_v16 = vpop.xlane.xlu1 %4561  ;;  %v4604_v8 = vpop.xlane.xlu0 %4603 }
 0x55e   : > { %v7547_v14 = vrot.slane %v4562_v16, %v13729_v38  ;;  %v7616_v45 = vrot.slane %v4604_v8, %v10396_v49 }
 0x560   : > { %v7548_v17 = vsel %vm13807_vm2, %v7547_v14, %v7543_v26  ;;  %v7617_v55 = vsel %vm13811_vm3, %v7616_v45, %v7612_v25  ;;  %vm13814_vm2 = vmmov %vm13812_vm1  ;;  %vm13815_vm3 = vcmask 261312  }
 0x561   : > { %v4649_v32 = vpop.xlane.xlu1 %4648  ;;  %v4517_v11 = vpop.xlane.xlu0 %4516 }
 0x562   : > { %v7473_v43 = vrot.slane %v4517_v11, %v10714_v12  ;;  %v7691_v5 = vrot.slane %v4649_v32, %v10393_v47 }
 0x564   : > { %v7474_v4 = vsel %vm5239_vm4, %v7473_v43, %v7469_v3 }
 0x565   : > { %v4475_v58 = vpop.xlane.xlu1 %4474  ;;  %v4607_v42 = vpop.xlane.xlu0 %4606 }
 0x566   : > { %v7404_v48 = vrot.slane %v4475_v58, %v10900_v10  ;;  %v7621_v27 = vrot.slane %v4607_v42, %v10529_v18 }
 0x568   : > { %v7405_v52 = vsel %vm5253_vm6, %v7404_v48, %v7400_v53  ;;  %v7622_v44 = vsel %vm13812_vm1, %v7621_v27, %v7617_v55  ;;  %vm13816_vm1 = vmmov %vm13815_vm3 }
 0x569   : > { %v4565_v6 = vpop.xlane.xlu1 %4564  ;;  %v4652_v21 = vpop.xlane.xlu0 %4651 }
 0x56a   : > { %v7552_v51 = vrot.slane %v4565_v6, %v10714_v12  ;;  %v7695_v36 = vrot.slane %v4652_v21, %v10396_v49 }
 0x56c   : > { %v7553_v22 = vsel %vm5239_vm4, %v7552_v51, %v7548_v17  ;;  %v7696_v33 = vsel %vm13813_vm0, %v7695_v36, %v7691_v5 }
 0x56d   : > { %v4655_v0 = vpop.xlane.xlu1 %4654  ;;  %v4520_v28 = vpop.xlane.xlu0 %4519 }
 0x56e   : > { %v7700_v59 = vrot.slane %v4655_v0, %v10529_v18  ;;  %v7478_v41 = vrot.slane %v4520_v28, %v10754_v24 }
 0x570   : > { %v7701_v46 = vsel %vm13814_vm2, %v7700_v59, %v7696_v33  ;;  %v7479_v30 = vsel %vm5246_vm5, %v7478_v41, %v7474_v4 }
 0x571   : > { %v4523_v54 = vpop.xlane.xlu1 %4522  ;;  %v4610_v47 = vpop.xlane.xlu0 %4609 }
 0x572   : > { %v7483_v13 = vrot.slane %v4523_v54, %v10900_v10  ;;  %v7626_v49 = vrot.slane %v4610_v47, %v13729_v38 }
 0x574   : > { %v7484_v39 = vsel %vm5253_vm6, %v7483_v13, %v7479_v30  ;;  %v7627_v19 = vsel %vm13815_vm3, %v7626_v49, %v7622_v44 }
 0x575   : > { %v4613_v29 = vpop.xlane.xlu1 %4612  ;;  %v4478_v3 = vpop.xlane.xlu0 %4477 }
 0x576   : > { %v7631_v18 = vrot.slane %v4613_v29, %v10714_v12  ;;  %v7409_v57 = vrot.slane %v4478_v3, %v10940_v50 }
 0x578   : > { %v7632_v63 = vsel %vm5239_vm4, %v7631_v18, %v7627_v19  ;;  %v7410_v62 = vsel %vm5260_vm7, %v7409_v57, %v7405_v52 }
 0x579   : > { %v4481_v15 = vpop.xlane.xlu1 %4480  ;;  %v4568_v20 = vpop.xlane.xlu0 %4567 }
 0x57a   : > { %v7414_v40 = vrot.slane %v4481_v15, %v11086_v7  ;;  %v7557_v1 = vrot.slane %v4568_v20, %v10754_v24 }
 0x57c   : > { %v7415_v2 = vsel %vm5267_vm8, %v7414_v40, %v7410_v62  ;;  %v7558_v23 = vsel %vm5246_vm5, %v7557_v1, %v7553_v22 }
 0x57d   : > { %v4571_v53 = vpop.xlane.xlu1 %4570  ;;  %v4658_v26 = vpop.xlane.xlu0 %4657 }
 0x57e   : > { %v7562_v16 = vrot.slane %v4571_v53, %v10900_v10  ;;  %v7705_v8 = vrot.slane %v4658_v26, %v13729_v38 }
 0x580   : > { %v7563_v25 = vsel %vm5253_vm6, %v7562_v16, %v7558_v23  ;;  %v7706_v14 = vsel %vm13816_vm1, %v7705_v8, %v7701_v46 }
 0x581   : > { %v4661_v45 = vpop.xlane.xlu1 %4660  ;;  %v4526_v17 = vpop.xlane.xlu0 %4525 }
 0x582   : > { %v7710_v55 = vrot.slane %v4661_v45, %v10714_v12  ;;  %v7488_v32 = vrot.slane %v4526_v17, %v10940_v50 }
 0x584   : > { %v7711_v11 = vsel %vm5239_vm4, %v7710_v55, %v7706_v14  ;;  %v7489_v43 = vsel %vm5260_vm7, %v7488_v32, %v7484_v39  ;;  %vm13817_vm4 = vcmask 1043459  }
 0x585   : > { %v4529_v4 = vpop.xlane.xlu1 %4528  ;;  %v4616_v58 = vpop.xlane.xlu0 %4615 }
 0x586   : > { %v7493_v42 = vrot.slane %v4529_v4, %v11086_v7  ;;  %v7636_v38 = vrot.slane %v4616_v58, %v10754_v24 }
 0x588   : > { %v7494_v48 = vsel %vm5267_vm8, %v7493_v42, %v7489_v43  ;;  %v7637_v27 = vsel %vm5246_vm5, %v7636_v38, %v7632_v63 }
 0x589   : > { %v4619_v52 = vpop.xlane.xlu1 %4618  ;;  %v4484_v44 = vpop.xlane.xlu0 %4483 }
 0x58a   : > { %v7641_v12 = vrot.slane %v4619_v52, %v10900_v10  ;;  %v7419_v6 = vrot.slane %v4484_v44, %v11126_v56 }
 0x58c   : > { %v13547_v21 = vsel %vm5253_vm6, %v7641_v12, %v7637_v27  ;;  %v7420_v5 = vsel %vm5274_vm9, %v7419_v6, %v7415_v2 }
 0x58d   : > { %v4487_v51 = vpop.xlane.xlu1 %4486  ;;  %v4574_v36 = vpop.xlane.xlu0 %4573 }
 0x58e   : > { %v7424_v22 = vrot.slane %v4487_v51, %v11251_v35  ;;  %v7567_v33 = vrot.slane %v4574_v36, %v10940_v50 }
 0x590   : > { %v7425_v0 = vsel %vm5281_vm10, %v7424_v22, %v7420_v5  ;;  %v7568_v28 = vsel %vm5260_vm7, %v7567_v33, %v7563_v25 }
 0x591   : > { %v4577_v59 = vpop.xlane.xlu1 %4576  ;;  %v4664_v41 = vpop.xlane.xlu0 %4663 }
 0x592   : > { %v7572_v46 = vrot.slane %v4577_v59, %v11086_v7  ;;  %v7715_v30 = vrot.slane %v4664_v41, %v10754_v24 }
 0x594   : > { %v13557_v54 = vsel %vm5267_vm8, %v7572_v46, %v7568_v28  ;;  %v7716_v47 = vsel %vm5246_vm5, %v7715_v30, %v7711_v11  ;;  %vm13818_vm5 = vcmask 1044484  }
 0x595   : > { %v4667_v13 = vpop.xlane.xlu1 %4666  ;;  %v4532_v49 = vpop.xlane.xlu0 %4531 }
 0x596   : > { %v7720_v39 = vrot.slane %v4667_v13, %v10900_v10  ;;  %v7498_v19 = vrot.slane %v4532_v49, %v11126_v56 }
 0x598   : > { %v13563_v29 = vsel %vm5253_vm6, %v7720_v39, %v7716_v47  ;;  %v7499_v3 = vsel %vm5274_vm9, %v7498_v19, %v7494_v48  ;;  %vm13819_vm6 = vcmask 1045509  }
 0x599   : > { %v4535_v18 = vpop.xlane.xlu1 %4534  ;;  %v13566_v57 = vpop.xlane.xlu0 %4621 }
 0x59a   : > { %v7503_v24 = vrot.slane %v4535_v18, %v11251_v35 }
 0x59c   : > { %v7504_v63 = vsel %vm5281_vm10, %v7503_v24, %v7499_v3 }
 0x59d   : > { %v13570_v62 = vpop.xlane.xlu1 %4624  ;;  %v4490_v15 = vpop.xlane.xlu0 %4489 }
 0x59e   : > { %v7429_v11 = vrot.slane %v4490_v15, %v11285_v60 }
 0x5a0   : > { %v7430_v48 = vsel %vm5288_vm11, %v7429_v11, %v7425_v0 }
 0x5a1   : > { %v4493_v20 = vpop.xlane.xlu1 %4492  ;;  %v4580_v40 = vpop.xlane.xlu0 %4579 }
 0x5a2   : > { %v7434_v43 = vrot.slane %v4493_v20, %v11406_v37  ;;  %v7577_v49 = vrot.slane %v4580_v40, %v11126_v56 }
 0x5a4   : > { %v7435_v52 = vsel %vm5295_vm12, %v7434_v43, %v7430_v48  ;;  %v7578_v20 = vsel %vm5274_vm9, %v7577_v49, %v13557_v54  ;;  %v7651_v54 = vrot.slane %v13570_v62, %v11086_v7  ;;  %v7816_v49 = vld [vmem:[%s13710_s4 + $0x10] sm:$0xff] }
 0x5a5   : > { %v4583_v10 = vpop.xlane.xlu1 %4582  ;;  %v13572_v1 = vpop.xlane.xlu0 %4669 }
 0x5a6   : > { %v7582_v19 = vrot.slane %v4583_v10, %v11251_v35 }
 0x5a8   : > { %v7583_v40 = vsel %vm5281_vm10, %v7582_v19, %v7578_v20 }
 0x5a9   : > { %v13574_v2 = vpop.xlane.xlu1 %4672  ;;  %v4538_v23 = vpop.xlane.xlu0 %4537 }
 0x5aa   : > { %v7508_v27 = vrot.slane %v4538_v23, %v11285_v60 }
 0x5ac   : > { %v7509_v0 = vsel %vm5288_vm11, %v7508_v27, %v7504_v63  ;;  %v7725_v27 = vrot.slane %v13572_v1, %v10940_v50 }
 0x5ad   : > { %v4541_v53 = vpop.xlane.xlu1 %4540  ;;  %v13576_v26 = vpop.xlane.xlu0 %4627 }
 0x5ae   : > { %v7513_v44 = vrot.slane %v4541_v53, %v11406_v37 }
 0x5b0   : > { %v7514_v59 = vsel %vm5295_vm12, %v7513_v44, %v7509_v0  ;;  %v7730_v44 = vrot.slane %v13574_v2, %v11086_v7  ;;  %v7726_v2 = vsel %vm5260_vm7, %v7725_v27, %v13563_v29 }
 0x5b1   : > { %v13578_v16 = vpop.xlane.xlu1 %4630  ;;  %v4496_v8 = vpop.xlane.xlu0 %4495 }
 0x5b2   : > { %v7439_v42 = vrot.slane %v4496_v8, %v11441_v31 }
 0x5b4   : > { %v7440_v5 = vsel %vm5302_vm13, %v7439_v42, %v7435_v52 }
 0x5b5   : > { %v4499_v25 = vpop.xlane.xlu1 %4498  ;;  %v4586_v14 = vpop.xlane.xlu0 %4585 }
 0x5b6   : > { %v7444_v38 = vrot.slane %v4499_v25, %v11564_v61  ;;  %v7587_v18 = vrot.slane %v4586_v14, %v11285_v60 }
 0x5b8   : > { %v7445_v22 = vsel %vm5309_vm14, %v7444_v38, %v7440_v5  ;;  %v7588_v53 = vsel %vm5288_vm11, %v7587_v18, %v7583_v40 }
 0x5b9   : > { %v4589_v45 = vpop.xlane.xlu1 %4588  ;;  %v13580_v17 = vpop.xlane.xlu0 %4675 }
 0x5ba   : > { %v7592_v15 = vrot.slane %v4589_v45, %v11406_v37  ;;  %v7646_v45 = vrot.slane %v13566_v57, %v10940_v50  ;;  %v7661_v57 = vrot.slane %v13578_v16, %v11251_v35  ;;  %v7735_v50 = vrot.slane %v13580_v17, %v11126_v56 }
 0x5bc   : > { %v7593_v25 = vsel %vm5295_vm12, %v7592_v15, %v7588_v53  ;;  %v7647_v62 = vsel %vm5260_vm7, %v7646_v45, %v13547_v21  ;;  %vm7822_vm7 = vcmask 7168  }
 0x5bd   : > { %v13582_v55 = vpop.xlane.xlu1 %4678  ;;  %v4544_v32 = vpop.xlane.xlu0 %4543 }
 0x5be   : > { %v7518_v51 = vrot.slane %v4544_v32, %v11441_v31  ;;  %v7740_v5 = vrot.slane %v13582_v55, %v11251_v35  ;;  %v7814_v55 = vld [vmem:[%s13710_s4] sm:$0xff] }
 0x5c0   : > { %v7519_v47 = vsel %vm5302_vm13, %v7518_v51, %v7514_v59 }
 0x5c1   : > { %v4547_v4 = vpop.xlane.xlu1 %4546  ;;  %v13586_v58 = vpop.xlane.xlu0 %4633 }
 0x5c2   : > { %v7523_v33 = vrot.slane %v4547_v4, %v11564_v61  ;;  %v7656_v4 = vrot.slane %v13576_v26, %v11126_v56  ;;  %v7666_v26 = vrot.slane %v13586_v58, %v11285_v60  ;;  %v7731_v56 = vsel %vm5267_vm8, %v7730_v44, %v7726_v2 }
 0x5c4   : > { %v7524_v39 = vsel %vm5309_vm14, %v7523_v33, %v7519_v47 }
 0x5c5   : > { %v13594_v12 = vpop.xlane.xlu1 %4636  ;;  %v4502_v6 = vpop.xlane.xlu0 %4501 }
 0x5c6   : > { %v7449_v36 = vrot.slane %v4502_v6, %v11600_v34  ;;  %v7652_v6 = vsel %vm5267_vm8, %v7651_v54, %v7647_v62  ;;  %v7671_v1 = vrot.slane %v13594_v12, %v11406_v37  ;;  %vm13820_vm8 = vcmask 1046534  }
 0x5c7   : > { %v7657_v16 = vsel %vm5274_vm9, %v7656_v4, %v7652_v6 }
 0x5c8   : > { %v7450_v28 = vsel %vm5316_vm15, %v7449_v36, %v7445_v22  ;;  %v7662_v58 = vsel %vm5281_vm10, %v7661_v57, %v7657_v16  ;;  %v7736_v22 = vsel %vm5274_vm9, %v7735_v50, %v7731_v56  ;;  %vm13821_vm9 = vcmask 1047559  }
 0x5c9   : > { %v7797_v41 = vsel %vm13817_vm4, %v7450_v28, %v13462_v9  ;;  %v4550_v46 = vpop.xlane.xlu1 %4549  ;;  %v4592_v30 = vpop.xlane.xlu0 %4591  ;;  %v7667_v17 = vsel %vm5288_vm11, %v7666_v26, %v7662_v58  ;;  %v7741_v33 = vsel %vm5281_vm10, %v7740_v5, %v7736_v22 }
 0x5ca   : > { %v7528_v13 = vrot.slane %v4550_v46, %v11600_v34  ;;  %v7597_v23 = vrot.slane %v4592_v30, %v11441_v31  ;;  %v7672_v29 = vsel %vm5295_vm12, %v7671_v1, %v7667_v17 }
 0x5cc   : > { %v7529_v3 = vsel %vm5316_vm15, %v7528_v13, %v7524_v39  ;;  %v7598_v11 = vsel %vm5302_vm13, %v7597_v23, %v7593_v25 }
 0x5cd   : > { %v7798_v24 = vsel %vm13818_vm5, %v7529_v3, %v7797_v41  ;;  %v4640_v63 = vpop.xlane.xlu1 %4639  ;;  %v4682_v9 = vpop.xlane.xlu0 %4681 }
 0x5ce   : > { %v7676_v21 = vrot.slane %v4640_v63, %v11441_v31  ;;  %v7745_v36 = vrot.slane %v4682_v9, %v11285_v60  ;;  %v7815_v9 = vld [vmem:[%s13710_s4 + $0x8] sm:$0xff] }
 0x5d0   : > { %v7677_v60 = vsel %vm5302_vm13, %v7676_v21, %v7672_v29  ;;  %v7746_v28 = vsel %vm5288_vm11, %v7745_v36, %v7741_v33 }
 0x5d1   : > { %v4598_v10 = vpop.xlane.xlu1 %4597  ;;  %v4595_v8 = vpop.xlane.xlu0 %4594 }
 0x5d2   : > { %v7607_v14 = vrot.slane %v4598_v10, %v11600_v34  ;;  %v7602_v32 = vrot.slane %v4595_v8, %v11564_v61 }
 0x5d4   : > { %v7603_v43 = vsel %vm5309_vm14, %v7602_v32, %v7598_v11 }
 0x5d5   : > { %v7608_v42 = vsel %vm5316_vm15, %v7607_v14, %v7603_v43  ;;  %v4688_v38 = vpop.xlane.xlu1 %4687  ;;  %v4685_v48 = vpop.xlane.xlu0 %4684 }
 0x5d6   : > { %v7799_v52 = vsel %vm13819_vm6, %v7608_v42, %v7798_v24  ;;  %v7750_v12 = vrot.slane %v4685_v48, %v11406_v37  ;;  %v7755_v59 = vrot.slane %v4688_v38, %v11441_v31 }
 0x5d8   : > { %v7751_v30 = vsel %vm5295_vm12, %v7750_v12, %v7746_v28 }
 0x5d9   : > { %v4691_v51 = vpop.xlane.xlu1 %4690  ;;  %v4643_v7 = vpop.xlane.xlu0 %4642  ;;  %v7756_v18 = vsel %vm5302_vm13, %v7755_v59, %v7751_v30 }
 0x5da   : > { %v7681_v35 = vrot.slane %v4643_v7, %v11564_v61  ;;  %v7760_v47 = vrot.slane %v4691_v51, %v11564_v61 }
 0x5dc   : > { %v7682_v13 = vsel %vm5309_vm14, %v7681_v35, %v7677_v60  ;;  %v7761_v63 = vsel %vm5309_vm14, %v7760_v47, %v7756_v18 }
 0x5dd   : > { %v7807_v37 = vpop.xlane.xlu1 %7806  ;;  %v4646_v0 = vpop.xlane.xlu0 %4645 }
 0x5de   : > { %v7818_v41 = vadd.f32 %v7814_v55, %v7807_v37  ;;  %v7686_v46 = vrot.slane %v4646_v0, %v11600_v34 }
 0x5e0   : > { %7823 = vst.msk [vmem:[%s13671_s10] sm:$0xff] %vm7822_vm7, %v7818_v41  ;;  %v7687_v39 = vsel %vm5316_vm15, %v7686_v46, %v7682_v13 }
 0x5e1   : > { %v7811_v31 = vpop.xlane.xlu1 %7810  ;;  %v4694_v19 = vpop.xlane.xlu0 %4693  ;;  %v7800_v3 = vsel %vm13820_vm8, %v7687_v39, %v7799_v52 }
 0x5e2   : > { %v7820_v24 = vadd.f32 %v7816_v49, %v7811_v31  ;;  %v7765_v61 = vrot.slane %v4694_v19, %v11600_v34  ;;  %v7817_v34 = vld [vmem:[%s13710_s4 + $0x18] sm:$0xff] }
 0x5e4   : > { %7825 = vst.msk [vmem:[%s13671_s10 + $0x10] sm:$0xff] %vm7822_vm7, %v7820_v24  ;;  %v7766_v15 = vsel %vm5316_vm15, %v7765_v61, %v7761_v63 }
 0x5e5   : > { %v7809_v20 = vpop.xlane.xlu0 %7808  ;;  %v7801_v23 = vsel %vm13821_vm9, %v7766_v15, %v7800_v3 }
 0x5e6   : > { %v7819_v40 = vadd.f32 %v7815_v9, %v7809_v20  ;;  %7812 = vadd.xlane.f32.xlu0 %v7801_v23 }
 0x5e8   : > { %7824 = vst.msk [vmem:[%s13671_s10 + $0x8] sm:$0xff] %vm7822_vm7, %v7819_v40 }
 0x673   : > { %v7813_v53 = vpop.xlane.xlu0 %7812 }
 0x674   : > { %v7821_v10 = vadd.f32 %v7817_v34, %v7813_v53 }
 0x676   : > { %7826 = vst.msk [vmem:[%s13671_s10 + $0x18] sm:$0xff] %vm7822_vm7, %v7821_v10 }
 0x677 PF: > { %s15_s18 = sadd.s32 1, %s9639_s18  }
 0x678   : > { %p12_p4 = scmp.ge.s32.totalorder %s15_s18, 4  }
 0x67a   :  { %14 = sbr.rel (!%p12_p4) target bundleno = 1 (0x1), region = 70 }

</bundles_post_ra>
